<compile_context>
chip_gen: v5e
topology: v5e:2x2
jax: 0.10.0
libtpu: 0.0.40
codegen_flags: <defaults>
</compile_context>

<pallas_src>
import jax
import jax.numpy as jnp
from jax import lax
from jax.experimental import pallas as pl
from jax.experimental.pallas import tpu as pltpu


# ----------------------------- fused Pallas kernel ---------------------------

def _fused_attn_kernel(x_ref, wq_ref, wk_ref, wv_ref, bias_ref, wo_ref, bo_ref,
                       o_ref):
    """One (Bt, N, C) batch tile per grid step; everything stays in VMEM."""
    bt, n, c = x_ref.shape
    heads = wq_ref.shape[0]
    cdt = wq_ref.dtype                                   # bf16 compute dtype

    # f32 -> bf16 cast happens here on the VPU (cheap), not in the wrapper.
    x2d = x_ref[...].reshape(bt * n, c).astype(cdt)      # (Bt*N, C)

    # Per-head projections.  Weights are (H, C, D): the head "split" is a static
    # leading-axis index, never a 16-lane column slice of an activation tile.
    # Softmax scale is already folded into wq (prep time, f32, exact).
    q = [jnp.dot(x2d, wq_ref[h], preferred_element_type=jnp.float32).astype(cdt)
         for h in range(heads)]
    k = [jnp.dot(x2d, wk_ref[h], preferred_element_type=jnp.float32).astype(cdt)
         for h in range(heads)]
    v = [jnp.dot(x2d, wv_ref[h], preferred_element_type=jnp.float32).astype(cdt)
         for h in range(heads)]

    # bf16-resident bias, cast to f32 once (hoisted out of the batch loop).
    bias = [bias_ref[h].astype(jnp.float32) for h in range(heads)]   # (N, N)
    b_out = bo_ref[...]                                              # (1, out) f32

    for b in range(bt):                      # static, unrolled batch-tile loop
        rows = slice(b * n, (b + 1) * n)     # sublane (row) slice, tile-aligned
        y = None
        for h in range(heads):
            qh = q[h][rows]                  # (N, D)
            kh = k[h][rows]
            vh = v[h][rows]

            # q @ k^T without materializing a transposed K tile.
            s = lax.dot_general(qh, kh, (((1,), (1,)), ((), ())),
                                preferred_element_type=jnp.float32)  # (N, N)
            s = s + bias[h]

            # Numerically-stable softmax; exp + reciprocal run on the EUP.
            s = s - jnp.max(s, axis=-1, keepdims=True)
            p = jnp.exp(s)
            inv = pl.reciprocal(jnp.sum(p, axis=-1, keepdims=True), approx=True)
            p = (p * inv).astype(cdt)

            oh = jnp.dot(p, vh, preferred_element_type=jnp.float32).astype(cdt)
            # Per-head slice of the output projection: accumulate instead of a
            # lane concatenate of head outputs.
            contrib = jnp.dot(oh, wo_ref[h], preferred_element_type=jnp.float32)
            y = contrib if y is None else y + contrib

        # Linear bias; Dropout(p=0.0) is the identity.
        o_ref[b] = (y + b_out).astype(o_ref.dtype)


# ------------------------- relative position index ---------------------------

def make_relative_index(img_h, img_w):
    ys, xs = jnp.meshgrid(jnp.arange(img_h), jnp.arange(img_w), indexing="ij")
    coords = jnp.stack([ys, xs]).reshape(2, -1)            # (2, n)
    rel = coords[:, :, None] - coords[:, None, :]          # (2, n, n)
    rel = rel.at[0].add(img_h - 1)
    rel = rel.at[1].add(img_w - 1)
    rel = rel.at[0].multiply(2 * img_w - 1)
    return rel.transpose(1, 2, 0).sum(-1).reshape(-1)      # (n*n,)


# ------------------------- one-time parameter prep ----------------------------

def prepare_params(params, *, heads, head_channel, img_size,
                   compute_dtype=jnp.bfloat16):
    """Hoisted out of the forward: per-head weight split, bias gather, scale fold."""
    img_h, img_w = img_size
    N = img_h * img_w
    D = head_channel
    C = params["w_qkv"].shape[0]
    inner = heads * D
    scale = D ** (-0.5)

    w_qkv = params["w_qkv"].astype(jnp.float32)
    wq = w_qkv[:, :inner] * scale            # fold softmax scale into q weights
    wk = w_qkv[:, inner:2 * inner]
    wv = w_qkv[:, 2 * inner:]

    def split_heads(w):                       # (C, inner) -> (H, C, D), head-major
        return w.reshape(C, heads, D).transpose(1, 0, 2)

    # relative-position bias -> (H, N, N), done once; stored bf16 (resident).
    rel_index = make_relative_index(img_h, img_w)                   # (N*N,)
    bias = params["rel_bias_table"][rel_index]                      # (N*N, H)
    bias = bias.reshape(N, N, heads).transpose(2, 0, 1)             # (H, N, N)

    wo = params["w_out"].astype(jnp.float32).reshape(heads, D, -1)  # (H, D, out)

    return {
        "wq": split_heads(wq).astype(compute_dtype),                # (H, C, D)
        "wk": split_heads(wk).astype(compute_dtype),                # (H, C, D)
        "wv": split_heads(wv).astype(compute_dtype),                # (H, C, D)
        "bias": bias.astype(compute_dtype),                         # (H, N, N) bf16
        "wo": wo.astype(compute_dtype),                             # (H, D, out)
        "b_out": params["b_out"].astype(jnp.float32).reshape(1, -1),  # (1, out)
    }


# ------------------------------ batch-tile choice -----------------------------

def _pick_batch_tile(B, N):
    """Fill the MXU M dimension (>=256 rows) but keep >=2 grid steps when
    possible so v7x's two TensorCores both get work."""
    bt = max(1, min(B, pl.cdiv(256, N)))
    while B % bt:
        bt -= 1
    if B // bt < 2 and B > 1:
        bt = max(1, B // 2)
        while B % bt:
            bt -= 1
    return bt


# ------------------------------ full forward ---------------------------------

def attention_forward(x, prepped):
    B, N, C = x.shape
    heads, _, D = prepped["wq"].shape
    inner = heads * D
    out_channel = prepped["wo"].shape[-1]

    bt = _pick_batch_tile(B, N)
    assert B % bt == 0, "batch tile must divide batch"
    grid = (B // bt,)
    # Block last-two dims equal the full array dims, so the (8,128) BlockSpec
    # rule is satisfied for any N / C / out_channel.

    flops = (2 * B * N * C * 3 * inner            # qkv projection
             + 2 * B * heads * N * N * D * 2      # scores + PV
             + 2 * B * N * inner * out_channel)   # output projection
    transcendentals = B * heads * N * N           # softmax exp
    bytes_accessed = (int(x.size) * x.dtype.itemsize
                      + sum(int(v.size) * v.dtype.itemsize
                            for v in prepped.values())
                      + B * N * out_channel * 2)  # bf16 output writeback

    return pl.pallas_call(
        _fused_attn_kernel,
        out_shape=jax.ShapeDtypeStruct((B, N, out_channel), jnp.bfloat16),
        grid_spec=pltpu.PrefetchScalarGridSpec(
            num_scalar_prefetch=0,
            grid=grid,
            in_specs=[
                pl.BlockSpec((bt, N, C), lambda i: (i, 0, 0)),               # x (f32)
                pl.BlockSpec((heads, C, D), lambda i: (0, 0, 0)),            # wq (resident)
                pl.BlockSpec((heads, C, D), lambda i: (0, 0, 0)),            # wk (resident)
                pl.BlockSpec((heads, C, D), lambda i: (0, 0, 0)),            # wv (resident)
                pl.BlockSpec((heads, N, N), lambda i: (0, 0, 0)),            # bias (bf16, resident)
                pl.BlockSpec((heads, D, out_channel), lambda i: (0, 0, 0)),  # wo (resident)
                pl.BlockSpec((1, out_channel), lambda i: (0, 0)),            # b_out (resident)
            ],
            out_specs=pl.BlockSpec((bt, N, out_channel), lambda i: (i, 0, 0)),
        ),
        compiler_params=pltpu.CompilerParams(
            dimension_semantics=("parallel",),
            # Budgeted against v7x's 64 MiB physical VMEM; leaves double-buffer
            # headroom while allowing larger Bt / N than the default scoped cap.
            vmem_limit_bytes=64 * 1024 * 1024,
        ),
        cost_estimate=pl.CostEstimate(flops=flops,
                                      transcendentals=transcendentals,
                                      bytes_accessed=bytes_accessed),
    )(x, prepped["wq"], prepped["wk"], prepped["wv"], prepped["bias"],
      prepped["wo"], prepped["b_out"])


# ------------------------------ pure-JAX reference ---------------------------

def reference_forward(x, params, *, heads, head_channel, img_size):
    B, N, C = x.shape
    img_h, img_w = img_size
    D = head_channel
    inner = heads * D
    scale = D ** (-0.5)

    qkv = x @ params["w_qkv"]
    q, k, v = jnp.split(qkv, 3, axis=-1)
    q, k, v = map(lambda t: t.reshape(B, N, heads, D).transpose(0, 2, 1, 3),
                  (q, k, v))
    dots = jnp.einsum("bhnd,bhmd->bhnm", q, k) * scale
    rel_index = make_relative_index(img_h, img_w)
    bias = params["rel_bias_table"][rel_index].reshape(N, N, heads)
    bias = bias.transpose(2, 0, 1)[None]                          # (1, H, N, N)
    attn = jax.nn.softmax(dots + bias, axis=-1)
    out = jnp.einsum("bhnm,bhmd->bhnd", attn, v)
    out = out.transpose(0, 2, 1, 3).reshape(B, N, inner)
    return out @ params["w_out"] + params["b_out"]


# ----------------------------------- main -------------------------------------

if __name__ == "__main__":
    key = jax.random.PRNGKey(0)

    B = 8                       # small, but lets Bt*N = 256 with a grid of 2
    img_h, img_w = 8, 8
    N = img_h * img_w           # 64
    in_channel = 32
    out_channel = 32
    heads = 4
    head_channel = 16
    inner = heads * head_channel

    k1, k2, k3, k4, k5 = jax.random.split(key, 5)
    x = jax.random.normal(k1, (B, N, in_channel), jnp.float32)

    # Deterministic synthetic parameters (shapes from the module __init__).
    # The PyTorch module inits relative_bias_table to zeros; use small values
    # so the bias-add path is actually exercised.
    params = {
        "w_qkv": jax.random.normal(k2, (in_channel, 3 * inner), jnp.float32) * 0.05,
        "rel_bias_table": jax.random.normal(
            k3, ((2 * img_h - 1) * (2 * img_w - 1), heads), jnp.float32) * 0.02,
        "w_out": jax.random.normal(k4, (inner, out_channel), jnp.float32) * 0.05,
        "b_out": jax.random.normal(k5, (out_channel,), jnp.float32) * 0.02,
    }

    prepped = prepare_params(params, heads=heads, head_channel=head_channel,
                             img_size=(img_h, img_w))

    y = attention_forward(x, prepped)
    y = jax.block_until_ready(y)

    y_ref = reference_forward(x, params, heads=heads, head_channel=head_channel,
                              img_size=(img_h, img_w))
    y_f32 = y.astype(jnp.float32)
    err = float(jnp.max(jnp.abs(y_f32 - y_ref)))
    # bf16 matmul operands, bf16 bias/output storage + approx EUP reciprocal
    # -> loosened tolerance vs the f32 reference.
    assert jnp.allclose(y_f32, y_ref, atol=3e-2, rtol=3e-2), f"max abs err {err}"
    print("KERNEL_OK")
</pallas_src>

<mosaic_0001>
module attributes {stable_mosaic.version = 11 : i64} {
  func.func @_fused_attn_kernel(%arg0: i32, %arg1: memref<4x64x32xf32, #tpu.memory_space<vmem>>, %arg2: memref<4x32x16xbf16, #tpu.memory_space<vmem>>, %arg3: memref<4x32x16xbf16, #tpu.memory_space<vmem>>, %arg4: memref<4x32x16xbf16, #tpu.memory_space<vmem>>, %arg5: memref<4x64x64xbf16, #tpu.memory_space<vmem>>, %arg6: memref<4x16x32xbf16, #tpu.memory_space<vmem>>, %arg7: memref<1x32xf32, #tpu.memory_space<vmem>>, %arg8: memref<4x64x32xbf16, #tpu.memory_space<vmem>>) attributes {dimension_semantics = [#tpu.dimension_semantics<parallel>], iteration_bounds = array<i64: 2>, scalar_prefetch = 0 : i64, scratch_operands = 0 : i64, tpu.core_type = #tpu.core_type<tc>, window_params = [{transform_indices = @transform_0, window_bounds = array<i64: 4, 64, 32>}, {pipeline_mode = #tpu.pipeline_mode<synchronous>, transform_indices = @transform_1, window_bounds = array<i64: 4, 32, 16>}, {pipeline_mode = #tpu.pipeline_mode<synchronous>, transform_indices = @transform_2, window_bounds = array<i64: 4, 32, 16>}, {pipeline_mode = #tpu.pipeline_mode<synchronous>, transform_indices = @transform_3, window_bounds = array<i64: 4, 32, 16>}, {pipeline_mode = #tpu.pipeline_mode<synchronous>, transform_indices = @transform_4, window_bounds = array<i64: 4, 64, 64>}, {pipeline_mode = #tpu.pipeline_mode<synchronous>, transform_indices = @transform_5, window_bounds = array<i64: 4, 16, 32>}, {pipeline_mode = #tpu.pipeline_mode<synchronous>, transform_indices = @transform_6, window_bounds = array<i64: 1, 32>}, {transform_indices = @transform_7, window_bounds = array<i64: 4, 64, 32>}]} {
    %c0 = arith.constant 0 : index
    %c0_0 = arith.constant 0 : index
    %c0_1 = arith.constant 0 : index
    %0 = vector.load %arg1[%c0, %c0_0, %c0_1] : memref<4x64x32xf32, #tpu.memory_space<vmem>>, vector<4x64x32xf32>
    %1 = vector.shape_cast %0 : vector<4x64x32xf32> to vector<256x32xf32>
    %2 = arith.truncf %1 : vector<256x32xf32> to vector<256x32xbf16>
    %c0_2 = arith.constant 0 : index
    %c0_3 = arith.constant 0 : index
    %c0_4 = arith.constant 0 : index
    %3 = vector.load %arg2[%c0_2, %c0_3, %c0_4] : memref<4x32x16xbf16, #tpu.memory_space<vmem>>, vector<1x32x16xbf16>
    %4 = vector.shape_cast %3 : vector<1x32x16xbf16> to vector<32x16xbf16>
    %cst = arith.constant dense<0.000000e+00> : vector<256x16xf32>
    %5 = tpu.matmul %2, %4, %cst {dimension_numbers = #tpu.dot_dimension_numbers<[1], [0], [0], [1], [0, 0, 1, 1], [], []>} : vector<256x32xbf16>, vector<32x16xbf16>, vector<256x16xf32> -> vector<256x16xf32>
    %6 = arith.truncf %5 : vector<256x16xf32> to vector<256x16xbf16>
    %c1 = arith.constant 1 : index
    %c0_5 = arith.constant 0 : index
    %c0_6 = arith.constant 0 : index
    %7 = vector.load %arg2[%c1, %c0_5, %c0_6] : memref<4x32x16xbf16, #tpu.memory_space<vmem>>, vector<1x32x16xbf16>
    %8 = vector.shape_cast %7 : vector<1x32x16xbf16> to vector<32x16xbf16>
    %cst_7 = arith.constant dense<0.000000e+00> : vector<256x16xf32>
    %9 = tpu.matmul %2, %8, %cst_7 {dimension_numbers = #tpu.dot_dimension_numbers<[1], [0], [0], [1], [0, 0, 1, 1], [], []>} : vector<256x32xbf16>, vector<32x16xbf16>, vector<256x16xf32> -> vector<256x16xf32>
    %10 = arith.truncf %9 : vector<256x16xf32> to vector<256x16xbf16>
    %c2 = arith.constant 2 : index
    %c0_8 = arith.constant 0 : index
    %c0_9 = arith.constant 0 : index
    %11 = vector.load %arg2[%c2, %c0_8, %c0_9] : memref<4x32x16xbf16, #tpu.memory_space<vmem>>, vector<1x32x16xbf16>
    %12 = vector.shape_cast %11 : vector<1x32x16xbf16> to vector<32x16xbf16>
    %cst_10 = arith.constant dense<0.000000e+00> : vector<256x16xf32>
    %13 = tpu.matmul %2, %12, %cst_10 {dimension_numbers = #tpu.dot_dimension_numbers<[1], [0], [0], [1], [0, 0, 1, 1], [], []>} : vector<256x32xbf16>, vector<32x16xbf16>, vector<256x16xf32> -> vector<256x16xf32>
    %14 = arith.truncf %13 : vector<256x16xf32> to vector<256x16xbf16>
    %c3 = arith.constant 3 : index
    %c0_11 = arith.constant 0 : index
    %c0_12 = arith.constant 0 : index
    %15 = vector.load %arg2[%c3, %c0_11, %c0_12] : memref<4x32x16xbf16, #tpu.memory_space<vmem>>, vector<1x32x16xbf16>
    %16 = vector.shape_cast %15 : vector<1x32x16xbf16> to vector<32x16xbf16>
    %cst_13 = arith.constant dense<0.000000e+00> : vector<256x16xf32>
    %17 = tpu.matmul %2, %16, %cst_13 {dimension_numbers = #tpu.dot_dimension_numbers<[1], [0], [0], [1], [0, 0, 1, 1], [], []>} : vector<256x32xbf16>, vector<32x16xbf16>, vector<256x16xf32> -> vector<256x16xf32>
    %18 = arith.truncf %17 : vector<256x16xf32> to vector<256x16xbf16>
    %c0_14 = arith.constant 0 : index
    %c0_15 = arith.constant 0 : index
    %c0_16 = arith.constant 0 : index
    %19 = vector.load %arg3[%c0_14, %c0_15, %c0_16] : memref<4x32x16xbf16, #tpu.memory_space<vmem>>, vector<1x32x16xbf16>
    %20 = vector.shape_cast %19 : vector<1x32x16xbf16> to vector<32x16xbf16>
    %cst_17 = arith.constant dense<0.000000e+00> : vector<256x16xf32>
    %21 = tpu.matmul %2, %20, %cst_17 {dimension_numbers = #tpu.dot_dimension_numbers<[1], [0], [0], [1], [0, 0, 1, 1], [], []>} : vector<256x32xbf16>, vector<32x16xbf16>, vector<256x16xf32> -> vector<256x16xf32>
    %22 = arith.truncf %21 : vector<256x16xf32> to vector<256x16xbf16>
    %c1_18 = arith.constant 1 : index
    %c0_19 = arith.constant 0 : index
    %c0_20 = arith.constant 0 : index
    %23 = vector.load %arg3[%c1_18, %c0_19, %c0_20] : memref<4x32x16xbf16, #tpu.memory_space<vmem>>, vector<1x32x16xbf16>
    %24 = vector.shape_cast %23 : vector<1x32x16xbf16> to vector<32x16xbf16>
    %cst_21 = arith.constant dense<0.000000e+00> : vector<256x16xf32>
    %25 = tpu.matmul %2, %24, %cst_21 {dimension_numbers = #tpu.dot_dimension_numbers<[1], [0], [0], [1], [0, 0, 1, 1], [], []>} : vector<256x32xbf16>, vector<32x16xbf16>, vector<256x16xf32> -> vector<256x16xf32>
    %26 = arith.truncf %25 : vector<256x16xf32> to vector<256x16xbf16>
    %c2_22 = arith.constant 2 : index
    %c0_23 = arith.constant 0 : index
    %c0_24 = arith.constant 0 : index
    %27 = vector.load %arg3[%c2_22, %c0_23, %c0_24] : memref<4x32x16xbf16, #tpu.memory_space<vmem>>, vector<1x32x16xbf16>
    %28 = vector.shape_cast %27 : vector<1x32x16xbf16> to vector<32x16xbf16>
    %cst_25 = arith.constant dense<0.000000e+00> : vector<256x16xf32>
    %29 = tpu.matmul %2, %28, %cst_25 {dimension_numbers = #tpu.dot_dimension_numbers<[1], [0], [0], [1], [0, 0, 1, 1], [], []>} : vector<256x32xbf16>, vector<32x16xbf16>, vector<256x16xf32> -> vector<256x16xf32>
    %30 = arith.truncf %29 : vector<256x16xf32> to vector<256x16xbf16>
    %c3_26 = arith.constant 3 : index
    %c0_27 = arith.constant 0 : index
    %c0_28 = arith.constant 0 : index
    %31 = vector.load %arg3[%c3_26, %c0_27, %c0_28] : memref<4x32x16xbf16, #tpu.memory_space<vmem>>, vector<1x32x16xbf16>
    %32 = vector.shape_cast %31 : vector<1x32x16xbf16> to vector<32x16xbf16>
    %cst_29 = arith.constant dense<0.000000e+00> : vector<256x16xf32>
    %33 = tpu.matmul %2, %32, %cst_29 {dimension_numbers = #tpu.dot_dimension_numbers<[1], [0], [0], [1], [0, 0, 1, 1], [], []>} : vector<256x32xbf16>, vector<32x16xbf16>, vector<256x16xf32> -> vector<256x16xf32>
    %34 = arith.truncf %33 : vector<256x16xf32> to vector<256x16xbf16>
    %c0_30 = arith.constant 0 : index
    %c0_31 = arith.constant 0 : index
    %c0_32 = arith.constant 0 : index
    %35 = vector.load %arg4[%c0_30, %c0_31, %c0_32] : memref<4x32x16xbf16, #tpu.memory_space<vmem>>, vector<1x32x16xbf16>
    %36 = vector.shape_cast %35 : vector<1x32x16xbf16> to vector<32x16xbf16>
    %cst_33 = arith.constant dense<0.000000e+00> : vector<256x16xf32>
    %37 = tpu.matmul %2, %36, %cst_33 {dimension_numbers = #tpu.dot_dimension_numbers<[1], [0], [0], [1], [0, 0, 1, 1], [], []>} : vector<256x32xbf16>, vector<32x16xbf16>, vector<256x16xf32> -> vector<256x16xf32>
    %38 = arith.truncf %37 : vector<256x16xf32> to vector<256x16xbf16>
    %c1_34 = arith.constant 1 : index
    %c0_35 = arith.constant 0 : index
    %c0_36 = arith.constant 0 : index
    %39 = vector.load %arg4[%c1_34, %c0_35, %c0_36] : memref<4x32x16xbf16, #tpu.memory_space<vmem>>, vector<1x32x16xbf16>
    %40 = vector.shape_cast %39 : vector<1x32x16xbf16> to vector<32x16xbf16>
    %cst_37 = arith.constant dense<0.000000e+00> : vector<256x16xf32>
    %41 = tpu.matmul %2, %40, %cst_37 {dimension_numbers = #tpu.dot_dimension_numbers<[1], [0], [0], [1], [0, 0, 1, 1], [], []>} : vector<256x32xbf16>, vector<32x16xbf16>, vector<256x16xf32> -> vector<256x16xf32>
    %42 = arith.truncf %41 : vector<256x16xf32> to vector<256x16xbf16>
    %c2_38 = arith.constant 2 : index
    %c0_39 = arith.constant 0 : index
    %c0_40 = arith.constant 0 : index
    %43 = vector.load %arg4[%c2_38, %c0_39, %c0_40] : memref<4x32x16xbf16, #tpu.memory_space<vmem>>, vector<1x32x16xbf16>
    %44 = vector.shape_cast %43 : vector<1x32x16xbf16> to vector<32x16xbf16>
    %cst_41 = arith.constant dense<0.000000e+00> : vector<256x16xf32>
    %45 = tpu.matmul %2, %44, %cst_41 {dimension_numbers = #tpu.dot_dimension_numbers<[1], [0], [0], [1], [0, 0, 1, 1], [], []>} : vector<256x32xbf16>, vector<32x16xbf16>, vector<256x16xf32> -> vector<256x16xf32>
    %46 = arith.truncf %45 : vector<256x16xf32> to vector<256x16xbf16>
    %c3_42 = arith.constant 3 : index
    %c0_43 = arith.constant 0 : index
    %c0_44 = arith.constant 0 : index
    %47 = vector.load %arg4[%c3_42, %c0_43, %c0_44] : memref<4x32x16xbf16, #tpu.memory_space<vmem>>, vector<1x32x16xbf16>
    %48 = vector.shape_cast %47 : vector<1x32x16xbf16> to vector<32x16xbf16>
    %cst_45 = arith.constant dense<0.000000e+00> : vector<256x16xf32>
    %49 = tpu.matmul %2, %48, %cst_45 {dimension_numbers = #tpu.dot_dimension_numbers<[1], [0], [0], [1], [0, 0, 1, 1], [], []>} : vector<256x32xbf16>, vector<32x16xbf16>, vector<256x16xf32> -> vector<256x16xf32>
    %50 = arith.truncf %49 : vector<256x16xf32> to vector<256x16xbf16>
    %c0_46 = arith.constant 0 : index
    %c0_47 = arith.constant 0 : index
    %c0_48 = arith.constant 0 : index
    %51 = vector.load %arg5[%c0_46, %c0_47, %c0_48] : memref<4x64x64xbf16, #tpu.memory_space<vmem>>, vector<1x64x64xbf16>
    %52 = vector.shape_cast %51 : vector<1x64x64xbf16> to vector<64x64xbf16>
    %53 = arith.extf %52 : vector<64x64xbf16> to vector<64x64xf32>
    %c1_49 = arith.constant 1 : index
    %c0_50 = arith.constant 0 : index
    %c0_51 = arith.constant 0 : index
    %54 = vector.load %arg5[%c1_49, %c0_50, %c0_51] : memref<4x64x64xbf16, #tpu.memory_space<vmem>>, vector<1x64x64xbf16>
    %55 = vector.shape_cast %54 : vector<1x64x64xbf16> to vector<64x64xbf16>
    %56 = arith.extf %55 : vector<64x64xbf16> to vector<64x64xf32>
    %c2_52 = arith.constant 2 : index
    %c0_53 = arith.constant 0 : index
    %c0_54 = arith.constant 0 : index
    %57 = vector.load %arg5[%c2_52, %c0_53, %c0_54] : memref<4x64x64xbf16, #tpu.memory_space<vmem>>, vector<1x64x64xbf16>
    %58 = vector.shape_cast %57 : vector<1x64x64xbf16> to vector<64x64xbf16>
    %59 = arith.extf %58 : vector<64x64xbf16> to vector<64x64xf32>
    %c3_55 = arith.constant 3 : index
    %c0_56 = arith.constant 0 : index
    %c0_57 = arith.constant 0 : index
    %60 = vector.load %arg5[%c3_55, %c0_56, %c0_57] : memref<4x64x64xbf16, #tpu.memory_space<vmem>>, vector<1x64x64xbf16>
    %61 = vector.shape_cast %60 : vector<1x64x64xbf16> to vector<64x64xbf16>
    %62 = arith.extf %61 : vector<64x64xbf16> to vector<64x64xf32>
    %c0_58 = arith.constant 0 : index
    %c0_59 = arith.constant 0 : index
    %63 = vector.load %arg7[%c0_58, %c0_59] : memref<1x32xf32, #tpu.memory_space<vmem>>, vector<1x32xf32>
    %64 = vector.extract_strided_slice %6 {offsets = [0, 0], sizes = [64, 16], strides = [1, 1]} : vector<256x16xbf16> to vector<64x16xbf16>
    %65 = vector.extract_strided_slice %22 {offsets = [0, 0], sizes = [64, 16], strides = [1, 1]} : vector<256x16xbf16> to vector<64x16xbf16>
    %66 = vector.extract_strided_slice %38 {offsets = [0, 0], sizes = [64, 16], strides = [1, 1]} : vector<256x16xbf16> to vector<64x16xbf16>
    %cst_60 = arith.constant dense<0.000000e+00> : vector<64x64xf32>
    %67 = tpu.matmul %64, %65, %cst_60 {dimension_numbers = #tpu.dot_dimension_numbers<[1], [1], [0], [0], [0, 0, 1, 0], [], []>} : vector<64x16xbf16>, vector<64x16xbf16>, vector<64x64xf32> -> vector<64x64xf32>
    %68 = arith.addf %67, %53 : vector<64x64xf32>
    %cst_61 = arith.constant dense<0xFF800000> : vector<64xf32>
    %69 = vector.multi_reduction <maximumf>, %68, %cst_61 [1] : vector<64x64xf32> to vector<64xf32>
    %70 = vector.shape_cast %69 : vector<64xf32> to vector<64x1xf32>
    %71 = vector.broadcast %70 : vector<64x1xf32> to vector<64x64xf32>
    %72 = arith.subf %68, %71 : vector<64x64xf32>
    %73 = math.exp %72 : vector<64x64xf32>
    %cst_62 = arith.constant dense<0.000000e+00> : vector<64xf32>
    %74 = vector.multi_reduction <add>, %73, %cst_62 [1] : vector<64x64xf32> to vector<64xf32>
    %75 = vector.shape_cast %74 : vector<64xf32> to vector<64x1xf32>
    %76 = tpu.reciprocal %75 {approx = true} : vector<64x1xf32> -> vector<64x1xf32>
    %77 = vector.broadcast %76 : vector<64x1xf32> to vector<64x64xf32>
    %78 = arith.mulf %73, %77 : vector<64x64xf32>
    %79 = arith.truncf %78 : vector<64x64xf32> to vector<64x64xbf16>
    %cst_63 = arith.constant dense<0.000000e+00> : vector<64x16xf32>
    %80 = tpu.matmul %79, %66, %cst_63 {dimension_numbers = #tpu.dot_dimension_numbers<[1], [0], [0], [1], [0, 0, 1, 1], [], []>} : vector<64x64xbf16>, vector<64x16xbf16>, vector<64x16xf32> -> vector<64x16xf32>
    %81 = arith.truncf %80 : vector<64x16xf32> to vector<64x16xbf16>
    %c0_64 = arith.constant 0 : index
    %c0_65 = arith.constant 0 : index
    %c0_66 = arith.constant 0 : index
    %82 = vector.load %arg6[%c0_64, %c0_65, %c0_66] : memref<4x16x32xbf16, #tpu.memory_space<vmem>>, vector<1x16x32xbf16>
    %83 = vector.shape_cast %82 : vector<1x16x32xbf16> to vector<16x32xbf16>
    %cst_67 = arith.constant dense<0.000000e+00> : vector<64x32xf32>
    %84 = tpu.matmul %81, %83, %cst_67 {dimension_numbers = #tpu.dot_dimension_numbers<[1], [0], [0], [1], [0, 0, 1, 1], [], []>} : vector<64x16xbf16>, vector<16x32xbf16>, vector<64x32xf32> -> vector<64x32xf32>
    %85 = vector.extract_strided_slice %10 {offsets = [0, 0], sizes = [64, 16], strides = [1, 1]} : vector<256x16xbf16> to vector<64x16xbf16>
    %86 = vector.extract_strided_slice %26 {offsets = [0, 0], sizes = [64, 16], strides = [1, 1]} : vector<256x16xbf16> to vector<64x16xbf16>
    %87 = vector.extract_strided_slice %42 {offsets = [0, 0], sizes = [64, 16], strides = [1, 1]} : vector<256x16xbf16> to vector<64x16xbf16>
    %cst_68 = arith.constant dense<0.000000e+00> : vector<64x64xf32>
    %88 = tpu.matmul %85, %86, %cst_68 {dimension_numbers = #tpu.dot_dimension_numbers<[1], [1], [0], [0], [0, 0, 1, 0], [], []>} : vector<64x16xbf16>, vector<64x16xbf16>, vector<64x64xf32> -> vector<64x64xf32>
    %89 = arith.addf %88, %56 : vector<64x64xf32>
    %cst_69 = arith.constant dense<0xFF800000> : vector<64xf32>
    %90 = vector.multi_reduction <maximumf>, %89, %cst_69 [1] : vector<64x64xf32> to vector<64xf32>
    %91 = vector.shape_cast %90 : vector<64xf32> to vector<64x1xf32>
    %92 = vector.broadcast %91 : vector<64x1xf32> to vector<64x64xf32>
    %93 = arith.subf %89, %92 : vector<64x64xf32>
    %94 = math.exp %93 : vector<64x64xf32>
    %cst_70 = arith.constant dense<0.000000e+00> : vector<64xf32>
    %95 = vector.multi_reduction <add>, %94, %cst_70 [1] : vector<64x64xf32> to vector<64xf32>
    %96 = vector.shape_cast %95 : vector<64xf32> to vector<64x1xf32>
    %97 = tpu.reciprocal %96 {approx = true} : vector<64x1xf32> -> vector<64x1xf32>
    %98 = vector.broadcast %97 : vector<64x1xf32> to vector<64x64xf32>
    %99 = arith.mulf %94, %98 : vector<64x64xf32>
    %100 = arith.truncf %99 : vector<64x64xf32> to vector<64x64xbf16>
    %cst_71 = arith.constant dense<0.000000e+00> : vector<64x16xf32>
    %101 = tpu.matmul %100, %87, %cst_71 {dimension_numbers = #tpu.dot_dimension_numbers<[1], [0], [0], [1], [0, 0, 1, 1], [], []>} : vector<64x64xbf16>, vector<64x16xbf16>, vector<64x16xf32> -> vector<64x16xf32>
    %102 = arith.truncf %101 : vector<64x16xf32> to vector<64x16xbf16>
    %c1_72 = arith.constant 1 : index
    %c0_73 = arith.constant 0 : index
    %c0_74 = arith.constant 0 : index
    %103 = vector.load %arg6[%c1_72, %c0_73, %c0_74] : memref<4x16x32xbf16, #tpu.memory_space<vmem>>, vector<1x16x32xbf16>
    %104 = vector.shape_cast %103 : vector<1x16x32xbf16> to vector<16x32xbf16>
    %cst_75 = arith.constant dense<0.000000e+00> : vector<64x32xf32>
    %105 = tpu.matmul %102, %104, %cst_75 {dimension_numbers = #tpu.dot_dimension_numbers<[1], [0], [0], [1], [0, 0, 1, 1], [], []>} : vector<64x16xbf16>, vector<16x32xbf16>, vector<64x32xf32> -> vector<64x32xf32>
    %106 = arith.addf %84, %105 : vector<64x32xf32>
    %107 = vector.extract_strided_slice %14 {offsets = [0, 0], sizes = [64, 16], strides = [1, 1]} : vector<256x16xbf16> to vector<64x16xbf16>
    %108 = vector.extract_strided_slice %30 {offsets = [0, 0], sizes = [64, 16], strides = [1, 1]} : vector<256x16xbf16> to vector<64x16xbf16>
    %109 = vector.extract_strided_slice %46 {offsets = [0, 0], sizes = [64, 16], strides = [1, 1]} : vector<256x16xbf16> to vector<64x16xbf16>
    %cst_76 = arith.constant dense<0.000000e+00> : vector<64x64xf32>
    %110 = tpu.matmul %107, %108, %cst_76 {dimension_numbers = #tpu.dot_dimension_numbers<[1], [1], [0], [0], [0, 0, 1, 0], [], []>} : vector<64x16xbf16>, vector<64x16xbf16>, vector<64x64xf32> -> vector<64x64xf32>
    %111 = arith.addf %110, %59 : vector<64x64xf32>
    %cst_77 = arith.constant dense<0xFF800000> : vector<64xf32>
    %112 = vector.multi_reduction <maximumf>, %111, %cst_77 [1] : vector<64x64xf32> to vector<64xf32>
    %113 = vector.shape_cast %112 : vector<64xf32> to vector<64x1xf32>
    %114 = vector.broadcast %113 : vector<64x1xf32> to vector<64x64xf32>
    %115 = arith.subf %111, %114 : vector<64x64xf32>
    %116 = math.exp %115 : vector<64x64xf32>
    %cst_78 = arith.constant dense<0.000000e+00> : vector<64xf32>
    %117 = vector.multi_reduction <add>, %116, %cst_78 [1] : vector<64x64xf32> to vector<64xf32>
    %118 = vector.shape_cast %117 : vector<64xf32> to vector<64x1xf32>
    %119 = tpu.reciprocal %118 {approx = true} : vector<64x1xf32> -> vector<64x1xf32>
    %120 = vector.broadcast %119 : vector<64x1xf32> to vector<64x64xf32>
    %121 = arith.mulf %116, %120 : vector<64x64xf32>
    %122 = arith.truncf %121 : vector<64x64xf32> to vector<64x64xbf16>
    %cst_79 = arith.constant dense<0.000000e+00> : vector<64x16xf32>
    %123 = tpu.matmul %122, %109, %cst_79 {dimension_numbers = #tpu.dot_dimension_numbers<[1], [0], [0], [1], [0, 0, 1, 1], [], []>} : vector<64x64xbf16>, vector<64x16xbf16>, vector<64x16xf32> -> vector<64x16xf32>
    %124 = arith.truncf %123 : vector<64x16xf32> to vector<64x16xbf16>
    %c2_80 = arith.constant 2 : index
    %c0_81 = arith.constant 0 : index
    %c0_82 = arith.constant 0 : index
    %125 = vector.load %arg6[%c2_80, %c0_81, %c0_82] : memref<4x16x32xbf16, #tpu.memory_space<vmem>>, vector<1x16x32xbf16>
    %126 = vector.shape_cast %125 : vector<1x16x32xbf16> to vector<16x32xbf16>
    %cst_83 = arith.constant dense<0.000000e+00> : vector<64x32xf32>
    %127 = tpu.matmul %124, %126, %cst_83 {dimension_numbers = #tpu.dot_dimension_numbers<[1], [0], [0], [1], [0, 0, 1, 1], [], []>} : vector<64x16xbf16>, vector<16x32xbf16>, vector<64x32xf32> -> vector<64x32xf32>
    %128 = arith.addf %106, %127 : vector<64x32xf32>
    %129 = vector.extract_strided_slice %18 {offsets = [0, 0], sizes = [64, 16], strides = [1, 1]} : vector<256x16xbf16> to vector<64x16xbf16>
    %130 = vector.extract_strided_slice %34 {offsets = [0, 0], sizes = [64, 16], strides = [1, 1]} : vector<256x16xbf16> to vector<64x16xbf16>
    %131 = vector.extract_strided_slice %50 {offsets = [0, 0], sizes = [64, 16], strides = [1, 1]} : vector<256x16xbf16> to vector<64x16xbf16>
    %cst_84 = arith.constant dense<0.000000e+00> : vector<64x64xf32>
    %132 = tpu.matmul %129, %130, %cst_84 {dimension_numbers = #tpu.dot_dimension_numbers<[1], [1], [0], [0], [0, 0, 1, 0], [], []>} : vector<64x16xbf16>, vector<64x16xbf16>, vector<64x64xf32> -> vector<64x64xf32>
    %133 = arith.addf %132, %62 : vector<64x64xf32>
    %cst_85 = arith.constant dense<0xFF800000> : vector<64xf32>
    %134 = vector.multi_reduction <maximumf>, %133, %cst_85 [1] : vector<64x64xf32> to vector<64xf32>
    %135 = vector.shape_cast %134 : vector<64xf32> to vector<64x1xf32>
    %136 = vector.broadcast %135 : vector<64x1xf32> to vector<64x64xf32>
    %137 = arith.subf %133, %136 : vector<64x64xf32>
    %138 = math.exp %137 : vector<64x64xf32>
    %cst_86 = arith.constant dense<0.000000e+00> : vector<64xf32>
    %139 = vector.multi_reduction <add>, %138, %cst_86 [1] : vector<64x64xf32> to vector<64xf32>
    %140 = vector.shape_cast %139 : vector<64xf32> to vector<64x1xf32>
    %141 = tpu.reciprocal %140 {approx = true} : vector<64x1xf32> -> vector<64x1xf32>
    %142 = vector.broadcast %141 : vector<64x1xf32> to vector<64x64xf32>
    %143 = arith.mulf %138, %142 : vector<64x64xf32>
    %144 = arith.truncf %143 : vector<64x64xf32> to vector<64x64xbf16>
    %cst_87 = arith.constant dense<0.000000e+00> : vector<64x16xf32>
    %145 = tpu.matmul %144, %131, %cst_87 {dimension_numbers = #tpu.dot_dimension_numbers<[1], [0], [0], [1], [0, 0, 1, 1], [], []>} : vector<64x64xbf16>, vector<64x16xbf16>, vector<64x16xf32> -> vector<64x16xf32>
    %146 = arith.truncf %145 : vector<64x16xf32> to vector<64x16xbf16>
    %c3_88 = arith.constant 3 : index
    %c0_89 = arith.constant 0 : index
    %c0_90 = arith.constant 0 : index
    %147 = vector.load %arg6[%c3_88, %c0_89, %c0_90] : memref<4x16x32xbf16, #tpu.memory_space<vmem>>, vector<1x16x32xbf16>
    %148 = vector.shape_cast %147 : vector<1x16x32xbf16> to vector<16x32xbf16>
    %cst_91 = arith.constant dense<0.000000e+00> : vector<64x32xf32>
    %149 = tpu.matmul %146, %148, %cst_91 {dimension_numbers = #tpu.dot_dimension_numbers<[1], [0], [0], [1], [0, 0, 1, 1], [], []>} : vector<64x16xbf16>, vector<16x32xbf16>, vector<64x32xf32> -> vector<64x32xf32>
    %150 = arith.addf %128, %149 : vector<64x32xf32>
    %151 = vector.broadcast %63 : vector<1x32xf32> to vector<64x32xf32>
    %152 = arith.addf %150, %151 : vector<64x32xf32>
    %153 = arith.truncf %152 : vector<64x32xf32> to vector<64x32xbf16>
    %c0_92 = arith.constant 0 : index
    %c0_93 = arith.constant 0 : index
    %c0_94 = arith.constant 0 : index
    %154 = vector.load %arg8[%c0_92, %c0_93, %c0_94] : memref<4x64x32xbf16, #tpu.memory_space<vmem>>, vector<1x64x32xbf16>
    %155 = vector.shape_cast %154 : vector<1x64x32xbf16> to vector<64x32xbf16>
    %156 = vector.shape_cast %153 : vector<64x32xbf16> to vector<1x64x32xbf16>
    tpu.vector_store %arg8[%c0_92, %c0_93, %c0_94], %156 {strides = array<i32>} : memref<4x64x32xbf16, #tpu.memory_space<vmem>>, vector<1x64x32xbf16>,
    %157 = vector.extract_strided_slice %6 {offsets = [64, 0], sizes = [64, 16], strides = [1, 1]} : vector<256x16xbf16> to vector<64x16xbf16>
    %158 = vector.extract_strided_slice %22 {offsets = [64, 0], sizes = [64, 16], strides = [1, 1]} : vector<256x16xbf16> to vector<64x16xbf16>
    %159 = vector.extract_strided_slice %38 {offsets = [64, 0], sizes = [64, 16], strides = [1, 1]} : vector<256x16xbf16> to vector<64x16xbf16>
    %cst_95 = arith.constant dense<0.000000e+00> : vector<64x64xf32>
    %160 = tpu.matmul %157, %158, %cst_95 {dimension_numbers = #tpu.dot_dimension_numbers<[1], [1], [0], [0], [0, 0, 1, 0], [], []>} : vector<64x16xbf16>, vector<64x16xbf16>, vector<64x64xf32> -> vector<64x64xf32>
    %161 = arith.addf %160, %53 : vector<64x64xf32>
    %cst_96 = arith.constant dense<0xFF800000> : vector<64xf32>
    %162 = vector.multi_reduction <maximumf>, %161, %cst_96 [1] : vector<64x64xf32> to vector<64xf32>
    %163 = vector.shape_cast %162 : vector<64xf32> to vector<64x1xf32>
    %164 = vector.broadcast %163 : vector<64x1xf32> to vector<64x64xf32>
    %165 = arith.subf %161, %164 : vector<64x64xf32>
    %166 = math.exp %165 : vector<64x64xf32>
    %cst_97 = arith.constant dense<0.000000e+00> : vector<64xf32>
    %167 = vector.multi_reduction <add>, %166, %cst_97 [1] : vector<64x64xf32> to vector<64xf32>
    %168 = vector.shape_cast %167 : vector<64xf32> to vector<64x1xf32>
    %169 = tpu.reciprocal %168 {approx = true} : vector<64x1xf32> -> vector<64x1xf32>
    %170 = vector.broadcast %169 : vector<64x1xf32> to vector<64x64xf32>
    %171 = arith.mulf %166, %170 : vector<64x64xf32>
    %172 = arith.truncf %171 : vector<64x64xf32> to vector<64x64xbf16>
    %cst_98 = arith.constant dense<0.000000e+00> : vector<64x16xf32>
    %173 = tpu.matmul %172, %159, %cst_98 {dimension_numbers = #tpu.dot_dimension_numbers<[1], [0], [0], [1], [0, 0, 1, 1], [], []>} : vector<64x64xbf16>, vector<64x16xbf16>, vector<64x16xf32> -> vector<64x16xf32>
    %174 = arith.truncf %173 : vector<64x16xf32> to vector<64x16xbf16>
    %c0_99 = arith.constant 0 : index
    %c0_100 = arith.constant 0 : index
    %c0_101 = arith.constant 0 : index
    %175 = vector.load %arg6[%c0_99, %c0_100, %c0_101] : memref<4x16x32xbf16, #tpu.memory_space<vmem>>, vector<1x16x32xbf16>
    %176 = vector.shape_cast %175 : vector<1x16x32xbf16> to vector<16x32xbf16>
    %cst_102 = arith.constant dense<0.000000e+00> : vector<64x32xf32>
    %177 = tpu.matmul %174, %176, %cst_102 {dimension_numbers = #tpu.dot_dimension_numbers<[1], [0], [0], [1], [0, 0, 1, 1], [], []>} : vector<64x16xbf16>, vector<16x32xbf16>, vector<64x32xf32> -> vector<64x32xf32>
    %178 = vector.extract_strided_slice %10 {offsets = [64, 0], sizes = [64, 16], strides = [1, 1]} : vector<256x16xbf16> to vector<64x16xbf16>
    %179 = vector.extract_strided_slice %26 {offsets = [64, 0], sizes = [64, 16], strides = [1, 1]} : vector<256x16xbf16> to vector<64x16xbf16>
    %180 = vector.extract_strided_slice %42 {offsets = [64, 0], sizes = [64, 16], strides = [1, 1]} : vector<256x16xbf16> to vector<64x16xbf16>
    %cst_103 = arith.constant dense<0.000000e+00> : vector<64x64xf32>
    %181 = tpu.matmul %178, %179, %cst_103 {dimension_numbers = #tpu.dot_dimension_numbers<[1], [1], [0], [0], [0, 0, 1, 0], [], []>} : vector<64x16xbf16>, vector<64x16xbf16>, vector<64x64xf32> -> vector<64x64xf32>
    %182 = arith.addf %181, %56 : vector<64x64xf32>
    %cst_104 = arith.constant dense<0xFF800000> : vector<64xf32>
    %183 = vector.multi_reduction <maximumf>, %182, %cst_104 [1] : vector<64x64xf32> to vector<64xf32>
    %184 = vector.shape_cast %183 : vector<64xf32> to vector<64x1xf32>
    %185 = vector.broadcast %184 : vector<64x1xf32> to vector<64x64xf32>
    %186 = arith.subf %182, %185 : vector<64x64xf32>
    %187 = math.exp %186 : vector<64x64xf32>
    %cst_105 = arith.constant dense<0.000000e+00> : vector<64xf32>
    %188 = vector.multi_reduction <add>, %187, %cst_105 [1] : vector<64x64xf32> to vector<64xf32>
    %189 = vector.shape_cast %188 : vector<64xf32> to vector<64x1xf32>
    %190 = tpu.reciprocal %189 {approx = true} : vector<64x1xf32> -> vector<64x1xf32>
    %191 = vector.broadcast %190 : vector<64x1xf32> to vector<64x64xf32>
    %192 = arith.mulf %187, %191 : vector<64x64xf32>
    %193 = arith.truncf %192 : vector<64x64xf32> to vector<64x64xbf16>
    %cst_106 = arith.constant dense<0.000000e+00> : vector<64x16xf32>
    %194 = tpu.matmul %193, %180, %cst_106 {dimension_numbers = #tpu.dot_dimension_numbers<[1], [0], [0], [1], [0, 0, 1, 1], [], []>} : vector<64x64xbf16>, vector<64x16xbf16>, vector<64x16xf32> -> vector<64x16xf32>
    %195 = arith.truncf %194 : vector<64x16xf32> to vector<64x16xbf16>
    %c1_107 = arith.constant 1 : index
    %c0_108 = arith.constant 0 : index
    %c0_109 = arith.constant 0 : index
    %196 = vector.load %arg6[%c1_107, %c0_108, %c0_109] : memref<4x16x32xbf16, #tpu.memory_space<vmem>>, vector<1x16x32xbf16>
    %197 = vector.shape_cast %196 : vector<1x16x32xbf16> to vector<16x32xbf16>
    %cst_110 = arith.constant dense<0.000000e+00> : vector<64x32xf32>
    %198 = tpu.matmul %195, %197, %cst_110 {dimension_numbers = #tpu.dot_dimension_numbers<[1], [0], [0], [1], [0, 0, 1, 1], [], []>} : vector<64x16xbf16>, vector<16x32xbf16>, vector<64x32xf32> -> vector<64x32xf32>
    %199 = arith.addf %177, %198 : vector<64x32xf32>
    %200 = vector.extract_strided_slice %14 {offsets = [64, 0], sizes = [64, 16], strides = [1, 1]} : vector<256x16xbf16> to vector<64x16xbf16>
    %201 = vector.extract_strided_slice %30 {offsets = [64, 0], sizes = [64, 16], strides = [1, 1]} : vector<256x16xbf16> to vector<64x16xbf16>
    %202 = vector.extract_strided_slice %46 {offsets = [64, 0], sizes = [64, 16], strides = [1, 1]} : vector<256x16xbf16> to vector<64x16xbf16>
    %cst_111 = arith.constant dense<0.000000e+00> : vector<64x64xf32>
    %203 = tpu.matmul %200, %201, %cst_111 {dimension_numbers = #tpu.dot_dimension_numbers<[1], [1], [0], [0], [0, 0, 1, 0], [], []>} : vector<64x16xbf16>, vector<64x16xbf16>, vector<64x64xf32> -> vector<64x64xf32>
    %204 = arith.addf %203, %59 : vector<64x64xf32>
    %cst_112 = arith.constant dense<0xFF800000> : vector<64xf32>
    %205 = vector.multi_reduction <maximumf>, %204, %cst_112 [1] : vector<64x64xf32> to vector<64xf32>
    %206 = vector.shape_cast %205 : vector<64xf32> to vector<64x1xf32>
    %207 = vector.broadcast %206 : vector<64x1xf32> to vector<64x64xf32>
    %208 = arith.subf %204, %207 : vector<64x64xf32>
    %209 = math.exp %208 : vector<64x64xf32>
    %cst_113 = arith.constant dense<0.000000e+00> : vector<64xf32>
    %210 = vector.multi_reduction <add>, %209, %cst_113 [1] : vector<64x64xf32> to vector<64xf32>
    %211 = vector.shape_cast %210 : vector<64xf32> to vector<64x1xf32>
    %212 = tpu.reciprocal %211 {approx = true} : vector<64x1xf32> -> vector<64x1xf32>
    %213 = vector.broadcast %212 : vector<64x1xf32> to vector<64x64xf32>
    %214 = arith.mulf %209, %213 : vector<64x64xf32>
    %215 = arith.truncf %214 : vector<64x64xf32> to vector<64x64xbf16>
    %cst_114 = arith.constant dense<0.000000e+00> : vector<64x16xf32>
    %216 = tpu.matmul %215, %202, %cst_114 {dimension_numbers = #tpu.dot_dimension_numbers<[1], [0], [0], [1], [0, 0, 1, 1], [], []>} : vector<64x64xbf16>, vector<64x16xbf16>, vector<64x16xf32> -> vector<64x16xf32>
    %217 = arith.truncf %216 : vector<64x16xf32> to vector<64x16xbf16>
    %c2_115 = arith.constant 2 : index
    %c0_116 = arith.constant 0 : index
    %c0_117 = arith.constant 0 : index
    %218 = vector.load %arg6[%c2_115, %c0_116, %c0_117] : memref<4x16x32xbf16, #tpu.memory_space<vmem>>, vector<1x16x32xbf16>
    %219 = vector.shape_cast %218 : vector<1x16x32xbf16> to vector<16x32xbf16>
    %cst_118 = arith.constant dense<0.000000e+00> : vector<64x32xf32>
    %220 = tpu.matmul %217, %219, %cst_118 {dimension_numbers = #tpu.dot_dimension_numbers<[1], [0], [0], [1], [0, 0, 1, 1], [], []>} : vector<64x16xbf16>, vector<16x32xbf16>, vector<64x32xf32> -> vector<64x32xf32>
    %221 = arith.addf %199, %220 : vector<64x32xf32>
    %222 = vector.extract_strided_slice %18 {offsets = [64, 0], sizes = [64, 16], strides = [1, 1]} : vector<256x16xbf16> to vector<64x16xbf16>
    %223 = vector.extract_strided_slice %34 {offsets = [64, 0], sizes = [64, 16], strides = [1, 1]} : vector<256x16xbf16> to vector<64x16xbf16>
    %224 = vector.extract_strided_slice %50 {offsets = [64, 0], sizes = [64, 16], strides = [1, 1]} : vector<256x16xbf16> to vector<64x16xbf16>
    %cst_119 = arith.constant dense<0.000000e+00> : vector<64x64xf32>
    %225 = tpu.matmul %222, %223, %cst_119 {dimension_numbers = #tpu.dot_dimension_numbers<[1], [1], [0], [0], [0, 0, 1, 0], [], []>} : vector<64x16xbf16>, vector<64x16xbf16>, vector<64x64xf32> -> vector<64x64xf32>
    %226 = arith.addf %225, %62 : vector<64x64xf32>
    %cst_120 = arith.constant dense<0xFF800000> : vector<64xf32>
    %227 = vector.multi_reduction <maximumf>, %226, %cst_120 [1] : vector<64x64xf32> to vector<64xf32>
    %228 = vector.shape_cast %227 : vector<64xf32> to vector<64x1xf32>
    %229 = vector.broadcast %228 : vector<64x1xf32> to vector<64x64xf32>
    %230 = arith.subf %226, %229 : vector<64x64xf32>
    %231 = math.exp %230 : vector<64x64xf32>
    %cst_121 = arith.constant dense<0.000000e+00> : vector<64xf32>
    %232 = vector.multi_reduction <add>, %231, %cst_121 [1] : vector<64x64xf32> to vector<64xf32>
    %233 = vector.shape_cast %232 : vector<64xf32> to vector<64x1xf32>
    %234 = tpu.reciprocal %233 {approx = true} : vector<64x1xf32> -> vector<64x1xf32>
    %235 = vector.broadcast %234 : vector<64x1xf32> to vector<64x64xf32>
    %236 = arith.mulf %231, %235 : vector<64x64xf32>
    %237 = arith.truncf %236 : vector<64x64xf32> to vector<64x64xbf16>
    %cst_122 = arith.constant dense<0.000000e+00> : vector<64x16xf32>
    %238 = tpu.matmul %237, %224, %cst_122 {dimension_numbers = #tpu.dot_dimension_numbers<[1], [0], [0], [1], [0, 0, 1, 1], [], []>} : vector<64x64xbf16>, vector<64x16xbf16>, vector<64x16xf32> -> vector<64x16xf32>
    %239 = arith.truncf %238 : vector<64x16xf32> to vector<64x16xbf16>
    %c3_123 = arith.constant 3 : index
    %c0_124 = arith.constant 0 : index
    %c0_125 = arith.constant 0 : index
    %240 = vector.load %arg6[%c3_123, %c0_124, %c0_125] : memref<4x16x32xbf16, #tpu.memory_space<vmem>>, vector<1x16x32xbf16>
    %241 = vector.shape_cast %240 : vector<1x16x32xbf16> to vector<16x32xbf16>
    %cst_126 = arith.constant dense<0.000000e+00> : vector<64x32xf32>
    %242 = tpu.matmul %239, %241, %cst_126 {dimension_numbers = #tpu.dot_dimension_numbers<[1], [0], [0], [1], [0, 0, 1, 1], [], []>} : vector<64x16xbf16>, vector<16x32xbf16>, vector<64x32xf32> -> vector<64x32xf32>
    %243 = arith.addf %221, %242 : vector<64x32xf32>
    %244 = vector.broadcast %63 : vector<1x32xf32> to vector<64x32xf32>
    %245 = arith.addf %243, %244 : vector<64x32xf32>
    %246 = arith.truncf %245 : vector<64x32xf32> to vector<64x32xbf16>
    %c1_127 = arith.constant 1 : index
    %c0_128 = arith.constant 0 : index
    %c0_129 = arith.constant 0 : index
    %247 = vector.load %arg8[%c1_127, %c0_128, %c0_129] : memref<4x64x32xbf16, #tpu.memory_space<vmem>>, vector<1x64x32xbf16>
    %248 = vector.shape_cast %247 : vector<1x64x32xbf16> to vector<64x32xbf16>
    %249 = vector.shape_cast %246 : vector<64x32xbf16> to vector<1x64x32xbf16>
    tpu.vector_store %arg8[%c1_127, %c0_128, %c0_129], %249 {strides = array<i32>} : memref<4x64x32xbf16, #tpu.memory_space<vmem>>, vector<1x64x32xbf16>,
    %250 = vector.extract_strided_slice %6 {offsets = [128, 0], sizes = [64, 16], strides = [1, 1]} : vector<256x16xbf16> to vector<64x16xbf16>
    %251 = vector.extract_strided_slice %22 {offsets = [128, 0], sizes = [64, 16], strides = [1, 1]} : vector<256x16xbf16> to vector<64x16xbf16>
    %252 = vector.extract_strided_slice %38 {offsets = [128, 0], sizes = [64, 16], strides = [1, 1]} : vector<256x16xbf16> to vector<64x16xbf16>
    %cst_130 = arith.constant dense<0.000000e+00> : vector<64x64xf32>
    %253 = tpu.matmul %250, %251, %cst_130 {dimension_numbers = #tpu.dot_dimension_numbers<[1], [1], [0], [0], [0, 0, 1, 0], [], []>} : vector<64x16xbf16>, vector<64x16xbf16>, vector<64x64xf32> -> vector<64x64xf32>
    %254 = arith.addf %253, %53 : vector<64x64xf32>
    %cst_131 = arith.constant dense<0xFF800000> : vector<64xf32>
    %255 = vector.multi_reduction <maximumf>, %254, %cst_131 [1] : vector<64x64xf32> to vector<64xf32>
    %256 = vector.shape_cast %255 : vector<64xf32> to vector<64x1xf32>
    %257 = vector.broadcast %256 : vector<64x1xf32> to vector<64x64xf32>
    %258 = arith.subf %254, %257 : vector<64x64xf32>
    %259 = math.exp %258 : vector<64x64xf32>
    %cst_132 = arith.constant dense<0.000000e+00> : vector<64xf32>
    %260 = vector.multi_reduction <add>, %259, %cst_132 [1] : vector<64x64xf32> to vector<64xf32>
    %261 = vector.shape_cast %260 : vector<64xf32> to vector<64x1xf32>
    %262 = tpu.reciprocal %261 {approx = true} : vector<64x1xf32> -> vector<64x1xf32>
    %263 = vector.broadcast %262 : vector<64x1xf32> to vector<64x64xf32>
    %264 = arith.mulf %259, %263 : vector<64x64xf32>
    %265 = arith.truncf %264 : vector<64x64xf32> to vector<64x64xbf16>
    %cst_133 = arith.constant dense<0.000000e+00> : vector<64x16xf32>
    %266 = tpu.matmul %265, %252, %cst_133 {dimension_numbers = #tpu.dot_dimension_numbers<[1], [0], [0], [1], [0, 0, 1, 1], [], []>} : vector<64x64xbf16>, vector<64x16xbf16>, vector<64x16xf32> -> vector<64x16xf32>
    %267 = arith.truncf %266 : vector<64x16xf32> to vector<64x16xbf16>
    %c0_134 = arith.constant 0 : index
    %c0_135 = arith.constant 0 : index
    %c0_136 = arith.constant 0 : index
    %268 = vector.load %arg6[%c0_134, %c0_135, %c0_136] : memref<4x16x32xbf16, #tpu.memory_space<vmem>>, vector<1x16x32xbf16>
    %269 = vector.shape_cast %268 : vector<1x16x32xbf16> to vector<16x32xbf16>
    %cst_137 = arith.constant dense<0.000000e+00> : vector<64x32xf32>
    %270 = tpu.matmul %267, %269, %cst_137 {dimension_numbers = #tpu.dot_dimension_numbers<[1], [0], [0], [1], [0, 0, 1, 1], [], []>} : vector<64x16xbf16>, vector<16x32xbf16>, vector<64x32xf32> -> vector<64x32xf32>
    %271 = vector.extract_strided_slice %10 {offsets = [128, 0], sizes = [64, 16], strides = [1, 1]} : vector<256x16xbf16> to vector<64x16xbf16>
    %272 = vector.extract_strided_slice %26 {offsets = [128, 0], sizes = [64, 16], strides = [1, 1]} : vector<256x16xbf16> to vector<64x16xbf16>
    %273 = vector.extract_strided_slice %42 {offsets = [128, 0], sizes = [64, 16], strides = [1, 1]} : vector<256x16xbf16> to vector<64x16xbf16>
    %cst_138 = arith.constant dense<0.000000e+00> : vector<64x64xf32>
    %274 = tpu.matmul %271, %272, %cst_138 {dimension_numbers = #tpu.dot_dimension_numbers<[1], [1], [0], [0], [0, 0, 1, 0], [], []>} : vector<64x16xbf16>, vector<64x16xbf16>, vector<64x64xf32> -> vector<64x64xf32>
    %275 = arith.addf %274, %56 : vector<64x64xf32>
    %cst_139 = arith.constant dense<0xFF800000> : vector<64xf32>
    %276 = vector.multi_reduction <maximumf>, %275, %cst_139 [1] : vector<64x64xf32> to vector<64xf32>
    %277 = vector.shape_cast %276 : vector<64xf32> to vector<64x1xf32>
    %278 = vector.broadcast %277 : vector<64x1xf32> to vector<64x64xf32>
    %279 = arith.subf %275, %278 : vector<64x64xf32>
    %280 = math.exp %279 : vector<64x64xf32>
    %cst_140 = arith.constant dense<0.000000e+00> : vector<64xf32>
    %281 = vector.multi_reduction <add>, %280, %cst_140 [1] : vector<64x64xf32> to vector<64xf32>
    %282 = vector.shape_cast %281 : vector<64xf32> to vector<64x1xf32>
    %283 = tpu.reciprocal %282 {approx = true} : vector<64x1xf32> -> vector<64x1xf32>
    %284 = vector.broadcast %283 : vector<64x1xf32> to vector<64x64xf32>
    %285 = arith.mulf %280, %284 : vector<64x64xf32>
    %286 = arith.truncf %285 : vector<64x64xf32> to vector<64x64xbf16>
    %cst_141 = arith.constant dense<0.000000e+00> : vector<64x16xf32>
    %287 = tpu.matmul %286, %273, %cst_141 {dimension_numbers = #tpu.dot_dimension_numbers<[1], [0], [0], [1], [0, 0, 1, 1], [], []>} : vector<64x64xbf16>, vector<64x16xbf16>, vector<64x16xf32> -> vector<64x16xf32>
    %288 = arith.truncf %287 : vector<64x16xf32> to vector<64x16xbf16>
    %c1_142 = arith.constant 1 : index
    %c0_143 = arith.constant 0 : index
    %c0_144 = arith.constant 0 : index
    %289 = vector.load %arg6[%c1_142, %c0_143, %c0_144] : memref<4x16x32xbf16, #tpu.memory_space<vmem>>, vector<1x16x32xbf16>
    %290 = vector.shape_cast %289 : vector<1x16x32xbf16> to vector<16x32xbf16>
    %cst_145 = arith.constant dense<0.000000e+00> : vector<64x32xf32>
    %291 = tpu.matmul %288, %290, %cst_145 {dimension_numbers = #tpu.dot_dimension_numbers<[1], [0], [0], [1], [0, 0, 1, 1], [], []>} : vector<64x16xbf16>, vector<16x32xbf16>, vector<64x32xf32> -> vector<64x32xf32>
    %292 = arith.addf %270, %291 : vector<64x32xf32>
    %293 = vector.extract_strided_slice %14 {offsets = [128, 0], sizes = [64, 16], strides = [1, 1]} : vector<256x16xbf16> to vector<64x16xbf16>
    %294 = vector.extract_strided_slice %30 {offsets = [128, 0], sizes = [64, 16], strides = [1, 1]} : vector<256x16xbf16> to vector<64x16xbf16>
    %295 = vector.extract_strided_slice %46 {offsets = [128, 0], sizes = [64, 16], strides = [1, 1]} : vector<256x16xbf16> to vector<64x16xbf16>
    %cst_146 = arith.constant dense<0.000000e+00> : vector<64x64xf32>
    %296 = tpu.matmul %293, %294, %cst_146 {dimension_numbers = #tpu.dot_dimension_numbers<[1], [1], [0], [0], [0, 0, 1, 0], [], []>} : vector<64x16xbf16>, vector<64x16xbf16>, vector<64x64xf32> -> vector<64x64xf32>
    %297 = arith.addf %296, %59 : vector<64x64xf32>
    %cst_147 = arith.constant dense<0xFF800000> : vector<64xf32>
    %298 = vector.multi_reduction <maximumf>, %297, %cst_147 [1] : vector<64x64xf32> to vector<64xf32>
    %299 = vector.shape_cast %298 : vector<64xf32> to vector<64x1xf32>
    %300 = vector.broadcast %299 : vector<64x1xf32> to vector<64x64xf32>
    %301 = arith.subf %297, %300 : vector<64x64xf32>
    %302 = math.exp %301 : vector<64x64xf32>
    %cst_148 = arith.constant dense<0.000000e+00> : vector<64xf32>
    %303 = vector.multi_reduction <add>, %302, %cst_148 [1] : vector<64x64xf32> to vector<64xf32>
    %304 = vector.shape_cast %303 : vector<64xf32> to vector<64x1xf32>
    %305 = tpu.reciprocal %304 {approx = true} : vector<64x1xf32> -> vector<64x1xf32>
    %306 = vector.broadcast %305 : vector<64x1xf32> to vector<64x64xf32>
    %307 = arith.mulf %302, %306 : vector<64x64xf32>
    %308 = arith.truncf %307 : vector<64x64xf32> to vector<64x64xbf16>
    %cst_149 = arith.constant dense<0.000000e+00> : vector<64x16xf32>
    %309 = tpu.matmul %308, %295, %cst_149 {dimension_numbers = #tpu.dot_dimension_numbers<[1], [0], [0], [1], [0, 0, 1, 1], [], []>} : vector<64x64xbf16>, vector<64x16xbf16>, vector<64x16xf32> -> vector<64x16xf32>
    %310 = arith.truncf %309 : vector<64x16xf32> to vector<64x16xbf16>
    %c2_150 = arith.constant 2 : index
    %c0_151 = arith.constant 0 : index
    %c0_152 = arith.constant 0 : index
    %311 = vector.load %arg6[%c2_150, %c0_151, %c0_152] : memref<4x16x32xbf16, #tpu.memory_space<vmem>>, vector<1x16x32xbf16>
    %312 = vector.shape_cast %311 : vector<1x16x32xbf16> to vector<16x32xbf16>
    %cst_153 = arith.constant dense<0.000000e+00> : vector<64x32xf32>
    %313 = tpu.matmul %310, %312, %cst_153 {dimension_numbers = #tpu.dot_dimension_numbers<[1], [0], [0], [1], [0, 0, 1, 1], [], []>} : vector<64x16xbf16>, vector<16x32xbf16>, vector<64x32xf32> -> vector<64x32xf32>
    %314 = arith.addf %292, %313 : vector<64x32xf32>
    %315 = vector.extract_strided_slice %18 {offsets = [128, 0], sizes = [64, 16], strides = [1, 1]} : vector<256x16xbf16> to vector<64x16xbf16>
    %316 = vector.extract_strided_slice %34 {offsets = [128, 0], sizes = [64, 16], strides = [1, 1]} : vector<256x16xbf16> to vector<64x16xbf16>
    %317 = vector.extract_strided_slice %50 {offsets = [128, 0], sizes = [64, 16], strides = [1, 1]} : vector<256x16xbf16> to vector<64x16xbf16>
    %cst_154 = arith.constant dense<0.000000e+00> : vector<64x64xf32>
    %318 = tpu.matmul %315, %316, %cst_154 {dimension_numbers = #tpu.dot_dimension_numbers<[1], [1], [0], [0], [0, 0, 1, 0], [], []>} : vector<64x16xbf16>, vector<64x16xbf16>, vector<64x64xf32> -> vector<64x64xf32>
    %319 = arith.addf %318, %62 : vector<64x64xf32>
    %cst_155 = arith.constant dense<0xFF800000> : vector<64xf32>
    %320 = vector.multi_reduction <maximumf>, %319, %cst_155 [1] : vector<64x64xf32> to vector<64xf32>
    %321 = vector.shape_cast %320 : vector<64xf32> to vector<64x1xf32>
    %322 = vector.broadcast %321 : vector<64x1xf32> to vector<64x64xf32>
    %323 = arith.subf %319, %322 : vector<64x64xf32>
    %324 = math.exp %323 : vector<64x64xf32>
    %cst_156 = arith.constant dense<0.000000e+00> : vector<64xf32>
    %325 = vector.multi_reduction <add>, %324, %cst_156 [1] : vector<64x64xf32> to vector<64xf32>
    %326 = vector.shape_cast %325 : vector<64xf32> to vector<64x1xf32>
    %327 = tpu.reciprocal %326 {approx = true} : vector<64x1xf32> -> vector<64x1xf32>
    %328 = vector.broadcast %327 : vector<64x1xf32> to vector<64x64xf32>
    %329 = arith.mulf %324, %328 : vector<64x64xf32>
    %330 = arith.truncf %329 : vector<64x64xf32> to vector<64x64xbf16>
    %cst_157 = arith.constant dense<0.000000e+00> : vector<64x16xf32>
    %331 = tpu.matmul %330, %317, %cst_157 {dimension_numbers = #tpu.dot_dimension_numbers<[1], [0], [0], [1], [0, 0, 1, 1], [], []>} : vector<64x64xbf16>, vector<64x16xbf16>, vector<64x16xf32> -> vector<64x16xf32>
    %332 = arith.truncf %331 : vector<64x16xf32> to vector<64x16xbf16>
    %c3_158 = arith.constant 3 : index
    %c0_159 = arith.constant 0 : index
    %c0_160 = arith.constant 0 : index
    %333 = vector.load %arg6[%c3_158, %c0_159, %c0_160] : memref<4x16x32xbf16, #tpu.memory_space<vmem>>, vector<1x16x32xbf16>
    %334 = vector.shape_cast %333 : vector<1x16x32xbf16> to vector<16x32xbf16>
    %cst_161 = arith.constant dense<0.000000e+00> : vector<64x32xf32>
    %335 = tpu.matmul %332, %334, %cst_161 {dimension_numbers = #tpu.dot_dimension_numbers<[1], [0], [0], [1], [0, 0, 1, 1], [], []>} : vector<64x16xbf16>, vector<16x32xbf16>, vector<64x32xf32> -> vector<64x32xf32>
    %336 = arith.addf %314, %335 : vector<64x32xf32>
    %337 = vector.broadcast %63 : vector<1x32xf32> to vector<64x32xf32>
    %338 = arith.addf %336, %337 : vector<64x32xf32>
    %339 = arith.truncf %338 : vector<64x32xf32> to vector<64x32xbf16>
    %c2_162 = arith.constant 2 : index
    %c0_163 = arith.constant 0 : index
    %c0_164 = arith.constant 0 : index
    %340 = vector.load %arg8[%c2_162, %c0_163, %c0_164] : memref<4x64x32xbf16, #tpu.memory_space<vmem>>, vector<1x64x32xbf16>
    %341 = vector.shape_cast %340 : vector<1x64x32xbf16> to vector<64x32xbf16>
    %342 = vector.shape_cast %339 : vector<64x32xbf16> to vector<1x64x32xbf16>
    tpu.vector_store %arg8[%c2_162, %c0_163, %c0_164], %342 {strides = array<i32>} : memref<4x64x32xbf16, #tpu.memory_space<vmem>>, vector<1x64x32xbf16>,
    %343 = vector.extract_strided_slice %6 {offsets = [192, 0], sizes = [64, 16], strides = [1, 1]} : vector<256x16xbf16> to vector<64x16xbf16>
    %344 = vector.extract_strided_slice %22 {offsets = [192, 0], sizes = [64, 16], strides = [1, 1]} : vector<256x16xbf16> to vector<64x16xbf16>
    %345 = vector.extract_strided_slice %38 {offsets = [192, 0], sizes = [64, 16], strides = [1, 1]} : vector<256x16xbf16> to vector<64x16xbf16>
    %cst_165 = arith.constant dense<0.000000e+00> : vector<64x64xf32>
    %346 = tpu.matmul %343, %344, %cst_165 {dimension_numbers = #tpu.dot_dimension_numbers<[1], [1], [0], [0], [0, 0, 1, 0], [], []>} : vector<64x16xbf16>, vector<64x16xbf16>, vector<64x64xf32> -> vector<64x64xf32>
    %347 = arith.addf %346, %53 : vector<64x64xf32>
    %cst_166 = arith.constant dense<0xFF800000> : vector<64xf32>
    %348 = vector.multi_reduction <maximumf>, %347, %cst_166 [1] : vector<64x64xf32> to vector<64xf32>
    %349 = vector.shape_cast %348 : vector<64xf32> to vector<64x1xf32>
    %350 = vector.broadcast %349 : vector<64x1xf32> to vector<64x64xf32>
    %351 = arith.subf %347, %350 : vector<64x64xf32>
    %352 = math.exp %351 : vector<64x64xf32>
    %cst_167 = arith.constant dense<0.000000e+00> : vector<64xf32>
    %353 = vector.multi_reduction <add>, %352, %cst_167 [1] : vector<64x64xf32> to vector<64xf32>
    %354 = vector.shape_cast %353 : vector<64xf32> to vector<64x1xf32>
    %355 = tpu.reciprocal %354 {approx = true} : vector<64x1xf32> -> vector<64x1xf32>
    %356 = vector.broadcast %355 : vector<64x1xf32> to vector<64x64xf32>
    %357 = arith.mulf %352, %356 : vector<64x64xf32>
    %358 = arith.truncf %357 : vector<64x64xf32> to vector<64x64xbf16>
    %cst_168 = arith.constant dense<0.000000e+00> : vector<64x16xf32>
    %359 = tpu.matmul %358, %345, %cst_168 {dimension_numbers = #tpu.dot_dimension_numbers<[1], [0], [0], [1], [0, 0, 1, 1], [], []>} : vector<64x64xbf16>, vector<64x16xbf16>, vector<64x16xf32> -> vector<64x16xf32>
    %360 = arith.truncf %359 : vector<64x16xf32> to vector<64x16xbf16>
    %c0_169 = arith.constant 0 : index
    %c0_170 = arith.constant 0 : index
    %c0_171 = arith.constant 0 : index
    %361 = vector.load %arg6[%c0_169, %c0_170, %c0_171] : memref<4x16x32xbf16, #tpu.memory_space<vmem>>, vector<1x16x32xbf16>
    %362 = vector.shape_cast %361 : vector<1x16x32xbf16> to vector<16x32xbf16>
    %cst_172 = arith.constant dense<0.000000e+00> : vector<64x32xf32>
    %363 = tpu.matmul %360, %362, %cst_172 {dimension_numbers = #tpu.dot_dimension_numbers<[1], [0], [0], [1], [0, 0, 1, 1], [], []>} : vector<64x16xbf16>, vector<16x32xbf16>, vector<64x32xf32> -> vector<64x32xf32>
    %364 = vector.extract_strided_slice %10 {offsets = [192, 0], sizes = [64, 16], strides = [1, 1]} : vector<256x16xbf16> to vector<64x16xbf16>
    %365 = vector.extract_strided_slice %26 {offsets = [192, 0], sizes = [64, 16], strides = [1, 1]} : vector<256x16xbf16> to vector<64x16xbf16>
    %366 = vector.extract_strided_slice %42 {offsets = [192, 0], sizes = [64, 16], strides = [1, 1]} : vector<256x16xbf16> to vector<64x16xbf16>
    %cst_173 = arith.constant dense<0.000000e+00> : vector<64x64xf32>
    %367 = tpu.matmul %364, %365, %cst_173 {dimension_numbers = #tpu.dot_dimension_numbers<[1], [1], [0], [0], [0, 0, 1, 0], [], []>} : vector<64x16xbf16>, vector<64x16xbf16>, vector<64x64xf32> -> vector<64x64xf32>
    %368 = arith.addf %367, %56 : vector<64x64xf32>
    %cst_174 = arith.constant dense<0xFF800000> : vector<64xf32>
    %369 = vector.multi_reduction <maximumf>, %368, %cst_174 [1] : vector<64x64xf32> to vector<64xf32>
    %370 = vector.shape_cast %369 : vector<64xf32> to vector<64x1xf32>
    %371 = vector.broadcast %370 : vector<64x1xf32> to vector<64x64xf32>
    %372 = arith.subf %368, %371 : vector<64x64xf32>
    %373 = math.exp %372 : vector<64x64xf32>
    %cst_175 = arith.constant dense<0.000000e+00> : vector<64xf32>
    %374 = vector.multi_reduction <add>, %373, %cst_175 [1] : vector<64x64xf32> to vector<64xf32>
    %375 = vector.shape_cast %374 : vector<64xf32> to vector<64x1xf32>
    %376 = tpu.reciprocal %375 {approx = true} : vector<64x1xf32> -> vector<64x1xf32>
    %377 = vector.broadcast %376 : vector<64x1xf32> to vector<64x64xf32>
    %378 = arith.mulf %373, %377 : vector<64x64xf32>
    %379 = arith.truncf %378 : vector<64x64xf32> to vector<64x64xbf16>
    %cst_176 = arith.constant dense<0.000000e+00> : vector<64x16xf32>
    %380 = tpu.matmul %379, %366, %cst_176 {dimension_numbers = #tpu.dot_dimension_numbers<[1], [0], [0], [1], [0, 0, 1, 1], [], []>} : vector<64x64xbf16>, vector<64x16xbf16>, vector<64x16xf32> -> vector<64x16xf32>
    %381 = arith.truncf %380 : vector<64x16xf32> to vector<64x16xbf16>
    %c1_177 = arith.constant 1 : index
    %c0_178 = arith.constant 0 : index
    %c0_179 = arith.constant 0 : index
    %382 = vector.load %arg6[%c1_177, %c0_178, %c0_179] : memref<4x16x32xbf16, #tpu.memory_space<vmem>>, vector<1x16x32xbf16>
    %383 = vector.shape_cast %382 : vector<1x16x32xbf16> to vector<16x32xbf16>
    %cst_180 = arith.constant dense<0.000000e+00> : vector<64x32xf32>
    %384 = tpu.matmul %381, %383, %cst_180 {dimension_numbers = #tpu.dot_dimension_numbers<[1], [0], [0], [1], [0, 0, 1, 1], [], []>} : vector<64x16xbf16>, vector<16x32xbf16>, vector<64x32xf32> -> vector<64x32xf32>
    %385 = arith.addf %363, %384 : vector<64x32xf32>
    %386 = vector.extract_strided_slice %14 {offsets = [192, 0], sizes = [64, 16], strides = [1, 1]} : vector<256x16xbf16> to vector<64x16xbf16>
    %387 = vector.extract_strided_slice %30 {offsets = [192, 0], sizes = [64, 16], strides = [1, 1]} : vector<256x16xbf16> to vector<64x16xbf16>
    %388 = vector.extract_strided_slice %46 {offsets = [192, 0], sizes = [64, 16], strides = [1, 1]} : vector<256x16xbf16> to vector<64x16xbf16>
    %cst_181 = arith.constant dense<0.000000e+00> : vector<64x64xf32>
    %389 = tpu.matmul %386, %387, %cst_181 {dimension_numbers = #tpu.dot_dimension_numbers<[1], [1], [0], [0], [0, 0, 1, 0], [], []>} : vector<64x16xbf16>, vector<64x16xbf16>, vector<64x64xf32> -> vector<64x64xf32>
    %390 = arith.addf %389, %59 : vector<64x64xf32>
    %cst_182 = arith.constant dense<0xFF800000> : vector<64xf32>
    %391 = vector.multi_reduction <maximumf>, %390, %cst_182 [1] : vector<64x64xf32> to vector<64xf32>
    %392 = vector.shape_cast %391 : vector<64xf32> to vector<64x1xf32>
    %393 = vector.broadcast %392 : vector<64x1xf32> to vector<64x64xf32>
    %394 = arith.subf %390, %393 : vector<64x64xf32>
    %395 = math.exp %394 : vector<64x64xf32>
    %cst_183 = arith.constant dense<0.000000e+00> : vector<64xf32>
    %396 = vector.multi_reduction <add>, %395, %cst_183 [1] : vector<64x64xf32> to vector<64xf32>
    %397 = vector.shape_cast %396 : vector<64xf32> to vector<64x1xf32>
    %398 = tpu.reciprocal %397 {approx = true} : vector<64x1xf32> -> vector<64x1xf32>
    %399 = vector.broadcast %398 : vector<64x1xf32> to vector<64x64xf32>
    %400 = arith.mulf %395, %399 : vector<64x64xf32>
    %401 = arith.truncf %400 : vector<64x64xf32> to vector<64x64xbf16>
    %cst_184 = arith.constant dense<0.000000e+00> : vector<64x16xf32>
    %402 = tpu.matmul %401, %388, %cst_184 {dimension_numbers = #tpu.dot_dimension_numbers<[1], [0], [0], [1], [0, 0, 1, 1], [], []>} : vector<64x64xbf16>, vector<64x16xbf16>, vector<64x16xf32> -> vector<64x16xf32>
    %403 = arith.truncf %402 : vector<64x16xf32> to vector<64x16xbf16>
    %c2_185 = arith.constant 2 : index
    %c0_186 = arith.constant 0 : index
    %c0_187 = arith.constant 0 : index
    %404 = vector.load %arg6[%c2_185, %c0_186, %c0_187] : memref<4x16x32xbf16, #tpu.memory_space<vmem>>, vector<1x16x32xbf16>
    %405 = vector.shape_cast %404 : vector<1x16x32xbf16> to vector<16x32xbf16>
    %cst_188 = arith.constant dense<0.000000e+00> : vector<64x32xf32>
    %406 = tpu.matmul %403, %405, %cst_188 {dimension_numbers = #tpu.dot_dimension_numbers<[1], [0], [0], [1], [0, 0, 1, 1], [], []>} : vector<64x16xbf16>, vector<16x32xbf16>, vector<64x32xf32> -> vector<64x32xf32>
    %407 = arith.addf %385, %406 : vector<64x32xf32>
    %408 = vector.extract_strided_slice %18 {offsets = [192, 0], sizes = [64, 16], strides = [1, 1]} : vector<256x16xbf16> to vector<64x16xbf16>
    %409 = vector.extract_strided_slice %34 {offsets = [192, 0], sizes = [64, 16], strides = [1, 1]} : vector<256x16xbf16> to vector<64x16xbf16>
    %410 = vector.extract_strided_slice %50 {offsets = [192, 0], sizes = [64, 16], strides = [1, 1]} : vector<256x16xbf16> to vector<64x16xbf16>
    %cst_189 = arith.constant dense<0.000000e+00> : vector<64x64xf32>
    %411 = tpu.matmul %408, %409, %cst_189 {dimension_numbers = #tpu.dot_dimension_numbers<[1], [1], [0], [0], [0, 0, 1, 0], [], []>} : vector<64x16xbf16>, vector<64x16xbf16>, vector<64x64xf32> -> vector<64x64xf32>
    %412 = arith.addf %411, %62 : vector<64x64xf32>
    %cst_190 = arith.constant dense<0xFF800000> : vector<64xf32>
    %413 = vector.multi_reduction <maximumf>, %412, %cst_190 [1] : vector<64x64xf32> to vector<64xf32>
    %414 = vector.shape_cast %413 : vector<64xf32> to vector<64x1xf32>
    %415 = vector.broadcast %414 : vector<64x1xf32> to vector<64x64xf32>
    %416 = arith.subf %412, %415 : vector<64x64xf32>
    %417 = math.exp %416 : vector<64x64xf32>
    %cst_191 = arith.constant dense<0.000000e+00> : vector<64xf32>
    %418 = vector.multi_reduction <add>, %417, %cst_191 [1] : vector<64x64xf32> to vector<64xf32>
    %419 = vector.shape_cast %418 : vector<64xf32> to vector<64x1xf32>
    %420 = tpu.reciprocal %419 {approx = true} : vector<64x1xf32> -> vector<64x1xf32>
    %421 = vector.broadcast %420 : vector<64x1xf32> to vector<64x64xf32>
    %422 = arith.mulf %417, %421 : vector<64x64xf32>
    %423 = arith.truncf %422 : vector<64x64xf32> to vector<64x64xbf16>
    %cst_192 = arith.constant dense<0.000000e+00> : vector<64x16xf32>
    %424 = tpu.matmul %423, %410, %cst_192 {dimension_numbers = #tpu.dot_dimension_numbers<[1], [0], [0], [1], [0, 0, 1, 1], [], []>} : vector<64x64xbf16>, vector<64x16xbf16>, vector<64x16xf32> -> vector<64x16xf32>
    %425 = arith.truncf %424 : vector<64x16xf32> to vector<64x16xbf16>
    %c3_193 = arith.constant 3 : index
    %c0_194 = arith.constant 0 : index
    %c0_195 = arith.constant 0 : index
    %426 = vector.load %arg6[%c3_193, %c0_194, %c0_195] : memref<4x16x32xbf16, #tpu.memory_space<vmem>>, vector<1x16x32xbf16>
    %427 = vector.shape_cast %426 : vector<1x16x32xbf16> to vector<16x32xbf16>
    %cst_196 = arith.constant dense<0.000000e+00> : vector<64x32xf32>
    %428 = tpu.matmul %425, %427, %cst_196 {dimension_numbers = #tpu.dot_dimension_numbers<[1], [0], [0], [1], [0, 0, 1, 1], [], []>} : vector<64x16xbf16>, vector<16x32xbf16>, vector<64x32xf32> -> vector<64x32xf32>
    %429 = arith.addf %407, %428 : vector<64x32xf32>
    %430 = vector.broadcast %63 : vector<1x32xf32> to vector<64x32xf32>
    %431 = arith.addf %429, %430 : vector<64x32xf32>
    %432 = arith.truncf %431 : vector<64x32xf32> to vector<64x32xbf16>
    %c3_197 = arith.constant 3 : index
    %c0_198 = arith.constant 0 : index
    %c0_199 = arith.constant 0 : index
    %433 = vector.load %arg8[%c3_197, %c0_198, %c0_199] : memref<4x64x32xbf16, #tpu.memory_space<vmem>>, vector<1x64x32xbf16>
    %434 = vector.shape_cast %433 : vector<1x64x32xbf16> to vector<64x32xbf16>
    %435 = vector.shape_cast %432 : vector<64x32xbf16> to vector<1x64x32xbf16>
    tpu.vector_store %arg8[%c3_197, %c0_198, %c0_199], %435 {strides = array<i32>} : memref<4x64x32xbf16, #tpu.memory_space<vmem>>, vector<1x64x32xbf16>,
    return
  }
  func.func @transform_0(%arg0: i32) -> (i32, i32, i32) {
    %c0_i32 = arith.constant 0 : i32
    %c0_i32_0 = arith.constant 0 : i32
    %c0_i32_1 = arith.constant 0 : i32
    return %arg0, %c0_i32, %c0_i32_0 : i32, i32, i32
  }
  func.func @transform_1(%arg0: i32) -> (i32, i32, i32) {
    %c0_i32 = arith.constant 0 : i32
    %c0_i32_0 = arith.constant 0 : i32
    %c0_i32_1 = arith.constant 0 : i32
    %c0_i32_2 = arith.constant 0 : i32
    return %c0_i32, %c0_i32_0, %c0_i32_1 : i32, i32, i32
  }
  func.func @transform_2(%arg0: i32) -> (i32, i32, i32) {
    %c0_i32 = arith.constant 0 : i32
    %c0_i32_0 = arith.constant 0 : i32
    %c0_i32_1 = arith.constant 0 : i32
    %c0_i32_2 = arith.constant 0 : i32
    return %c0_i32, %c0_i32_0, %c0_i32_1 : i32, i32, i32
  }
  func.func @transform_3(%arg0: i32) -> (i32, i32, i32) {
    %c0_i32 = arith.constant 0 : i32
    %c0_i32_0 = arith.constant 0 : i32
    %c0_i32_1 = arith.constant 0 : i32
    %c0_i32_2 = arith.constant 0 : i32
    return %c0_i32, %c0_i32_0, %c0_i32_1 : i32, i32, i32
  }
  func.func @transform_4(%arg0: i32) -> (i32, i32, i32) {
    %c0_i32 = arith.constant 0 : i32
    %c0_i32_0 = arith.constant 0 : i32
    %c0_i32_1 = arith.constant 0 : i32
    %c0_i32_2 = arith.constant 0 : i32
    return %c0_i32, %c0_i32_0, %c0_i32_1 : i32, i32, i32
  }
  func.func @transform_5(%arg0: i32) -> (i32, i32, i32) {
    %c0_i32 = arith.constant 0 : i32
    %c0_i32_0 = arith.constant 0 : i32
    %c0_i32_1 = arith.constant 0 : i32
    %c0_i32_2 = arith.constant 0 : i32
    return %c0_i32, %c0_i32_0, %c0_i32_1 : i32, i32, i32
  }
  func.func @transform_6(%arg0: i32) -> (i32, i32) {
    %c0_i32 = arith.constant 0 : i32
    %c0_i32_0 = arith.constant 0 : i32
    %c0_i32_1 = arith.constant 0 : i32
    return %c0_i32, %c0_i32_0 : i32, i32
  }
  func.func @transform_7(%arg0: i32) -> (i32, i32, i32) {
    %c0_i32 = arith.constant 0 : i32
    %c0_i32_0 = arith.constant 0 : i32
    %c0_i32_1 = arith.constant 0 : i32
    return %arg0, %c0_i32, %c0_i32_0 : i32, i32, i32
  }
}

</mosaic_0001>

<bundles_post_ra>
// kernel: tpu_custom_call.1
= control target key start
LH: loop header
LB: loop body
LE: loop exit
PB: predicated region body
PF: predicated region fallthrough
CT: control target
= control target key end

     0   :  { %s8542_s24 = smov 0   ;;  %s13068_s0 = inlined_call_operand.vmem [shape: f32[8,64,32], index: 0, kind: input, shape index: {}]   ;;  %s13069_s1 = inlined_call_operand.vmem [shape: bf16[4,32,16], index: 1, kind: input, shape index: {}]   ;;  %s13070_s2 = inlined_call_operand.vmem [shape: bf16[4,32,16], index: 2, kind: input, shape index: {}]   ;;  %s13071_s3 = inlined_call_operand.vmem [shape: bf16[4,32,16], index: 3, kind: input, shape index: {}]   ;;  %s13072_s4 = inlined_call_operand.vmem [shape: bf16[4,64,64], index: 4, kind: input, shape index: {}]   ;;  %s13073_s5 = inlined_call_operand.vmem [shape: bf16[4,16,32], index: 5, kind: input, shape index: {}]   ;;  %s13074_s6 = inlined_call_operand.vmem [shape: f32[1,32], index: 6, kind: input, shape index: {}]   ;;  %s13075_s7 = inlined_call_operand.vmem [shape: bf16[8,64,32], index: 7, kind: output, shape index: {}]  }
   0x1 LB: > { %s7184_s25 = sadd.s32 4294967295, %s8500_s24   ;;  %p7188_p0 = scmp.ge.s32.totalorder %s8500_s24, 1  ;;  %s8500_s24 = sphi %s8542_s24, %s17_s24  }
   0x2   : > { %p239_p1 = scmp.lt.s32.totalorder %s8500_s24, 3 }
   0x4   : > { %p240_p2 = pnand %p7188_p0, %p239_p1 }
   0x6   : > { %243 = sbr.rel (%p240_p2) target bundleno = 4941 (0x134d), region = 48 }
   0xb   : > { %v7852_v0 = vld [vmem:[%s13069_s1 + $0x8] sm:$0xff]  ;;  %v7854_v1 = vld [vmem:[%s13069_s1 + $0x18] sm:$0xff]  ;;  %s7189_s9 = sshll.u32 %s7184_s25, 2  ;;  %v7851_v3 = vld [vmem:[%s13069_s1] sm:$0xff]  ;;  %vm352_vm0 = vcmask 261120   ;;  %vm2146_vm1 = vcmask 130048  }
   0xc   : > { %v7856_v2 = vld [vmem:[%s13069_s1 + $0x28] sm:$0xff]  ;;  %p274_p3 = scmp.lt.s32.totalorder %s7189_s9, 7  ;;  %407 = vmatpush.bf16.msra.mxu0 %v7852_v0  ;;  %545 = vmatpush.bf16.msra.mxu1 %v7854_v1  ;;  %v7853_v4 = vld [vmem:[%s13069_s1 + $0x10] sm:$0xff]  ;;  %v7855_v5 = vld [vmem:[%s13069_s1 + $0x20] sm:$0xff]  ;;  %vm2200_vm2 = vcmask 523264   ;;  %vm3358_vm3 = vcmask 257024  }
   0xd   : > { %683 = vmatpush.bf16.msra.mxu2 %v7856_v2  ;;  %v7864_v6 = vld [vmem:[%s13070_s2 + $0x28] sm:$0xff]  ;;  %v7858_v22 = vld [vmem:[%s13069_s1 + $0x38] sm:$0xff]  ;;  %v7857_v23 = vld [vmem:[%s13069_s1 + $0x30] sm:$0xff] }
   0xe   : > { %s14231_s9 = smov (!%p274_p3, %s7189_s9), 7  ;;  %821 = vmatpush.bf16.msra.mxu3 %v7858_v22  ;;  %v7863_v30 = vld [vmem:[%s13070_s2 + $0x20] sm:$0xff] }
   0xf   : > { %s7849_s18 = sshll.u32 %s14231_s9, 6  ;;  %s7850_s16 = sshll.u32 %s14231_s9, 5 }
  0x10   : > { %408 = vmatpush.bf16.msra.mxu0 %v7851_v3  ;;  %546 = vmatpush.bf16.msra.mxu1 %v7853_v4  ;;  %s8577_s21 = scalar_lea.vmem %s13068_s0, %s7849_s18  ;;  %s11414_s19 = scalar_lea.vmem %s13075_s7, %s7850_s16 }
  0x11   : > { %684 = vmatpush.bf16.msra.mxu2 %v7855_v5  ;;  %v288_v7 = vld [vmem:[%s8577_s21] sm:$0xff]  ;;  %v289_v8 = vld [vmem:[%s8577_s21 + $0x8] sm:$0xff]  ;;  %v290_v10 = vld [vmem:[%s8577_s21 + $0x10] sm:$0xff] }
  0x12   : > { %v8581_v9 = vpack.c.bf16 %v289_v8, %v288_v7  ;;  %v291_v11 = vld [vmem:[%s8577_s21 + $0x18] sm:$0xff]  ;;  %v292_v13 = vld [vmem:[%s8577_s21 + $0x20] sm:$0xff]  ;;  %v293_v14 = vld [vmem:[%s8577_s21 + $0x28] sm:$0xff]  ;;  %822 = vmatpush.bf16.msra.mxu3 %v7857_v23 }
  0x13   : > { %v8591_v12 = vpack.c.bf16 %v291_v11, %v290_v10  ;;  %v8601_v15 = vpack.c.bf16 %v293_v14, %v292_v13  ;;  %v294_v16 = vld [vmem:[%s8577_s21 + $0x30] sm:$0xff]  ;;  %v295_v17 = vld [vmem:[%s8577_s21 + $0x38] sm:$0xff]  ;;  %v296_v19 = vld [vmem:[%s8577_s21 + $0x40] sm:$0xff] }
  0x14   : > { %7203 = vmatmul.msk.bf16.vlgmr.msra.gmra.mxu0 %vm352_vm0, %v8581_v9  ;;  %7231 = vmatmul.msk.bf16.vlgmr.msra.gmra.mxu1 %vm352_vm0, %v8581_v9  ;;  %v8611_v18 = vpack.c.bf16 %v295_v17, %v294_v16  ;;  %v297_v20 = vld [vmem:[%s8577_s21 + $0x48] sm:$0xff]  ;;  %v298_v24 = vld [vmem:[%s8577_s21 + $0x50] sm:$0xff]  ;;  %v299_v25 = vld [vmem:[%s8577_s21 + $0x58] sm:$0xff] }
  0x15   : > { %1234 = vmatpush.bf16.msrb.mxu2 %v7864_v6  ;;  %v8621_v21 = vpack.c.bf16 %v297_v20, %v296_v19  ;;  %7287 = vmatmul.msk.bf16.vlgmr.msra.gmra.mxu3 %vm352_vm0, %v8581_v9  ;;  %v8639_v26 = vpack.c.bf16 %v299_v25, %v298_v24  ;;  %v300_v27 = vld [vmem:[%s8577_s21 + $0x60] sm:$0xff]  ;;  %v301_v28 = vld [vmem:[%s8577_s21 + $0x68] sm:$0xff]  ;;  %v302_v31 = vld [vmem:[%s8577_s21 + $0x70] sm:$0xff] }
  0x16   : > { %7259 = vmatmul.msk.bf16.vlgmr.msra.gmra.mxu2 %vm352_vm0, %v8581_v9  ;;  %v8651_v29 = vpack.c.bf16 %v301_v28, %v300_v27  ;;  %v303_v32 = vld [vmem:[%s8577_s21 + $0x78] sm:$0xff]  ;;  %v304_v34 = vld [vmem:[%s8577_s21 + $0x80] sm:$0xff]  ;;  %v305_v35 = vld [vmem:[%s8577_s21 + $0x88] sm:$0xff] }
  0x17   : > { %v8666_v33 = vpack.c.bf16 %v303_v32, %v302_v31  ;;  %v8678_v36 = vpack.c.bf16 %v305_v35, %v304_v34  ;;  %v306_v50 = vld [vmem:[%s8577_s21 + $0x90] sm:$0xff]  ;;  %v307_v51 = vld [vmem:[%s8577_s21 + $0x98] sm:$0xff]  ;;  %v308_v11 = vld [vmem:[%s8577_s21 + $0xa0] sm:$0xff] }
  0x18   : > { %v8702_v56 = vpack.c.bf16 %v307_v51, %v306_v50  ;;  %v309_v13 = vld [vmem:[%s8577_s21 + $0xa8] sm:$0xff] }
  0x19   : > { %1235 = vmatpush.bf16.msrb.mxu2 %v7863_v30  ;;  %v8732_v20 = vpack.c.bf16 %v309_v13, %v308_v11  ;;  %v7860_v50 = vld [vmem:[%s13070_s2 + $0x8] sm:$0xff] }
  0x1a   : > { %958 = vmatpush.bf16.msrb.mxu0 %v7860_v50 }
  0x24   : > { %7204 = vmatmul.msk.bf16.gmra.mxu0 %vm352_vm0, %v8591_v12  ;;  %7232 = vmatmul.msk.bf16.gmra.mxu1 %vm352_vm0, %v8591_v12 }
  0x25   : > { %7288 = vmatmul.msk.bf16.gmra.mxu3 %vm352_vm0, %v8591_v12 }
  0x26   : > { %7260 = vmatmul.msk.bf16.gmra.mxu2 %vm352_vm0, %v8591_v12 }
  0x34   : > { %7205 = vmatmul.msk.bf16.gmra.mxu0 %vm352_vm0, %v8601_v15  ;;  %7233 = vmatmul.msk.bf16.gmra.mxu1 %vm352_vm0, %v8601_v15 }
  0x35   : > { %7289 = vmatmul.msk.bf16.gmra.mxu3 %vm352_vm0, %v8601_v15 }
  0x36   : > { %7261 = vmatmul.msk.bf16.gmra.mxu2 %vm352_vm0, %v8601_v15 }
  0x44   : > { %7206 = vmatmul.msk.bf16.gmra.mxu0 %vm352_vm0, %v8611_v18  ;;  %7234 = vmatmul.msk.bf16.gmra.mxu1 %vm352_vm0, %v8611_v18 }
  0x45   : > { %7290 = vmatmul.msk.bf16.gmra.mxu3 %vm352_vm0, %v8611_v18 }
  0x46   : > { %7262 = vmatmul.msk.bf16.gmra.mxu2 %vm352_vm0, %v8611_v18 }
  0x54   : > { %7207 = vmatmul.msk.bf16.gmra.mxu0 %vm352_vm0, %v8621_v21  ;;  %7235 = vmatmul.msk.bf16.gmra.mxu1 %vm352_vm0, %v8621_v21 }
  0x55   : > { %7291 = vmatmul.msk.bf16.gmra.mxu3 %vm352_vm0, %v8621_v21 }
  0x56   : > { %7263 = vmatmul.msk.bf16.gmra.mxu2 %vm352_vm0, %v8621_v21 }
  0x64   : > { %7208 = vmatmul.msk.bf16.gmra.mxu0 %vm352_vm0, %v8639_v26  ;;  %7236 = vmatmul.msk.bf16.gmra.mxu1 %vm352_vm0, %v8639_v26 }
  0x65   : > { %7292 = vmatmul.msk.bf16.gmra.mxu3 %vm352_vm0, %v8639_v26 }
  0x66   : > { %7264 = vmatmul.msk.bf16.gmra.mxu2 %vm352_vm0, %v8639_v26 }
  0x74   : > { %7209 = vmatmul.msk.bf16.gmra.mxu0 %vm352_vm0, %v8651_v29  ;;  %7237 = vmatmul.msk.bf16.gmra.mxu1 %vm352_vm0, %v8651_v29 }
  0x75   : > { %7293 = vmatmul.msk.bf16.gmra.mxu3 %vm352_vm0, %v8651_v29 }
  0x76   : > { %7265 = vmatmul.msk.bf16.gmra.mxu2 %vm352_vm0, %v8651_v29 }
  0x84   : > { %7210 = vmatmul.msk.bf16.gmra.mxu0 %vm352_vm0, %v8666_v33  ;;  %7238 = vmatmul.msk.bf16.gmra.mxu1 %vm352_vm0, %v8666_v33 }
  0x85   : > { %7294 = vmatmul.msk.bf16.gmra.mxu3 %vm352_vm0, %v8666_v33 }
  0x86   : > { %7266 = vmatmul.msk.bf16.gmra.mxu2 %vm352_vm0, %v8666_v33 }
  0x91   : > { %v410_v37 = vpop.f32.mrf.mxu0  ;;  %v548_v38 = vpop.f32.mrf.mxu1 }
  0x92   : > { %v490_v39 = vpack.c.bf16 %v410_v37, %v410_v37  ;;  %v628_v40 = vpack.c.bf16 %v548_v38, %v548_v38 }
  0x94   : > { %7211 = vmatmul.msk.bf16.gmra.mxu0 %vm352_vm0, %v8678_v36  ;;  %7239 = vmatmul.msk.bf16.gmra.mxu1 %vm352_vm0, %v8678_v36  ;;  %v8686_v44 = vunpack.c.l.b16 %v490_v39  ;;  %v8688_v45 = vunpack.c.l.b16 %v628_v40 }
  0x95   : > { %7295 = vmatmul.msk.bf16.gmra.mxu3 %vm352_vm0, %v8678_v36 }
  0x96   : > { %7267 = vmatmul.msk.bf16.gmra.mxu2 %vm352_vm0, %v8678_v36 }
  0x99   : > { %v686_v41 = vpop.f32.mrf.mxu2  ;;  %v412_v42 = vpop.f32.mrf.mxu0 }
  0x9a   : > { %v550_v43 = vpop.f32.mrf.mxu1  ;;  %v491_v46 = vpack.c.bf16 %v412_v42, %v412_v42  ;;  %v766_v54 = vpack.c.bf16 %v686_v41, %v686_v41 }
  0x9b   : > { %v629_v47 = vpack.c.bf16 %v550_v43, %v550_v43  ;;  %v310_v43 = vld [vmem:[%s8577_s21 + $0xb0] sm:$0xff] }
  0x9c   : > { %v8690_v48 = vunpack.c.l.b16 %v491_v46  ;;  %v8704_v60 = vunpack.c.l.b16 %v766_v54  ;;  %v311_v46 = vld [vmem:[%s8577_s21 + $0xb8] sm:$0xff] }
  0x9d   : > { %v8692_v49 = vunpack.c.l.b16 %v629_v47  ;;  %v7859_v47 = vld [vmem:[%s13070_s2] sm:$0xff] }
  0x9e   : > { %13354 = vst [vmem:[#allocation2_spill] sm:$0xff] %v8704_v60  ;;  %959 = vmatpush.bf16.msrb.mxu0 %v7859_v47  ;;  %v7872_v47 = vld [vmem:[%s13071_s3 + $0x28] sm:$0xff] }
  0x9f   : > { %1785 = vmatpush.bf16.msra.mxu2 %v7872_v47  ;;  %v319_v47 = vld [vmem:[%s8577_s21 + $0xf8] sm:$0xff] }
  0xa1   : > { %v688_v55 = vpop.f32.mrf.mxu2  ;;  %v415_v58 = vpop.f32.mrf.mxu0 }
  0xa2   : > { %v767_v57 = vpack.c.bf16 %v688_v55, %v688_v55  ;;  %v553_v59 = vpop.f32.mrf.mxu1  ;;  %v492_v63 = vpack.c.bf16 %v415_v58, %v415_v58  ;;  %v8762_v55 = vpack.c.bf16 %v311_v46, %v310_v43 }
  0xa3   : > { %v630_v0 = vpack.c.bf16 %v553_v59, %v553_v59 }
  0xa4   : > { %v8706_v61 = vunpack.c.l.b16 %v767_v57  ;;  %7212 = vmatmul.msk.bf16.gmra.mxu0 %vm352_vm0, %v8702_v56  ;;  %7240 = vmatmul.msk.bf16.gmra.mxu1 %vm352_vm0, %v8702_v56  ;;  %v8716_v4 = vunpack.c.l.b16 %v492_v63 }
  0xa5   : > { %v8718_v5 = vunpack.c.l.b16 %v630_v0  ;;  %7296 = vmatmul.msk.bf16.gmra.mxu3 %vm352_vm0, %v8702_v56 }
  0xa6   : > { %13355 = vst [vmem:[#allocation3_spill] sm:$0xff] %v8706_v61  ;;  %7268 = vmatmul.msk.bf16.gmra.mxu2 %vm352_vm0, %v8702_v56 }
  0xa9   : > { %v691_v1 = vpop.f32.mrf.mxu2  ;;  %v417_v2 = vpop.f32.mrf.mxu0 }
  0xaa   : > { %v555_v3 = vpop.f32.mrf.mxu1  ;;  %v493_v6 = vpack.c.bf16 %v417_v2, %v417_v2  ;;  %v768_v17 = vpack.c.bf16 %v691_v1, %v691_v1 }
  0xab   : > { %v631_v7 = vpack.c.bf16 %v555_v3, %v555_v3 }
  0xac   : > { %v8720_v8 = vunpack.c.l.b16 %v493_v6  ;;  %v8734_v25 = vunpack.c.l.b16 %v768_v17 }
  0xad   : > { %v8722_v10 = vunpack.c.l.b16 %v631_v7 }
  0xae   : > { %13356 = vst [vmem:[#allocation4_spill] sm:$0xff] %v8734_v25 }
  0xb1   : > { %v693_v19 = vpop.f32.mrf.mxu2  ;;  %v420_v23 = vpop.f32.mrf.mxu0 }
  0xb2   : > { %v769_v22 = vpack.c.bf16 %v693_v19, %v693_v19  ;;  %v558_v24 = vpop.f32.mrf.mxu1  ;;  %v494_v30 = vpack.c.bf16 %v420_v23, %v420_v23 }
  0xb3   : > { %v632_v31 = vpack.c.bf16 %v558_v24, %v558_v24 }
  0xb4   : > { %v8736_v27 = vunpack.c.l.b16 %v769_v22  ;;  %7213 = vmatmul.msk.bf16.gmra.mxu0 %vm352_vm0, %v8732_v20  ;;  %7241 = vmatmul.msk.bf16.gmra.mxu1 %vm352_vm0, %v8732_v20  ;;  %v8746_v37 = vunpack.c.l.b16 %v494_v30  ;;  %v312_v30 = vld [vmem:[%s8577_s21 + $0xc0] sm:$0xff] }
  0xb5   : > { %v8748_v38 = vunpack.c.l.b16 %v632_v31  ;;  %v313_v31 = vld [vmem:[%s8577_s21 + $0xc8] sm:$0xff]  ;;  %7297 = vmatmul.msk.bf16.gmra.mxu3 %vm352_vm0, %v8732_v20 }
  0xb6   : > { %13357 = vst [vmem:[#allocation5_spill] sm:$0xff] %v8736_v27  ;;  %7269 = vmatmul.msk.bf16.gmra.mxu2 %vm352_vm0, %v8732_v20 }
  0xb7   : > { %13358 = vst [vmem:[#allocation6_spill] sm:$0xff] %v8746_v37 }
  0xb8   : > { %13359 = vst [vmem:[#allocation7_spill] sm:$0xff] %v8748_v38 }
  0xb9   : > { %v696_v32 = vpop.f32.mrf.mxu2  ;;  %v422_v34 = vpop.f32.mrf.mxu0 }
  0xba   : > { %v560_v35 = vpop.f32.mrf.mxu1  ;;  %v495_v39 = vpack.c.bf16 %v422_v34, %v422_v34  ;;  %v770_v51 = vpack.c.bf16 %v696_v32, %v696_v32  ;;  %v824_v34 = vpop.f32.mrf.mxu3 }
  0xbb   : > { %v633_v40 = vpack.c.bf16 %v560_v35, %v560_v35  ;;  %v904_v50 = vpack.c.bf16 %v824_v34, %v824_v34 }
  0xbc   : > { %v8750_v41 = vunpack.c.l.b16 %v495_v39  ;;  %v8764_v63 = vunpack.c.l.b16 %v770_v51 }
  0xbd   : > { %v8752_v42 = vunpack.c.l.b16 %v633_v40  ;;  %v8792_v40 = vpack.c.bf16 %v313_v31, %v312_v30 }
  0xbe   : > { %13360 = vst [vmem:[#allocation8_spill] sm:$0xff] %v8750_v41 }
  0xbf   : > { %13361 = vst [vmem:[#allocation9_spill] sm:$0xff] %v8752_v42 }
  0xc0   : > { %13362 = vst [vmem:[#allocation10_spill] sm:$0xff] %v8764_v63 }
  0xc1   : > { %v698_v54 = vpop.f32.mrf.mxu2  ;;  %v425_v58 = vpop.f32.mrf.mxu0 }
  0xc2   : > { %v771_v57 = vpack.c.bf16 %v698_v54, %v698_v54  ;;  %v563_v59 = vpop.f32.mrf.mxu1  ;;  %v496_v2 = vpack.c.bf16 %v425_v58, %v425_v58  ;;  %v826_v34 = vpop.f32.mrf.mxu3 }
  0xc3   : > { %v634_v3 = vpack.c.bf16 %v563_v59, %v563_v59 }
  0xc4   : > { %v8766_v0 = vunpack.c.l.b16 %v771_v57  ;;  %7214 = vmatmul.msk.bf16.gmra.mxu0 %vm352_vm0, %v8762_v55  ;;  %7242 = vmatmul.msk.bf16.gmra.mxu1 %vm352_vm0, %v8762_v55  ;;  %v8776_v13 = vunpack.c.l.b16 %v496_v2 }
  0xc5   : > { %v8778_v17 = vunpack.c.l.b16 %v634_v3  ;;  %7298 = vmatmul.msk.bf16.gmra.mxu3 %vm352_vm0, %v8762_v55 }
  0xc6   : > { %13363 = vst [vmem:[#allocation11_spill] sm:$0xff] %v8766_v0  ;;  %7270 = vmatmul.msk.bf16.gmra.mxu2 %vm352_vm0, %v8762_v55 }
  0xc7   : > { %13364 = vst [vmem:[#allocation12_spill] sm:$0xff] %v8776_v13 }
  0xc8   : > { %13365 = vst [vmem:[#allocation13_spill] sm:$0xff] %v8778_v17 }
  0xc9   : > { %v701_v6 = vpop.f32.mrf.mxu2  ;;  %v427_v7 = vpop.f32.mrf.mxu0 }
  0xca   : > { %v565_v11 = vpop.f32.mrf.mxu1  ;;  %v497_v19 = vpack.c.bf16 %v427_v7, %v427_v7  ;;  %v772_v35 = vpack.c.bf16 %v701_v6, %v701_v6 }
  0xcb   : > { %v635_v22 = vpack.c.bf16 %v565_v11, %v565_v11 }
  0xcc   : > { %v8780_v23 = vunpack.c.l.b16 %v497_v19  ;;  %v8794_v54 = vunpack.c.l.b16 %v772_v35 }
  0xcd   : > { %v8782_v24 = vunpack.c.l.b16 %v635_v22 }
  0xce   : > { %13366 = vst [vmem:[#allocation14_spill] sm:$0xff] %v8780_v23 }
  0xcf   : > { %13367 = vst [vmem:[#allocation15_spill] sm:$0xff] %v8782_v24 }
  0xd0   : > { %13368 = vst [vmem:[#allocation16_spill] sm:$0xff] %v8794_v54 }
  0xd1   : > { %v703_v39 = vpop.f32.mrf.mxu2  ;;  %v430_v46 = vpop.f32.mrf.mxu0 }
  0xd2   : > { %v773_v43 = vpack.c.bf16 %v703_v39, %v703_v39  ;;  %v568_v51 = vpop.f32.mrf.mxu1  ;;  %v498_v59 = vpack.c.bf16 %v430_v46, %v430_v46  ;;  %v314_v39 = vld [vmem:[%s8577_s21 + $0xd0] sm:$0xff] }
  0xd3   : > { %v636_v2 = vpack.c.bf16 %v568_v51, %v568_v51 }
  0xd4   : > { %v8796_v57 = vunpack.c.l.b16 %v773_v43  ;;  %7215 = vmatmul.msk.bf16.gmra.mxu0 %vm352_vm0, %v8792_v40  ;;  %7243 = vmatmul.msk.bf16.gmra.mxu1 %vm352_vm0, %v8792_v40  ;;  %v8806_v11 = vunpack.c.l.b16 %v498_v59  ;;  %v315_v43 = vld [vmem:[%s8577_s21 + $0xd8] sm:$0xff] }
  0xd5   : > { %v8808_v19 = vunpack.c.l.b16 %v636_v2  ;;  %v8822_v2 = vpack.c.bf16 %v315_v43, %v314_v39  ;;  %7299 = vmatmul.msk.bf16.gmra.mxu3 %vm352_vm0, %v8792_v40 }
  0xd6   : > { %13369 = vst [vmem:[#allocation17_spill] sm:$0xff] %v8796_v57  ;;  %7271 = vmatmul.msk.bf16.gmra.mxu2 %vm352_vm0, %v8792_v40 }
  0xd7   : > { %13370 = vst [vmem:[#allocation18_spill] sm:$0xff] %v8806_v11 }
  0xd8   : > { %13371 = vst [vmem:[#allocation19_spill] sm:$0xff] %v8808_v19 }
  0xd9   : > { %v706_v3 = vpop.f32.mrf.mxu2  ;;  %v432_v6 = vpop.f32.mrf.mxu0 }
  0xda   : > { %v570_v7 = vpop.f32.mrf.mxu1  ;;  %v499_v22 = vpack.c.bf16 %v432_v6, %v432_v6  ;;  %v774_v51 = vpack.c.bf16 %v706_v3, %v706_v3 }
  0xdb   : > { %v637_v30 = vpack.c.bf16 %v570_v7, %v570_v7 }
  0xdc   : > { %v8810_v31 = vunpack.c.l.b16 %v499_v22 }
  0xdd   : > { %v8812_v35 = vunpack.c.l.b16 %v637_v30  ;;  %v8824_v30 = vunpack.c.l.b16 %v774_v51 }
  0xde   : > { %13372 = vst [vmem:[#allocation20_spill] sm:$0xff] %v8810_v31 }
  0xdf   : > { %13373 = vst [vmem:[#allocation21_spill] sm:$0xff] %v8812_v35 }
  0xe0   : > { %13374 = vst [vmem:[#allocation22_spill] sm:$0xff] %v8824_v30 }
  0xe1   : > { %v708_v59 = vpop.f32.mrf.mxu2  ;;  %v435_v7 = vpop.f32.mrf.mxu0 }
  0xe2   : > { %v775_v6 = vpack.c.bf16 %v708_v59, %v708_v59  ;;  %v573_v22 = vpop.f32.mrf.mxu1  ;;  %v500_v3 = vpack.c.bf16 %v435_v7, %v435_v7  ;;  %v7862_v7 = vld [vmem:[%s13070_s2 + $0x18] sm:$0xff] }
  0xe3   : > { %v638_v39 = vpack.c.bf16 %v573_v22, %v573_v22  ;;  %v316_v22 = vld [vmem:[%s8577_s21 + $0xe0] sm:$0xff]  ;;  %1096 = vmatpush.bf16.msrb.mxu1 %v7862_v7 }
  0xe4   : > { %v8826_v1 = vunpack.c.l.b16 %v775_v6  ;;  %7216 = vmatmul.msk.bf16.gmra.mxu0 %vm352_vm0, %v8822_v2  ;;  %7244 = vmatmul.msk.bf16.gmra.mxu1 %vm352_vm0, %v8822_v2  ;;  %v8836_v6 = vunpack.c.l.b16 %v500_v3  ;;  %v317_v3 = vld [vmem:[%s8577_s21 + $0xe8] sm:$0xff] }
  0xe5   : > { %v8838_v58 = vunpack.c.l.b16 %v638_v39  ;;  %v7861_v39 = vld [vmem:[%s13070_s2 + $0x10] sm:$0xff] }
  0xe6   : > { %13375 = vst [vmem:[#allocation23_spill] sm:$0xff] %v8826_v1  ;;  %7272 = vmatmul.msk.bf16.gmra.mxu2 %vm352_vm0, %v8822_v2 }
  0xe7   : > { %13376 = vst [vmem:[#allocation24_spill] sm:$0xff] %v8836_v6  ;;  %1097 = vmatpush.bf16.msrb.mxu1 %v7861_v39  ;;  %v8881_v39 = vunpack.c.l.b16 %v904_v50 }
  0xe8   : > { %13377 = vst [vmem:[#allocation25_spill] sm:$0xff] %v8838_v58  ;;  %v829_v58 = vpop.f32.mrf.mxu3 }
  0xe9   : > { %v711_v43 = vpop.f32.mrf.mxu2  ;;  %v437_v51 = vpop.f32.mrf.mxu0  ;;  %13382 = vst [vmem:[#allocation30_spill] sm:$0xff] %v8881_v39 }
  0xea   : > { %v575_v59 = vpop.f32.mrf.mxu1  ;;  %v501_v28 = vpack.c.bf16 %v437_v51, %v437_v51 }
  0xeb   : > { %v639_v62 = vpack.c.bf16 %v575_v59, %v575_v59  ;;  %v8858_v59 = vpack.c.bf16 %v317_v3, %v316_v22 }
  0xec   : > { %v8840_v32 = vunpack.c.l.b16 %v501_v28 }
  0xed   : > { %v8842_v46 = vunpack.c.l.b16 %v639_v62  ;;  %v776_v62 = vpack.c.bf16 %v711_v43, %v711_v43 }
  0xee   : > { %13378 = vst [vmem:[#allocation26_spill] sm:$0xff] %v8840_v32 }
  0xef   : > { %13379 = vst [vmem:[#allocation27_spill] sm:$0xff] %v8842_v46  ;;  %v8866_v43 = vunpack.c.l.b16 %v776_v62  ;;  %v905_v62 = vpack.c.bf16 %v826_v34, %v826_v34  ;;  %v318_v34 = vld [vmem:[%s8577_s21 + $0xf0] sm:$0xff]  ;;  %v906_v46 = vpack.c.bf16 %v829_v58, %v829_v58 }
  0xf1   : > { %v713_v28 = vpop.f32.mrf.mxu2  ;;  %v440_v14 = vpop.f32.mrf.mxu0  ;;  %13380 = vst [vmem:[#allocation28_spill] sm:$0xff] %v8866_v43  ;;  %v8883_v53 = vunpack.c.l.b16 %v905_v62  ;;  %v8917_v58 = vunpack.c.l.b16 %v906_v46 }
  0xf2   : > { %v777_v16 = vpack.c.bf16 %v713_v28, %v713_v28  ;;  %v578_v51 = vpop.f32.mrf.mxu1  ;;  %v502_v3 = vpack.c.bf16 %v440_v14, %v440_v14 }
  0xf3   : > { %13383 = vst [vmem:[#allocation31_spill] sm:$0xff] %v8883_v53 }
  0xf4   : > { %v8868_v7 = vunpack.c.l.b16 %v777_v16  ;;  %7217 = vmatmul.msk.bf16.gmra.mxu0 %vm352_vm0, %v8858_v59  ;;  %7245 = vmatmul.msk.bf16.gmra.mxu1 %vm352_vm0, %v8858_v59  ;;  %v640_v16 = vpack.c.bf16 %v578_v51, %v578_v51  ;;  %v8885_v22 = vunpack.c.l.b16 %v502_v3  ;;  %13390 = vst [vmem:[#allocation38_spill] sm:$0xff] %v8917_v58 }
  0xf6   : > { %13381 = vst [vmem:[#allocation29_spill] sm:$0xff] %v8868_v7  ;;  %7273 = vmatmul.msk.bf16.gmra.mxu2 %vm352_vm0, %v8858_v59  ;;  %v8887_v43 = vunpack.c.l.b16 %v640_v16 }
  0xf7   : > { %13384 = vst [vmem:[#allocation32_spill] sm:$0xff] %v8885_v22 }
  0xf8   : > { %13385 = vst [vmem:[#allocation33_spill] sm:$0xff] %v8887_v43 }
  0xf9   : > { %v716_v28 = vpop.f32.mrf.mxu2  ;;  %v442_v14 = vpop.f32.mrf.mxu0 }
  0xfa   : > { %v580_v52 = vpop.f32.mrf.mxu1  ;;  %v503_v7 = vpack.c.bf16 %v442_v14, %v442_v14  ;;  %v778_v16 = vpack.c.bf16 %v716_v28, %v716_v28  ;;  %v8903_v14 = vpack.c.bf16 %v319_v47, %v318_v34  ;;  %v831_v34 = vpop.f32.mrf.mxu3  ;;  %7300 = vmatmul.msk.bf16.gmra.mxu3 %vm352_vm0, %v8822_v2 }
  0xfb   : > { %v641_v30 = vpack.c.bf16 %v580_v52, %v580_v52 }
  0xfc   : > { %v8891_v51 = vunpack.c.l.b16 %v503_v7  ;;  %v8905_v19 = vunpack.c.l.b16 %v778_v16  ;;  %v907_v16 = vpack.c.bf16 %v831_v34, %v831_v34 }
  0xfd   : > { %v8893_v50 = vunpack.c.l.b16 %v641_v30 }
  0xfe   : > { %13386 = vst [vmem:[#allocation34_spill] sm:$0xff] %v8891_v51 }
  0xff   : > { %13387 = vst [vmem:[#allocation35_spill] sm:$0xff] %v8893_v50 }
 0x100   : > { %13388 = vst [vmem:[#allocation36_spill] sm:$0xff] %v8905_v19 }
 0x101   : > { %v718_v52 = vpop.f32.mrf.mxu2  ;;  %v445_v1 = vpop.f32.mrf.mxu0 }
 0x102   : > { %v779_v7 = vpack.c.bf16 %v718_v52, %v718_v52  ;;  %v583_v30 = vpop.f32.mrf.mxu1  ;;  %v504_v62 = vpack.c.bf16 %v445_v1, %v445_v1  ;;  %v834_v46 = vpop.f32.mrf.mxu3 }
 0x103   : > { %v642_v47 = vpack.c.bf16 %v583_v30, %v583_v30  ;;  %v908_v1 = vpack.c.bf16 %v834_v46, %v834_v46 }
 0x104   : > { %v8907_v35 = vunpack.c.l.b16 %v779_v7  ;;  %7218 = vmatmul.msk.bf16.gmra.mxu0 %vm352_vm0, %v8903_v14  ;;  %7246 = vmatmul.msk.bf16.gmra.mxu1 %vm352_vm0, %v8903_v14  ;;  %v8919_v7 = vunpack.c.l.b16 %v907_v16  ;;  %v8921_v3 = vunpack.c.l.b16 %v504_v62 }
 0x105   : > { %v8923_v39 = vunpack.c.l.b16 %v642_v47  ;;  %v8949_v46 = vunpack.c.l.b16 %v908_v1 }
 0x106   : > { %13389 = vst [vmem:[#allocation37_spill] sm:$0xff] %v8907_v35  ;;  %7274 = vmatmul.msk.bf16.gmra.mxu2 %vm352_vm0, %v8903_v14 }
 0x107   : > { %13391 = vst [vmem:[#allocation39_spill] sm:$0xff] %v8919_v7 }
 0x108   : > { %13392 = vst [vmem:[#allocation40_spill] sm:$0xff] %v8921_v3 }
 0x109   : > { %v721_v52 = vpop.f32.mrf.mxu2  ;;  %v447_v43 = vpop.f32.mrf.mxu0  ;;  %13393 = vst [vmem:[#allocation41_spill] sm:$0xff] %v8923_v39 }
 0x10a   : > { %v585_v50 = vpop.f32.mrf.mxu1  ;;  %v505_v53 = vpack.c.bf16 %v447_v43, %v447_v43  ;;  %v780_v16 = vpack.c.bf16 %v721_v52, %v721_v52  ;;  %13398 = vst [vmem:[#allocation46_spill] sm:$0xff] %v8949_v46 }
 0x10b   : > { %v643_v28 = vpack.c.bf16 %v585_v50, %v585_v50 }
 0x10c   : > { %v8927_v19 = vunpack.c.l.b16 %v505_v53  ;;  %v8937_v53 = vunpack.c.l.b16 %v780_v16 }
 0x10d   : > { %v8929_v30 = vunpack.c.l.b16 %v643_v28 }
 0x10e   : > { %13394 = vst [vmem:[#allocation42_spill] sm:$0xff] %v8927_v19 }
 0x10f   : > { %13395 = vst [vmem:[#allocation43_spill] sm:$0xff] %v8929_v30 }
 0x110   : > { %13396 = vst [vmem:[#allocation44_spill] sm:$0xff] %v8937_v53 }
 0x111   : > { %v723_v43 = vpop.f32.mrf.mxu2  ;;  %v450_v47 = vpop.f32.mrf.mxu0 }
 0x112   : > { %v781_v50 = vpack.c.bf16 %v723_v43, %v723_v43  ;;  %v588_v35 = vpop.f32.mrf.mxu1  ;;  %v506_v62 = vpack.c.bf16 %v450_v47, %v450_v47  ;;  %v836_v43 = vpop.f32.mrf.mxu3  ;;  %7301 = vmatmul.msk.bf16.gmra.mxu3 %vm352_vm0, %v8858_v59 }
 0x113   : > { %v644_v34 = vpack.c.bf16 %v588_v35, %v588_v35  ;;  %v909_v16 = vpack.c.bf16 %v836_v43, %v836_v43 }
 0x114   : > { %v8939_v28 = vunpack.c.l.b16 %v781_v50  ;;  %7311 = vmatmul.msk.bf16.vlgmr.msrb.gmra.mxu0 %vm352_vm0, %v8581_v9  ;;  %7339 = vmatmul.msk.bf16.vlgmr.msrb.gmra.mxu1 %vm352_vm0, %v8581_v9  ;;  %v8953_v30 = vunpack.c.l.b16 %v506_v62 }
 0x115   : > { %v8951_v39 = vunpack.c.l.b16 %v909_v16  ;;  %v8955_v3 = vunpack.c.l.b16 %v644_v34 }
 0x116   : > { %13397 = vst [vmem:[#allocation45_spill] sm:$0xff] %v8939_v28  ;;  %7367 = vmatmul.msk.bf16.vlgmr.msrb.gmra.mxu2 %vm352_vm0, %v8581_v9 }
 0x117   : > { %13399 = vst [vmem:[#allocation47_spill] sm:$0xff] %v8951_v39 }
 0x118   : > { %13400 = vst [vmem:[#allocation48_spill] sm:$0xff] %v8953_v30 }
 0x119   : > { %v726_v50 = vpop.f32.mrf.mxu2  ;;  %v452_v58 = vpop.f32.mrf.mxu0  ;;  %13401 = vst [vmem:[#allocation49_spill] sm:$0xff] %v8955_v3 }
 0x11a   : > { %v590_v7 = vpop.f32.mrf.mxu1  ;;  %v507_v19 = vpack.c.bf16 %v452_v58, %v452_v58  ;;  %v839_v1 = vpop.f32.mrf.mxu3  ;;  %v782_v16 = vpack.c.bf16 %v726_v50, %v726_v50 }
 0x11b   : > { %v645_v52 = vpack.c.bf16 %v590_v7, %v590_v7  ;;  %v910_v47 = vpack.c.bf16 %v839_v1, %v839_v1 }
 0x11c   : > { %v8959_v53 = vunpack.c.l.b16 %v507_v19  ;;  %v8969_v19 = vunpack.c.l.b16 %v782_v16 }
 0x11d   : > { %v8961_v35 = vunpack.c.l.b16 %v645_v52  ;;  %v8981_v1 = vunpack.c.l.b16 %v910_v47 }
 0x11e   : > { %13402 = vst [vmem:[#allocation50_spill] sm:$0xff] %v8959_v53 }
 0x11f   : > { %13403 = vst [vmem:[#allocation51_spill] sm:$0xff] %v8961_v35 }
 0x120   : > { %13404 = vst [vmem:[#allocation52_spill] sm:$0xff] %v8969_v19 }
 0x121   : > { %v728_v58 = vpop.f32.mrf.mxu2  ;;  %v455_v34 = vpop.f32.mrf.mxu0  ;;  %13406 = vst [vmem:[#allocation54_spill] sm:$0xff] %v8981_v1 }
 0x122   : > { %v783_v7 = vpack.c.bf16 %v728_v58, %v728_v58  ;;  %v593_v28 = vpop.f32.mrf.mxu1  ;;  %v508_v43 = vpack.c.bf16 %v455_v34, %v455_v34  ;;  %v841_v58 = vpop.f32.mrf.mxu3  ;;  %7302 = vmatmul.msk.bf16.gmra.mxu3 %vm352_vm0, %v8903_v14 }
 0x123   : > { %v646_v62 = vpack.c.bf16 %v593_v28, %v593_v28  ;;  %v911_v16 = vpack.c.bf16 %v841_v58, %v841_v58 }
 0x124   : > { %v8971_v52 = vunpack.c.l.b16 %v783_v7  ;;  %7312 = vmatmul.msk.bf16.gmra.mxu0 %vm352_vm0, %v8591_v12  ;;  %7340 = vmatmul.msk.bf16.gmra.mxu1 %vm352_vm0, %v8591_v12  ;;  %v8985_v53 = vunpack.c.l.b16 %v508_v43 }
 0x125   : > { %v8983_v30 = vunpack.c.l.b16 %v911_v16  ;;  %v8987_v46 = vunpack.c.l.b16 %v646_v62 }
 0x126   : > { %13405 = vst [vmem:[#allocation53_spill] sm:$0xff] %v8971_v52  ;;  %7368 = vmatmul.msk.bf16.gmra.mxu2 %vm352_vm0, %v8591_v12 }
 0x127   : > { %13407 = vst [vmem:[#allocation55_spill] sm:$0xff] %v8983_v30 }
 0x128   : > { %13408 = vst [vmem:[#allocation56_spill] sm:$0xff] %v8985_v53 }
 0x129   : > { %v731_v7 = vpop.f32.mrf.mxu2  ;;  %v457_v3 = vpop.f32.mrf.mxu0  ;;  %13409 = vst [vmem:[#allocation57_spill] sm:$0xff] %v8987_v46 }
 0x12a   : > { %v595_v35 = vpop.f32.mrf.mxu1  ;;  %v509_v39 = vpack.c.bf16 %v457_v3, %v457_v3  ;;  %v844_v47 = vpop.f32.mrf.mxu3  ;;  %v784_v16 = vpack.c.bf16 %v731_v7, %v731_v7 }
 0x12b   : > { %v647_v50 = vpack.c.bf16 %v595_v35, %v595_v35  ;;  %v912_v34 = vpack.c.bf16 %v844_v47, %v844_v47 }
 0x12c   : > { %v8991_v19 = vunpack.c.l.b16 %v509_v39  ;;  %v9001_v39 = vunpack.c.l.b16 %v784_v16 }
 0x12d   : > { %v8993_v28 = vunpack.c.l.b16 %v647_v50  ;;  %v9013_v47 = vunpack.c.l.b16 %v912_v34 }
 0x12e   : > { %13410 = vst [vmem:[#allocation58_spill] sm:$0xff] %v8991_v19 }
 0x12f   : > { %13411 = vst [vmem:[#allocation59_spill] sm:$0xff] %v8993_v28 }
 0x130   : > { %13412 = vst [vmem:[#allocation60_spill] sm:$0xff] %v9001_v39 }
 0x131   : > { %v733_v3 = vpop.f32.mrf.mxu2  ;;  %v460_v62 = vpop.f32.mrf.mxu0  ;;  %13414 = vst [vmem:[#allocation62_spill] sm:$0xff] %v9013_v47 }
 0x132   : > { %v785_v35 = vpack.c.bf16 %v733_v3, %v733_v3  ;;  %v598_v52 = vpop.f32.mrf.mxu1  ;;  %v510_v58 = vpack.c.bf16 %v460_v62, %v460_v62  ;;  %v846_v3 = vpop.f32.mrf.mxu3 }
 0x133   : > { %v648_v43 = vpack.c.bf16 %v598_v52, %v598_v52  ;;  %v913_v16 = vpack.c.bf16 %v846_v3, %v846_v3 }
 0x134   : > { %v9003_v50 = vunpack.c.l.b16 %v785_v35  ;;  %7313 = vmatmul.msk.bf16.gmra.mxu0 %vm352_vm0, %v8601_v15  ;;  %7341 = vmatmul.msk.bf16.gmra.mxu1 %vm352_vm0, %v8601_v15  ;;  %v9017_v19 = vunpack.c.l.b16 %v510_v58 }
 0x135   : > { %v9015_v53 = vunpack.c.l.b16 %v913_v16  ;;  %v9019_v1 = vunpack.c.l.b16 %v648_v43 }
 0x136   : > { %13413 = vst [vmem:[#allocation61_spill] sm:$0xff] %v9003_v50  ;;  %7369 = vmatmul.msk.bf16.gmra.mxu2 %vm352_vm0, %v8601_v15 }
 0x137   : > { %13415 = vst [vmem:[#allocation63_spill] sm:$0xff] %v9015_v53 }
 0x138   : > { %13416 = vst [vmem:[#allocation64_spill] sm:$0xff] %v9017_v19 }
 0x139   : > { %v736_v35 = vpop.f32.mrf.mxu2  ;;  %v462_v46 = vpop.f32.mrf.mxu0  ;;  %13417 = vst [vmem:[#allocation65_spill] sm:$0xff] %v9019_v1 }
 0x13a   : > { %v600_v28 = vpop.f32.mrf.mxu1  ;;  %v511_v30 = vpack.c.bf16 %v462_v46, %v462_v46  ;;  %v849_v34 = vpop.f32.mrf.mxu3  ;;  %v786_v16 = vpack.c.bf16 %v736_v35, %v736_v35 }
 0x13b   : > { %v649_v7 = vpack.c.bf16 %v600_v28, %v600_v28  ;;  %v914_v62 = vpack.c.bf16 %v849_v34, %v849_v34 }
 0x13c   : > { %v9023_v39 = vunpack.c.l.b16 %v511_v30  ;;  %v9033_v30 = vunpack.c.l.b16 %v786_v16 }
 0x13d   : > { %v9025_v52 = vunpack.c.l.b16 %v649_v7  ;;  %v9045_v34 = vunpack.c.l.b16 %v914_v62 }
 0x13e   : > { %13418 = vst [vmem:[#allocation66_spill] sm:$0xff] %v9023_v39 }
 0x13f   : > { %13419 = vst [vmem:[#allocation67_spill] sm:$0xff] %v9025_v52 }
 0x140   : > { %13420 = vst [vmem:[#allocation68_spill] sm:$0xff] %v9033_v30 }
 0x141   : > { %v738_v46 = vpop.f32.mrf.mxu2  ;;  %v465_v43 = vpop.f32.mrf.mxu0  ;;  %13422 = vst [vmem:[#allocation70_spill] sm:$0xff] %v9045_v34 }
 0x142   : > { %v787_v28 = vpack.c.bf16 %v738_v46, %v738_v46  ;;  %v603_v50 = vpop.f32.mrf.mxu1  ;;  %v512_v3 = vpack.c.bf16 %v465_v43, %v465_v43  ;;  %v851_v46 = vpop.f32.mrf.mxu3 }
 0x143   : > { %v650_v58 = vpack.c.bf16 %v603_v50, %v603_v50  ;;  %v915_v16 = vpack.c.bf16 %v851_v46, %v851_v46 }
 0x144   : > { %v9035_v7 = vunpack.c.l.b16 %v787_v28  ;;  %7314 = vmatmul.msk.bf16.gmra.mxu0 %vm352_vm0, %v8611_v18  ;;  %7342 = vmatmul.msk.bf16.gmra.mxu1 %vm352_vm0, %v8611_v18  ;;  %v9049_v39 = vunpack.c.l.b16 %v512_v3 }
 0x145   : > { %v9047_v19 = vunpack.c.l.b16 %v915_v16  ;;  %v9051_v47 = vunpack.c.l.b16 %v650_v58 }
 0x146   : > { %13421 = vst [vmem:[#allocation69_spill] sm:$0xff] %v9035_v7  ;;  %7370 = vmatmul.msk.bf16.gmra.mxu2 %vm352_vm0, %v8611_v18 }
 0x147   : > { %13423 = vst [vmem:[#allocation71_spill] sm:$0xff] %v9047_v19 }
 0x148   : > { %13424 = vst [vmem:[#allocation72_spill] sm:$0xff] %v9049_v39 }
 0x149   : > { %v741_v28 = vpop.f32.mrf.mxu2  ;;  %v467_v1 = vpop.f32.mrf.mxu0  ;;  %13425 = vst [vmem:[#allocation73_spill] sm:$0xff] %v9051_v47 }
 0x14a   : > { %v605_v52 = vpop.f32.mrf.mxu1  ;;  %v513_v53 = vpack.c.bf16 %v467_v1, %v467_v1  ;;  %v854_v62 = vpop.f32.mrf.mxu3  ;;  %v788_v16 = vpack.c.bf16 %v741_v28, %v741_v28 }
 0x14b   : > { %v651_v35 = vpack.c.bf16 %v605_v52, %v605_v52  ;;  %v916_v43 = vpack.c.bf16 %v854_v62, %v854_v62 }
 0x14c   : > { %v9055_v30 = vunpack.c.l.b16 %v513_v53  ;;  %v9065_v53 = vunpack.c.l.b16 %v788_v16 }
 0x14d   : > { %v9057_v50 = vunpack.c.l.b16 %v651_v35  ;;  %v9077_v62 = vunpack.c.l.b16 %v916_v43 }
 0x14e   : > { %13426 = vst [vmem:[#allocation74_spill] sm:$0xff] %v9055_v30 }
 0x14f   : > { %13427 = vst [vmem:[#allocation75_spill] sm:$0xff] %v9057_v50 }
 0x150   : > { %13428 = vst [vmem:[#allocation76_spill] sm:$0xff] %v9065_v53 }
 0x151   : > { %v743_v1 = vpop.f32.mrf.mxu2  ;;  %v470_v58 = vpop.f32.mrf.mxu0  ;;  %13430 = vst [vmem:[#allocation78_spill] sm:$0xff] %v9077_v62 }
 0x152   : > { %v789_v52 = vpack.c.bf16 %v743_v1, %v743_v1  ;;  %v608_v7 = vpop.f32.mrf.mxu1  ;;  %v514_v46 = vpack.c.bf16 %v470_v58, %v470_v58  ;;  %v856_v1 = vpop.f32.mrf.mxu3 }
 0x153   : > { %v652_v3 = vpack.c.bf16 %v608_v7, %v608_v7  ;;  %v917_v16 = vpack.c.bf16 %v856_v1, %v856_v1 }
 0x154   : > { %v9067_v35 = vunpack.c.l.b16 %v789_v52  ;;  %7315 = vmatmul.msk.bf16.gmra.mxu0 %vm352_vm0, %v8621_v21  ;;  %7343 = vmatmul.msk.bf16.gmra.mxu1 %vm352_vm0, %v8621_v21  ;;  %v9081_v30 = vunpack.c.l.b16 %v514_v46 }
 0x155   : > { %v9079_v39 = vunpack.c.l.b16 %v917_v16  ;;  %v9083_v34 = vunpack.c.l.b16 %v652_v3  ;;  %v7866_v3 = vld [vmem:[%s13070_s2 + $0x38] sm:$0xff] }
 0x156   : > { %13429 = vst [vmem:[#allocation77_spill] sm:$0xff] %v9067_v35  ;;  %7371 = vmatmul.msk.bf16.gmra.mxu2 %vm352_vm0, %v8621_v21  ;;  %1372 = vmatpush.bf16.msrb.mxu3 %v7866_v3 }
 0x157   : > { %13431 = vst [vmem:[#allocation79_spill] sm:$0xff] %v9079_v39 }
 0x158   : > { %13432 = vst [vmem:[#allocation80_spill] sm:$0xff] %v9081_v30 }
 0x159   : > { %v746_v52 = vpop.f32.mrf.mxu2  ;;  %v472_v47 = vpop.f32.mrf.mxu0  ;;  %13433 = vst [vmem:[#allocation81_spill] sm:$0xff] %v9083_v34 }
 0x15a   : > { %v610_v50 = vpop.f32.mrf.mxu1  ;;  %v515_v19 = vpack.c.bf16 %v472_v47, %v472_v47  ;;  %v859_v43 = vpop.f32.mrf.mxu3  ;;  %v790_v47 = vpack.c.bf16 %v746_v52, %v746_v52 }
 0x15b   : > { %v653_v28 = vpack.c.bf16 %v610_v50, %v610_v50  ;;  %v918_v35 = vpack.c.bf16 %v859_v43, %v859_v43  ;;  %v7865_v43 = vld [vmem:[%s13070_s2 + $0x30] sm:$0xff] }
 0x15c   : > { %v9087_v53 = vunpack.c.l.b16 %v515_v19  ;;  %1373 = vmatpush.bf16.msrb.mxu3 %v7865_v43 }
 0x15d   : > { %v9089_v7 = vunpack.c.l.b16 %v653_v28  ;;  %v9098_v28 = vunpack.c.l.b16 %v790_v47 }
 0x15e   : > { %13434 = vst [vmem:[#allocation82_spill] sm:$0xff] %v9087_v53 }
 0x15f   : > { %13435 = vst [vmem:[#allocation83_spill] sm:$0xff] %v9089_v7  ;;  %7395 = vmatmul.msk.bf16.vlgmr.msrb.gmra.mxu3 %vm352_vm0, %v8581_v9 }
 0x160   : > { %13436 = vst [vmem:[#allocation84_spill] sm:$0xff] %v9098_v28 }
 0x161   : > { %v748_v50 = vpop.f32.mrf.mxu2  ;;  %v475_v58 = vpop.f32.mrf.mxu0 }
 0x162   : > { %v791_v16 = vpack.c.bf16 %v748_v50, %v748_v50  ;;  %v613_v19 = vpop.f32.mrf.mxu1  ;;  %v516_v52 = vpack.c.bf16 %v475_v58, %v475_v58  ;;  %v861_v3 = vpop.f32.mrf.mxu3  ;;  %v9113_v50 = vunpack.c.l.b16 %v918_v35 }
 0x163   : > { %v654_v47 = vpack.c.bf16 %v613_v19, %v613_v19 }
 0x164   : > { %v9100_v62 = vunpack.c.l.b16 %v791_v16  ;;  %7316 = vmatmul.msk.bf16.gmra.mxu0 %vm352_vm0, %v8639_v26  ;;  %7344 = vmatmul.msk.bf16.gmra.mxu1 %vm352_vm0, %v8639_v26  ;;  %13438 = vst [vmem:[#allocation86_spill] sm:$0xff] %v9113_v50  ;;  %v919_v16 = vpack.c.bf16 %v861_v3, %v861_v3  ;;  %v9117_v7 = vunpack.c.l.b16 %v516_v52 }
 0x165   : > { %v9119_v28 = vunpack.c.l.b16 %v654_v47 }
 0x166   : > { %13437 = vst [vmem:[#allocation85_spill] sm:$0xff] %v9100_v62  ;;  %7372 = vmatmul.msk.bf16.gmra.mxu2 %vm352_vm0, %v8639_v26  ;;  %v9115_v34 = vunpack.c.l.b16 %v919_v16 }
 0x167   : > { %13440 = vst [vmem:[#allocation88_spill] sm:$0xff] %v9117_v7 }
 0x168   : > { %13439 = vst [vmem:[#allocation87_spill] sm:$0xff] %v9115_v34 }
 0x169   : > { %v751_v1 = vpop.f32.mrf.mxu2  ;;  %v477_v46 = vpop.f32.mrf.mxu0  ;;  %13441 = vst [vmem:[#allocation89_spill] sm:$0xff] %v9119_v28 }
 0x16a   : > { %v615_v58 = vpop.f32.mrf.mxu1  ;;  %v517_v62 = vpack.c.bf16 %v477_v46, %v477_v46  ;;  %v864_v3 = vpop.f32.mrf.mxu3  ;;  %v792_v47 = vpack.c.bf16 %v751_v1, %v751_v1 }
 0x16b   : > { %v655_v30 = vpack.c.bf16 %v615_v58, %v615_v58  ;;  %v920_v53 = vpack.c.bf16 %v864_v3, %v864_v3  ;;  %v7871_v3 = vld [vmem:[%s13071_s3 + $0x20] sm:$0xff] }
 0x16c   : > { %v9125_v35 = vunpack.c.l.b16 %v517_v62  ;;  %v9133_v50 = vunpack.c.l.b16 %v792_v47  ;;  %1786 = vmatpush.bf16.msra.mxu2 %v7871_v3 }
 0x16d   : > { %v9127_v19 = vunpack.c.l.b16 %v655_v30 }
 0x16e   : > { %13442 = vst [vmem:[#allocation90_spill] sm:$0xff] %v9125_v35 }
 0x16f   : > { %13443 = vst [vmem:[#allocation91_spill] sm:$0xff] %v9127_v19  ;;  %7396 = vmatmul.msk.bf16.gmra.mxu3 %vm352_vm0, %v8591_v12 }
 0x170   : > { %13444 = vst [vmem:[#allocation92_spill] sm:$0xff] %v9133_v50 }
 0x171   : > { %v753_v46 = vpop.f32.mrf.mxu2  ;;  %v480_v58 = vpop.f32.mrf.mxu0 }
 0x172   : > { %v793_v16 = vpack.c.bf16 %v753_v46, %v753_v46  ;;  %v618_v39 = vpop.f32.mrf.mxu1  ;;  %v518_v62 = vpack.c.bf16 %v480_v58, %v480_v58  ;;  %v866_v1 = vpop.f32.mrf.mxu3  ;;  %v9148_v46 = vunpack.c.l.b16 %v920_v53 }
 0x173   : > { %v656_v47 = vpack.c.bf16 %v618_v39, %v618_v39 }
 0x174   : > { %v9135_v34 = vunpack.c.l.b16 %v793_v16  ;;  %7317 = vmatmul.msk.bf16.gmra.mxu0 %vm352_vm0, %v8651_v29  ;;  %7345 = vmatmul.msk.bf16.gmra.mxu1 %vm352_vm0, %v8651_v29  ;;  %13446 = vst [vmem:[#allocation94_spill] sm:$0xff] %v9148_v46  ;;  %v921_v16 = vpack.c.bf16 %v866_v1, %v866_v1  ;;  %v9152_v28 = vunpack.c.l.b16 %v518_v62 }
 0x175   : > { %v9154_v50 = vunpack.c.l.b16 %v656_v47 }
 0x176   : > { %13445 = vst [vmem:[#allocation93_spill] sm:$0xff] %v9135_v34  ;;  %7373 = vmatmul.msk.bf16.gmra.mxu2 %vm352_vm0, %v8651_v29  ;;  %v9150_v52 = vunpack.c.l.b16 %v921_v16 }
 0x177   : > { %13448 = vst [vmem:[#allocation96_spill] sm:$0xff] %v9152_v28 }
 0x178   : > { %13447 = vst [vmem:[#allocation95_spill] sm:$0xff] %v9150_v52 }
 0x179   : > { %v756_v43 = vpop.f32.mrf.mxu2  ;;  %v482_v30 = vpop.f32.mrf.mxu0  ;;  %13449 = vst [vmem:[#allocation97_spill] sm:$0xff] %v9154_v50 }
 0x17a   : > { %v620_v58 = vpop.f32.mrf.mxu1  ;;  %v519_v34 = vpack.c.bf16 %v482_v30, %v482_v30  ;;  %v869_v1 = vpop.f32.mrf.mxu3  ;;  %v794_v47 = vpack.c.bf16 %v756_v43, %v756_v43 }
 0x17b   : > { %v657_v19 = vpack.c.bf16 %v620_v58, %v620_v58  ;;  %v922_v7 = vpack.c.bf16 %v869_v1, %v869_v1 }
 0x17c   : > { %v9160_v39 = vunpack.c.l.b16 %v519_v34  ;;  %v9168_v46 = vunpack.c.l.b16 %v794_v47 }
 0x17d   : > { %v9162_v53 = vunpack.c.l.b16 %v657_v19  ;;  %v9180_v1 = vunpack.c.l.b16 %v922_v7 }
 0x17e   : > { %13450 = vst [vmem:[#allocation98_spill] sm:$0xff] %v9160_v39 }
 0x17f   : > { %13451 = vst [vmem:[#allocation99_spill] sm:$0xff] %v9162_v53  ;;  %7397 = vmatmul.msk.bf16.gmra.mxu3 %vm352_vm0, %v8601_v15 }
 0x180   : > { %13452 = vst [vmem:[#allocation100_spill] sm:$0xff] %v9168_v46 }
 0x181   : > { %v758_v30 = vpop.f32.mrf.mxu2  ;;  %v485_v58 = vpop.f32.mrf.mxu0  ;;  %13454 = vst [vmem:[#allocation102_spill] sm:$0xff] %v9180_v1 }
 0x182   : > { %v795_v16 = vpack.c.bf16 %v758_v30, %v758_v30  ;;  %v623_v35 = vpop.f32.mrf.mxu1  ;;  %v520_v19 = vpack.c.bf16 %v485_v58, %v485_v58  ;;  %v871_v43 = vpop.f32.mrf.mxu3 }
 0x183   : > { %v658_v30 = vpack.c.bf16 %v623_v35, %v623_v35  ;;  %v923_v47 = vpack.c.bf16 %v871_v43, %v871_v43 }
 0x184   : > { %v9170_v52 = vunpack.c.l.b16 %v795_v16  ;;  %7318 = vmatmul.msk.bf16.gmra.mxu0 %vm352_vm0, %v8666_v33  ;;  %7346 = vmatmul.msk.bf16.gmra.mxu1 %vm352_vm0, %v8666_v33  ;;  %v9184_v62 = vunpack.c.l.b16 %v520_v19 }
 0x185   : > { %v9182_v3 = vunpack.c.l.b16 %v923_v47  ;;  %v9186_v28 = vunpack.c.l.b16 %v658_v30 }
 0x186   : > { %13453 = vst [vmem:[#allocation101_spill] sm:$0xff] %v9170_v52  ;;  %7374 = vmatmul.msk.bf16.gmra.mxu2 %vm352_vm0, %v8666_v33 }
 0x187   : > { %13455 = vst [vmem:[#allocation103_spill] sm:$0xff] %v9182_v3 }
 0x188   : > { %13456 = vst [vmem:[#allocation104_spill] sm:$0xff] %v9184_v62 }
 0x189   : > { %v761_v16 = vpop.f32.mrf.mxu2  ;;  %v487_v50 = vpop.f32.mrf.mxu0  ;;  %13457 = vst [vmem:[#allocation105_spill] sm:$0xff] %v9186_v28 }
 0x18a   : > { %v625_v53 = vpop.f32.mrf.mxu1  ;;  %v521_v39 = vpack.c.bf16 %v487_v50, %v487_v50  ;;  %v874_v43 = vpop.f32.mrf.mxu3  ;;  %v796_v47 = vpack.c.bf16 %v761_v16, %v761_v16 }
 0x18b   : > { %v659_v34 = vpack.c.bf16 %v625_v53, %v625_v53  ;;  %v924_v52 = vpack.c.bf16 %v874_v43, %v874_v43 }
 0x18c   : > { %v9192_v7 = vunpack.c.l.b16 %v521_v39  ;;  %v9204_v1 = vunpack.c.l.b16 %v796_v47 }
 0x18d   : > { %v9194_v35 = vunpack.c.l.b16 %v659_v34 }
 0x18e   : > { %13458 = vst [vmem:[#allocation106_spill] sm:$0xff] %v9192_v7 }
 0x18f   : > { %13459 = vst [vmem:[#allocation107_spill] sm:$0xff] %v9194_v35  ;;  %7398 = vmatmul.msk.bf16.gmra.mxu3 %vm352_vm0, %v8611_v18 }
 0x190   : > { %13460 = vst [vmem:[#allocation108_spill] sm:$0xff] %v9204_v1 }
 0x191   : > { %v763_v50 = vpop.f32.mrf.mxu2  ;;  %v9200_v46 = vpop.f32.mrf.mxu0 }
 0x192   : > { %v797_v53 = vpack.c.bf16 %v763_v50, %v763_v50  ;;  %v9202_v58 = vpop.f32.mrf.mxu1  ;;  %v876_v16 = vpop.f32.mrf.mxu3  ;;  %v9216_v50 = vunpack.c.l.b16 %v924_v52 }
 0x193   : > { %v925_v43 = vpack.c.bf16 %v876_v16, %v876_v16  ;;  %v1179_v27 = vpack.c.bf16 %v9202_v58, %v9202_v58 }
 0x194   : > { %v9206_v39 = vunpack.c.l.b16 %v797_v53  ;;  %7319 = vmatmul.msk.bf16.gmra.mxu0 %vm352_vm0, %v8678_v36  ;;  %7347 = vmatmul.msk.bf16.gmra.mxu1 %vm352_vm0, %v8678_v36  ;;  %13462 = vst [vmem:[#allocation110_spill] sm:$0xff] %v9216_v50 }
 0x195   : > { %v9218_v30 = vunpack.c.l.b16 %v925_v43 }
 0x196   : > { %13461 = vst [vmem:[#allocation109_spill] sm:$0xff] %v9206_v39  ;;  %7375 = vmatmul.msk.bf16.gmra.mxu2 %vm352_vm0, %v8678_v36 }
 0x197   : > { %13463 = vst [vmem:[#allocation111_spill] sm:$0xff] %v9218_v30 }
 0x199   : > { %v1237_v47 = vpop.f32.mrf.mxu2  ;;  %v9220_v53 = vpop.f32.mrf.mxu0 }
 0x19a   : > { %v9222_v19 = vpop.f32.mrf.mxu1  ;;  %v879_v34 = vpop.f32.mrf.mxu3  ;;  %v1317_v1 = vpack.c.bf16 %v1237_v47, %v1237_v47 }
 0x19b   : > { %v926_v43 = vpack.c.bf16 %v879_v34, %v879_v34  ;;  %v1180_v31 = vpack.c.bf16 %v9222_v19, %v9222_v19 }
 0x19c   : > { %v9232_v3 = vunpack.c.l.b16 %v1317_v1 }
 0x19d   : > { %v9244_v28 = vunpack.c.l.b16 %v926_v43  ;;  %v9300_v19 = vunpack.c.l.b16 %v1180_v31 }
 0x19f   : > { %13464 = vst [vmem:[#allocation112_spill] sm:$0xff] %v9244_v28  ;;  %7399 = vmatmul.msk.bf16.gmra.mxu3 %vm352_vm0, %v8621_v21 }
 0x1a1   : > { %v1239_v39 = vpop.f32.mrf.mxu2  ;;  %v9228_v52 = vpop.f32.mrf.mxu0 }
 0x1a2   : > { %v1318_v35 = vpack.c.bf16 %v1239_v39, %v1239_v39  ;;  %v9230_v16 = vpop.f32.mrf.mxu1  ;;  %v881_v47 = vpop.f32.mrf.mxu3 }
 0x1a3   : > { %v927_v34 = vpack.c.bf16 %v881_v47, %v881_v47 }
 0x1a4   : > { %v9234_v62 = vunpack.c.l.b16 %v1318_v35  ;;  %7320 = vmatmul.msk.bf16.gmra.mxu0 %vm352_vm0, %v8702_v56  ;;  %7348 = vmatmul.msk.bf16.gmra.mxu1 %vm352_vm0, %v8702_v56 }
 0x1a5   : > { %v9246_v50 = vunpack.c.l.b16 %v927_v34 }
 0x1a6   : > { %7376 = vmatmul.msk.bf16.gmra.mxu2 %vm352_vm0, %v8702_v56 }
 0x1a7   : > { %13465 = vst [vmem:[#allocation113_spill] sm:$0xff] %v9246_v50 }
 0x1a9   : > { %v1242_v1 = vpop.f32.mrf.mxu2  ;;  %v9248_v35 = vpop.f32.mrf.mxu0 }
 0x1aa   : > { %v9250_v30 = vpop.f32.mrf.mxu1  ;;  %v884_v22 = vpop.f32.mrf.mxu3  ;;  %v1319_v51 = vpack.c.bf16 %v1242_v1, %v1242_v1 }
 0x1ab   : > { %v928_v32 = vpack.c.bf16 %v884_v22, %v884_v22 }
 0x1ac   : > { %v9258_v34 = vunpack.c.l.b16 %v1319_v51 }
 0x1ad   : > { %v9270_v7 = vunpack.c.l.b16 %v928_v32 }
 0x1af   : > { %13466 = vst [vmem:[#allocation114_spill] sm:$0xff] %v9270_v7  ;;  %7400 = vmatmul.msk.bf16.gmra.mxu3 %vm352_vm0, %v8639_v26  ;;  %v9298_v7 = vunpack.c.l.b16 %v1179_v27 }
 0x1b1   : > { %v1244_v6 = vpop.f32.mrf.mxu2  ;;  %v9256_v43 = vpop.f32.mrf.mxu0 }
 0x1b2   : > { %v1320_v39 = vpack.c.bf16 %v1244_v6, %v1244_v6  ;;  %v1109_v47 = vpop.f32.mrf.mxu1  ;;  %v886_v1 = vpop.f32.mrf.mxu3 }
 0x1b3   : > { %v929_v22 = vpack.c.bf16 %v886_v1, %v886_v1 }
 0x1b4   : > { %v9260_v11 = vunpack.c.l.b16 %v1320_v39  ;;  %7321 = vmatmul.msk.bf16.gmra.mxu0 %vm352_vm0, %v8732_v20  ;;  %7349 = vmatmul.msk.bf16.gmra.mxu1 %vm352_vm0, %v8732_v20 }
 0x1b5   : > { %v9272_v28 = vunpack.c.l.b16 %v929_v22 }
 0x1b6   : > { %7377 = vmatmul.msk.bf16.gmra.mxu2 %vm352_vm0, %v8732_v20 }
 0x1b7   : > { %13467 = vst [vmem:[#allocation115_spill] sm:$0xff] %v9272_v28 }
 0x1b9   : > { %v1247_v51 = vpop.f32.mrf.mxu2  ;;  %v9274_v39 = vpop.f32.mrf.mxu0 }
 0x1ba   : > { %v1111_v50 = vpop.f32.mrf.mxu1  ;;  %v889_v54 = vpop.f32.mrf.mxu3  ;;  %v1321_v57 = vpack.c.bf16 %v1247_v51, %v1247_v51 }
 0x1bb   : > { %v930_v25 = vpack.c.bf16 %v889_v54, %v889_v54  ;;  %v1184_v61 = vpack.c.bf16 %v1111_v50, %v1111_v50 }
 0x1bc   : > { %v9280_v1 = vunpack.c.l.b16 %v1321_v57 }
 0x1bd   : > { %v9296_v51 = vunpack.c.l.b16 %v930_v25 }
 0x1bf   : > { %13468 = vst [vmem:[#allocation116_spill] sm:$0xff] %v9296_v51  ;;  %7401 = vmatmul.msk.bf16.gmra.mxu3 %vm352_vm0, %v8651_v29 }
 0x1c1   : > { %v1249_v63 = vpop.f32.mrf.mxu2  ;;  %v976_v6 = vpop.f32.mrf.mxu0 }
 0x1c2   : > { %v1322_v0 = vpack.c.bf16 %v1249_v63, %v1249_v63  ;;  %v1114_v32 = vpop.f32.mrf.mxu1  ;;  %v1047_v63 = vpack.c.bf16 %v976_v6, %v976_v6  ;;  %v891_v54 = vpop.f32.mrf.mxu3  ;;  %v1183_v6 = vpack.c.bf16 %v1109_v47, %v1109_v47  ;;  %v2400_v47 = vpack.c.b16 %v9300_v19, %v9298_v7 }
 0x1c3   : > { %v1185_v57 = vpack.c.bf16 %v1114_v32, %v1114_v32  ;;  %v931_v58 = vpack.c.bf16 %v891_v54, %v891_v54  ;;  %v2397_v54 = vunpack.c.l.b16 %v1184_v61  ;;  %v1182_v61 = vpack.c.bf16 %v9250_v30, %v9250_v30 }
 0x1c4   : > { %v9282_v22 = vunpack.c.l.b16 %v1322_v0  ;;  %7322 = vmatmul.msk.bf16.gmra.mxu0 %vm352_vm0, %v8762_v55  ;;  %7350 = vmatmul.msk.bf16.gmra.mxu1 %vm352_vm0, %v8762_v55  ;;  %v9306_v17 = vunpack.c.l.b16 %v1047_v63  ;;  %v2396_v63 = vunpack.c.l.b16 %v1183_v6 }
 0x1c5   : > { %v9304_v60 = vunpack.c.l.b16 %v931_v58  ;;  %v2398_v23 = vunpack.c.l.b16 %v1185_v57  ;;  %v2395_v6 = vunpack.c.l.b16 %v1182_v61 }
 0x1c6   : > { %7378 = vmatmul.msk.bf16.gmra.mxu2 %vm352_vm0, %v8762_v55  ;;  %v2402_v7 = vpack.c.b16 %v2397_v54, %v2396_v63 }
 0x1c7   : > { %13469 = vst [vmem:[#allocation117_spill] sm:$0xff] %v9304_v60 }
 0x1c9   : > { %v9302_v28 = vpop.f32.mrf.mxu2  ;;  %v978_v24 = vpop.f32.mrf.mxu0 }
 0x1ca   : > { %v1116_v13 = vpop.f32.mrf.mxu1  ;;  %v1048_v0 = vpack.c.bf16 %v978_v24, %v978_v24  ;;  %v894_v50 = vpop.f32.mrf.mxu3 }
 0x1cb   : > { %v1186_v32 = vpack.c.bf16 %v1116_v13, %v1116_v13  ;;  %v932_v19 = vpack.c.bf16 %v894_v50, %v894_v50 }
 0x1cc   : > { %v9312_v27 = vunpack.c.l.b16 %v1048_v0  ;;  %v1181_v0 = vpack.c.bf16 %v9230_v16, %v9230_v16 }
 0x1cd   : > { %v2399_v31 = vunpack.c.l.b16 %v1186_v32 }
 0x1cf   : > { %v2403_v24 = vpack.c.b16 %v2399_v31, %v2398_v23  ;;  %v2394_v23 = vunpack.c.l.b16 %v1181_v0  ;;  %v2423_v31 = vsel %vm2146_vm1, %v2402_v7, 0  ;;  %7402 = vmatmul.msk.bf16.gmra.mxu3 %vm352_vm0, %v8666_v33 }
 0x1d1   : > { %v9318_v13 = vpop.f32.mrf.mxu2  ;;  %v2426_v58 = vsel %vm2146_vm1, %v2403_v24, 0  ;;  %v9323_v25 = vpop.f32.mrf.mxu0  ;;  %v9336_v24 = vunpack.c.l.b16 %v932_v19  ;;  %v2401_v57 = vpack.c.b16 %v2395_v6, %v2394_v23  ;;  %v7869_v6 = vld [vmem:[%s13071_s3 + $0x10] sm:$0xff] }
 0x1d2   : > { %v9325_v32 = vpop.f32.mrf.mxu1  ;;  %2432 = vmatpush.bf16.xpose.msrb.mxu2 %v2426_v58  ;;  %v896_v16 = vpop.f32.mrf.mxu3 }
 0x1d3   : > { %13470 = vst [vmem:[#allocation118_spill] sm:$0xff] %v9325_v32  ;;  %v933_v58 = vpack.c.bf16 %v896_v16, %v896_v16  ;;  %v2420_v7 = vsel %vm2146_vm1, %v2401_v57, 0 }
 0x1d4   : > { %7323 = vmatmul.msk.bf16.gmra.mxu0 %vm352_vm0, %v8792_v40  ;;  %7351 = vmatmul.msk.bf16.gmra.mxu1 %vm352_vm0, %v8792_v40  ;;  %13471 = vst [vmem:[#allocation119_spill] sm:$0xff] %v9336_v24  ;;  %v7867_v24 = vld [vmem:[%s13071_s3] sm:$0xff] }
 0x1d5   : > { %v9338_v63 = vunpack.c.l.b16 %v933_v58 }
 0x1d6   : > { %7379 = vmatmul.msk.bf16.gmra.mxu2 %vm352_vm0, %v8792_v40 }
 0x1d7   : > { %13472 = vst [vmem:[#allocation120_spill] sm:$0xff] %v9338_v63 }
 0x1d9   : > { %v1257_v30 = vpop.f32.mrf.mxu2  ;;  %v9340_v50 = vpop.f32.mrf.mxu0 }
 0x1da   : > { %v9342_v54 = vpop.f32.mrf.mxu1  ;;  %2433 = vmatpush.bf16.xpose.msrb.mxu2 %v2423_v31  ;;  %v899_v61 = vpop.f32.mrf.mxu3  ;;  %v1325_v19 = vpack.c.bf16 %v1257_v30, %v1257_v30  ;;  %v2417_v30 = vsel %vm2146_vm1, %v2400_v47, 0  ;;  %v7868_v47 = vld [vmem:[%s13071_s3 + $0x8] sm:$0xff] }
 0x1db   : > { %13473 = vst [vmem:[#allocation121_spill] sm:$0xff] %v9342_v54  ;;  %v934_v54 = vpack.c.bf16 %v899_v61, %v899_v61  ;;  %1509 = vmatpush.bf16.msra.mxu0 %v7868_v47 }
 0x1dc   : > { %v9353_v31 = vunpack.c.l.b16 %v1325_v19 }
 0x1dd   : > { %v9366_v61 = vunpack.c.l.b16 %v934_v54  ;;  %v7870_v54 = vld [vmem:[%s13071_s3 + $0x18] sm:$0xff] }
 0x1de   : > { %13475 = vst [vmem:[#allocation123_spill] sm:$0xff] %v9353_v31  ;;  %1647 = vmatpush.bf16.msra.mxu1 %v7870_v54 }
 0x1df   : > { %13477 = vst [vmem:[#allocation125_spill] sm:$0xff] %v9366_v61  ;;  %7403 = vmatmul.msk.bf16.gmra.mxu3 %vm352_vm0, %v8678_v36  ;;  %1510 = vmatpush.bf16.msra.mxu0 %v7867_v24 }
 0x1e1   : > { %v1259_v16 = vpop.f32.mrf.mxu2  ;;  %v9349_v58 = vpop.f32.mrf.mxu0 }
 0x1e2   : > { %v1326_v51 = vpack.c.bf16 %v1259_v16, %v1259_v16  ;;  %v9351_v60 = vpop.f32.mrf.mxu1  ;;  %2434 = vmatpush.bf16.xpose.msrb.mxu2 %v2420_v7  ;;  %v901_v57 = vpop.f32.mrf.mxu3  ;;  %1648 = vmatpush.bf16.msra.mxu1 %v7869_v6 }
 0x1e3   : > { %13474 = vst [vmem:[#allocation122_spill] sm:$0xff] %v9351_v60  ;;  %v935_v7 = vpack.c.bf16 %v901_v57, %v901_v57 }
 0x1e4   : > { %v9355_v23 = vunpack.c.l.b16 %v1326_v51  ;;  %7324 = vmatmul.msk.bf16.gmra.mxu0 %vm352_vm0, %v8822_v2  ;;  %7352 = vmatmul.msk.bf16.gmra.mxu1 %vm352_vm0, %v8822_v2 }
 0x1e5   : > { %v9368_v19 = vunpack.c.l.b16 %v935_v7 }
 0x1e6   : > { %13476 = vst [vmem:[#allocation124_spill] sm:$0xff] %v9355_v23  ;;  %7380 = vmatmul.msk.bf16.gmra.mxu2 %vm352_vm0, %v8822_v2 }
 0x1e7   : > { %13478 = vst [vmem:[#allocation126_spill] sm:$0xff] %v9368_v19 }
 0x1e9   : > { %v1262_v51 = vpop.f32.mrf.mxu2  ;;  %v9370_v16 = vpop.f32.mrf.mxu0 }
 0x1ea   : > { %v9372_v0 = vpop.f32.mrf.mxu1  ;;  %2435 = vmatpush.bf16.xpose.msrb.mxu2 %v2417_v30  ;;  %v9384_v57 = vpop.f32.mrf.mxu3  ;;  %v1327_v7 = vpack.c.bf16 %v1262_v51, %v1262_v51 }
 0x1eb   : > { %13479 = vst [vmem:[#allocation127_spill] sm:$0xff] %v9372_v0 }
 0x1ec   : > { %13480 = vst [vmem:[#allocation128_spill] sm:$0xff] %v9384_v57  ;;  %v9396_v31 = vunpack.c.l.b16 %v1327_v7 }
 0x1ee   : > { %13482 = vst [vmem:[#allocation130_spill] sm:$0xff] %v9396_v31 }
 0x1ef   : > { %7404 = vmatmul.msk.bf16.gmra.mxu3 %vm352_vm0, %v8702_v56 }
 0x1f1   : > { %v1264_v30 = vpop.f32.mrf.mxu2  ;;  %v9392_v19 = vpop.f32.mrf.mxu0 }
 0x1f2   : > { %v1328_v61 = vpack.c.bf16 %v1264_v30, %v1264_v30  ;;  %v9394_v63 = vpop.f32.mrf.mxu1  ;;  %v9406_v51 = vpop.f32.mrf.mxu3 }
 0x1f3   : > { %13481 = vst [vmem:[#allocation129_spill] sm:$0xff] %v9394_v63 }
 0x1f4   : > { %v9398_v47 = vunpack.c.l.b16 %v1328_v61  ;;  %7325 = vmatmul.msk.bf16.gmra.mxu0 %vm352_vm0, %v8858_v59  ;;  %7353 = vmatmul.msk.bf16.gmra.mxu1 %vm352_vm0, %v8858_v59  ;;  %13484 = vst [vmem:[#allocation132_spill] sm:$0xff] %v9406_v51 }
 0x1f6   : > { %13483 = vst [vmem:[#allocation131_spill] sm:$0xff] %v9398_v47  ;;  %7381 = vmatmul.msk.bf16.gmra.mxu2 %vm352_vm0, %v8858_v59 }
 0x1f9   : > { %v1267_v24 = vpop.f32.mrf.mxu2  ;;  %v9410_v6 = vpop.f32.mrf.mxu0 }
 0x1fa   : > { %v9412_v7 = vpop.f32.mrf.mxu1  ;;  %v9416_v61 = vpop.f32.mrf.mxu3  ;;  %v1329_v30 = vpack.c.bf16 %v1267_v24, %v1267_v24 }
 0x1fb   : > { %13485 = vst [vmem:[#allocation133_spill] sm:$0xff] %v9412_v7 }
 0x1fc   : > { %13486 = vst [vmem:[#allocation134_spill] sm:$0xff] %v9416_v61  ;;  %v9418_v60 = vunpack.c.l.b16 %v1329_v30 }
 0x1fe   : > { %13487 = vst [vmem:[#allocation135_spill] sm:$0xff] %v9418_v60 }
 0x1ff   : > { %7405 = vmatmul.msk.bf16.gmra.mxu3 %vm352_vm0, %v8732_v20 }
 0x201   : > { %v1269_v23 = vpop.f32.mrf.mxu2  ;;  %v996_v32 = vpop.f32.mrf.mxu0 }
 0x202   : > { %v1330_v57 = vpack.c.bf16 %v1269_v23, %v1269_v23  ;;  %v1134_v0 = vpop.f32.mrf.mxu1  ;;  %v9428_v54 = vpop.f32.mrf.mxu3  ;;  %v1055_v24 = vpack.c.bf16 %v996_v32, %v996_v32  ;;  %v1323_v23 = vpack.c.bf16 %v9302_v28, %v9302_v28 }
 0x203   : > { %13489 = vst [vmem:[#allocation137_spill] sm:$0xff] %v9428_v54  ;;  %v1193_v31 = vpack.c.bf16 %v1134_v0, %v1134_v0 }
 0x204   : > { %v9420_v51 = vunpack.c.l.b16 %v1330_v57  ;;  %7326 = vmatmul.msk.bf16.gmra.mxu0 %vm352_vm0, %v8903_v14  ;;  %7354 = vmatmul.msk.bf16.gmra.mxu1 %vm352_vm0, %v8903_v14  ;;  %v1324_v57 = vpack.c.bf16 %v9318_v13, %v9318_v13  ;;  %v9434_v38 = vunpack.c.l.b16 %v1055_v24 }
 0x205   : > { %v9436_v42 = vunpack.c.l.b16 %v1193_v31 }
 0x206   : > { %13488 = vst [vmem:[#allocation136_spill] sm:$0xff] %v9420_v51  ;;  %7382 = vmatmul.msk.bf16.gmra.mxu2 %vm352_vm0, %v8903_v14  ;;  %v2750_v60 = vunpack.c.l.b16 %v1324_v57 }
 0x207   : > { %13490 = vst [vmem:[#allocation138_spill] sm:$0xff] %v9434_v38 }
 0x209   : > { %v1272_v30 = vpop.f32.mrf.mxu2  ;;  %v998_v47 = vpop.f32.mrf.mxu0 }
 0x20a   : > { %v1136_v61 = vpop.f32.mrf.mxu1  ;;  %v1056_v37 = vpack.c.bf16 %v998_v47, %v998_v47  ;;  %v9446_v13 = vpop.f32.mrf.mxu3  ;;  %v2749_v47 = vunpack.c.l.b16 %v1323_v23 }
 0x20b   : > { %v1194_v41 = vpack.c.bf16 %v1136_v61, %v1136_v61  ;;  %13492 = vst [vmem:[#allocation140_spill] sm:$0xff] %v9446_v13  ;;  %v1331_v61 = vpack.c.bf16 %v1272_v30, %v1272_v30 }
 0x20c   : > { %v9442_v32 = vunpack.c.l.b16 %v1056_v37  ;;  %v2754_v54 = vpack.c.b16 %v2750_v60, %v2749_v47  ;;  %v13498_v47 = vpack.c.b16 %v9282_v22, %v9280_v1  ;;  %v13502_v1 = vpack.c.b16 %v9260_v11, %v9258_v34 }
 0x20d   : > { %v9444_v0 = vunpack.c.l.b16 %v1194_v41  ;;  %v9456_v41 = vunpack.c.l.b16 %v1331_v61  ;;  %v13506_v34 = vpack.c.b16 %v9234_v62, %v9232_v3 }
 0x20e   : > { %13491 = vst [vmem:[#allocation139_spill] sm:$0xff] %v9442_v32  ;;  %v2777_v60 = vsel %vm2146_vm1, %v2754_v54, 0  ;;  %v2774_v61 = vsel %vm2146_vm1, %v13498_v47, 0  ;;  %v2771_v22 = vsel %vm2146_vm1, %v13502_v1, 0 }
 0x20f   : > { %13494 = vst [vmem:[#allocation142_spill] sm:$0xff] %v9456_v41  ;;  %7406 = vmatmul.msk.bf16.gmra.mxu3 %vm352_vm0, %v8762_v55 }
 0x211   : > { %v1274_v51 = vpop.f32.mrf.mxu2  ;;  %v9452_v63 = vpop.f32.mrf.mxu0 }
 0x212   : > { %v1332_v7 = vpack.c.bf16 %v1274_v51, %v1274_v51  ;;  %v9454_v37 = vpop.f32.mrf.mxu1  ;;  %v9469_v51 = vpop.f32.mrf.mxu3 }
 0x213   : > { %13493 = vst [vmem:[#allocation141_spill] sm:$0xff] %v9454_v37 }
 0x214   : > { %v9458_v28 = vunpack.c.l.b16 %v1332_v7  ;;  %7419 = vmatmul.msk.bf16.vlgmr.msra.gmra.mxu0 %vm352_vm0, %v8581_v9  ;;  %7447 = vmatmul.msk.bf16.vlgmr.msra.gmra.mxu1 %vm352_vm0, %v8581_v9  ;;  %13496 = vst [vmem:[#allocation144_spill] sm:$0xff] %v9469_v51 }
 0x216   : > { %13495 = vst [vmem:[#allocation143_spill] sm:$0xff] %v9458_v28  ;;  %7475 = vmatmul.msk.bf16.vlgmr.msra.gmra.mxu2 %vm352_vm0, %v8581_v9 }
 0x217   : > { %2783 = vmatpush.bf16.xpose.msra.mxu2 %v2777_v60 }
 0x219   : > { %v1277_v30 = vpop.f32.mrf.mxu2  ;;  %v9471_v7 = vpop.f32.mrf.mxu0 }
 0x21a   : > { %v9473_v57 = vpop.f32.mrf.mxu1  ;;  %v1390_v23 = vpop.f32.mrf.mxu3  ;;  %v1333_v24 = vpack.c.bf16 %v1277_v30, %v1277_v30 }
 0x21b   : > { %13497 = vst [vmem:[#allocation145_spill] sm:$0xff] %v9473_v57  ;;  %v1461_v28 = vpack.c.bf16 %v1390_v23, %v1390_v23 }
 0x21c   : > { %v9485_v38 = vunpack.c.l.b16 %v1333_v24 }
 0x21e   : > { %13500 = vst [vmem:[#allocation147_spill] sm:$0xff] %v9485_v38 }
 0x21f   : > { %2784 = vmatpush.bf16.xpose.msra.mxu2 %v2774_v61  ;;  %7407 = vmatmul.msk.bf16.gmra.mxu3 %vm352_vm0, %v8792_v40 }
 0x221   : > { %v1279_v54 = vpop.f32.mrf.mxu2  ;;  %v9481_v41 = vpop.f32.mrf.mxu0 }
 0x222   : > { %v1334_v31 = vpack.c.bf16 %v1279_v54, %v1279_v54  ;;  %v9483_v60 = vpop.f32.mrf.mxu1  ;;  %v1392_v30 = vpop.f32.mrf.mxu3 }
 0x223   : > { %13499 = vst [vmem:[#allocation146_spill] sm:$0xff] %v9483_v60  ;;  %v1462_v23 = vpack.c.bf16 %v1392_v30, %v1392_v30 }
 0x224   : > { %v9487_v32 = vunpack.c.l.b16 %v1334_v31  ;;  %7420 = vmatmul.msk.bf16.gmra.mxu0 %vm352_vm0, %v8591_v12  ;;  %7448 = vmatmul.msk.bf16.gmra.mxu1 %vm352_vm0, %v8591_v12  ;;  %v9501_v31 = vunpack.c.l.b16 %v1461_v28  ;;  %v2768_v28 = vsel %vm2146_vm1, %v13506_v34, 0 }
 0x225   : > { %v9503_v61 = vunpack.c.l.b16 %v1462_v23 }
 0x226   : > { %13501 = vst [vmem:[#allocation148_spill] sm:$0xff] %v9487_v32  ;;  %7476 = vmatmul.msk.bf16.gmra.mxu2 %vm352_vm0, %v8591_v12 }
 0x227   : > { %2785 = vmatpush.bf16.xpose.msra.mxu2 %v2771_v22  ;;  %13503 = vst [vmem:[#allocation149_spill] sm:$0xff] %v9501_v31 }
 0x228   : > { %13504 = vst [vmem:[#allocation150_spill] sm:$0xff] %v9503_v61 }
 0x229   : > { %v1282_v47 = vpop.f32.mrf.mxu2  ;;  %v9505_v54 = vpop.f32.mrf.mxu0 }
 0x22a   : > { %v9507_v60 = vpop.f32.mrf.mxu1  ;;  %v9517_v1 = vpop.f32.mrf.mxu3  ;;  %v1335_v22 = vpack.c.bf16 %v1282_v47, %v1282_v47 }
 0x22b   : > { %13505 = vst [vmem:[#allocation151_spill] sm:$0xff] %v9507_v60 }
 0x22c   : > { %13507 = vst [vmem:[#allocation152_spill] sm:$0xff] %v9517_v1  ;;  %v9523_v32 = vunpack.c.l.b16 %v1335_v22 }
 0x22e   : > { %13509 = vst [vmem:[#allocation154_spill] sm:$0xff] %v9523_v32 }
 0x22f   : > { %2786 = vmatpush.bf16.xpose.msra.mxu2 %v2768_v28  ;;  %7408 = vmatmul.msk.bf16.gmra.mxu3 %vm352_vm0, %v8822_v2 }
 0x231   : > { %v1284_v30 = vpop.f32.mrf.mxu2  ;;  %v9519_v24 = vpop.f32.mrf.mxu0 }
 0x232   : > { %v1336_v23 = vpack.c.bf16 %v1284_v30, %v1284_v30  ;;  %v9521_v38 = vpop.f32.mrf.mxu1  ;;  %v9533_v62 = vpop.f32.mrf.mxu3 }
 0x233   : > { %13508 = vst [vmem:[#allocation153_spill] sm:$0xff] %v9521_v38 }
 0x234   : > { %v9525_v11 = vunpack.c.l.b16 %v1336_v23  ;;  %7421 = vmatmul.msk.bf16.gmra.mxu0 %vm352_vm0, %v8601_v15  ;;  %7449 = vmatmul.msk.bf16.gmra.mxu1 %vm352_vm0, %v8601_v15  ;;  %13511 = vst [vmem:[#allocation156_spill] sm:$0xff] %v9533_v62 }
 0x236   : > { %13510 = vst [vmem:[#allocation155_spill] sm:$0xff] %v9525_v11  ;;  %7477 = vmatmul.msk.bf16.gmra.mxu2 %vm352_vm0, %v8601_v15 }
 0x239   : > { %v1287_v47 = vpop.f32.mrf.mxu2  ;;  %v9537_v34 = vpop.f32.mrf.mxu0 }
 0x23a   : > { %v9539_v28 = vpop.f32.mrf.mxu1  ;;  %v9543_v22 = vpop.f32.mrf.mxu3  ;;  %v1337_v30 = vpack.c.bf16 %v1287_v47, %v1287_v47 }
 0x23b   : > { %13512 = vst [vmem:[#allocation157_spill] sm:$0xff] %v9539_v28 }
 0x23c   : > { %13513 = vst [vmem:[#allocation158_spill] sm:$0xff] %v9543_v22  ;;  %v9545_v60 = vunpack.c.l.b16 %v1337_v30 }
 0x23e   : > { %13514 = vst [vmem:[#allocation159_spill] sm:$0xff] %v9545_v60 }
 0x23f   : > { %7409 = vmatmul.msk.bf16.gmra.mxu3 %vm352_vm0, %v8858_v59 }
 0x241   : > { %v1289_v23 = vpop.f32.mrf.mxu2  ;;  %v1016_v61 = vpop.f32.mrf.mxu0 }
 0x242   : > { %v1338_v31 = vpack.c.bf16 %v1289_v23, %v1289_v23  ;;  %v1154_v38 = vpop.f32.mrf.mxu1  ;;  %v9555_v3 = vpop.f32.mrf.mxu3  ;;  %v1063_v23 = vpack.c.bf16 %v1016_v61, %v1016_v61 }
 0x243   : > { %13516 = vst [vmem:[#allocation161_spill] sm:$0xff] %v9555_v3  ;;  %v1201_v32 = vpack.c.bf16 %v1154_v38, %v1154_v38 }
 0x244   : > { %v9547_v57 = vunpack.c.l.b16 %v1338_v31  ;;  %7422 = vmatmul.msk.bf16.gmra.mxu0 %vm352_vm0, %v8611_v18  ;;  %7450 = vmatmul.msk.bf16.gmra.mxu1 %vm352_vm0, %v8611_v18  ;;  %v9559_v28 = vunpack.c.l.b16 %v1063_v23 }
 0x245   : > { %v9561_v37 = vunpack.c.l.b16 %v1201_v32 }
 0x246   : > { %13515 = vst [vmem:[#allocation160_spill] sm:$0xff] %v9547_v57  ;;  %7478 = vmatmul.msk.bf16.gmra.mxu2 %vm352_vm0, %v8611_v18 }
 0x247   : > { %13517 = vst [vmem:[#allocation162_spill] sm:$0xff] %v9559_v28 }
 0x248   : > { %13518 = vst [vmem:[#allocation163_spill] sm:$0xff] %v9561_v37 }
 0x249   : > { %v1292_v30 = vpop.f32.mrf.mxu2  ;;  %v1018_v11 = vpop.f32.mrf.mxu0 }
 0x24a   : > { %v1156_v31 = vpop.f32.mrf.mxu1  ;;  %v1064_v22 = vpack.c.bf16 %v1018_v11, %v1018_v11  ;;  %v9569_v51 = vpop.f32.mrf.mxu3  ;;  %v1339_v23 = vpack.c.bf16 %v1292_v30, %v1292_v30 }
 0x24b   : > { %v1202_v62 = vpack.c.bf16 %v1156_v31, %v1156_v31  ;;  %13521 = vst [vmem:[#allocation166_spill] sm:$0xff] %v9569_v51 }
 0x24c   : > { %v9565_v1 = vunpack.c.l.b16 %v1064_v22  ;;  %v9579_v60 = vunpack.c.l.b16 %v1339_v23 }
 0x24d   : > { %v9567_v3 = vunpack.c.l.b16 %v1202_v62 }
 0x24e   : > { %13519 = vst [vmem:[#allocation164_spill] sm:$0xff] %v9565_v1 }
 0x24f   : > { %13520 = vst [vmem:[#allocation165_spill] sm:$0xff] %v9567_v3  ;;  %7410 = vmatmul.msk.bf16.gmra.mxu3 %vm352_vm0, %v8903_v14 }
 0x250   : > { %13523 = vst [vmem:[#allocation168_spill] sm:$0xff] %v9579_v60 }
 0x251   : > { %v1294_v32 = vpop.f32.mrf.mxu2  ;;  %v9575_v11 = vpop.f32.mrf.mxu0 }
 0x252   : > { %v1340_v47 = vpack.c.bf16 %v1294_v32, %v1294_v32  ;;  %v9577_v31 = vpop.f32.mrf.mxu1  ;;  %v9591_v30 = vpop.f32.mrf.mxu3 }
 0x253   : > { %13522 = vst [vmem:[#allocation167_spill] sm:$0xff] %v9577_v31 }
 0x254   : > { %v9581_v22 = vunpack.c.l.b16 %v1340_v47  ;;  %7423 = vmatmul.msk.bf16.gmra.mxu0 %vm352_vm0, %v8621_v21  ;;  %7451 = vmatmul.msk.bf16.gmra.mxu1 %vm352_vm0, %v8621_v21  ;;  %13525 = vst [vmem:[#allocation170_spill] sm:$0xff] %v9591_v30  ;;  %v7874_v47 = vld [vmem:[%s13071_s3 + $0x38] sm:$0xff] }
 0x255   : > { %1923 = vmatpush.bf16.msra.mxu3 %v7874_v47 }
 0x256   : > { %13524 = vst [vmem:[#allocation169_spill] sm:$0xff] %v9581_v22  ;;  %7479 = vmatmul.msk.bf16.gmra.mxu2 %vm352_vm0, %v8621_v21 }
 0x259   : > { %v1297_v32 = vpop.f32.mrf.mxu2  ;;  %v9593_v38 = vpop.f32.mrf.mxu0 }
 0x25a   : > { %v9595_v23 = vpop.f32.mrf.mxu1  ;;  %v1410_v61 = vpop.f32.mrf.mxu3  ;;  %v1341_v62 = vpack.c.bf16 %v1297_v32, %v1297_v32 }
 0x25b   : > { %13526 = vst [vmem:[#allocation171_spill] sm:$0xff] %v9595_v23  ;;  %v1469_v1 = vpack.c.bf16 %v1410_v61, %v1410_v61  ;;  %v7873_v23 = vld [vmem:[%s13071_s3 + $0x30] sm:$0xff] }
 0x25c   : > { %v9606_v37 = vunpack.c.l.b16 %v1341_v62  ;;  %1924 = vmatpush.bf16.msra.mxu3 %v7873_v23 }
 0x25d   : > { %v9621_v62 = vunpack.c.l.b16 %v1469_v1 }
 0x25e   : > { %13528 = vst [vmem:[#allocation173_spill] sm:$0xff] %v9606_v37 }
 0x25f   : > { %13530 = vst [vmem:[#allocation175_spill] sm:$0xff] %v9621_v62  ;;  %7503 = vmatmul.msk.bf16.vlgmr.msra.gmra.mxu3 %vm352_vm0, %v8581_v9  ;;  %v1046_v62 = vpack.c.bf16 %v9274_v39, %v9274_v39  ;;  %v1043_v39 = vpack.c.bf16 %v9228_v52, %v9228_v52 }
 0x261   : > { %v1299_v57 = vpop.f32.mrf.mxu2  ;;  %v9602_v22 = vpop.f32.mrf.mxu0 }
 0x262   : > { %v1342_v60 = vpack.c.bf16 %v1299_v57, %v1299_v57  ;;  %v9604_v28 = vpop.f32.mrf.mxu1  ;;  %v1412_v57 = vpop.f32.mrf.mxu3 }
 0x263   : > { %13527 = vst [vmem:[#allocation172_spill] sm:$0xff] %v9604_v28 }
 0x264   : > { %v9608_v3 = vunpack.c.l.b16 %v1342_v60  ;;  %7424 = vmatmul.msk.bf16.gmra.mxu0 %vm352_vm0, %v8639_v26  ;;  %7452 = vmatmul.msk.bf16.gmra.mxu1 %vm352_vm0, %v8639_v26  ;;  %v1470_v60 = vpack.c.bf16 %v1412_v57, %v1412_v57 }
 0x266   : > { %13529 = vst [vmem:[#allocation174_spill] sm:$0xff] %v9608_v3  ;;  %7480 = vmatmul.msk.bf16.gmra.mxu2 %vm352_vm0, %v8639_v26  ;;  %v9623_v47 = vunpack.c.l.b16 %v1470_v60 }
 0x268   : > { %13531 = vst [vmem:[#allocation176_spill] sm:$0xff] %v9623_v47  ;;  %v13542_v47 = vpack.c.b16 %v9312_v27, %v9306_v17  ;;  %v1044_v17 = vpack.c.bf16 %v9248_v35, %v9248_v35  ;;  %v2136_v35 = vunpack.c.l.b16 %v1043_v39 }
 0x269   : > { %v1302_v32 = vpop.f32.mrf.mxu2  ;;  %v9625_v28 = vpop.f32.mrf.mxu0 }
 0x26a   : > { %13532 = vst [vmem:[#allocation177_spill] sm:$0xff] %v9625_v28  ;;  %v9627_v31 = vpop.f32.mrf.mxu1  ;;  %v9633_v51 = vpop.f32.mrf.mxu3  ;;  %v1343_v61 = vpack.c.bf16 %v1302_v32, %v1302_v32 }
 0x26b   : > { %13533 = vst [vmem:[#allocation178_spill] sm:$0xff] %v9627_v31 }
 0x26c   : > { %13534 = vst [vmem:[#allocation179_spill] sm:$0xff] %v9633_v51  ;;  %v9639_v60 = vunpack.c.l.b16 %v1343_v61 }
 0x26e   : > { %13537 = vst [vmem:[#allocation182_spill] sm:$0xff] %v9639_v60 }
 0x26f   : > { %7504 = vmatmul.msk.bf16.gmra.mxu3 %vm352_vm0, %v8591_v12 }
 0x271   : > { %v1304_v1 = vpop.f32.mrf.mxu2  ;;  %v9635_v57 = vpop.f32.mrf.mxu0 }
 0x272   : > { %v1344_v37 = vpack.c.bf16 %v1304_v1, %v1304_v1  ;;  %13535 = vst [vmem:[#allocation180_spill] sm:$0xff] %v9635_v57  ;;  %v9637_v23 = vpop.f32.mrf.mxu1  ;;  %v9649_v9 = vpop.f32.mrf.mxu3 }
 0x273   : > { %13536 = vst [vmem:[#allocation181_spill] sm:$0xff] %v9637_v23  ;;  %v2169_v23 = vsel %vm2146_vm1, %v13542_v47, 0 }
 0x274   : > { %v9641_v3 = vunpack.c.l.b16 %v1344_v37  ;;  %7425 = vmatmul.msk.bf16.gmra.mxu0 %vm352_vm0, %v8651_v29  ;;  %7453 = vmatmul.msk.bf16.gmra.mxu1 %vm352_vm0, %v8651_v29  ;;  %13539 = vst [vmem:[#allocation184_spill] sm:$0xff] %v9649_v9  ;;  %v1045_v37 = vpack.c.bf16 %v9256_v43, %v9256_v43 }
 0x275   : > { %2175 = vmatpush.bf16.xpose.msrb.mxu0 %v2169_v23 }
 0x276   : > { %13538 = vst [vmem:[#allocation183_spill] sm:$0xff] %v9641_v3  ;;  %7481 = vmatmul.msk.bf16.gmra.mxu2 %vm352_vm0, %v8651_v29  ;;  %v2138_v3 = vunpack.c.l.b16 %v1045_v37 }
 0x279   : > { %v1307_v1 = vpop.f32.mrf.mxu2  ;;  %v9653_v30 = vpop.f32.mrf.mxu0 }
 0x27a   : > { %13540 = vst [vmem:[#allocation185_spill] sm:$0xff] %v9653_v30  ;;  %v9655_v61 = vpop.f32.mrf.mxu1  ;;  %v9667_v32 = vpop.f32.mrf.mxu3  ;;  %v1345_v60 = vpack.c.bf16 %v1307_v1, %v1307_v1 }
 0x27b   : > { %13541 = vst [vmem:[#allocation186_spill] sm:$0xff] %v9655_v61  ;;  %v2139_v61 = vunpack.c.l.b16 %v1046_v62 }
 0x27c   : > { %13543 = vst [vmem:[#allocation187_spill] sm:$0xff] %v9667_v32  ;;  %v9669_v30 = vunpack.c.l.b16 %v1345_v60  ;;  %v2137_v60 = vunpack.c.l.b16 %v1044_v17 }
 0x27d   : > { %v2144_v27 = vpack.c.b16 %v2139_v61, %v2138_v3 }
 0x27e   : > { %13544 = vst [vmem:[#allocation188_spill] sm:$0xff] %v9669_v30 }
 0x27f   : > { %v2166_v23 = vsel %vm2146_vm1, %v2144_v27, 0  ;;  %7505 = vmatmul.msk.bf16.gmra.mxu3 %vm352_vm0, %v8601_v15  ;;  %v2143_v27 = vpack.c.b16 %v2137_v60, %v2136_v35 }
 0x280   : > { %2176 = vmatpush.bf16.xpose.msrb.mxu0 %v2166_v23 }
 0x281   : > { %v1309_v31 = vpop.f32.mrf.mxu2  ;;  %v1036_v12 = vpop.f32.mrf.mxu0  ;;  %v2163_v15 = vsel %vm2146_vm1, %v2143_v27, 0 }
 0x282   : > { %v1346_v9 = vpack.c.bf16 %v1309_v31, %v1309_v31  ;;  %v1174_v51 = vpop.f32.mrf.mxu1  ;;  %v9683_v31 = vpop.f32.mrf.mxu3  ;;  %v1071_v47 = vpack.c.bf16 %v1036_v12, %v1036_v12  ;;  %v1042_v12 = vpack.c.bf16 %v9220_v53, %v9220_v53 }
 0x283   : > { %13546 = vst [vmem:[#allocation190_spill] sm:$0xff] %v9683_v31  ;;  %v1209_v52 = vpack.c.bf16 %v1174_v51, %v1174_v51  ;;  %v1041_v51 = vpack.c.bf16 %v9200_v46, %v9200_v46 }
 0x284   : > { %v9671_v43 = vunpack.c.l.b16 %v1346_v9  ;;  %7426 = vmatmul.msk.bf16.gmra.mxu0 %vm352_vm0, %v8666_v33  ;;  %7454 = vmatmul.msk.bf16.gmra.mxu1 %vm352_vm0, %v8666_v33  ;;  %v9688_v61 = vunpack.c.l.b16 %v1071_v47 }
 0x285   : > { %v9690_v37 = vunpack.c.l.b16 %v1209_v52  ;;  %v2134_v46 = vunpack.c.l.b16 %v1041_v51 }
 0x286   : > { %13545 = vst [vmem:[#allocation189_spill] sm:$0xff] %v9671_v43  ;;  %7482 = vmatmul.msk.bf16.gmra.mxu2 %vm352_vm0, %v8666_v33 }
 0x287   : > { %13547 = vst [vmem:[#allocation191_spill] sm:$0xff] %v9688_v61 }
 0x288   : > { %13548 = vst [vmem:[#allocation192_spill] sm:$0xff] %v9690_v37  ;;  %2177 = vmatpush.bf16.xpose.msrb.mxu0 %v2163_v15 }
 0x289   : > { %v1312_v9 = vpop.f32.mrf.mxu2  ;;  %v1038_v3 = vpop.f32.mrf.mxu0 }
 0x28a   : > { %v1176_v1 = vpop.f32.mrf.mxu1  ;;  %v1072_v32 = vpack.c.bf16 %v1038_v3, %v1038_v3  ;;  %v9702_v47 = vpop.f32.mrf.mxu3  ;;  %v1347_v3 = vpack.c.bf16 %v1312_v9, %v1312_v9 }
 0x28b   : > { %v1210_v57 = vpack.c.bf16 %v1176_v1, %v1176_v1  ;;  %13551 = vst [vmem:[#allocation195_spill] sm:$0xff] %v9702_v47  ;;  %v2135_v1 = vunpack.c.l.b16 %v1042_v12 }
 0x28c   : > { %v9698_v39 = vunpack.c.l.b16 %v1072_v32  ;;  %v9713_v35 = vunpack.c.l.b16 %v1347_v3 }
 0x28d   : > { %v9700_v17 = vunpack.c.l.b16 %v1210_v57  ;;  %v2142_v52 = vpack.c.b16 %v2135_v1, %v2134_v46 }
 0x28e   : > { %13549 = vst [vmem:[#allocation193_spill] sm:$0xff] %v9698_v39 }
 0x28f   : > { %13550 = vst [vmem:[#allocation194_spill] sm:$0xff] %v9700_v17  ;;  %v2160_v12 = vsel %vm2146_vm1, %v2142_v52, 0  ;;  %7506 = vmatmul.msk.bf16.gmra.mxu3 %vm352_vm0, %v8611_v18 }
 0x290   : > { %13553 = vst [vmem:[#allocation197_spill] sm:$0xff] %v9713_v35  ;;  %2178 = vmatpush.bf16.xpose.msrb.mxu0 %v2160_v12 }
 0x291   : > { %v1314_v53 = vpop.f32.mrf.mxu2  ;;  %v9709_v62 = vpop.f32.mrf.mxu0 }
 0x292   : > { %v1348_v32 = vpack.c.bf16 %v1314_v53, %v1314_v53  ;;  %13552 = vst [vmem:[#allocation196_spill] sm:$0xff] %v9709_v62  ;;  %v9711_v57 = vpop.f32.mrf.mxu1  ;;  %v9725_v51 = vpop.f32.mrf.mxu3 }
 0x293   : > { %13555 = vst [vmem:[#allocation199_spill] sm:$0xff] %v9725_v51 }
 0x294   : > { %v9715_v60 = vunpack.c.l.b16 %v1348_v32  ;;  %7427 = vmatmul.msk.bf16.gmra.mxu0 %vm352_vm0, %v8678_v36  ;;  %7455 = vmatmul.msk.bf16.gmra.mxu1 %vm352_vm0, %v8678_v36 }
 0x296   : > { %13554 = vst [vmem:[#allocation198_spill] sm:$0xff] %v9715_v60  ;;  %7483 = vmatmul.msk.bf16.gmra.mxu2 %vm352_vm0, %v8678_v36 }
 0x299   : > { %v1788_v27 = vpop.f32.mrf.mxu2  ;;  %v9728_v15 = vpop.f32.mrf.mxu0 }
 0x29a   : > { %13556 = vst [vmem:[#allocation200_spill] sm:$0xff] %v9728_v15  ;;  %v9730_v3 = vpop.f32.mrf.mxu1  ;;  %v1430_v46 = vpop.f32.mrf.mxu3  ;;  %v1868_v1 = vpack.c.bf16 %v1788_v27, %v1788_v27 }
 0x29b   : > { %v1477_v30 = vpack.c.bf16 %v1430_v46, %v1430_v46 }
 0x29c   : > { %v9738_v43 = vunpack.c.l.b16 %v1868_v1 }
 0x29d   : > { %v9750_v27 = vunpack.c.l.b16 %v1477_v30 }
 0x29f   : > { %13558 = vst [vmem:[#allocation202_spill] sm:$0xff] %v9750_v27  ;;  %7507 = vmatmul.msk.bf16.gmra.mxu3 %vm352_vm0, %v8621_v21 }
 0x2a1   : > { %v1790_v53 = vpop.f32.mrf.mxu2  ;;  %v9734_v9 = vpop.f32.mrf.mxu0 }
 0x2a2   : > { %v1869_v32 = vpack.c.bf16 %v1790_v53, %v1790_v53  ;;  %13557 = vst [vmem:[#allocation201_spill] sm:$0xff] %v9734_v9  ;;  %v9736_v23 = vpop.f32.mrf.mxu1  ;;  %v1432_v18 = vpop.f32.mrf.mxu3 }
 0x2a3   : > { %v1478_v46 = vpack.c.bf16 %v1432_v18, %v1432_v18 }
 0x2a4   : > { %v9740_v52 = vunpack.c.l.b16 %v1869_v32  ;;  %7428 = vmatmul.msk.bf16.gmra.mxu0 %vm352_vm0, %v8702_v56  ;;  %7456 = vmatmul.msk.bf16.gmra.mxu1 %vm352_vm0, %v8702_v56 }
 0x2a5   : > { %v9754_v53 = vunpack.c.l.b16 %v1478_v46 }
 0x2a6   : > { %7484 = vmatmul.msk.bf16.gmra.mxu2 %vm352_vm0, %v8702_v56 }
 0x2a7   : > { %13559 = vst [vmem:[#allocation203_spill] sm:$0xff] %v9754_v53 }
 0x2a9   : > { %v9752_v1 = vpop.f32.mrf.mxu2  ;;  %v9756_v32 = vpop.f32.mrf.mxu0 }
 0x2aa   : > { %13560 = vst [vmem:[#allocation204_spill] sm:$0xff] %v9756_v32  ;;  %v1657_v35 = vpop.f32.mrf.mxu1  ;;  %v9762_v61 = vpop.f32.mrf.mxu3 }
 0x2ab   : > { %13561 = vst [vmem:[#allocation205_spill] sm:$0xff] %v9762_v61 }
 0x2af   : > { %7508 = vmatmul.msk.bf16.gmra.mxu3 %vm352_vm0, %v8639_v26 }
 0x2b1   : > { %v9764_v39 = vpop.f32.mrf.mxu2  ;;  %v9766_v30 = vpop.f32.mrf.mxu0 }
 0x2b2   : > { %13562 = vst [vmem:[#allocation206_spill] sm:$0xff] %v9766_v30  ;;  %v1660_v18 = vpop.f32.mrf.mxu1  ;;  %v9774_v46 = vpop.f32.mrf.mxu3  ;;  %v1049_v30 = vpack.c.bf16 %v9323_v25, %v9323_v25  ;;  %v1730_v25 = vpack.c.bf16 %v9711_v57, %v9711_v57 }
 0x2b3   : > { %13563 = vst [vmem:[#allocation207_spill] sm:$0xff] %v9774_v46  ;;  %v1734_v47 = vpack.c.bf16 %v1660_v18, %v1660_v18 }
 0x2b4   : > { %7429 = vmatmul.msk.bf16.gmra.mxu0 %vm352_vm0, %v8732_v20  ;;  %7457 = vmatmul.msk.bf16.gmra.mxu1 %vm352_vm0, %v8732_v20  ;;  %v9802_v28 = vunpack.c.l.b16 %v1049_v30 }
 0x2b6   : > { %7485 = vmatmul.msk.bf16.gmra.mxu2 %vm352_vm0, %v8732_v20 }
 0x2b9   : > { %v9776_v60 = vpop.f32.mrf.mxu2  ;;  %v9778_v21 = vpop.f32.mrf.mxu0 }
 0x2ba   : > { %13564 = vst [vmem:[#allocation208_spill] sm:$0xff] %v9778_v21  ;;  %v1662_v12 = vpop.f32.mrf.mxu1  ;;  %v9782_v27 = vpop.f32.mrf.mxu3 }
 0x2bb   : > { %13565 = vst [vmem:[#allocation209_spill] sm:$0xff] %v9782_v27  ;;  %v1735_v26 = vpack.c.bf16 %v1662_v12, %v1662_v12  ;;  %v2561_v12 = vunpack.c.l.b16 %v1734_v47 }
 0x2bd   : > { %v2562_v18 = vunpack.c.l.b16 %v1735_v26 }
 0x2bf   : > { %7509 = vmatmul.msk.bf16.gmra.mxu3 %vm352_vm0, %v8651_v29 }
 0x2c1   : > { %v1800_v53 = vpop.f32.mrf.mxu2  ;;  %v1527_v37 = vpop.f32.mrf.mxu0 }
 0x2c2   : > { %v1665_v17 = vpop.f32.mrf.mxu1  ;;  %v9790_v46 = vpop.f32.mrf.mxu3  ;;  %v1598_v61 = vpack.c.bf16 %v1527_v37, %v1527_v37  ;;  %v1732_v37 = vpack.c.bf16 %v9736_v23, %v9736_v23  ;;  %v1873_v26 = vpack.c.bf16 %v1800_v53, %v1800_v53  ;;  %v1051_v53 = vpack.c.bf16 %v9349_v58, %v9349_v58 }
 0x2c3   : > { %13566 = vst [vmem:[#allocation210_spill] sm:$0xff] %v9790_v46  ;;  %v1736_v51 = vpack.c.bf16 %v1665_v17, %v1665_v17  ;;  %v1050_v46 = vpack.c.bf16 %v9340_v50, %v9340_v50  ;;  %v1733_v17 = vpack.c.bf16 %v1657_v35, %v1657_v35  ;;  %v1731_v50 = vpack.c.bf16 %v9730_v3, %v9730_v3 }
 0x2c4   : > { %7430 = vmatmul.msk.bf16.gmra.mxu0 %vm352_vm0, %v8762_v55  ;;  %7458 = vmatmul.msk.bf16.gmra.mxu1 %vm352_vm0, %v8762_v55  ;;  %v2307_v62 = vunpack.c.l.b16 %v1598_v61  ;;  %v2559_v23 = vunpack.c.l.b16 %v1732_v37 }
 0x2c5   : > { %v2563_v32 = vunpack.c.l.b16 %v1736_v51  ;;  %v9804_v29 = vunpack.c.l.b16 %v1050_v46  ;;  %v2560_v35 = vunpack.c.l.b16 %v1733_v17 }
 0x2c6   : > { %7486 = vmatmul.msk.bf16.gmra.mxu2 %vm352_vm0, %v8762_v55 }
 0x2c7   : > { %v2566_v30 = vpack.c.b16 %v2560_v35, %v2559_v23 }
 0x2c9   : > { %v1803_v31 = vpop.f32.mrf.mxu2  ;;  %v1529_v27 = vpop.f32.mrf.mxu0 }
 0x2ca   : > { %v1667_v15 = vpop.f32.mrf.mxu1  ;;  %v1599_v9 = vpack.c.bf16 %v1529_v27, %v1529_v27  ;;  %v9800_v51 = vpop.f32.mrf.mxu3  ;;  %v1874_v3 = vpack.c.bf16 %v1803_v31, %v1803_v31  ;;  %v1871_v31 = vpack.c.bf16 %v9764_v39, %v9764_v39 }
 0x2cb   : > { %v1737_v21 = vpack.c.bf16 %v1667_v15, %v1667_v15 }
 0x2cc   : > { %v2308_v13 = vunpack.c.l.b16 %v1599_v9  ;;  %v2567_v9 = vpack.c.b16 %v2562_v18, %v2561_v12  ;;  %v1872_v18 = vpack.c.bf16 %v9776_v60, %v9776_v60  ;;  %v1870_v60 = vpack.c.bf16 %v9752_v1, %v9752_v1 }
 0x2cd   : > { %v2564_v61 = vunpack.c.l.b16 %v1737_v21 }
 0x2ce   : > { %v2312_v15 = vpack.c.b16 %v2308_v13, %v2307_v62  ;;  %v2557_v62 = vunpack.c.l.b16 %v1730_v25  ;;  %v2912_v23 = vunpack.c.l.b16 %v1872_v18 }
 0x2cf   : > { %v2568_v27 = vpack.c.b16 %v2564_v61, %v2563_v32  ;;  %v2558_v32 = vunpack.c.l.b16 %v1731_v50  ;;  %v2914_v61 = vunpack.c.l.b16 %v1874_v3  ;;  %7510 = vmatmul.msk.bf16.gmra.mxu3 %vm352_vm0, %v8666_v33  ;;  %v1052_v50 = vpack.c.bf16 %v9370_v16, %v9370_v16 }
 0x2d0   : > { %2333 = vmatpush.bf16.msrb.mxu1 %v2312_v15 }
 0x2d1   : > { %v1805_v47 = vpop.f32.mrf.mxu2  ;;  %2589 = vmatpush.bf16.msrb.mxu3 %v2568_v27  ;;  %v9810_v21 = vpop.f32.mrf.mxu0  ;;  %v2565_v12 = vpack.c.b16 %v2558_v32, %v2557_v62  ;;  %v2913_v27 = vunpack.c.l.b16 %v1873_v26  ;;  %v9838_v39 = vunpack.c.l.b16 %v1052_v50  ;;  %v2910_v32 = vunpack.c.l.b16 %v1870_v60 }
 0x2d2   : > { %v1875_v13 = vpack.c.bf16 %v1805_v47, %v1805_v47  ;;  %v9818_v46 = vpop.f32.mrf.mxu3  ;;  %v2911_v47 = vunpack.c.l.b16 %v1871_v31  ;;  %v1053_v60 = vpack.c.bf16 %v9392_v19, %v9392_v19  ;;  %v1057_v50 = vpack.c.bf16 %v9452_v63, %v9452_v63 }
 0x2d3   : > { %v13580_v63 = vpack.c.b16 %v8690_v48, %v8686_v44  ;;  %v1059_v44 = vpack.c.bf16 %v9481_v41, %v9481_v41  ;;  %v1060_v48 = vpack.c.bf16 %v9505_v54, %v9505_v54  ;;  %v13587_v54 = vpack.c.b16 %v8722_v10, %v8718_v5 }
 0x2d4   : > { %7431 = vmatmul.msk.bf16.gmra.mxu0 %vm352_vm0, %v8792_v40  ;;  %7459 = vmatmul.msk.bf16.gmra.mxu1 %vm352_vm0, %v8792_v40  ;;  %v2915_v37 = vunpack.c.l.b16 %v1875_v13  ;;  %v9836_v13 = vunpack.c.l.b16 %v1051_v53  ;;  %v2917_v26 = vpack.c.b16 %v2911_v47, %v2910_v32  ;;  %v13571_v53 = vpack.c.b16 %v9740_v52, %v9738_v43 }
 0x2d5   : > { %2590 = vmatpush.bf16.msrb.mxu3 %v2567_v9  ;;  %v2918_v9 = vpack.c.b16 %v2913_v27, %v2912_v23  ;;  %v1054_v23 = vpack.c.bf16 %v9410_v6, %v9410_v6  ;;  %v1061_v5 = vpack.c.bf16 %v9519_v24, %v9519_v24  ;;  %v1062_v10 = vpack.c.bf16 %v9537_v34, %v9537_v34 }
 0x2d6   : > { %7487 = vmatmul.msk.bf16.gmra.mxu2 %vm352_vm0, %v8792_v40  ;;  %v2919_v25 = vpack.c.b16 %v2915_v37, %v2914_v61  ;;  %v9929_v37 = vunpack.c.l.b16 %v1057_v50 }
 0x2d7   : > { %v9991_v24 = vunpack.c.l.b16 %v1062_v10 }
 0x2d8   : > { %13576 = vst [vmem:[#allocation219_spill] sm:$0xff] %v9929_v37 }
 0x2d9   : > { %v1808_v17 = vpop.f32.mrf.mxu2  ;;  %2591 = vmatpush.bf16.msrb.mxu3 %v2566_v30  ;;  %v9824_v15 = vpop.f32.mrf.mxu0  ;;  %13589 = vst [vmem:[#allocation228_spill] sm:$0xff] %v9991_v24 }
 0x2da   : > { %v1450_v35 = vpop.f32.mrf.mxu3  ;;  %v1876_v33 = vpack.c.bf16 %v1808_v17, %v1808_v17 }
 0x2db   : > { %v1485_v16 = vpack.c.bf16 %v1450_v35, %v1450_v35 }
 0x2dc   : > { %v9842_v3 = vunpack.c.l.b16 %v1876_v33  ;;  %v9875_v33 = vunpack.c.l.b16 %v1053_v60 }
 0x2dd   : > { %2592 = vmatpush.bf16.msrb.mxu3 %v2565_v12  ;;  %v9854_v18 = vunpack.c.l.b16 %v1485_v16  ;;  %v1058_v12 = vpack.c.bf16 %v9471_v7, %v9471_v7 }
 0x2de   : > { %13567 = vst [vmem:[#allocation211_spill] sm:$0xff] %v9842_v3 }
 0x2df   : > { %13569 = vst [vmem:[#allocation213_spill] sm:$0xff] %v9854_v18  ;;  %7511 = vmatmul.msk.bf16.gmra.mxu3 %vm352_vm0, %v8678_v36 }
 0x2e1   : > { %2940 = vmatpush.bf16.msra.mxu3 %v2919_v25  ;;  %v1810_v62 = vpop.f32.mrf.mxu2  ;;  %v9840_v30 = vpop.f32.mrf.mxu0 }
 0x2e2   : > { %v1877_v58 = vpack.c.bf16 %v1810_v62, %v1810_v62  ;;  %v1452_v17 = vpop.f32.mrf.mxu3 }
 0x2e3   : > { %v1486_v61 = vpack.c.bf16 %v1452_v17, %v1452_v17 }
 0x2e4   : > { %v9844_v1 = vunpack.c.l.b16 %v1877_v58  ;;  %7432 = vmatmul.msk.bf16.gmra.mxu0 %vm352_vm0, %v8822_v2  ;;  %7460 = vmatmul.msk.bf16.gmra.mxu1 %vm352_vm0, %v8822_v2 }
 0x2e5   : > { %2941 = vmatpush.bf16.msra.mxu3 %v2918_v9  ;;  %v9858_v27 = vunpack.c.l.b16 %v1486_v61  ;;  %v9877_v9 = vunpack.c.l.b16 %v1054_v23 }
 0x2e6   : > { %13568 = vst [vmem:[#allocation212_spill] sm:$0xff] %v9844_v1  ;;  %7488 = vmatmul.msk.bf16.gmra.mxu2 %vm352_vm0, %v8822_v2 }
 0x2e7   : > { %13570 = vst [vmem:[#allocation214_spill] sm:$0xff] %v9858_v27 }
 0x2e9   : > { %2942 = vmatpush.bf16.msra.mxu3 %v2917_v26  ;;  %v1813_v31 = vpop.f32.mrf.mxu2  ;;  %v9860_v25 = vpop.f32.mrf.mxu0 }
 0x2ea   : > { %v9873_v35 = vpop.f32.mrf.mxu3  ;;  %v1878_v47 = vpack.c.bf16 %v1813_v31, %v1813_v31 }
 0x2ec   : > { %v9881_v32 = vunpack.c.l.b16 %v1878_v47 }
 0x2ed   : > { %2943 = vmatpush.bf16.msra.mxu3 %v13571_v53 }
 0x2ee   : > { %13572 = vst [vmem:[#allocation215_spill] sm:$0xff] %v9881_v32  ;;  %v13707_v32 = vld [vmem:[#allocation210_spill] sm:$0xff] }
 0x2ef   : > { %7512 = vmatmul.msk.bf16.gmra.mxu3 %vm352_vm0, %v8702_v56 }
 0x2f1   : > { %v1815_v43 = vpop.f32.mrf.mxu2  ;;  %v9879_v62 = vpop.f32.mrf.mxu0 }
 0x2f2   : > { %v1879_v52 = vpack.c.bf16 %v1815_v43, %v1815_v43  ;;  %v9891_v6 = vpop.f32.mrf.mxu3 }
 0x2f4   : > { %v9883_v36 = vunpack.c.l.b16 %v1879_v52  ;;  %7433 = vmatmul.msk.bf16.gmra.mxu0 %vm352_vm0, %v8858_v59  ;;  %7461 = vmatmul.msk.bf16.gmra.mxu1 %vm352_vm0, %v8858_v59 }
 0x2f6   : > { %13573 = vst [vmem:[#allocation216_spill] sm:$0xff] %v9883_v36  ;;  %7489 = vmatmul.msk.bf16.gmra.mxu2 %vm352_vm0, %v8858_v59 }
 0x2f9   : > { %v1818_v16 = vpop.f32.mrf.mxu2  ;;  %v9897_v26 = vpop.f32.mrf.mxu0 }
 0x2fa   : > { %v9901_v17 = vpop.f32.mrf.mxu3  ;;  %v1880_v61 = vpack.c.bf16 %v1818_v16, %v1818_v16 }
 0x2fc   : > { %v9903_v23 = vunpack.c.l.b16 %v1880_v61 }
 0x2fe   : > { %13574 = vst [vmem:[#allocation217_spill] sm:$0xff] %v9903_v23 }
 0x2ff   : > { %7513 = vmatmul.msk.bf16.gmra.mxu3 %vm352_vm0, %v8732_v20 }
 0x301   : > { %v1820_v31 = vpop.f32.mrf.mxu2  ;;  %v1547_v60 = vpop.f32.mrf.mxu0 }
 0x302   : > { %v1881_v53 = vpack.c.bf16 %v1820_v31, %v1820_v31  ;;  %v9911_v43 = vpop.f32.mrf.mxu3  ;;  %v1606_v52 = vpack.c.bf16 %v1547_v60, %v1547_v60 }
 0x304   : > { %v9905_v47 = vunpack.c.l.b16 %v1881_v53  ;;  %7434 = vmatmul.msk.bf16.gmra.mxu0 %vm352_vm0, %v8903_v14  ;;  %7462 = vmatmul.msk.bf16.gmra.mxu1 %vm352_vm0, %v8903_v14  ;;  %v9917_v31 = vunpack.c.l.b16 %v1606_v52  ;;  %v9931_v52 = vunpack.c.l.b16 %v1058_v12  ;;  %v13581_v12 = vpack.c.b16 %v8692_v49, %v8688_v45 }
 0x306   : > { %13575 = vst [vmem:[#allocation218_spill] sm:$0xff] %v9905_v47  ;;  %7490 = vmatmul.msk.bf16.gmra.mxu2 %vm352_vm0, %v8903_v14 }
 0x307   : > { %13577 = vst [vmem:[#allocation220_spill] sm:$0xff] %v9931_v52 }
 0x309   : > { %v1823_v16 = vpop.f32.mrf.mxu2  ;;  %v1549_v61 = vpop.f32.mrf.mxu0 }
 0x30a   : > { %v1607_v53 = vpack.c.bf16 %v1549_v61, %v1549_v61  ;;  %v1936_v60 = vpop.f32.mrf.mxu3  ;;  %v1882_v57 = vpack.c.bf16 %v1823_v16, %v1823_v16 }
 0x30c   : > { %v9925_v58 = vunpack.c.l.b16 %v1607_v53  ;;  %v9933_v20 = vunpack.c.l.b16 %v1882_v57 }
 0x30e   : > { %13578 = vst [vmem:[#allocation221_spill] sm:$0xff] %v9933_v20 }
 0x30f   : > { %7514 = vmatmul.msk.bf16.gmra.mxu3 %vm352_vm0, %v8762_v55  ;;  %v13586_v55 = vpack.c.b16 %v8720_v8, %v8716_v4 }
 0x311   : > { %v1825_v61 = vpop.f32.mrf.mxu2 }
 0x312   : > { %v1883_v19 = vpack.c.bf16 %v1825_v61, %v1825_v61  ;;  %v1938_v57 = vpop.f32.mrf.mxu3  ;;  %v9955_v61 = vunpack.c.l.b16 %v1059_v44 }
 0x314   : > { %v9935_v18 = vunpack.c.l.b16 %v1883_v19  ;;  %7543 = vmatmul.msk.bf16.vlgmr.msrb.gmra.mxu0 %vm2146_vm1, %v13580_v63  ;;  %13582 = vst [vmem:[#allocation223_spill] sm:$0xff] %v9955_v61  ;;  %v9957_v63 = vunpack.c.l.b16 %v1060_v48  ;;  %v2010_v48 = vpack.c.bf16 %v1936_v60, %v1936_v60  ;;  %v2008_v60 = vpack.c.bf16 %v9901_v17, %v9901_v17 }
 0x316   : > { %13579 = vst [vmem:[#allocation222_spill] sm:$0xff] %v9935_v18  ;;  %7551 = vmatmul.msk.bf16.vlgmr.msrb.gmra.mxu2 %vm2146_vm1, %v13581_v12  ;;  %v3224_v8 = vunpack.c.l.b16 %v2010_v48  ;;  %v9989_v48 = vunpack.c.l.b16 %v1061_v5  ;;  %v13595_v5 = vld [vmem:[#allocation6_spill] sm:$0xff] }
 0x317   : > { %13583 = vst [vmem:[#allocation224_spill] sm:$0xff] %v9957_v63 }
 0x318   : > { %13588 = vst [vmem:[#allocation227_spill] sm:$0xff] %v9989_v48 }
 0x319   : > { %v1828_v16 = vpop.f32.mrf.mxu2 }
 0x31a   : > { %v1941_v19 = vpop.f32.mrf.mxu3  ;;  %v1884_v53 = vpack.c.bf16 %v1828_v16, %v1828_v16 }
 0x31b   : > { %v2012_v12 = vpack.c.bf16 %v1941_v19, %v1941_v19  ;;  %v2011_v19 = vpack.c.bf16 %v1938_v57, %v1938_v57  ;;  %v2009_v57 = vpack.c.bf16 %v9911_v43, %v9911_v43 }
 0x31c   : > { %v9959_v7 = vunpack.c.l.b16 %v1884_v53 }
 0x31d   : > { %v3226_v53 = vunpack.c.l.b16 %v2012_v12 }
 0x31e   : > { %13584 = vst [vmem:[#allocation225_spill] sm:$0xff] %v9959_v7 }
 0x31f   : > { %7515 = vmatmul.msk.bf16.gmra.mxu3 %vm352_vm0, %v8792_v40  ;;  %v2007_v40 = vpack.c.bf16 %v9891_v6, %v9891_v6  ;;  %v13593_v6 = vld [vmem:[#allocation133_spill] sm:$0xff] }
 0x321   : > { %v1830_v45 = vpop.f32.mrf.mxu2 }
 0x322   : > { %v1885_v49 = vpack.c.bf16 %v1830_v45, %v1830_v45  ;;  %v1943_v16 = vpop.f32.mrf.mxu3 }
 0x323   : > { %v2013_v45 = vpack.c.bf16 %v1943_v16, %v1943_v16 }
 0x324   : > { %v9961_v50 = vunpack.c.l.b16 %v1885_v49  ;;  %7544 = vmatmul.msk.bf16.gmra.mxu0 %vm2146_vm1, %v13586_v55  ;;  %v3225_v55 = vunpack.c.l.b16 %v2011_v19  ;;  %v3223_v19 = vunpack.c.l.b16 %v2009_v57  ;;  %v13597_v57 = vld [vmem:[#allocation9_spill] sm:$0xff] }
 0x325   : > { %v3227_v4 = vunpack.c.l.b16 %v2013_v45  ;;  %v3221_v45 = vunpack.c.l.b16 %v2007_v40 }
 0x326   : > { %13585 = vst [vmem:[#allocation226_spill] sm:$0xff] %v9961_v50  ;;  %7552 = vmatmul.msk.bf16.gmra.mxu2 %vm2146_vm1, %v13587_v54  ;;  %v3230_v12 = vpack.c.b16 %v3225_v55, %v3224_v8  ;;  %v2006_v54 = vpack.c.bf16 %v9873_v35, %v9873_v35  ;;  %v13592_v35 = vld [vmem:[#allocation129_spill] sm:$0xff]  ;;  %v13594_v55 = vld [vmem:[#allocation8_spill] sm:$0xff] }
 0x327   : > { %v3231_v56 = vpack.c.b16 %v3227_v4, %v3226_v53  ;;  %v1191_v8 = vpack.c.bf16 %v13592_v35, %v13592_v35  ;;  %v13596_v10 = vpack.c.b16 %v13594_v55, %v13595_v5  ;;  %v13600_v5 = vld [vmem:[#allocation122_spill] sm:$0xff] }
 0x328   : > { %v3220_v53 = vunpack.c.l.b16 %v2006_v54 }
 0x329   : > { %v1833_v49 = vpop.f32.mrf.mxu2  ;;  %3252 = vmatpush.bf16.msrb.mxu2 %v3231_v56  ;;  %v3222_v56 = vunpack.c.l.b16 %v2008_v60 }
 0x32a   : > { %v1886_v16 = vpack.c.bf16 %v1833_v49, %v1833_v49  ;;  %v1192_v49 = vpack.c.bf16 %v13593_v6, %v13593_v6 }
 0x32b   : > { %v3229_v40 = vpack.c.b16 %v3223_v19, %v3222_v56 }
 0x32c   : > { %v9993_v43 = vunpack.c.l.b16 %v1886_v16  ;;  %v3656_v35 = vunpack.c.l.b16 %v1192_v49  ;;  %v13605_v49 = vld [vmem:[#allocation121_spill] sm:$0xff] }
 0x32d   : > { %3253 = vmatpush.bf16.msrb.mxu2 %v3230_v12  ;;  %v13598_v12 = vld [vmem:[#allocation7_spill] sm:$0xff] }
 0x32e   : > { %13590 = vst [vmem:[#allocation229_spill] sm:$0xff] %v9993_v43  ;;  %v13599_v54 = vpack.c.b16 %v13597_v57, %v13598_v12  ;;  %v13601_v57 = vld [vmem:[#allocation127_spill] sm:$0xff] }
 0x32f   : > { %7516 = vmatmul.msk.bf16.gmra.mxu3 %vm352_vm0, %v8822_v2  ;;  %v1190_v12 = vpack.c.bf16 %v13601_v57, %v13601_v57  ;;  %v13608_v57 = vld [vmem:[#allocation14_spill] sm:$0xff] }
 0x331   : > { %v1835_v34 = vpop.f32.mrf.mxu2  ;;  %3254 = vmatpush.bf16.msrb.mxu2 %v3229_v40  ;;  %v3654_v44 = vunpack.c.l.b16 %v1190_v12 }
 0x332   : > { %v1887_v17 = vpack.c.bf16 %v1835_v34, %v1835_v34  ;;  %v3228_v34 = vpack.c.b16 %v3221_v45, %v3220_v53 }
 0x334   : > { %v9995_v4 = vunpack.c.l.b16 %v1887_v17  ;;  %7545 = vmatmul.msk.bf16.gmra.mxu0 %vm2146_vm1, %v13596_v10  ;;  %v3655_v17 = vunpack.c.l.b16 %v1191_v8  ;;  %v1189_v10 = vpack.c.bf16 %v13600_v5, %v13600_v5  ;;  %v13604_v8 = vld [vmem:[#allocation118_spill] sm:$0xff]  ;;  %v13607_v5 = vld [vmem:[#allocation132_spill] sm:$0xff] }
 0x335   : > { %3255 = vmatpush.bf16.msrb.mxu2 %v3228_v34  ;;  %v1187_v2 = vpack.c.bf16 %v13604_v8, %v13604_v8  ;;  %v1188_v34 = vpack.c.bf16 %v13605_v49, %v13605_v49 }
 0x336   : > { %13591 = vst [vmem:[#allocation230_spill] sm:$0xff] %v9995_v4  ;;  %7553 = vmatmul.msk.bf16.gmra.mxu2 %vm2146_vm1, %v13599_v54  ;;  %v3661_v55 = vpack.c.b16 %v3656_v35, %v3655_v17  ;;  %v3653_v54 = vunpack.c.l.b16 %v1189_v10  ;;  %v13606_v17 = vld [vmem:[#allocation128_spill] sm:$0xff] }
 0x337   : > { %v1455_v35 = vpack.c.bf16 %v13606_v17, %v13606_v17  ;;  %v13609_v10 = vld [vmem:[#allocation12_spill] sm:$0xff]  ;;  %v3651_v16 = vunpack.c.l.b16 %v1187_v2  ;;  %v3652_v41 = vunpack.c.l.b16 %v1188_v34 }
 0x338   : > { %v13610_v12 = vpack.c.b16 %v13608_v57, %v13609_v10  ;;  %v3660_v8 = vpack.c.b16 %v3654_v44, %v3653_v54  ;;  %v1065_v44 = vpack.c.bf16 %v9575_v11, %v9575_v11  ;;  %v1066_v54 = vpack.c.bf16 %v9593_v38, %v9593_v38  ;;  %v13619_v11 = vld [vmem:[#allocation134_spill] sm:$0xff]  ;;  %v13620_v38 = vld [vmem:[#allocation137_spill] sm:$0xff] }
 0x339   : > { %v1838_v6 = vpop.f32.mrf.mxu2  ;;  %v10041_v17 = vunpack.c.l.b16 %v1455_v35  ;;  %v3659_v57 = vpack.c.b16 %v3652_v41, %v3651_v16  ;;  %v13618_v41 = vpack.c.b16 %v9444_v0, %v9436_v42 }
 0x33a   : > { %v1888_v56 = vpack.c.bf16 %v1838_v6, %v1838_v6  ;;  %v1456_v6 = vpack.c.bf16 %v13607_v5, %v13607_v5  ;;  %v10053_v35 = vunpack.c.l.b16 %v1065_v44  ;;  %v13621_v44 = vld [vmem:[#allocation3_spill] sm:$0xff] }
 0x33b   : > { %v3685_v16 = vsel %vm2146_vm1, %v13618_v41, 0  ;;  %v3682_v41 = vsel %vm2146_vm1, %v3661_v55, 0 }
 0x33c   : > { %v10019_v53 = vunpack.c.l.b16 %v1888_v56  ;;  %v13611_v56 = vld [vmem:[#allocation15_spill] sm:$0xff]  ;;  %v10043_v60 = vunpack.c.l.b16 %v1456_v6  ;;  %13614 = vst [vmem:[#allocation8_spill] sm:$0xff] %v10053_v35  ;;  %v10055_v6 = vunpack.c.l.b16 %v1066_v54  ;;  %v13622_v54 = vld [vmem:[#allocation2_spill] sm:$0xff]  ;;  %v13655_v35 = vld [vmem:[#allocation204_spill] sm:$0xff] }
 0x33e   : > { %13602 = vst [vmem:[#allocation129_spill] sm:$0xff] %v10019_v53 }
 0x33f   : > { %7517 = vmatmul.msk.bf16.gmra.mxu3 %vm352_vm0, %v8858_v59  ;;  %13615 = vst [vmem:[#allocation6_spill] sm:$0xff] %v10055_v6 }
 0x341   : > { %v1840_v19 = vpop.f32.mrf.mxu2 }
 0x342   : > { %v1889_v40 = vpack.c.bf16 %v1840_v19, %v1840_v19  ;;  %v13612_v19 = vld [vmem:[#allocation13_spill] sm:$0xff] }
 0x344   : > { %v10021_v45 = vunpack.c.l.b16 %v1889_v40  ;;  %7546 = vmatmul.msk.bf16.gmra.mxu0 %vm2146_vm1, %v13610_v12  ;;  %v13613_v40 = vpack.c.b16 %v13611_v56, %v13612_v19  ;;  %v1457_v19 = vpack.c.bf16 %v13619_v11, %v13619_v11  ;;  %v13641_v11 = vld [vmem:[#allocation10_spill] sm:$0xff] }
 0x346   : > { %13603 = vst [vmem:[#allocation133_spill] sm:$0xff] %v10021_v45  ;;  %7554 = vmatmul.msk.bf16.gmra.mxu2 %vm2146_vm1, %v13613_v40  ;;  %v1458_v40 = vpack.c.bf16 %v13620_v38, %v13620_v38  ;;  %v10077_v42 = vunpack.c.l.b16 %v1457_v19  ;;  %v1067_v38 = vpack.c.bf16 %v9602_v22, %v9602_v22  ;;  %v13632_v22 = vld [vmem:[#allocation4_spill] sm:$0xff] }
 0x347   : > { %v13673_v45 = vld [vmem:[#allocation184_spill] sm:$0xff] }
 0x348   : > { %v10079_v0 = vunpack.c.l.b16 %v1458_v40  ;;  %v10094_v40 = vunpack.c.l.b16 %v1067_v38 }
 0x349   : > { %v1843_v5 = vpop.f32.mrf.mxu2 }
 0x34a   : > { %v1890_v2 = vpack.c.bf16 %v1843_v5, %v1843_v5  ;;  %13627 = vst [vmem:[#allocation118_spill] sm:$0xff] %v10094_v40  ;;  %v13631_v5 = vld [vmem:[#allocation5_spill] sm:$0xff] }
 0x34b   : > { %v13633_v10 = vpack.c.b16 %v13631_v5, %v13632_v22  ;;  %v13636_v22 = vld [vmem:[#allocation185_spill] sm:$0xff] }
 0x34c   : > { %v10057_v56 = vunpack.c.l.b16 %v1890_v2  ;;  %v13623_v2 = vpack.c.b16 %v13621_v44, %v13622_v54  ;;  %v13625_v44 = vld [vmem:[#allocation177_spill] sm:$0xff] }
 0x34e   : > { %13616 = vst [vmem:[#allocation9_spill] sm:$0xff] %v10057_v56 }
 0x34f   : > { %7518 = vmatmul.msk.bf16.gmra.mxu3 %vm352_vm0, %v8903_v14  ;;  %v3679_v14 = vsel %vm2146_vm1, %v3660_v8, 0 }
 0x351   : > { %v1845_v34 = vpop.f32.mrf.mxu2 }
 0x352   : > { %v1891_v12 = vpack.c.bf16 %v1845_v34, %v1845_v34  ;;  %v13630_v34 = vld [vmem:[#allocation144_spill] sm:$0xff] }
 0x353   : > { %v1460_v49 = vpack.c.bf16 %v13630_v34, %v13630_v34 }
 0x354   : > { %v10059_v59 = vunpack.c.l.b16 %v1891_v12 }
 0x356   : > { %13617 = vst [vmem:[#allocation7_spill] sm:$0xff] %v10059_v59  ;;  %7577 = vmatmul.msk.bf16.vlgmr.msra.gmra.mxu2 %vm2146_vm1, %v13623_v2  ;;  %v13629_v2 = vld [vmem:[#allocation140_spill] sm:$0xff] }
 0x357   : > { %3691 = vmatpush.bf16.xpose.msra.mxu2 %v3685_v16  ;;  %v1068_v16 = vpack.c.bf16 %v13625_v44, %v13625_v44  ;;  %v1459_v55 = vpack.c.bf16 %v13629_v2, %v13629_v2  ;;  %v10111_v44 = vunpack.c.l.b16 %v1460_v49  ;;  %v13635_v2 = vld [vmem:[#allocation180_spill] sm:$0xff] }
 0x358   : > { %v1069_v5 = vpack.c.bf16 %v13635_v2, %v13635_v2 }
 0x359   : > { %v10081_v12 = vpop.f32.mrf.mxu2  ;;  %v10096_v54 = vunpack.c.l.b16 %v1068_v16  ;;  %v10109_v38 = vunpack.c.l.b16 %v1459_v55  ;;  %v3676_v16 = vsel %vm2146_vm1, %v3659_v57, 0  ;;  %v13640_v55 = vld [vmem:[#allocation11_spill] sm:$0xff] }
 0x35a   : > { %13624 = vst [vmem:[#allocation122_spill] sm:$0xff] %v10081_v12  ;;  %v13642_v12 = vpack.c.b16 %v13640_v55, %v13641_v11  ;;  %v13650_v55 = vld [vmem:[#allocation16_spill] sm:$0xff] }
 0x35b   : > { %13628 = vst [vmem:[#allocation121_spill] sm:$0xff] %v10096_v54 }
 0x35f   : > { %3692 = vmatpush.bf16.xpose.msra.mxu2 %v3682_v41 }
 0x361   : > { %v10092_v19 = vpop.f32.mrf.mxu2 }
 0x362   : > { %13626 = vst [vmem:[#allocation127_spill] sm:$0xff] %v10092_v19  ;;  %v13646_v19 = vld [vmem:[#allocation156_spill] sm:$0xff] }
 0x366   : > { %7578 = vmatmul.msk.bf16.gmra.mxu2 %vm2146_vm1, %v13633_v10  ;;  %v1070_v10 = vpack.c.bf16 %v13636_v22, %v13636_v22  ;;  %v13645_v22 = vld [vmem:[#allocation152_spill] sm:$0xff] }
 0x367   : > { %3693 = vmatpush.bf16.xpose.msra.mxu2 %v3679_v14  ;;  %v10124_v14 = vunpack.c.l.b16 %v1069_v5  ;;  %v1464_v5 = vpack.c.bf16 %v13646_v19, %v13646_v19  ;;  %v1595_v19 = vpack.c.bf16 %v13655_v35, %v13655_v35 }
 0x368   : > { %v10126_v49 = vunpack.c.l.b16 %v1070_v10  ;;  %v13647_v10 = vld [vmem:[#allocation206_spill] sm:$0xff] }
 0x369   : > { %v10113_v8 = vpop.f32.mrf.mxu2  ;;  %13638 = vst [vmem:[#allocation14_spill] sm:$0xff] %v10124_v14 }
 0x36a   : > { %13634 = vst [vmem:[#allocation128_spill] sm:$0xff] %v10113_v8  ;;  %v1596_v8 = vpack.c.bf16 %v13647_v10, %v13647_v10 }
 0x36b   : > { %13639 = vst [vmem:[#allocation12_spill] sm:$0xff] %v10126_v49 }
 0x36c   : > { %v2305_v6 = vunpack.c.l.b16 %v1596_v8 }
 0x36f   : > { %3694 = vmatpush.bf16.xpose.msra.mxu2 %v3676_v16  ;;  %v1463_v16 = vpack.c.bf16 %v13645_v22, %v13645_v22 }
 0x371   : > { %v10122_v41 = vpop.f32.mrf.mxu2  ;;  %v10150_v57 = vunpack.c.l.b16 %v1463_v16 }
 0x372   : > { %13637 = vst [vmem:[#allocation132_spill] sm:$0xff] %v10122_v41  ;;  %v13648_v41 = vld [vmem:[#allocation208_spill] sm:$0xff] }
 0x373   : > { %v1597_v11 = vpack.c.bf16 %v13648_v41, %v13648_v41  ;;  %13652 = vst [vmem:[#allocation134_spill] sm:$0xff] %v10150_v57  ;;  %v13657_v41 = vld [vmem:[#allocation196_spill] sm:$0xff] }
 0x374   : > { %v1592_v54 = vpack.c.bf16 %v13657_v41, %v13657_v41  ;;  %v13660_v41 = vld [vmem:[#allocation158_spill] sm:$0xff] }
 0x375   : > { %v2306_v10 = vunpack.c.l.b16 %v1597_v11  ;;  %v7958_v11 = vld [vmem:[%s13072_s4 + $0x20] sm:$0xff]  }
 0x376   : > { %7579 = vmatmul.msk.bf16.gmra.mxu2 %vm2146_vm1, %v13642_v12  ;;  %v13649_v12 = vld [vmem:[#allocation17_spill] sm:$0xff] }
 0x377   : > { %v13651_v27 = vpack.c.b16 %v13649_v12, %v13650_v55  ;;  %v13658_v12 = vld [vmem:[#allocation200_spill] sm:$0xff]  ;;  %v2304_v55 = vunpack.c.l.b16 %v1595_v19 }
 0x379   : > { %v10134_v34 = vpop.f32.mrf.mxu2 }
 0x37a   : > { %13643 = vst [vmem:[#allocation15_spill] sm:$0xff] %v10134_v34  ;;  %v10152_v34 = vunpack.c.l.b16 %v1464_v5  ;;  %v2311_v5 = vpack.c.b16 %v2306_v10, %v2305_v6  ;;  %v10175_v10 = vunpack.c.l.bf16 %v7958_v11 }
 0x37c   : > { %13653 = vst [vmem:[#allocation137_spill] sm:$0xff] %v10152_v34  ;;  %2334 = vmatpush.bf16.msrb.mxu1 %v2311_v5 }
 0x37d   : > { %13662 = vst [vmem:[#allocation177_spill] sm:$0xff] %v10175_v10 }
 0x381   : > { %v10136_v2 = vpop.f32.mrf.mxu2 }
 0x382   : > { %13644 = vst [vmem:[#allocation13_spill] sm:$0xff] %v10136_v2  ;;  %v13654_v2 = vld [vmem:[#allocation201_spill] sm:$0xff] }
 0x383   : > { %v1594_v22 = vpack.c.bf16 %v13654_v2, %v13654_v2  ;;  %v2301_v2 = vunpack.c.l.b16 %v1592_v54 }
 0x385   : > { %v2303_v16 = vunpack.c.l.b16 %v1594_v22  ;;  %v13661_v22 = vld [vmem:[#allocation161_spill] sm:$0xff] }
 0x386   : > { %7580 = vmatmul.msk.bf16.gmra.mxu2 %vm2146_vm1, %v13651_v27  ;;  %v1593_v27 = vpack.c.bf16 %v13658_v12, %v13658_v12  ;;  %v1465_v12 = vpack.c.bf16 %v13660_v41, %v13660_v41  ;;  %v1466_v6 = vpack.c.bf16 %v13661_v22, %v13661_v22 }
 0x387   : > { %v2310_v8 = vpack.c.b16 %v2304_v55, %v2303_v16 }
 0x388   : > { %v2302_v49 = vunpack.c.l.b16 %v1593_v27  ;;  %v10177_v54 = vunpack.c.l.b16 %v1465_v12  ;;  %v10179_v27 = vunpack.c.l.b16 %v1466_v6  ;;  %v7959_v12 = vld [vmem:[%s13072_s4 + $0x28] sm:$0xff]   ;;  %v13666_v6 = vld [vmem:[#allocation166_spill] sm:$0xff] }
 0x389   : > { %v10158_v40 = vpop.f32.mrf.mxu2  ;;  %2335 = vmatpush.bf16.msrb.mxu1 %v2310_v8  ;;  %v10215_v7 = vunpack.c.h.bf16 %v7959_v12 }
 0x38a   : > { %13656 = vst [vmem:[#allocation3_spill] sm:$0xff] %v10158_v40  ;;  %v2309_v19 = vpack.c.b16 %v2302_v49, %v2301_v2  ;;  %v10188_v49 = vunpack.c.h.bf16 %v7958_v11  ;;  %v10202_v11 = vunpack.c.l.bf16 %v7959_v12 }
 0x38b   : > { %13663 = vst [vmem:[#allocation140_spill] sm:$0xff] %v10177_v54 }
 0x38c   : > { %13664 = vst [vmem:[#allocation144_spill] sm:$0xff] %v10179_v27 }
 0x38d   : > { %2336 = vmatpush.bf16.msrb.mxu1 %v2309_v19  ;;  %13665 = vst [vmem:[#allocation5_spill] sm:$0xff] %v10188_v49  ;;  %v1467_v19 = vpack.c.bf16 %v13666_v6, %v13666_v6 }
 0x38e   : > { %13668 = vst [vmem:[#allocation4_spill] sm:$0xff] %v10202_v11 }
 0x38f   : > { %v10204_v14 = vunpack.c.l.b16 %v1467_v19  ;;  %13669 = vst [vmem:[#allocation180_spill] sm:$0xff] %v10215_v7  ;;  %v7960_v19 = vld [vmem:[%s13072_s4 + $0x30] sm:$0xff]  }
 0x391   : > { %v10166_v35 = vpop.f32.mrf.mxu2 }
 0x392   : > { %13659 = vst [vmem:[#allocation2_spill] sm:$0xff] %v10166_v35 }
 0x399   : > { %v2437_v16 = vpop.f32.mrf.mxu2 }
 0x39a   : > { %v10182_v55 = vadd.f32 %v10175_v10, %v2437_v16  ;;  %v13667_v16 = vld [vmem:[#allocation170_spill] sm:$0xff] }
 0x39c   : > { %v2457_v5 = vsel %vm2200_vm2, %v10182_v55, -inf }
 0x39d   : > { %2458 = vmax.xlane.f32.xlu0 %v2457_v5  ;;  %v1468_v5 = vpack.c.bf16 %v13667_v16, %v13667_v16 }
 0x3a1   : > { %v2439_v2 = vpop.f32.mrf.mxu2 }
 0x3a2   : > { %v10191_v41 = vadd.f32 %v10188_v49, %v2439_v2  ;;  %v10206_v2 = vunpack.c.l.b16 %v1468_v5  ;;  %v10225_v5 = vunpack.c.l.bf16 %v7960_v19 }
 0x3a4   : > { %v2460_v22 = vsel %vm2200_vm2, %v10191_v41, -inf  ;;  %13670 = vst [vmem:[#allocation185_spill] sm:$0xff] %v10225_v5 }
 0x3a5   : > { %2461 = vmax.xlane.f32.xlu0 %v2460_v22 }
 0x3a9   : > { %v2442_v8 = vpop.f32.mrf.mxu2 }
 0x3aa   : > { %v10209_v40 = vadd.f32 %v10202_v11, %v2442_v8 }
 0x3ac   : > { %v2463_v35 = vsel %vm2200_vm2, %v10209_v40, -inf }
 0x3ad   : > { %2464 = vmax.xlane.f32.xlu1 %v2463_v35 }
 0x3b1   : > { %v2444_v22 = vpop.f32.mrf.mxu2 }
 0x3b2   : > { %v10218_v16 = vadd.f32 %v10215_v7, %v2444_v22  ;;  %v10232_v22 = vunpack.c.h.bf16 %v7960_v19 }
 0x3b4   : > { %v2466_v8 = vsel %vm2200_vm2, %v10218_v16, -inf  ;;  %13671 = vst [vmem:[#allocation11_spill] sm:$0xff] %v10232_v22 }
 0x3b5   : > { %2467 = vmax.xlane.f32.xlu1 %v2466_v8  ;;  %v7961_v8 = vld [vmem:[%s13072_s4 + $0x38] sm:$0xff]  }
 0x3b6   : > { %v10246_v19 = vunpack.c.l.bf16 %v7961_v8 }
 0x3b8   : > { %13674 = vst [vmem:[#allocation10_spill] sm:$0xff] %v10246_v19 }
 0x3b9   : > { %v2447_v35 = vpop.f32.mrf.mxu2 }
 0x3ba   : > { %v10228_v50 = vadd.f32 %v10225_v5, %v2447_v35  ;;  %v13672_v35 = vld [vmem:[#allocation179_spill] sm:$0xff] }
 0x3bb   : > { %v1471_v53 = vpack.c.bf16 %v13672_v35, %v13672_v35  ;;  %v1601_v35 = vpack.c.bf16 %v9824_v15, %v9824_v15 }
 0x3bc   : > { %v2469_v12 = vsel %vm2200_vm2, %v10228_v50, -inf }
 0x3bd   : > { %2470 = vmax.xlane.f32.xlu2 %v2469_v12  ;;  %v1472_v12 = vpack.c.bf16 %v13673_v45, %v13673_v45  ;;  %v10248_v59 = vunpack.c.l.b16 %v1471_v53  ;;  %v10261_v45 = vunpack.c.h.bf16 %v7961_v8  ;;  %v10267_v61 = vunpack.c.l.b16 %v1601_v35  ;;  %v13678_v8 = vld [vmem:[#allocation187_spill] sm:$0xff]  ;;  %v13679_v35 = vld [vmem:[#allocation190_spill] sm:$0xff] }
 0x3be   : > { %v1474_v53 = vpack.c.bf16 %v13679_v35, %v13679_v35  ;;  %v1603_v35 = vpack.c.bf16 %v9860_v25, %v9860_v25 }
 0x3bf   : > { %13675 = vst [vmem:[#allocation152_spill] sm:$0xff] %v10248_v59 }
 0x3c0   : > { %13677 = vst [vmem:[#allocation206_spill] sm:$0xff] %v10261_v45  ;;  %v10290_v48 = vunpack.c.l.b16 %v1474_v53  ;;  %v10305_v53 = vunpack.c.l.b16 %v1603_v35  ;;  %v1605_v35 = vpack.c.bf16 %v9897_v26, %v9897_v26 }
 0x3c1   : > { %v2449_v6 = vpop.f32.mrf.mxu2 }
 0x3c2   : > { %v10235_v43 = vadd.f32 %v10232_v22, %v2449_v6  ;;  %v10250_v6 = vunpack.c.l.b16 %v1472_v12  ;;  %13682 = vst [vmem:[#allocation16_spill] sm:$0xff] %v10290_v48  ;;  %v10313_v22 = vpop.f32.mrf.mxu0 }
 0x3c3   : > { %13685 = vst [vmem:[#allocation201_spill] sm:$0xff] %v10313_v22 }
 0x3c4   : > { %v2472_v4 = vsel %vm2200_vm2, %v10235_v43, -inf  ;;  %13676 = vst [vmem:[#allocation156_spill] sm:$0xff] %v10250_v6 }
 0x3c5   : > { %2473 = vmax.xlane.f32.xlu2 %v2472_v4  ;;  %v1600_v4 = vpack.c.bf16 %v9810_v21, %v9810_v21  ;;  %v10275_v21 = vld [vmem:[%s13072_s4 + $0x40] sm:$0xff]  }
 0x3c6   : > { %v10392_v23 = vunpack.c.h.bf16 %v10275_v21 }
 0x3c7   : > { %v10265_v12 = vunpack.c.l.b16 %v1600_v4  ;;  %v1473_v4 = vpack.c.bf16 %v13678_v8, %v13678_v8  ;;  %v1602_v8 = vpack.c.bf16 %v9840_v30, %v9840_v30 }
 0x3c9   : > { %v2452_v56 = vpop.f32.mrf.mxu2  ;;  %v10288_v6 = vunpack.c.l.b16 %v1473_v4  ;;  %v10303_v4 = vunpack.c.l.b16 %v1602_v8  ;;  %v1604_v8 = vpack.c.bf16 %v9879_v62, %v9879_v62 }
 0x3ca   : > { %v10253_v37 = vadd.f32 %v10246_v19, %v2452_v56  ;;  %v13684_v19 = vld [vmem:[#allocation199_spill] sm:$0xff] }
 0x3cb   : > { %13681 = vst [vmem:[#allocation17_spill] sm:$0xff] %v10288_v6  ;;  %v1476_v30 = vpack.c.bf16 %v13684_v19, %v13684_v19  ;;  %v10329_v19 = vpop.f32.mrf.mxu0  ;;  %v13689_v6 = vld [vmem:[#allocation141_spill] sm:$0xff] }
 0x3cc   : > { %v2475_v52 = vsel %vm2200_vm2, %v10253_v37, -inf  ;;  %13688 = vst [vmem:[#allocation200_spill] sm:$0xff] %v10329_v19 }
 0x3cd   : > { %2476 = vmax.xlane.f32.xlu0 %v2475_v52 }
 0x3d1   : > { %v2454_v56 = vpop.f32.mrf.mxu2 }
 0x3d2   : > { %v10270_v63 = vadd.f32 %v10261_v45, %v2454_v56  ;;  %v10286_v56 = vunpack.c.l.bf16 %v10275_v21  ;;  %v7963_v21 = vld [vmem:[%s13072_s4 + $0x48] sm:$0xff]  }
 0x3d3   : > { %v10341_v52 = vpop.f32.mrf.mxu0 }
 0x3d4   : > { %v2478_v15 = vsel %vm2200_vm2, %v10270_v63, -inf  ;;  %13680 = vst [vmem:[#allocation208_spill] sm:$0xff] %v10286_v56 }
 0x3d5   : > { %2479 = vmax.xlane.f32.xlu1 %v2478_v15  ;;  %13693 = vst [vmem:[#allocation166_spill] sm:$0xff] %v10341_v52 }
 0x3d9   : > { %v2788_v59 = vpop.f32.mrf.mxu2 }
 0x3da   : > { %v10293_v24 = vadd.f32 %v10286_v56, %v2788_v59  ;;  %v13683_v56 = vld [vmem:[#allocation195_spill] sm:$0xff]  ;;  %v10325_v59 = vunpack.c.l.b16 %v1604_v8 }
 0x3db   : > { %v1475_v45 = vpack.c.bf16 %v13683_v56, %v13683_v56  ;;  %v10327_v56 = vunpack.c.l.b16 %v1605_v35  ;;  %v13694_v35 = vld [vmem:[#allocation146_spill] sm:$0xff]  ;;  %v10349_v7 = vpop.f32.mrf.mxu0 }
 0x3dc   : > { %v2808_v15 = vsel %vm2200_vm2, %v10293_v24, -inf  ;;  %13696 = vst [vmem:[#allocation170_spill] sm:$0xff] %v10349_v7 }
 0x3dd   : > { %2809 = vmax.xlane.f32.xlu1 %v2808_v15  ;;  %v10315_v25 = vunpack.c.l.b16 %v1475_v45  ;;  %v10317_v15 = vunpack.c.l.b16 %v1476_v30  ;;  %v1195_v45 = vpack.c.bf16 %v13689_v6, %v13689_v6  ;;  %v13690_v30 = vld [vmem:[#allocation145_spill] sm:$0xff] }
 0x3de   : > { %v1196_v48 = vpack.c.bf16 %v13690_v30, %v13690_v30  ;;  %v13697_v30 = vld [vmem:[#allocation205_spill] sm:$0xff] }
 0x3df   : > { %13686 = vst [vmem:[#allocation204_spill] sm:$0xff] %v10315_v25  ;;  %v10337_v5 = vunpack.c.l.b16 %v1195_v45  ;;  %v1197_v25 = vpack.c.bf16 %v13694_v35, %v13694_v35  ;;  %v1479_v62 = vpack.c.bf16 %v13697_v30, %v13697_v30  ;;  %v13698_v45 = vld [vmem:[#allocation207_spill] sm:$0xff] }
 0x3e0   : > { %13687 = vst [vmem:[#allocation196_spill] sm:$0xff] %v10317_v15  ;;  %v10339_v26 = vunpack.c.l.b16 %v1196_v48  ;;  %v13695_v15 = vld [vmem:[#allocation151_spill] sm:$0xff]  ;;  %v1480_v48 = vpack.c.bf16 %v13698_v45, %v13698_v45 }
 0x3e1   : > { %13691 = vst [vmem:[#allocation158_spill] sm:$0xff] %v10337_v5  ;;  %v1198_v6 = vpack.c.bf16 %v13695_v15, %v13695_v15  ;;  %v10355_v11 = vunpack.c.l.b16 %v1197_v25  ;;  %v10359_v10 = vunpack.c.l.b16 %v1479_v62  ;;  %v2790_v1 = vpop.f32.mrf.mxu2  ;;  %v13704_v5 = vld [vmem:[#allocation153_spill] sm:$0xff]  ;;  %v1482_v15 = vpack.c.bf16 %v13707_v32, %v13707_v32 }
 0x3e2   : > { %13692 = vst [vmem:[#allocation161_spill] sm:$0xff] %v10339_v26  ;;  %v10361_v8 = vunpack.c.l.b16 %v1480_v48  ;;  %v13705_v62 = vld [vmem:[#allocation157_spill] sm:$0xff] }
 0x3e3   : > { %13699 = vst [vmem:[#allocation179_spill] sm:$0xff] %v10355_v11  ;;  %v10357_v49 = vunpack.c.l.b16 %v1198_v6  ;;  %v10367_v3 = vpop.f32.mrf.mxu0  ;;  %v1199_v6 = vpack.c.bf16 %v13704_v5, %v13704_v5  ;;  %v1200_v48 = vpack.c.bf16 %v13705_v62, %v13705_v62  ;;  %v13706_v26 = vld [vmem:[#allocation209_spill] sm:$0xff] }
 0x3e4   : > { %13701 = vst [vmem:[#allocation187_spill] sm:$0xff] %v10359_v10  ;;  %v1481_v35 = vpack.c.bf16 %v13706_v26, %v13706_v26 }
 0x3e5   : > { %13700 = vst [vmem:[#allocation184_spill] sm:$0xff] %v10357_v49  ;;  %v10378_v10 = vunpack.c.l.b16 %v1199_v6 }
 0x3e6   : > { %13702 = vst [vmem:[#allocation190_spill] sm:$0xff] %v10361_v8  ;;  %v10380_v8 = vunpack.c.l.b16 %v1200_v48  ;;  %v10385_v5 = vunpack.c.l.b16 %v1481_v35 }
 0x3e7   : > { %13703 = vst [vmem:[#allocation195_spill] sm:$0xff] %v10367_v3 }
 0x3e8   : > { %13708 = vst [vmem:[#allocation199_spill] sm:$0xff] %v10378_v10 }
 0x3e9   : > { %13709 = vst [vmem:[#allocation141_spill] sm:$0xff] %v10380_v8  ;;  %v2793_v62 = vpop.f32.mrf.mxu2 }
 0x3ea   : > { %13711 = vst [vmem:[#allocation146_spill] sm:$0xff] %v10385_v5 }
 0x3eb   : > { %13713 = vst [vmem:[#allocation205_spill] sm:$0xff] %v10392_v23 }
 0x410   : > { %v2459_v30 = vpop.xlane.xlu0 %2458 }
 0x411   : > { %v2481_v45 = vsub.f32 %v10182_v55, %v2459_v30  ;;  %v10382_v55 = vpop.f32.mrf.mxu0 }
 0x412   : > { %13710 = vst [vmem:[#allocation145_spill] sm:$0xff] %v10382_v55 }
 0x413   : > { %v2489_v25 = vmul.f32 1.442695, %v2481_v45  ;;  %v10387_v45 = vunpack.c.l.b16 %v1482_v15 }
 0x415   : > { %7979 = vpow2.f32 %v2489_v25  ;;  %13712 = vst [vmem:[#allocation151_spill] sm:$0xff] %v10387_v45 }
 0x418   : > { %v2462_v36 = vpop.xlane.xlu0 %2461 }
 0x419   : > { %v2482_v30 = vsub.f32 %v10191_v41, %v2462_v36  ;;  %v10401_v41 = vadd.f32 %v10392_v23, %v2790_v1  ;;  %v2795_v36 = vpop.f32.mrf.mxu2 }
 0x41b   : > { %v10389_v25 = vpop.eup %7979  ;;  %v2491_v26 = vmul.f32 1.442695, %v2482_v30  ;;  %v10409_v30 = vpop.f32.mrf.mxu0 }
 0x41c   : > { %v2505_v32 = vsel %vm2200_vm2, %v10389_v25, 0.0  ;;  %13714 = vst [vmem:[#allocation207_spill] sm:$0xff] %v10409_v30 }
 0x41d   : > { %7981 = vpow2.f32 %v2491_v26  ;;  %2506 = vadd.xlane.f32.xlu2 %v2505_v32  ;;  %v10411_v26 = vunpack.c.l.bf16 %v7963_v21  ;;  %v2811_v32 = vsel %vm2200_vm2, %v10401_v41, -inf }
 0x41f   : > { %13715 = vst [vmem:[#allocation153_spill] sm:$0xff] %v10411_v26 }
 0x420   : > { %v2465_v35 = vpop.xlane.xlu1 %2464 }
 0x421   : > { %v2483_v15 = vsub.f32 %v10209_v40, %v2465_v35  ;;  %v1483_v40 = vpack.c.bf16 %v9800_v51, %v9800_v51  ;;  %v1484_v35 = vpack.c.bf16 %v9818_v46, %v9818_v46 }
 0x423   : > { %v10407_v48 = vpop.eup %7981  ;;  %v2493_v6 = vmul.f32 1.442695, %v2483_v15  ;;  %v10422_v15 = vadd.f32 %v10411_v26, %v2793_v62  ;;  %v10425_v23 = vunpack.c.l.b16 %v1483_v40  ;;  %v10427_v47 = vunpack.c.l.b16 %v1484_v35  ;;  %v10437_v62 = vpop.f32.mrf.mxu0 }
 0x424   : > { %v2508_v1 = vsel %vm2200_vm2, %v10407_v48, 0.0  ;;  %13719 = vst [vmem:[#allocation231_spill] sm:$0xff] %v10437_v62 }
 0x425   : > { %7983 = vpow2.f32 %v2493_v6  ;;  %2812 = vmax.xlane.f32.xlu2 %v2811_v32  ;;  %2509 = vadd.xlane.f32.xlu0 %v2508_v1  ;;  %13716 = vst [vmem:[#allocation157_spill] sm:$0xff] %v10425_v23  ;;  %v10431_v32 = vunpack.c.h.bf16 %v7963_v21  ;;  %v2814_v51 = vsel %vm2200_vm2, %v10422_v15, -inf  ;;  %v7964_v21 = vld [vmem:[%s13072_s4 + $0x50] sm:$0xff]   ;;  %v13722_v23 = vld [vmem:[#allocation171_spill] sm:$0xff] }
 0x426   : > { %13717 = vst [vmem:[#allocation209_spill] sm:$0xff] %v10427_v47  ;;  %v1204_v47 = vpack.c.bf16 %v13722_v23, %v13722_v23  ;;  %v10472_v23 = vunpack.c.h.bf16 %v7964_v21 }
 0x427   : > { %13718 = vst [vmem:[#allocation210_spill] sm:$0xff] %v10431_v32  ;;  %v10442_v1 = vadd.f32 %v10431_v32, %v2795_v36  ;;  %v13721_v36 = vld [vmem:[#allocation167_spill] sm:$0xff] }
 0x428   : > { %v2468_v5 = vpop.xlane.xlu1 %2467  ;;  %v10467_v49 = vunpack.c.l.b16 %v1204_v47  ;;  %13726 = vst [vmem:[#allocation234_spill] sm:$0xff] %v10472_v23 }
 0x429   : > { %v2484_v45 = vsub.f32 %v10218_v16, %v2468_v5  ;;  %v2798_v5 = vpop.f32.mrf.mxu2  ;;  %v1203_v16 = vpack.c.bf16 %v13721_v36, %v13721_v36 }
 0x42a   : > { %13725 = vst [vmem:[#allocation233_spill] sm:$0xff] %v10467_v49 }
 0x42b   : > { %v10429_v11 = vpop.eup %7983  ;;  %v2495_v6 = vmul.f32 1.442695, %v2484_v45  ;;  %v10465_v32 = vunpack.c.l.b16 %v1203_v16  ;;  %v10478_v16 = vpop.f32.mrf.mxu3 }
 0x42c   : > { %v2511_v46 = vsel %vm2200_vm2, %v10429_v11, 0.0  ;;  %13727 = vst [vmem:[#allocation235_spill] sm:$0xff] %v10478_v16 }
 0x42d   : > { %7985 = vpow2.f32 %v2495_v6  ;;  %2815 = vmax.xlane.f32.xlu2 %v2814_v51  ;;  %2512 = vadd.xlane.f32.xlu0 %v2511_v46  ;;  %v10450_v6 = vunpack.c.l.bf16 %v7964_v21  ;;  %v2817_v46 = vsel %vm2200_vm2, %v10442_v1, -inf  ;;  %13724 = vst [vmem:[#allocation171_spill] sm:$0xff] %v10465_v32  ;;  %v13731_v32 = vld [vmem:[#allocation178_spill] sm:$0xff] }
 0x42e   : > { %v1206_v49 = vpack.c.bf16 %v13731_v32, %v13731_v32 }
 0x42f   : > { %13720 = vst [vmem:[#allocation232_spill] sm:$0xff] %v10450_v6 }
 0x430   : > { %v2471_v45 = vpop.xlane.xlu2 %2470 }
 0x431   : > { %v2485_v40 = vsub.f32 %v10228_v50, %v2471_v45  ;;  %v10460_v50 = vpop.f32.mrf.mxu0  ;;  %v10463_v45 = vadd.f32 %v10450_v6, %v2798_v5  ;;  %v2800_v20 = vpop.f32.mrf.mxu2 }
 0x432   : > { %13723 = vst [vmem:[#allocation167_spill] sm:$0xff] %v10460_v50  ;;  %v13730_v50 = vld [vmem:[#allocation172_spill] sm:$0xff] }
 0x433   : > { %v10448_v35 = vpop.eup %7985  ;;  %v2497_v26 = vmul.f32 1.442695, %v2485_v40  ;;  %v2820_v5 = vsel %vm2200_vm2, %v10463_v45, -inf }
 0x434   : > { %v2514_v51 = vsel %vm2200_vm2, %v10448_v35, 0.0 }
 0x435   : > { %7987 = vpow2.f32 %v2497_v26  ;;  %2515 = vadd.xlane.f32.xlu1 %v2514_v51  ;;  %2818 = vmax.xlane.f32.xlu0 %v2817_v46  ;;  %v7965_v51 = vld [vmem:[%s13072_s4 + $0x58] sm:$0xff]  }
 0x438   : > { %v2474_v40 = vpop.xlane.xlu2 %2473 }
 0x439   : > { %v2486_v18 = vsub.f32 %v10235_v43, %v2474_v40  ;;  %v10483_v43 = vadd.f32 %v10472_v23, %v2800_v20  ;;  %v10485_v21 = vpop.f32.mrf.mxu0  ;;  %v2803_v40 = vpop.f32.mrf.mxu2  ;;  %v10510_v23 = vunpack.c.l.b16 %v1206_v49 }
 0x43a   : > { %13728 = vst [vmem:[#allocation236_spill] sm:$0xff] %v10485_v21  ;;  %v1205_v21 = vpack.c.bf16 %v13730_v50, %v13730_v50 }
 0x43b   : > { %v10470_v36 = vpop.eup %7987  ;;  %v2499_v10 = vmul.f32 1.442695, %v2486_v18  ;;  %v2823_v47 = vsel %vm2200_vm2, %v10483_v43, -inf  ;;  %13734 = vst [vmem:[#allocation238_spill] sm:$0xff] %v10510_v23 }
 0x43c   : > { %v2517_v26 = vsel %vm2200_vm2, %v10470_v36, 0.0  ;;  %v10508_v6 = vunpack.c.l.b16 %v1205_v21 }
 0x43d   : > { %7989 = vpow2.f32 %v2499_v10  ;;  %2518 = vadd.xlane.f32.xlu1 %v2517_v26  ;;  %2821 = vmax.xlane.f32.xlu0 %v2820_v5  ;;  %v10493_v5 = vunpack.c.l.bf16 %v7965_v51 }
 0x43e   : > { %13733 = vst [vmem:[#allocation178_spill] sm:$0xff] %v10508_v6 }
 0x43f   : > { %13729 = vst [vmem:[#allocation237_spill] sm:$0xff] %v10493_v5 }
 0x440   : > { %v2477_v18 = vpop.xlane.xlu0 %2476 }
 0x441   : > { %v2487_v46 = vsub.f32 %v10253_v37, %v2477_v18  ;;  %v10503_v37 = vpop.f32.mrf.mxu3  ;;  %v10506_v18 = vadd.f32 %v10493_v5, %v2803_v40  ;;  %v10515_v50 = vpop.f32.mrf.mxu0 }
 0x442   : > { %13732 = vst [vmem:[#allocation172_spill] sm:$0xff] %v10503_v37 }
 0x443   : > { %v10491_v10 = vpop.eup %7989  ;;  %v2501_v26 = vmul.f32 1.442695, %v2487_v46  ;;  %13735 = vst [vmem:[#allocation239_spill] sm:$0xff] %v10515_v50 }
 0x444   : > { %v2520_v20 = vsel %vm2200_vm2, %v10491_v10, 0.0 }
 0x445   : > { %7991 = vpow2.f32 %v2501_v26  ;;  %2824 = vmax.xlane.f32.xlu1 %v2823_v47  ;;  %2521 = vadd.xlane.f32.xlu2 %v2520_v20  ;;  %v10517_v26 = vunpack.c.h.bf16 %v7965_v51  ;;  %v2826_v47 = vsel %vm2200_vm2, %v10506_v18, -inf  ;;  %v2805_v20 = vpop.f32.mrf.mxu2 }
 0x447   : > { %13736 = vst [vmem:[#allocation240_spill] sm:$0xff] %v10517_v26  ;;  %v10526_v49 = vadd.f32 %v10517_v26, %v2805_v20 }
 0x448   : > { %v2480_v46 = vpop.xlane.xlu1 %2479 }
 0x449   : > { %v2488_v8 = vsub.f32 %v10270_v63, %v2480_v46  ;;  %v13739_v63 = vld [vmem:[#allocation186_spill] sm:$0xff]  ;;  %v10541_v6 = vpop.f32.mrf.mxu0 }
 0x44a   : > { %v1208_v20 = vpack.c.bf16 %v13739_v63, %v13739_v63 }
 0x44b   : > { %v10513_v16 = vpop.eup %7991  ;;  %v2503_v32 = vmul.f32 1.442695, %v2488_v8  ;;  %v10528_v8 = vpop.f32.mrf.mxu3 }
 0x44c   : > { %v2523_v40 = vsel %vm2200_vm2, %v10513_v16, 0.0  ;;  %13737 = vst [vmem:[#allocation241_spill] sm:$0xff] %v10528_v8 }
 0x44d   : > { %7993 = vpow2.f32 %v2503_v32  ;;  %2827 = vmax.xlane.f32.xlu1 %v2826_v47  ;;  %2524 = vadd.xlane.f32.xlu2 %v2523_v40  ;;  %v2829_v32 = vsel %vm2200_vm2, %v10526_v49, -inf  ;;  %v13738_v47 = vld [vmem:[#allocation181_spill] sm:$0xff] }
 0x44e   : > { %v1207_v40 = vpack.c.bf16 %v13738_v47, %v13738_v47  ;;  %13740 = vst [vmem:[#allocation181_spill] sm:$0xff] %v10541_v6 }
 0x450   : > { %v2810_v21 = vpop.xlane.xlu1 %2809 }
 0x451   : > { %v2832_v51 = vsub.f32 %v10293_v24, %v2810_v21  ;;  %v10543_v24 = vunpack.c.l.b16 %v1207_v40  ;;  %v10545_v21 = vunpack.c.l.b16 %v1208_v20  ;;  %v10555_v47 = vpop.f32.mrf.mxu0 }
 0x452   : > { %13744 = vst [vmem:[#allocation244_spill] sm:$0xff] %v10555_v47 }
 0x453   : > { %v10531_v46 = vpop.eup %7993  ;;  %v2840_v50 = vmul.f32 1.442695, %v2832_v51  ;;  %13741 = vst [vmem:[#allocation186_spill] sm:$0xff] %v10543_v24  ;;  %v10547_v51 = vpop.f32.mrf.mxu3 }
 0x454   : > { %v2526_v5 = vsel %vm2200_vm2, %v10531_v46, 0.0  ;;  %13742 = vst [vmem:[#allocation242_spill] sm:$0xff] %v10545_v21 }
 0x455   : > { %7995 = vpow2.f32 %v2840_v50  ;;  %2527 = vadd.xlane.f32.xlu0 %v2526_v5  ;;  %2830 = vmax.xlane.f32.xlu2 %v2829_v32  ;;  %13743 = vst [vmem:[#allocation243_spill] sm:$0xff] %v10547_v51 }
 0x459   : > { %v10559_v5 = vpop.f32.mrf.mxu0 }
 0x45a   : > { %13746 = vst [vmem:[#allocation246_spill] sm:$0xff] %v10559_v5 }
 0x45b   : > { %v10549_v23 = vpop.eup %7995  ;;  %v10557_v50 = vpop.f32.mrf.mxu3 }
 0x45c   : > { %v2856_v26 = vsel %vm2200_vm2, %v10549_v23, 0.0  ;;  %13745 = vst [vmem:[#allocation245_spill] sm:$0xff] %v10557_v50 }
 0x45d   : > { %2857 = vadd.xlane.f32.xlu0 %v2856_v26 }
 0x461   : > { %v10563_v40 = vpop.f32.mrf.mxu0 }
 0x462   : > { %13748 = vst [vmem:[#allocation248_spill] sm:$0xff] %v10563_v40 }
 0x463   : > { %v10561_v32 = vpop.f32.mrf.mxu3 }
 0x464   : > { %13747 = vst [vmem:[#allocation247_spill] sm:$0xff] %v10561_v32 }
 0x469   : > { %v10567_v6 = vpop.f32.mrf.mxu0 }
 0x46a   : > { %13750 = vst [vmem:[#allocation250_spill] sm:$0xff] %v10567_v6 }
 0x46b   : > { %v10565_v20 = vpop.f32.mrf.mxu3 }
 0x46c   : > { %13749 = vst [vmem:[#allocation249_spill] sm:$0xff] %v10565_v20 }
 0x471   : > { %v2180_v26 = vpop.f32.mrf.mxu0 }
 0x473   : > { %v10569_v37 = vpop.f32.mrf.mxu3 }
 0x474   : > { %13751 = vst [vmem:[#allocation251_spill] sm:$0xff] %v10569_v37 }
 0x479   : > { %v2182_v24 = vpop.f32.mrf.mxu0 }
 0x47b   : > { %v10571_v51 = vpop.f32.mrf.mxu3 }
 0x47c   : > { %13752 = vst [vmem:[#allocation252_spill] sm:$0xff] %v10571_v51 }
 0x481   : > { %v2185_v40 = vpop.f32.mrf.mxu0 }
 0x483   : > { %v10573_v47 = vpop.f32.mrf.mxu3 }
 0x484   : > { %13753 = vst [vmem:[#allocation253_spill] sm:$0xff] %v10573_v47 }
 0x48b   : > { %v10576_v50 = vpop.f32.mrf.mxu3 }
 0x48c   : > { %13754 = vst [vmem:[#allocation254_spill] sm:$0xff] %v10576_v50  ;;  %v7955_v50 = vld [vmem:[%s13072_s4 + $0x8] sm:$0xff]  }
 0x490   : > { %v2507_v63 = vpop.xlane.xlu2 %2506 }
 0x491   : > { %7997 = vrcp.f32 %v2507_v63  ;;  %v7892_v63 = vld [vmem:[%s13072_s4] sm:$0xff]  }
 0x492   : > { %v10586_v47 = vunpack.c.l.bf16 %v7892_v63 }
 0x494   : > { %13755 = vst [vmem:[#allocation255_spill] sm:$0xff] %v10586_v47 }
 0x497   : > { %v7998_v6 = vpop.eup %7997 }
 0x498   : > { %v2813_v21 = vpop.xlane.xlu2 %2812  ;;  %v2510_v5 = vpop.xlane.xlu0 %2509  ;;  %v2537_v20 = vmul.f32 %v7998_v6, %v10389_v25 }
 0x499   : > { %v2833_v8 = vsub.f32 %v10401_v41, %v2813_v21  ;;  %7999 = vrcp.f32 %v2510_v5  ;;  %v10591_v6 = vpop.f32.mrf.mxu3 }
 0x49a   : > { %13756 = vst [vmem:[#allocation256_spill] sm:$0xff] %v10591_v6 }
 0x49b   : > { %v2842_v32 = vmul.f32 1.442695, %v2833_v8 }
 0x49d   : > { %8001 = vpow2.f32 %v2842_v32 }
 0x49f   : > { %v8000_v37 = vpop.eup %7999 }
 0x4a0   : > { %v2538_v51 = vmul.f32 %v8000_v37, %v10407_v48  ;;  %v2816_v19 = vpop.xlane.xlu2 %2815  ;;  %v2513_v22 = vpop.xlane.xlu0 %2512  ;;  %v10594_v37 = vadd.f32 %v10586_v47, %v2180_v26 }
 0x4a1   : > { %v2834_v41 = vsub.f32 %v10422_v15, %v2816_v19  ;;  %v2187_v48 = vpop.f32.mrf.mxu0 }
 0x4a2   : > { %v2545_v21 = vpack.c.bf16 %v2538_v51, %v2537_v20 }
 0x4a3   : > { %v10584_v5 = vpop.eup %8001  ;;  %v2844_v8 = vmul.f32 1.442695, %v2834_v41  ;;  %v10599_v41 = vunpack.c.h.bf16 %v7892_v63 }
 0x4a4   : > { %7555 = vmatmul.msk.bf16.vlgmr.msrb.gmra.mxu3 %vm2200_vm2, %v2545_v21  ;;  %v2859_v25 = vsel %vm2200_vm2, %v10584_v5, 0.0 }
 0x4a5   : > { %8003 = vpow2.f32 %v2844_v8  ;;  %2860 = vadd.xlane.f32.xlu1 %v2859_v25  ;;  %13757 = vst [vmem:[#allocation257_spill] sm:$0xff] %v10599_v41  ;;  %v2201_v8 = vsel %vm2200_vm2, %v10594_v37, -inf }
 0x4a6   : > { %8005 = vrcp.f32 %v2513_v22 }
 0x4a8   : > { %v2516_v19 = vpop.xlane.xlu1 %2515  ;;  %v2819_v15 = vpop.xlane.xlu0 %2818 }
 0x4a9   : > { %8007 = vrcp.f32 %v2516_v19  ;;  %v2835_v51 = vsub.f32 %v10442_v1, %v2819_v15  ;;  %v2190_v25 = vpop.f32.mrf.mxu0  ;;  %v10605_v19 = vpop.f32.mrf.mxu3  ;;  %v10608_v1 = vadd.f32 %v10599_v41, %v2182_v24 }
 0x4aa   : > { %13758 = vst [vmem:[#allocation258_spill] sm:$0xff] %v10605_v19  ;;  %v10618_v19 = vunpack.c.l.bf16 %v7955_v50 }
 0x4ab   : > { %v10597_v32 = vpop.eup %8003  ;;  %v2846_v20 = vmul.f32 1.442695, %v2835_v51 }
 0x4ac   : > { %v2862_v21 = vsel %vm2200_vm2, %v10597_v32, 0.0  ;;  %v8006_v22 = vpop.eup %8005  ;;  %13759 = vst [vmem:[#allocation259_spill] sm:$0xff] %v10618_v19 }
 0x4ad   : > { %8009 = vpow2.f32 %v2846_v20  ;;  %2863 = vadd.xlane.f32.xlu2 %v2862_v21  ;;  %2202 = vmax.xlane.f32.xlu1 %v2201_v8  ;;  %v2539_v63 = vmul.f32 %v8006_v22, %v10429_v11 }
 0x4af   : > { %v8008_v26 = vpop.eup %8007 }
 0x4b0   : > { %v2540_v15 = vmul.f32 %v8008_v26, %v10448_v35  ;;  %v2519_v51 = vpop.xlane.xlu1 %2518  ;;  %v2822_v6 = vpop.xlane.xlu0 %2821  ;;  %v2204_v35 = vsel %vm2200_vm2, %v10608_v1, -inf }
 0x4b1   : > { %v2836_v20 = vsub.f32 %v10463_v45, %v2822_v6  ;;  %v10626_v45 = vadd.f32 %v10618_v19, %v2185_v40  ;;  %v2192_v22 = vpop.f32.mrf.mxu0 }
 0x4b2   : > { %v2546_v21 = vpack.c.bf16 %v2540_v15, %v2539_v63  ;;  %v10629_v63 = vpop.f32.mrf.mxu3 }
 0x4b3   : > { %v10616_v8 = vpop.eup %8009  ;;  %v2848_v7 = vmul.f32 1.442695, %v2836_v20  ;;  %13760 = vst [vmem:[#allocation260_spill] sm:$0xff] %v10629_v63  ;;  %v2207_v40 = vsel %vm2200_vm2, %v10626_v45, -inf }
 0x4b4   : > { %7556 = vmatmul.msk.bf16.gmra.mxu3 %vm2200_vm2, %v2546_v21  ;;  %v2865_v11 = vsel %vm2200_vm2, %v10616_v8, 0.0  ;;  %v10633_v21 = vunpack.c.h.bf16 %v7955_v50 }
 0x4b5   : > { %8011 = vpow2.f32 %v2848_v7  ;;  %2866 = vadd.xlane.f32.xlu0 %v2865_v11  ;;  %2205 = vmax.xlane.f32.xlu2 %v2204_v35 }
 0x4b6   : > { %8013 = vrcp.f32 %v2519_v51  ;;  %13761 = vst [vmem:[#allocation261_spill] sm:$0xff] %v10633_v21 }
 0x4b8   : > { %v2825_v24 = vpop.xlane.xlu1 %2824  ;;  %v2522_v6 = vpop.xlane.xlu2 %2521 }
 0x4b9   : > { %v2837_v26 = vsub.f32 %v10483_v43, %v2825_v24  ;;  %8015 = vrcp.f32 %v2522_v6  ;;  %v10640_v43 = vadd.f32 %v10633_v21, %v2187_v48 }
 0x4ba   : > { %v10650_v55 = vpop.f32.mrf.mxu3 }
 0x4bb   : > { %v10631_v15 = vpop.eup %8011  ;;  %v2850_v20 = vmul.f32 1.442695, %v2837_v26  ;;  %v7956_v26 = vld [vmem:[%s13072_s4 + $0x10] sm:$0xff]   ;;  %13762 = vst [vmem:[#allocation262_spill] sm:$0xff] %v10650_v55 }
 0x4bc   : > { %v2868_v7 = vsel %vm2200_vm2, %v10631_v15, 0.0  ;;  %v8014_v51 = vpop.eup %8013  ;;  %v10652_v48 = vunpack.c.l.bf16 %v7956_v26 }
 0x4bd   : > { %8017 = vpow2.f32 %v2850_v20  ;;  %2869 = vadd.xlane.f32.xlu0 %v2868_v7  ;;  %2208 = vmax.xlane.f32.xlu2 %v2207_v40  ;;  %v2541_v35 = vmul.f32 %v8014_v51, %v10470_v36  ;;  %v2195_v7 = vpop.f32.mrf.mxu0  ;;  %v2210_v36 = vsel %vm2200_vm2, %v10640_v43, -inf }
 0x4be   : > { %13763 = vst [vmem:[#allocation263_spill] sm:$0xff] %v10652_v48 }
 0x4bf   : > { %v8016_v11 = vpop.eup %8015 }
 0x4c0   : > { %v2542_v24 = vmul.f32 %v8016_v11, %v10491_v10  ;;  %v2828_v50 = vpop.xlane.xlu1 %2827  ;;  %v2525_v6 = vpop.xlane.xlu2 %2524 }
 0x4c1   : > { %v2838_v63 = vsub.f32 %v10506_v18, %v2828_v50  ;;  %v10660_v18 = vadd.f32 %v10652_v48, %v2190_v25 }
 0x4c2   : > { %v2547_v52 = vpack.c.bf16 %v2542_v24, %v2541_v35 }
 0x4c3   : > { %v10648_v20 = vpop.eup %8017  ;;  %v2852_v40 = vmul.f32 1.442695, %v2838_v63 }
 0x4c4   : > { %7557 = vmatmul.msk.bf16.gmra.mxu3 %vm2200_vm2, %v2547_v52  ;;  %v2871_v10 = vsel %vm2200_vm2, %v10648_v20, 0.0  ;;  %v7957_v52 = vld [vmem:[%s13072_s4 + $0x18] sm:$0xff]  }
 0x4c5   : > { %8019 = vpow2.f32 %v2852_v40  ;;  %2211 = vmax.xlane.f32.xlu0 %v2210_v36  ;;  %2872 = vadd.xlane.f32.xlu1 %v2871_v10  ;;  %v10668_v50 = vunpack.c.h.bf16 %v7957_v52  ;;  %v10674_v36 = vunpack.c.h.bf16 %v7956_v26  ;;  %v10676_v10 = vpop.f32.mrf.mxu3  ;;  %v10688_v30 = vunpack.c.l.bf16 %v7957_v52 }
 0x4c6   : > { %8021 = vrcp.f32 %v2525_v6  ;;  %v2213_v6 = vsel %vm2200_vm2, %v10660_v18, -inf  ;;  %13766 = vst [vmem:[#allocation266_spill] sm:$0xff] %v10676_v10 }
 0x4c7   : > { %13764 = vst [vmem:[#allocation264_spill] sm:$0xff] %v10668_v50  ;;  %v10684_v3 = vadd.f32 %v10674_v36, %v2192_v22 }
 0x4c8   : > { %v2831_v63 = vpop.xlane.xlu2 %2830  ;;  %v2528_v51 = vpop.xlane.xlu0 %2527  ;;  %13765 = vst [vmem:[#allocation265_spill] sm:$0xff] %v10674_v36 }
 0x4c9   : > { %v2839_v11 = vsub.f32 %v10526_v49, %v2831_v63  ;;  %8023 = vrcp.f32 %v2528_v51  ;;  %v2197_v49 = vpop.f32.mrf.mxu0  ;;  %13767 = vst [vmem:[#allocation267_spill] sm:$0xff] %v10688_v30 }
 0x4ca   : > { %v10679_v51 = vadd.f32 %v10668_v50, %v2197_v49 }
 0x4cb   : > { %v10663_v35 = vpop.eup %8019  ;;  %v2854_v24 = vmul.f32 1.442695, %v2839_v11 }
 0x4cc   : > { %v2874_v25 = vsel %vm2200_vm2, %v10663_v35, 0.0  ;;  %v8022_v40 = vpop.eup %8021 }
 0x4cd   : > { %8025 = vpow2.f32 %v2854_v24  ;;  %2214 = vmax.xlane.f32.xlu0 %v2213_v6  ;;  %2875 = vadd.xlane.f32.xlu1 %v2874_v25  ;;  %v2543_v11 = vmul.f32 %v8022_v40, %v10513_v16  ;;  %v2222_v24 = vsel %vm2200_vm2, %v10679_v51, -inf  ;;  %v2216_v16 = vsel %vm2200_vm2, %v10684_v3, -inf }
 0x4cf   : > { %v8024_v63 = vpop.eup %8023 }
 0x4d0   : > { %v2544_v55 = vmul.f32 %v8024_v63, %v10531_v46  ;;  %v10697_v46 = vpop.f32.mrf.mxu3  ;;  %v7876_v63 = vld [vmem:[%s13073_s5 + $0x8] sm:$0xff] }
 0x4d1   : > { %13768 = vst [vmem:[#allocation268_spill] sm:$0xff] %v10697_v46  ;;  %2646 = vmatpush.bf16.msra.mxu0 %v7876_v63 }
 0x4d2   : > { %v2548_v62 = vpack.c.bf16 %v2544_v55, %v2543_v11  ;;  %v10700_v55 = vadd.f32 %v10688_v30, %v2195_v7  ;;  %v7877_v7 = vld [vmem:[%s13073_s5 + $0x10] sm:$0xff] }
 0x4d3   : > { %v10686_v26 = vpop.eup %8025 }
 0x4d4   : > { %7558 = vmatmul.msk.bf16.gmra.mxu3 %vm2200_vm2, %v2548_v62  ;;  %v2877_v6 = vsel %vm2200_vm2, %v10686_v26, 0.0  ;;  %v2219_v62 = vsel %vm2200_vm2, %v10700_v55, -inf }
 0x4d5   : > { %2223 = vmax.xlane.f32.xlu0 %v2222_v24  ;;  %2878 = vadd.xlane.f32.xlu2 %v2877_v6  ;;  %v2858_v24 = vpop.xlane.xlu0 %2857  ;;  %v10722_v6 = vpop.f32.mrf.mxu1 }
 0x4d6   : > { %2217 = vmax.xlane.f32.xlu1 %v2216_v16  ;;  %2997 = vmatpush.bf16.msrb.mxu0 %v7877_v7  ;;  %8027 = vrcp.f32 %v2858_v24 }
 0x4d8   : > { %v10704_v22 = vpop.f32.mrf.mxu3 }
 0x4d9   : > { %13769 = vst [vmem:[#allocation269_spill] sm:$0xff] %v10704_v22 }
 0x4dc   : > { %v8028_v22 = vpop.eup %8027 }
 0x4dd   : > { %2220 = vmax.xlane.f32.xlu2 %v2219_v62  ;;  %v10724_v62 = vpop.f32.mrf.mxu1  ;;  %v2888_v63 = vmul.f32 %v8028_v22, %v10549_v23 }
 0x4e0   : > { %v10706_v52 = vpop.f32.mrf.mxu3 }
 0x4e1   : > { %13770 = vst [vmem:[#allocation270_spill] sm:$0xff] %v10706_v52 }
 0x4e5   : > { %v10732_v24 = vpop.f32.mrf.mxu1 }
 0x4e8   : > { %v10708_v25 = vpop.f32.mrf.mxu3 }
 0x4e9   : > { %13771 = vst [vmem:[#allocation271_spill] sm:$0xff] %v10708_v25 }
 0x4f0   : > { %v10710_v40 = vpop.f32.mrf.mxu3 }
 0x4f1   : > { %13772 = vst [vmem:[#allocation272_spill] sm:$0xff] %v10710_v40 }
 0x4f8   : > { %v10712_v49 = vpop.f32.mrf.mxu3 }
 0x4f9   : > { %13773 = vst [vmem:[#allocation273_spill] sm:$0xff] %v10712_v49 }
 0x500   : > { %v10720_v11 = vpop.f32.mrf.mxu3 }
 0x501   : > { %13774 = vst [vmem:[#allocation274_spill] sm:$0xff] %v10720_v11 }
 0x508   : > { %v10726_v46 = vpop.f32.mrf.mxu3 }
 0x509   : > { %13775 = vst [vmem:[#allocation275_spill] sm:$0xff] %v10726_v46 }
 0x518   : > { %v2861_v16 = vpop.xlane.xlu1 %2860 }
 0x519   : > { %8029 = vrcp.f32 %v2861_v16 }
 0x51f   : > { %v8030_v25 = vpop.eup %8029 }
 0x520   : > { %v2889_v52 = vmul.f32 %v8030_v25, %v10584_v5  ;;  %v2864_v49 = vpop.xlane.xlu2 %2863  ;;  %v2203_v7 = vpop.xlane.xlu1 %2202 }
 0x521   : > { %v2225_v40 = vsub.f32 %v10594_v37, %v2203_v7  ;;  %v13776_v7 = vld [vmem:[#allocation139_spill] sm:$0xff] }
 0x522   : > { %v2896_v11 = vpack.c.bf16 %v2889_v52, %v2888_v63  ;;  %v10739_v52 = vpop.f32.mrf.mxu1 }
 0x523   : > { %v2233_v10 = vmul.f32 1.442695, %v2225_v40 }
 0x524   : > { %7581 = vmatmul.msk.bf16.vlgmr.msra.gmra.mxu3 %vm2200_vm2, %v2896_v11 }
 0x525   : > { %8031 = vpow2.f32 %v2233_v10 }
 0x526   : > { %8033 = vrcp.f32 %v2864_v49 }
 0x527   : > { %v2594_v16 = vpop.f32.mrf.mxu3 }
 0x528   : > { %v2867_v57 = vpop.xlane.xlu0 %2866  ;;  %v2206_v46 = vpop.xlane.xlu2 %2205 }
 0x529   : > { %8035 = vrcp.f32 %v2867_v57  ;;  %v2226_v23 = vsub.f32 %v10608_v1, %v2206_v46 }
 0x52b   : > { %v10735_v22 = vpop.eup %8031  ;;  %v2235_v5 = vmul.f32 1.442695, %v2226_v23  ;;  %v13777_v23 = vld [vmem:[#allocation138_spill] sm:$0xff] }
 0x52c   : > { %v2249_v37 = vsel %vm2200_vm2, %v10735_v22, 0.0  ;;  %v8034_v25 = vpop.eup %8033  ;;  %v13778_v34 = vpack.c.b16 %v13776_v7, %v13777_v23 }
 0x52d   : > { %8037 = vpow2.f32 %v2235_v5  ;;  %2250 = vadd.xlane.f32.xlu1 %v2249_v37  ;;  %v2890_v49 = vmul.f32 %v8034_v25, %v10597_v32 }
 0x52e   : > { %v3429_v54 = vsel %vm2146_vm1, %v13778_v34, 0 }
 0x52f   : > { %v8036_v40 = vpop.eup %8035  ;;  %v2596_v10 = vpop.f32.mrf.mxu3 }
 0x530   : > { %v2891_v11 = vmul.f32 %v8036_v40, %v10616_v8  ;;  %v2614_v57 = vpack.c.bf16 %v2596_v10, %v2594_v16  ;;  %v2870_v63 = vpop.xlane.xlu0 %2869  ;;  %v2209_v1 = vpop.xlane.xlu2 %2208  ;;  %v13779_v40 = vpack.c.b16 %v9877_v9, %v9875_v33 }
 0x531   : > { %v2227_v46 = vsub.f32 %v10626_v45, %v2209_v1  ;;  %v10754_v8 = vpop.f32.mrf.mxu1 }
 0x532   : > { %7565 = vmatmul.msk.bf16.vlgmr.msra.gmra.mxu0 %vm2146_vm1, %v2614_v57  ;;  %v2897_v5 = vpack.c.bf16 %v2891_v11, %v2890_v49 }
 0x533   : > { %v10749_v37 = vpop.eup %8037  ;;  %v2237_v27 = vmul.f32 1.442695, %v2227_v46  ;;  %3435 = vmatpush.bf16.xpose.msra.mxu0 %v3429_v54  ;;  %v3426_v54 = vsel %vm2146_vm1, %v13779_v40, 0 }
 0x534   : > { %7582 = vmatmul.msk.bf16.gmra.mxu3 %vm2200_vm2, %v2897_v5  ;;  %v2252_v32 = vsel %vm2200_vm2, %v10749_v37, 0.0  ;;  %v13780_v5 = vpack.c.b16 %v9838_v39, %v9836_v13 }
 0x535   : > { %8039 = vpow2.f32 %v2237_v27  ;;  %2253 = vadd.xlane.f32.xlu2 %v2252_v32 }
 0x536   : > { %8041 = vrcp.f32 %v2870_v63  ;;  %v3423_v32 = vsel %vm2146_vm1, %v13780_v5, 0 }
 0x537   : > { %v2599_v45 = vpop.f32.mrf.mxu3 }
 0x538   : > { %v2212_v16 = vpop.xlane.xlu0 %2211  ;;  %v2873_v25 = vpop.xlane.xlu1 %2872 }
 0x539   : > { %v2228_v34 = vsub.f32 %v10640_v43, %v2212_v16  ;;  %8043 = vrcp.f32 %v2873_v25  ;;  %v1682_v11 = vpop.f32.mrf.mxu1  ;;  %v7878_v25 = vld [vmem:[%s13073_s5 + $0x18] sm:$0xff] }
 0x53a   : > { %3309 = vmatpush.bf16.msrb.mxu3 %v7878_v25 }
 0x53b   : > { %v10761_v10 = vpop.eup %8039  ;;  %v2239_v49 = vmul.f32 1.442695, %v2228_v34  ;;  %3436 = vmatpush.bf16.xpose.msra.mxu0 %v3426_v54 }
 0x53c   : > { %v2255_v27 = vsel %vm2200_vm2, %v10761_v10, 0.0  ;;  %v8042_v57 = vpop.eup %8041 }
 0x53d   : > { %8045 = vpow2.f32 %v2239_v49  ;;  %2256 = vadd.xlane.f32.xlu0 %v2255_v27  ;;  %v2892_v43 = vmul.f32 %v8042_v57, %v10631_v15  ;;  %v13781_v57 = vpack.c.b16 %v9804_v29, %v9802_v28  ;;  %v1740_v29 = vpack.c.bf16 %v10732_v24, %v10732_v24 }
 0x53e   : > { %v1738_v24 = vpack.c.bf16 %v10722_v6, %v10722_v6 }
 0x53f   : > { %v8044_v63 = vpop.eup %8043  ;;  %v2601_v1 = vpop.f32.mrf.mxu3 }
 0x540   : > { %v2893_v46 = vmul.f32 %v8044_v63, %v10648_v20  ;;  %v2615_v33 = vpack.c.bf16 %v2601_v1, %v2599_v45  ;;  %v2215_v9 = vpop.xlane.xlu0 %2214  ;;  %v2876_v7 = vpop.xlane.xlu1 %2875  ;;  %v3420_v63 = vsel %vm2146_vm1, %v13781_v57, 0 }
 0x541   : > { %v2229_v23 = vsub.f32 %v10660_v18, %v2215_v9  ;;  %v1685_v45 = vpop.f32.mrf.mxu1 }
 0x542   : > { %7566 = vmatmul.msk.bf16.gmra.mxu0 %vm2146_vm1, %v2615_v33  ;;  %v2898_v16 = vpack.c.bf16 %v2893_v46, %v2892_v43  ;;  %v1744_v49 = vpack.c.bf16 %v1685_v45, %v1685_v45  ;;  %v1742_v46 = vpack.c.bf16 %v10754_v8, %v10754_v8  ;;  %v1743_v33 = vpack.c.bf16 %v1682_v11, %v1682_v11 }
 0x543   : > { %v10776_v15 = vpop.eup %8045  ;;  %v2241_v20 = vmul.f32 1.442695, %v2229_v23  ;;  %3437 = vmatpush.bf16.xpose.msra.mxu0 %v3423_v32  ;;  %v1741_v32 = vpack.c.bf16 %v10739_v52, %v10739_v52 }
 0x544   : > { %7583 = vmatmul.msk.bf16.gmra.mxu3 %vm2200_vm2, %v2898_v16  ;;  %v2258_v18 = vsel %vm2200_vm2, %v10776_v15, 0.0  ;;  %v3820_v11 = vunpack.c.l.b16 %v1742_v46  ;;  %v3821_v16 = vunpack.c.l.b16 %v1743_v33 }
 0x545   : > { %8047 = vpow2.f32 %v2241_v20  ;;  %2259 = vadd.xlane.f32.xlu1 %v2258_v18 }
 0x546   : > { %8049 = vrcp.f32 %v2876_v7 }
 0x547   : > { %v2604_v13 = vpop.f32.mrf.mxu3 }
 0x548   : > { %v2224_v39 = vpop.xlane.xlu0 %2223  ;;  %v2879_v34 = vpop.xlane.xlu2 %2878 }
 0x549   : > { %v2232_v40 = vsub.f32 %v10679_v51, %v2224_v39  ;;  %8051 = vrcp.f32 %v2879_v34  ;;  %v2218_v54 = vpop.xlane.xlu1 %2217  ;;  %v1687_v7 = vpop.f32.mrf.mxu1 }
 0x54a   : > { %v2230_v27 = vsub.f32 %v10684_v3, %v2218_v54  ;;  %v3822_v3 = vunpack.c.l.b16 %v1744_v49  ;;  %v1745_v28 = vpack.c.bf16 %v1687_v7, %v1687_v7  ;;  %v1739_v54 = vpack.c.bf16 %v10724_v62, %v10724_v62 }
 0x54b   : > { %v10787_v1 = vpop.eup %8047  ;;  %v2247_v43 = vmul.f32 1.442695, %v2232_v40  ;;  %3438 = vmatpush.bf16.xpose.msra.mxu0 %v3420_v63  ;;  %v3816_v62 = vunpack.c.l.b16 %v1738_v24 }
 0x54c   : > { %v2243_v9 = vmul.f32 1.442695, %v2230_v27  ;;  %v2261_v51 = vsel %vm2200_vm2, %v10787_v1, 0.0  ;;  %v8050_v23 = vpop.eup %8049  ;;  %v3823_v25 = vunpack.c.l.b16 %v1745_v28  ;;  %v3818_v27 = vunpack.c.l.b16 %v1740_v29 }
 0x54d   : > { %8053 = vpow2.f32 %v2247_v43  ;;  %2262 = vadd.xlane.f32.xlu2 %v2261_v51  ;;  %v2894_v20 = vmul.f32 %v8050_v23, %v10663_v35  ;;  %v3819_v35 = vunpack.c.l.b16 %v1741_v32  ;;  %v3817_v63 = vunpack.c.l.b16 %v1739_v54  ;;  %v13786_v54 = vld [vmem:[#allocation150_spill] sm:$0xff] }
 0x54e   : > { %8055 = vpow2.f32 %v2243_v9  ;;  %v3827_v40 = vpack.c.b16 %v3823_v25, %v3822_v3  ;;  %v7875_v3 = vld [vmem:[%s13073_s5] sm:$0xff] }
 0x54f   : > { %v8052_v5 = vpop.eup %8051  ;;  %v2606_v8 = vpop.f32.mrf.mxu3  ;;  %v3825_v46 = vpack.c.b16 %v3819_v35, %v3818_v27  ;;  %v3824_v9 = vpack.c.b16 %v3817_v63, %v3816_v62  ;;  %2693 = vmatpush.bf16.msra.mxu1 %v7875_v3 }
 0x550   : > { %v2895_v18 = vmul.f32 %v8052_v5, %v10686_v26  ;;  %v2616_v45 = vpack.c.bf16 %v2606_v8, %v2604_v13  ;;  %v2221_v39 = vpop.xlane.xlu2 %2220  ;;  %3848 = vmatpush.bf16.msra.mxu3 %v3827_v40  ;;  %v3826_v26 = vpack.c.b16 %v3821_v16, %v3820_v11 }
 0x551   : > { %v2231_v34 = vsub.f32 %v10700_v55, %v2221_v39  ;;  %v10822_v28 = vpop.f32.mrf.mxu1 }
 0x552   : > { %7567 = vmatmul.msk.bf16.gmra.mxu0 %vm2146_vm1, %v2616_v45  ;;  %v2899_v52 = vpack.c.bf16 %v2895_v18, %v2894_v20  ;;  %13782 = vst [vmem:[#allocation139_spill] sm:$0xff] %v10822_v28 }
 0x553   : > { %v10805_v49 = vpop.eup %8053  ;;  %v2245_v57 = vmul.f32 1.442695, %v2231_v34 }
 0x554   : > { %v10807_v13 = vpop.eup %8055  ;;  %7584 = vmatmul.msk.bf16.gmra.mxu3 %vm2200_vm2, %v2899_v52  ;;  %v2270_v55 = vsel %vm2200_vm2, %v10805_v49, 0.0  ;;  %v13787_v52 = vld [vmem:[#allocation149_spill] sm:$0xff] }
 0x555   : > { %8057 = vpow2.f32 %v2245_v57  ;;  %2271 = vadd.xlane.f32.xlu2 %v2270_v55  ;;  %v2264_v6 = vsel %vm2200_vm2, %v10807_v13, 0.0  ;;  %3849 = vmatpush.bf16.msra.mxu3 %v3826_v26  ;;  %v13788_v27 = vpack.c.b16 %v13786_v54, %v13787_v52  ;;  %v13790_v26 = vpack.c.b16 %v10111_v44, %v10109_v38 }
 0x556   : > { %2265 = vadd.xlane.f32.xlu0 %v2264_v6 }
 0x557   : > { %v2609_v43 = vpop.f32.mrf.mxu3  ;;  %v3089_v35 = vsel %vm2146_vm1, %v13788_v27, 0  ;;  %v3086_v55 = vsel %vm2146_vm1, %v13790_v26, 0 }
 0x559   : > { %3850 = vmatpush.bf16.msra.mxu3 %v3825_v46  ;;  %v10824_v29 = vpop.f32.mrf.mxu1 }
 0x55a   : > { %13783 = vst [vmem:[#allocation138_spill] sm:$0xff] %v10824_v29 }
 0x55b   : > { %v10814_v33 = vpop.eup %8057 }
 0x55c   : > { %v2267_v51 = vsel %vm2200_vm2, %v10814_v33, 0.0 }
 0x55d   : > { %2268 = vadd.xlane.f32.xlu1 %v2267_v51  ;;  %3851 = vmatpush.bf16.msra.mxu3 %v3824_v9 }
 0x55f   : > { %v2611_v7 = vpop.f32.mrf.mxu3 }
 0x560   : > { %v2617_v23 = vpack.c.bf16 %v2611_v7, %v2609_v43  ;;  %v13791_v7 = vpack.c.b16 %v10079_v0, %v10077_v42 }
 0x561   : > { %v10826_v8 = vpop.f32.mrf.mxu1 }
 0x562   : > { %7568 = vmatmul.msk.bf16.gmra.mxu0 %vm2146_vm1, %v2617_v23  ;;  %13784 = vst [vmem:[#allocation276_spill] sm:$0xff] %v10826_v8  ;;  %v3083_v38 = vsel %vm2146_vm1, %v13791_v7, 0 }
 0x569   : > { %v10830_v34 = vpop.f32.mrf.mxu1 }
 0x56a   : > { %13785 = vst [vmem:[#allocation277_spill] sm:$0xff] %v10830_v34 }
 0x5a0   : > { %v2251_v5 = vpop.xlane.xlu1 %2250 }
 0x5a1   : > { %8059 = vrcp.f32 %v2251_v5 }
 0x5a7   : > { %v2945_v32 = vpop.f32.mrf.mxu3  ;;  %v8060_v16 = vpop.eup %8059 }
 0x5a8   : > { %v2254_v11 = vpop.xlane.xlu2 %2253  ;;  %v2281_v18 = vmul.f32 %v8060_v16, %v10735_v22 }
 0x5a9   : > { %8061 = vrcp.f32 %v2254_v11 }
 0x5af   : > { %v8062_v25 = vpop.eup %8061  ;;  %v2947_v20 = vpop.f32.mrf.mxu3 }
 0x5b0   : > { %v2282_v45 = vmul.f32 %v8062_v25, %v10749_v37  ;;  %v2965_v39 = vpack.c.bf16 %v2947_v20, %v2945_v32  ;;  %v2257_v24 = vpop.xlane.xlu0 %2256  ;;  %v10838_v37 = vpop.f32.mrf.mxu1 }
 0x5b1   : > { %8063 = vrcp.f32 %v2257_v24  ;;  %13789 = vst [vmem:[#allocation150_spill] sm:$0xff] %v10838_v37  ;;  %v10867_v27 = vpop.f32.mrf.mxu0 }
 0x5b2   : > { %v2289_v40 = vpack.c.bf16 %v2282_v45, %v2281_v18  ;;  %7591 = vmatmul.msk.bf16.vlgmr.msrb.gmra.mxu0 %vm2146_vm1, %v2965_v39 }
 0x5b4   : > { %7547 = vmatmul.msk.bf16.vlgmr.msrb.gmra.mxu1 %vm2200_vm2, %v2289_v40 }
 0x5b5   : > { %3095 = vmatpush.bf16.xpose.msrb.mxu1 %v3089_v35 }
 0x5b7   : > { %v2950_v57 = vpop.f32.mrf.mxu3  ;;  %v8064_v6 = vpop.eup %8063 }
 0x5b8   : > { %v2260_v22 = vpop.xlane.xlu1 %2259  ;;  %v2283_v43 = vmul.f32 %v8064_v6, %v10761_v10  ;;  %v10852_v23 = vpop.f32.mrf.mxu1  ;;  %v13799_v6 = vld [vmem:[#allocation18_spill] sm:$0xff] }
 0x5b9   : > { %8065 = vrcp.f32 %v2260_v22  ;;  %13792 = vst [vmem:[#allocation149_spill] sm:$0xff] %v10852_v23  ;;  %v10874_v22 = vpop.f32.mrf.mxu0 }
 0x5bd   : > { %3096 = vmatpush.bf16.xpose.msrb.mxu1 %v3086_v55  ;;  %v13798_v55 = vld [vmem:[#allocation20_spill] sm:$0xff] }
 0x5bf   : > { %v8066_v62 = vpop.eup %8065  ;;  %v2952_v63 = vpop.f32.mrf.mxu3 }
 0x5c0   : > { %v2284_v46 = vmul.f32 %v8066_v62, %v10776_v15  ;;  %v2966_v9 = vpack.c.bf16 %v2952_v63, %v2950_v57  ;;  %v2263_v44 = vpop.xlane.xlu2 %2262  ;;  %v13793_v15 = vpack.c.b16 %v10043_v60, %v10041_v17  ;;  %v10858_v16 = vpop.f32.mrf.mxu1 }
 0x5c1   : > { %8067 = vrcp.f32 %v2263_v44  ;;  %13794 = vst [vmem:[#allocation278_spill] sm:$0xff] %v10858_v16  ;;  %v10882_v62 = vpop.f32.mrf.mxu0  ;;  %v13807_v44 = vld [vmem:[#allocation34_spill] sm:$0xff] }
 0x5c2   : > { %7592 = vmatmul.msk.bf16.gmra.mxu0 %vm2146_vm1, %v2966_v9  ;;  %v2290_v51 = vpack.c.bf16 %v2284_v46, %v2283_v43  ;;  %v3080_v5 = vsel %vm2146_vm1, %v13793_v15, 0  ;;  %v13803_v46 = vld [vmem:[#allocation26_spill] sm:$0xff]  ;;  %v13804_v9 = vld [vmem:[#allocation24_spill] sm:$0xff] }
 0x5c4   : > { %7548 = vmatmul.msk.bf16.gmra.mxu1 %vm2200_vm2, %v2290_v51  ;;  %v13805_v51 = vpack.c.b16 %v13803_v46, %v13804_v9 }
 0x5c5   : > { %3097 = vmatpush.bf16.xpose.msrb.mxu1 %v3083_v38 }
 0x5c7   : > { %v2955_v3 = vpop.f32.mrf.mxu3  ;;  %v8068_v32 = vpop.eup %8067 }
 0x5c8   : > { %v2285_v25 = vmul.f32 %v8068_v32, %v10787_v1  ;;  %v2272_v39 = vpop.xlane.xlu2 %2271  ;;  %v10864_v17 = vpop.f32.mrf.mxu1 }
 0x5c9   : > { %v2266_v10 = vpop.xlane.xlu0 %2265  ;;  %13795 = vst [vmem:[#allocation279_spill] sm:$0xff] %v10864_v17  ;;  %v13838_v17 = vld [vmem:[#allocation176_spill] sm:$0xff] }
 0x5ca   : > { %8069 = vrcp.f32 %v2266_v10 }
 0x5cd   : > { %3098 = vmatpush.bf16.xpose.msrb.mxu1 %v3080_v5 }
 0x5cf   : > { %v2957_v11 = vpop.f32.mrf.mxu3 }
 0x5d0   : > { %v8070_v42 = vpop.eup %8069  ;;  %v2967_v0 = vpack.c.bf16 %v2957_v11, %v2955_v3  ;;  %v2269_v18 = vpop.xlane.xlu1 %2268  ;;  %v13808_v3 = vld [vmem:[#allocation32_spill] sm:$0xff] }
 0x5d1   : > { %v2286_v20 = vmul.f32 %v8070_v42, %v10807_v13  ;;  %8071 = vrcp.f32 %v2269_v18  ;;  %v10871_v57 = vpop.f32.mrf.mxu1  ;;  %v13809_v10 = vpack.c.b16 %v13807_v44, %v13808_v3  ;;  %v13812_v42 = vld [vmem:[#allocation42_spill] sm:$0xff] }
 0x5d2   : > { %7593 = vmatmul.msk.bf16.gmra.mxu0 %vm2146_vm1, %v2967_v0  ;;  %8073 = vrcp.f32 %v2272_v39  ;;  %13796 = vst [vmem:[#allocation280_spill] sm:$0xff] %v10871_v57  ;;  %v13813_v0 = vld [vmem:[#allocation40_spill] sm:$0xff] }
 0x5d3   : > { %v2291_v45 = vpack.c.bf16 %v2286_v20, %v2285_v25  ;;  %v13814_v25 = vpack.c.b16 %v13812_v42, %v13813_v0 }
 0x5d5   : > { %7549 = vmatmul.msk.bf16.gmra.mxu1 %vm2200_vm2, %v2291_v45 }
 0x5d7   : > { %v2960_v60 = vpop.f32.mrf.mxu3  ;;  %v8072_v40 = vpop.eup %8071 }
 0x5d8   : > { %v8074_v24 = vpop.eup %8073  ;;  %v2287_v54 = vmul.f32 %v8072_v40, %v10814_v33  ;;  %v13800_v33 = vpack.c.b16 %v13798_v55, %v13799_v6  ;;  %v13819_v6 = vpack.c.b16 %v10267_v61, %v10265_v12 }
 0x5d9   : > { %v2288_v13 = vmul.f32 %v8074_v24, %v10805_v49  ;;  %v10876_v26 = vpop.f32.mrf.mxu1  ;;  %v10886_v49 = vpop.f32.mrf.mxu0 }
 0x5da   : > { %13797 = vst [vmem:[#allocation281_spill] sm:$0xff] %v10876_v26 }
 0x5db   : > { %v2292_v35 = vpack.c.bf16 %v2288_v13, %v2287_v54  ;;  %v13816_v54 = vpack.c.b16 %v9925_v58, %v9917_v31 }
 0x5df   : > { %v2962_v52 = vpop.f32.mrf.mxu3 }
 0x5e0   : > { %v2968_v1 = vpack.c.bf16 %v2962_v52, %v2960_v60 }
 0x5e1   : > { %v10884_v63 = vpop.f32.mrf.mxu1  ;;  %v10894_v7 = vpop.f32.mrf.mxu0 }
 0x5e2   : > { %7594 = vmatmul.msk.bf16.gmra.mxu0 %vm2146_vm1, %v2968_v1  ;;  %13801 = vst [vmem:[#allocation20_spill] sm:$0xff] %v10884_v63  ;;  %v13817_v1 = vpack.c.b16 %v10327_v56, %v10325_v59 }
 0x5e5   : > { %7550 = vmatmul.msk.bf16.gmra.mxu1 %vm2200_vm2, %v2292_v35  ;;  %v13818_v35 = vpack.c.b16 %v10305_v53, %v10303_v4 }
 0x5e9   : > { %v10888_v43 = vpop.f32.mrf.mxu1  ;;  %v10902_v15 = vpop.f32.mrf.mxu0 }
 0x5ea   : > { %13802 = vst [vmem:[#allocation18_spill] sm:$0xff] %v10888_v43 }
 0x5f1   : > { %v10896_v38 = vpop.f32.mrf.mxu1  ;;  %v10906_v32 = vpop.f32.mrf.mxu0 }
 0x5f2   : > { %7613 = vmatmul.msk.bf16.vlgmr.msra.gmra.mxu0 %vm2146_vm1, %v13800_v33  ;;  %13806 = vst [vmem:[#allocation26_spill] sm:$0xff] %v10896_v38 }
 0x5f9   : > { %v10904_v5 = vpop.f32.mrf.mxu1  ;;  %v10914_v20 = vpop.f32.mrf.mxu0 }
 0x5fa   : > { %13810 = vst [vmem:[#allocation24_spill] sm:$0xff] %v10904_v5 }
 0x601   : > { %v10908_v11 = vpop.f32.mrf.mxu1 }
 0x602   : > { %7614 = vmatmul.msk.bf16.gmra.mxu0 %vm2146_vm1, %v13805_v51  ;;  %13811 = vst [vmem:[#allocation34_spill] sm:$0xff] %v10908_v11 }
 0x609   : > { %v10916_v18 = vpop.f32.mrf.mxu1 }
 0x60a   : > { %13815 = vst [vmem:[#allocation32_spill] sm:$0xff] %v10916_v18 }
 0x612   : > { %7615 = vmatmul.msk.bf16.gmra.mxu0 %vm2146_vm1, %v13809_v10 }
 0x622   : > { %7616 = vmatmul.msk.bf16.gmra.mxu0 %vm2146_vm1, %v13814_v25 }
 0x62f   : > { %v10918_v45 = vpop.f32.mrf.mxu0 }
 0x631   : > { %v2338_v39 = vpop.f32.mrf.mxu1 }
 0x637   : > { %v10920_v60 = vpop.f32.mrf.mxu0 }
 0x639   : > { %v2340_v40 = vpop.f32.mrf.mxu1 }
 0x63a   : > { %v2358_v24 = vpack.c.bf16 %v2340_v40, %v2338_v39  ;;  %v13820_v39 = vld [vmem:[#allocation31_spill] sm:$0xff]  ;;  %v13821_v40 = vld [vmem:[#allocation30_spill] sm:$0xff] }
 0x63c   : > { %7573 = vmatmul.msk.bf16.vlgmr.msra.gmra.mxu1 %vm2146_vm1, %v2358_v24  ;;  %v13822_v24 = vpack.c.b16 %v13820_v39, %v13821_v40 }
 0x63d   : > { %3592 = vmatpush.bf16.msra.mxu1 %v13816_v54 }
 0x63f   : > { %v10926_v52 = vpop.f32.mrf.mxu0 }
 0x641   : > { %3593 = vmatpush.bf16.msra.mxu1 %v13817_v1  ;;  %v2343_v13 = vpop.f32.mrf.mxu1 }
 0x645   : > { %3594 = vmatpush.bf16.msra.mxu1 %v13818_v35 }
 0x647   : > { %v10934_v55 = vpop.f32.mrf.mxu0 }
 0x649   : > { %3595 = vmatpush.bf16.msra.mxu1 %v13819_v6  ;;  %v2345_v33 = vpop.f32.mrf.mxu1 }
 0x64a   : > { %v2359_v58 = vpack.c.bf16 %v2345_v33, %v2343_v13 }
 0x64c   : > { %7574 = vmatmul.msk.bf16.gmra.mxu1 %vm2146_vm1, %v2359_v58  ;;  %v13823_v58 = vld [vmem:[#allocation39_spill] sm:$0xff] }
 0x64f   : > { %v10940_v31 = vpop.f32.mrf.mxu0 }
 0x652   : > { %v2348_v46 = vpop.f32.mrf.mxu1 }
 0x657   : > { %v10942_v59 = vpop.f32.mrf.mxu0 }
 0x65a   : > { %v2350_v56 = vpop.f32.mrf.mxu1 }
 0x65b   : > { %v2360_v9 = vpack.c.bf16 %v2350_v56, %v2348_v46  ;;  %v13824_v46 = vld [vmem:[#allocation38_spill] sm:$0xff] }
 0x65c   : > { %v13825_v56 = vpack.c.b16 %v13823_v58, %v13824_v46  ;;  %v13829_v58 = vld [vmem:[#allocation55_spill] sm:$0xff]  ;;  %v13830_v46 = vld [vmem:[#allocation54_spill] sm:$0xff] }
 0x65d   : > { %7575 = vmatmul.msk.bf16.gmra.mxu1 %vm2146_vm1, %v2360_v9 }
 0x65f   : > { %v10945_v4 = vpop.f32.mrf.mxu0 }
 0x662   : > { %v2353_v53 = vpop.f32.mrf.mxu1 }
 0x667   : > { %v10947_v51 = vpop.f32.mrf.mxu0 }
 0x66a   : > { %v2355_v61 = vpop.f32.mrf.mxu1 }
 0x66b   : > { %v2361_v12 = vpack.c.bf16 %v2355_v61, %v2353_v53 }
 0x66d   : > { %7576 = vmatmul.msk.bf16.gmra.mxu1 %vm2146_vm1, %v2361_v12 }
 0x66f   : > { %v3440_v44 = vpop.f32.mrf.mxu0 }
 0x670   : > { %v3441_v3 = vadd.f32 %v10586_v47, %v3440_v44 }
 0x672   : > { %v3460_v10 = vsel %vm2200_vm2, %v3441_v3, -inf }
 0x673   : > { %3461 = vmax.xlane.f32.xlu0 %v3460_v10 }
 0x677   : > { %v3442_v42 = vpop.f32.mrf.mxu0 }
 0x678   : > { %v3443_v0 = vadd.f32 %v10599_v41, %v3442_v42  ;;  %v13826_v42 = vld [vmem:[#allocation47_spill] sm:$0xff] }
 0x67a   : > { %v3463_v25 = vsel %vm2200_vm2, %v3443_v0, -inf }
 0x67b   : > { %3464 = vmax.xlane.f32.xlu1 %v3463_v25  ;;  %v13827_v25 = vld [vmem:[#allocation46_spill] sm:$0xff] }
 0x67c   : > { %v13828_v39 = vpack.c.b16 %v13826_v42, %v13827_v25 }
 0x67d   : > { %7595 = vmatmul.msk.bf16.vlgmr.msrb.gmra.mxu1 %vm2146_vm1, %v13822_v24 }
 0x67f   : > { %v3445_v54 = vpop.f32.mrf.mxu0 }
 0x680   : > { %v3446_v1 = vadd.f32 %v10618_v19, %v3445_v54 }
 0x682   : > { %v3466_v13 = vsel %vm2200_vm2, %v3446_v1, -inf }
 0x683   : > { %3467 = vmax.xlane.f32.xlu2 %v3466_v13 }
 0x687   : > { %v3447_v35 = vpop.f32.mrf.mxu0 }
 0x688   : > { %v3448_v6 = vadd.f32 %v10633_v21, %v3447_v35 }
 0x68a   : > { %v3469_v33 = vsel %vm2200_vm2, %v3448_v6, -inf }
 0x68b   : > { %3470 = vmax.xlane.f32.xlu0 %v3469_v33 }
 0x68d   : > { %7596 = vmatmul.msk.bf16.gmra.mxu1 %vm2146_vm1, %v13825_v56  ;;  %v13831_v56 = vpack.c.b16 %v13829_v58, %v13830_v46 }
 0x68f   : > { %v3450_v9 = vpop.f32.mrf.mxu0 }
 0x690   : > { %v10967_v53 = vadd.f32 %v10652_v48, %v3450_v9 }
 0x692   : > { %v3472_v61 = vsel %vm2200_vm2, %v10967_v53, -inf }
 0x693   : > { %3473 = vmax.xlane.f32.xlu1 %v3472_v61 }
 0x697   : > { %v3452_v12 = vpop.f32.mrf.mxu0 }
 0x698   : > { %v10972_v44 = vadd.f32 %v10674_v36, %v3452_v12 }
 0x69a   : > { %v3475_v10 = vsel %vm2200_vm2, %v10972_v44, -inf }
 0x69b   : > { %3476 = vmax.xlane.f32.xlu2 %v3475_v10 }
 0x69d   : > { %7597 = vmatmul.msk.bf16.gmra.mxu1 %vm2146_vm1, %v13828_v39 }
 0x69f   : > { %v3455_v40 = vpop.f32.mrf.mxu0 }
 0x6a0   : > { %v10981_v24 = vadd.f32 %v10688_v30, %v3455_v40 }
 0x6a2   : > { %v3478_v54 = vsel %vm2200_vm2, %v10981_v24, -inf }
 0x6a3   : > { %3479 = vmax.xlane.f32.xlu0 %v3478_v54 }
 0x6a7   : > { %v3457_v13 = vpop.f32.mrf.mxu0 }
 0x6a8   : > { %v10986_v35 = vadd.f32 %v10668_v50, %v3457_v13 }
 0x6aa   : > { %v3481_v33 = vsel %vm2200_vm2, %v10986_v35, -inf }
 0x6ab   : > { %3482 = vmax.xlane.f32.xlu1 %v3481_v33 }
 0x6ad   : > { %7598 = vmatmul.msk.bf16.gmra.mxu1 %vm2146_vm1, %v13831_v56 }
 0x6b9   : > { %v10994_v9 = vpop.f32.mrf.mxu1 }
 0x6c1   : > { %v10996_v61 = vpop.f32.mrf.mxu1 }
 0x6c9   : > { %v10998_v12 = vpop.f32.mrf.mxu1 }
 0x6d1   : > { %v11000_v10 = vpop.f32.mrf.mxu1 }
 0x6da   : > { %v11002_v42 = vpop.f32.mrf.mxu1 }
 0x6e2   : > { %v11004_v25 = vpop.f32.mrf.mxu1 }
 0x6e6   : > { %v3462_v39 = vpop.xlane.xlu0 %3461 }
 0x6e7   : > { %v3484_v40 = vsub.f32 %v3441_v3, %v3462_v39  ;;  %v7966_v3 = vld [vmem:[%s13072_s4 + $0x60] sm:$0xff]  }
 0x6e8   : > { %v11028_v5 = vunpack.c.h.bf16 %v7966_v3 }
 0x6e9   : > { %v3492_v54 = vmul.f32 1.442695, %v3484_v40 }
 0x6ea   : > { %v11006_v13 = vpop.f32.mrf.mxu1  ;;  %13833 = vst [vmem:[#allocation40_spill] sm:$0xff] %v11028_v5 }
 0x6eb   : > { %8075 = vpow2.f32 %v3492_v54 }
 0x6ee   : > { %v3465_v33 = vpop.xlane.xlu1 %3464 }
 0x6ef   : > { %v3485_v58 = vsub.f32 %v3443_v0, %v3465_v33  ;;  %v11019_v0 = vunpack.c.l.bf16 %v7966_v3  ;;  %v7967_v3 = vld [vmem:[%s13072_s4 + $0x68] sm:$0xff]  }
 0x6f0   : > { %v11055_v30 = vunpack.c.h.bf16 %v7967_v3 }
 0x6f1   : > { %v11008_v46 = vpop.eup %8075  ;;  %v3494_v56 = vmul.f32 1.442695, %v3485_v58  ;;  %13832 = vst [vmem:[#allocation42_spill] sm:$0xff] %v11019_v0 }
 0x6f2   : > { %v11010_v26 = vpop.f32.mrf.mxu1  ;;  %v3508_v57 = vsel %vm2200_vm2, %v11008_v46, 0.0  ;;  %13834 = vst [vmem:[#allocation31_spill] sm:$0xff] %v11055_v30 }
 0x6f3   : > { %8077 = vpow2.f32 %v3494_v56  ;;  %3509 = vadd.xlane.f32.xlu2 %v3508_v57 }
 0x6f6   : > { %v3468_v43 = vpop.xlane.xlu2 %3467 }
 0x6f7   : > { %v3486_v63 = vsub.f32 %v3446_v1, %v3468_v43 }
 0x6f9   : > { %v11017_v39 = vpop.eup %8077  ;;  %v3496_v40 = vmul.f32 1.442695, %v3486_v63 }
 0x6fa   : > { %v3100_v54 = vpop.f32.mrf.mxu1  ;;  %v3511_v33 = vsel %vm2200_vm2, %v11017_v39, 0.0 }
 0x6fb   : > { %8079 = vpow2.f32 %v3496_v40  ;;  %3512 = vadd.xlane.f32.xlu0 %v3511_v33  ;;  %v11024_v58 = vadd.f32 %v11019_v0, %v3100_v54 }
 0x6fd   : > { %v3120_v18 = vsel %vm2200_vm2, %v11024_v58, -inf }
 0x6fe   : > { %v3471_v57 = vpop.xlane.xlu0 %3470 }
 0x6ff   : > { %v3487_v43 = vsub.f32 %v3448_v6, %v3471_v57 }
 0x701   : > { %v11026_v1 = vpop.eup %8079  ;;  %v3498_v56 = vmul.f32 1.442695, %v3487_v43  ;;  %v11043_v43 = vunpack.c.l.bf16 %v7967_v3  ;;  %v7968_v3 = vld [vmem:[%s13072_s4 + $0x70] sm:$0xff]  }
 0x702   : > { %v3102_v38 = vpop.f32.mrf.mxu1  ;;  %v3514_v63 = vsel %vm2200_vm2, %v11026_v1, 0.0  ;;  %v11082_v21 = vunpack.c.h.bf16 %v7968_v3 }
 0x703   : > { %8081 = vpow2.f32 %v3498_v56  ;;  %3515 = vadd.xlane.f32.xlu1 %v3514_v63  ;;  %3121 = vmax.xlane.f32.xlu0 %v3120_v18  ;;  %v11035_v40 = vadd.f32 %v11028_v5, %v3102_v38 }
 0x704   : > { %13835 = vst [vmem:[#allocation30_spill] sm:$0xff] %v11082_v21 }
 0x705   : > { %v3123_v38 = vsel %vm2200_vm2, %v11035_v40, -inf }
 0x706   : > { %v3474_v54 = vpop.xlane.xlu1 %3473 }
 0x707   : > { %v3488_v6 = vsub.f32 %v10967_v53, %v3474_v54 }
 0x709   : > { %v11041_v33 = vpop.eup %8081  ;;  %v3500_v57 = vmul.f32 1.442695, %v3488_v6 }
 0x70a   : > { %v3105_v11 = vpop.f32.mrf.mxu1  ;;  %v3517_v56 = vsel %vm2200_vm2, %v11041_v33, 0.0 }
 0x70b   : > { %8083 = vpow2.f32 %v3500_v57  ;;  %3518 = vadd.xlane.f32.xlu2 %v3517_v56  ;;  %3124 = vmax.xlane.f32.xlu1 %v3123_v38  ;;  %v11050_v18 = vadd.f32 %v11043_v43, %v3105_v11 }
 0x70d   : > { %v3126_v50 = vsel %vm2200_vm2, %v11050_v18, -inf }
 0x70e   : > { %v3477_v53 = vpop.xlane.xlu2 %3476 }
 0x70f   : > { %v3489_v63 = vsub.f32 %v10972_v44, %v3477_v53 }
 0x711   : > { %v11053_v54 = vpop.eup %8083  ;;  %v3502_v6 = vmul.f32 1.442695, %v3489_v63  ;;  %v11070_v63 = vunpack.c.l.bf16 %v7968_v3 }
 0x712   : > { %v3107_v36 = vpop.f32.mrf.mxu1  ;;  %v3520_v57 = vsel %vm2200_vm2, %v11053_v54, 0.0 }
 0x713   : > { %8085 = vpow2.f32 %v3502_v6  ;;  %3127 = vmax.xlane.f32.xlu1 %v3126_v50  ;;  %3521 = vadd.xlane.f32.xlu2 %v3520_v57  ;;  %v11062_v11 = vadd.f32 %v11055_v30, %v3107_v36 }
 0x715   : > { %v3129_v36 = vsel %vm2200_vm2, %v11062_v11, -inf }
 0x716   : > { %v3480_v56 = vpop.xlane.xlu0 %3479 }
 0x717   : > { %v3490_v44 = vsub.f32 %v10981_v24, %v3480_v56 }
 0x719   : > { %v11068_v38 = vpop.eup %8085  ;;  %v3504_v53 = vmul.f32 1.442695, %v3490_v44 }
 0x71a   : > { %v3110_v48 = vpop.f32.mrf.mxu1  ;;  %v3523_v50 = vsel %vm2200_vm2, %v11068_v38, 0.0 }
 0x71b   : > { %8087 = vpow2.f32 %v3504_v53  ;;  %3524 = vadd.xlane.f32.xlu0 %v3523_v50  ;;  %3130 = vmax.xlane.f32.xlu2 %v3129_v36  ;;  %v11077_v24 = vadd.f32 %v11070_v63, %v3110_v48 }
 0x71d   : > { %v3132_v53 = vsel %vm2200_vm2, %v11077_v24, -inf }
 0x71e   : > { %v3483_v6 = vpop.xlane.xlu1 %3482 }
 0x71f   : > { %v3491_v57 = vsub.f32 %v10986_v35, %v3483_v6  ;;  %v7969_v35 = vld [vmem:[%s13072_s4 + $0x78] sm:$0xff]  }
 0x720   : > { %v11096_v3 = vunpack.c.l.bf16 %v7969_v35 }
 0x721   : > { %v11080_v56 = vpop.eup %8087  ;;  %v3506_v44 = vmul.f32 1.442695, %v3491_v57 }
 0x722   : > { %v3112_v19 = vpop.f32.mrf.mxu1  ;;  %v3526_v41 = vsel %vm2200_vm2, %v11080_v56, 0.0  ;;  %13836 = vst [vmem:[#allocation39_spill] sm:$0xff] %v11096_v3 }
 0x723   : > { %8089 = vpow2.f32 %v3506_v44  ;;  %3527 = vadd.xlane.f32.xlu0 %v3526_v41  ;;  %3133 = vmax.xlane.f32.xlu2 %v3132_v53  ;;  %v11089_v48 = vadd.f32 %v11082_v21, %v3112_v19  ;;  %v11105_v19 = vunpack.c.h.bf16 %v7969_v35 }
 0x725   : > { %v3135_v6 = vsel %vm2200_vm2, %v11089_v48, -inf  ;;  %13837 = vst [vmem:[#allocation38_spill] sm:$0xff] %v11105_v19 }
 0x729   : > { %v11094_v50 = vpop.eup %8089 }
 0x72a   : > { %v3115_v36 = vpop.f32.mrf.mxu1  ;;  %v3529_v57 = vsel %vm2200_vm2, %v11094_v50, 0.0 }
 0x72b   : > { %3136 = vmax.xlane.f32.xlu0 %v3135_v6  ;;  %3530 = vadd.xlane.f32.xlu1 %v3529_v57  ;;  %v11103_v41 = vadd.f32 %v11096_v3, %v3115_v36  ;;  %v7879_v6 = vld [vmem:[%s13073_s5] sm:$0xff] }
 0x72c   : > { %3951 = vmatpush.bf16.msrb.mxu1 %v7879_v6  ;;  %v13839_v6 = vld [vmem:[#allocation175_spill] sm:$0xff] }
 0x72d   : > { %v3138_v53 = vsel %vm2200_vm2, %v11103_v41, -inf  ;;  %v13840_v16 = vpack.c.b16 %v13838_v17, %v13839_v6  ;;  %v13842_v6 = vld [vmem:[#allocation144_spill] sm:$0xff] }
 0x732   : > { %v3117_v44 = vpop.f32.mrf.mxu1 }
 0x733   : > { %v11110_v47 = vadd.f32 %v11105_v19, %v3117_v44  ;;  %3139 = vmax.xlane.f32.xlu1 %v3138_v53 }
 0x735   : > { %v3141_v29 = vsel %vm2200_vm2, %v11110_v47, -inf }
 0x736   : > { %3142 = vmax.xlane.f32.xlu2 %v3141_v29 }
 0x766   : > { %v3510_v36 = vpop.xlane.xlu2 %3509 }
 0x767   : > { %8091 = vrcp.f32 %v3510_v36  ;;  %v4346_v36 = vsel %vm2146_vm1, %v13840_v16, 0 }
 0x76d   : > { %v8092_v57 = vpop.eup %8091 }
 0x76e   : > { %v3513_v35 = vpop.xlane.xlu0 %3512  ;;  %v3540_v34 = vmul.f32 %v8092_v57, %v11008_v46 }
 0x76f   : > { %8093 = vrcp.f32 %v3513_v35 }
 0x775   : > { %v8094_v28 = vpop.eup %8093 }
 0x776   : > { %v3541_v44 = vmul.f32 %v8094_v28, %v11017_v39  ;;  %v3122_v53 = vpop.xlane.xlu0 %3121  ;;  %v3516_v8 = vpop.xlane.xlu1 %3515 }
 0x777   : > { %v3144_v23 = vsub.f32 %v11024_v58, %v3122_v53 }
 0x778   : > { %v3548_v29 = vpack.c.bf16 %v3541_v44, %v3540_v34  ;;  %v13841_v34 = vpack.c.b16 %v10206_v2, %v10204_v14 }
 0x779   : > { %v3152_v37 = vmul.f32 1.442695, %v3144_v23 }
 0x77a   : > { %7617 = vmatmul.msk.bf16.vlgmr.msra.gmra.mxu1 %vm2200_vm2, %v3548_v29  ;;  %v4343_v23 = vsel %vm2146_vm1, %v13841_v34, 0 }
 0x77b   : > { %8095 = vpow2.f32 %v3152_v37  ;;  %4352 = vmatpush.bf16.xpose.msra.mxu1 %v4346_v36  ;;  %v13843_v36 = vld [vmem:[#allocation140_spill] sm:$0xff] }
 0x77c   : > { %8097 = vrcp.f32 %v3516_v8 }
 0x77e   : > { %v3519_v35 = vpop.xlane.xlu2 %3518  ;;  %v3125_v46 = vpop.xlane.xlu1 %3124 }
 0x77f   : > { %8099 = vrcp.f32 %v3519_v35  ;;  %v3145_v28 = vsub.f32 %v11035_v40, %v3125_v46  ;;  %v13844_v35 = vpack.c.b16 %v13842_v6, %v13843_v36 }
 0x781   : > { %v11126_v39 = vpop.eup %8095  ;;  %v3154_v58 = vmul.f32 1.442695, %v3145_v28  ;;  %v4340_v46 = vsel %vm2146_vm1, %v13844_v35, 0 }
 0x782   : > { %v3168_v17 = vsel %vm2200_vm2, %v11126_v39, 0.0  ;;  %v8098_v16 = vpop.eup %8097 }
 0x783   : > { %8101 = vpow2.f32 %v3154_v58  ;;  %4353 = vmatpush.bf16.xpose.msra.mxu1 %v4343_v23  ;;  %3169 = vadd.xlane.f32.xlu0 %v3168_v17  ;;  %v3542_v37 = vmul.f32 %v8098_v16, %v11026_v1  ;;  %v13845_v23 = vld [vmem:[#allocation137_spill] sm:$0xff]  ;;  %v13846_v17 = vld [vmem:[#allocation134_spill] sm:$0xff] }
 0x784   : > { %v13847_v16 = vpack.c.b16 %v13845_v23, %v13846_v17 }
 0x785   : > { %v8100_v8 = vpop.eup %8099 }
 0x786   : > { %v3543_v40 = vmul.f32 %v8100_v8, %v11041_v33  ;;  %v3522_v57 = vpop.xlane.xlu2 %3521  ;;  %v3128_v44 = vpop.xlane.xlu1 %3127  ;;  %v4337_v8 = vsel %vm2146_vm1, %v13847_v16, 0 }
 0x787   : > { %v3146_v53 = vsub.f32 %v11050_v18, %v3128_v44 }
 0x788   : > { %v3549_v29 = vpack.c.bf16 %v3543_v40, %v3542_v37 }
 0x789   : > { %v11137_v14 = vpop.eup %8101  ;;  %v3156_v2 = vmul.f32 1.442695, %v3146_v53 }
 0x78a   : > { %7618 = vmatmul.msk.bf16.gmra.mxu1 %vm2200_vm2, %v3549_v29  ;;  %v3171_v1 = vsel %vm2200_vm2, %v11137_v14, 0.0 }
 0x78b   : > { %8103 = vpow2.f32 %v3156_v2  ;;  %4354 = vmatpush.bf16.xpose.msra.mxu1 %v4340_v46  ;;  %3172 = vadd.xlane.f32.xlu1 %v3171_v1 }
 0x78c   : > { %8105 = vrcp.f32 %v3522_v57 }
 0x78e   : > { %v3525_v33 = vpop.xlane.xlu0 %3524  ;;  %v3131_v18 = vpop.xlane.xlu2 %3130 }
 0x78f   : > { %8107 = vrcp.f32 %v3525_v33  ;;  %v3147_v28 = vsub.f32 %v11062_v11, %v3131_v18 }
 0x791   : > { %v11147_v58 = vpop.eup %8103  ;;  %v3158_v34 = vmul.f32 1.442695, %v3147_v28 }
 0x792   : > { %v3174_v37 = vsel %vm2200_vm2, %v11147_v58, 0.0  ;;  %v8106_v40 = vpop.eup %8105 }
 0x793   : > { %8109 = vpow2.f32 %v3158_v34  ;;  %4355 = vmatpush.bf16.xpose.msra.mxu1 %v4337_v8  ;;  %3175 = vadd.xlane.f32.xlu2 %v3174_v37  ;;  %v3544_v44 = vmul.f32 %v8106_v40, %v11053_v54 }
 0x795   : > { %v8108_v57 = vpop.eup %8107 }
 0x796   : > { %v3545_v11 = vmul.f32 %v8108_v57, %v11068_v38  ;;  %v3528_v53 = vpop.xlane.xlu0 %3527  ;;  %v3134_v29 = vpop.xlane.xlu2 %3133 }
 0x797   : > { %v3148_v2 = vsub.f32 %v11077_v24, %v3134_v29 }
 0x798   : > { %v3550_v6 = vpack.c.bf16 %v3545_v11, %v3544_v44 }
 0x799   : > { %v11158_v36 = vpop.eup %8109  ;;  %v3160_v35 = vmul.f32 1.442695, %v3148_v2  ;;  %v13848_v2 = vld [vmem:[#allocation207_spill] sm:$0xff] }
 0x79a   : > { %7619 = vmatmul.msk.bf16.gmra.mxu1 %vm2200_vm2, %v3550_v6  ;;  %v3177_v46 = vsel %vm2200_vm2, %v11158_v36, 0.0  ;;  %v1614_v6 = vpack.c.bf16 %v13848_v2, %v13848_v2 }
 0x79b   : > { %8111 = vpow2.f32 %v3160_v35  ;;  %3178 = vadd.xlane.f32.xlu0 %v3177_v46  ;;  %v13849_v35 = vld [vmem:[#allocation231_spill] sm:$0xff] }
 0x79c   : > { %8113 = vrcp.f32 %v3528_v53  ;;  %v1615_v46 = vpack.c.bf16 %v13849_v35, %v13849_v35  ;;  %v13855_v35 = vld [vmem:[#allocation200_spill] sm:$0xff] }
 0x79e   : > { %v3137_v1 = vpop.xlane.xlu0 %3136  ;;  %v3531_v54 = vpop.xlane.xlu1 %3530 }
 0x79f   : > { %v3149_v38 = vsub.f32 %v11089_v48, %v3137_v1  ;;  %8115 = vrcp.f32 %v3531_v54  ;;  %v13850_v54 = vld [vmem:[#allocation195_spill] sm:$0xff] }
 0x7a1   : > { %v11164_v33 = vpop.eup %8111  ;;  %v3162_v24 = vmul.f32 1.442695, %v3149_v38  ;;  %v1612_v38 = vpack.c.bf16 %v13850_v54, %v13850_v54 }
 0x7a2   : > { %v3180_v18 = vsel %vm2200_vm2, %v11164_v33, 0.0  ;;  %v8114_v28 = vpop.eup %8113 }
 0x7a3   : > { %8117 = vpow2.f32 %v3162_v24  ;;  %3181 = vadd.xlane.f32.xlu1 %v3180_v18  ;;  %v3546_v23 = vmul.f32 %v8114_v28, %v11080_v56  ;;  %v13851_v24 = vld [vmem:[#allocation145_spill] sm:$0xff]  ;;  %v4819_v28 = vunpack.c.l.b16 %v1614_v6 }
 0x7a4   : > { %v1613_v18 = vpack.c.bf16 %v13851_v24, %v13851_v24 }
 0x7a5   : > { %v8116_v34 = vpop.eup %8115 }
 0x7a6   : > { %v3547_v17 = vmul.f32 %v8116_v34, %v11094_v50  ;;  %v3140_v16 = vpop.xlane.xlu1 %3139  ;;  %v4820_v34 = vunpack.c.l.b16 %v1615_v46  ;;  %v1609_v46 = vpack.c.bf16 %v13855_v35, %v13855_v35 }
 0x7a7   : > { %v3150_v8 = vsub.f32 %v11103_v41, %v3140_v16  ;;  %v13852_v16 = vld [vmem:[#allocation166_spill] sm:$0xff] }
 0x7a8   : > { %v3551_v37 = vpack.c.bf16 %v3547_v17, %v3546_v23 }
 0x7a9   : > { %v11171_v48 = vpop.eup %8117  ;;  %v3164_v40 = vmul.f32 1.442695, %v3150_v8  ;;  %v3143_v57 = vpop.xlane.xlu2 %3142  ;;  %v1610_v8 = vpack.c.bf16 %v13852_v16, %v13852_v16 }
 0x7aa   : > { %v3151_v44 = vsub.f32 %v11110_v47, %v3143_v57  ;;  %7620 = vmatmul.msk.bf16.gmra.mxu1 %vm2200_vm2, %v3551_v37  ;;  %v3183_v11 = vsel %vm2200_vm2, %v11171_v48, 0.0 }
 0x7ab   : > { %8119 = vpow2.f32 %v3164_v40  ;;  %3184 = vadd.xlane.f32.xlu2 %v3183_v11  ;;  %v13853_v40 = vld [vmem:[#allocation170_spill] sm:$0xff]  ;;  %v4818_v11 = vunpack.c.l.b16 %v1613_v18 }
 0x7ac   : > { %v3166_v56 = vmul.f32 1.442695, %v3151_v44  ;;  %v1611_v57 = vpack.c.bf16 %v13853_v40, %v13853_v40  ;;  %v4817_v44 = vunpack.c.l.b16 %v1612_v38  ;;  %v13857_v40 = vld [vmem:[#allocation142_spill] sm:$0xff] }
 0x7ae   : > { %8121 = vpow2.f32 %v3166_v56  ;;  %v4824_v56 = vpack.c.b16 %v4820_v34, %v4819_v28  ;;  %v4816_v54 = vunpack.c.l.b16 %v1611_v57 }
 0x7b1   : > { %v11177_v50 = vpop.eup %8119 }
 0x7b2   : > { %v3186_v41 = vsel %vm2200_vm2, %v11177_v50, 0.0 }
 0x7b3   : > { %3187 = vadd.xlane.f32.xlu0 %v3186_v41 }
 0x7b4   : > { %v11181_v53 = vpop.eup %8121 }
 0x7b5   : > { %v3189_v47 = vsel %vm2200_vm2, %v11181_v53, 0.0 }
 0x7b6   : > { %3190 = vadd.xlane.f32.xlu1 %v3189_v47  ;;  %v13854_v47 = vld [vmem:[#allocation201_spill] sm:$0xff] }
 0x7b7   : > { %v1608_v2 = vpack.c.bf16 %v13854_v47, %v13854_v47 }
 0x7b9   : > { %v4813_v34 = vunpack.c.l.b16 %v1608_v2 }
 0x7f6   : > { %v3170_v1 = vpop.xlane.xlu0 %3169 }
 0x7f7   : > { %v3597_v29 = vpop.f32.mrf.mxu1  ;;  %8123 = vrcp.f32 %v3170_v1  ;;  %v4815_v1 = vunpack.c.l.b16 %v1610_v8 }
 0x7fd   : > { %v8124_v41 = vpop.eup %8123 }
 0x7fe   : > { %v3173_v23 = vpop.xlane.xlu1 %3172  ;;  %v3200_v24 = vmul.f32 %v8124_v41, %v11126_v39  ;;  %v13860_v41 = vld [vmem:[#allocation135_spill] sm:$0xff] }
 0x7ff   : > { %8125 = vrcp.f32 %v3173_v23  ;;  %v3599_v17 = vpop.f32.mrf.mxu1  ;;  %v4814_v23 = vunpack.c.l.b16 %v1609_v46 }
 0x800   : > { %v3617_v37 = vpack.c.bf16 %v3599_v17, %v3597_v29  ;;  %v4823_v29 = vpack.c.b16 %v4818_v11, %v4817_v44  ;;  %v4822_v17 = vpack.c.b16 %v4816_v54, %v4815_v1  ;;  %v13859_v11 = vld [vmem:[#allocation136_spill] sm:$0xff] }
 0x801   : > { %v4821_v39 = vpack.c.b16 %v4814_v23, %v4813_v34  ;;  %v13861_v47 = vpack.c.b16 %v13859_v11, %v13860_v41 }
 0x802   : > { %7643 = vmatmul.msk.bf16.vlgmr.msrb.gmra.mxu1 %vm2146_vm1, %v3617_v37  ;;  %v13856_v37 = vld [vmem:[#allocation143_spill] sm:$0xff] }
 0x803   : > { %4845 = vmatpush.bf16.msrb.mxu1 %v4824_v56  ;;  %v13858_v56 = vpack.c.b16 %v13856_v37, %v13857_v40  ;;  %v4032_v2 = vsel %vm2146_vm1, %v13861_v47, 0 }
 0x805   : > { %v8126_v6 = vpop.eup %8125  ;;  %v4035_v8 = vsel %vm2146_vm1, %v13858_v56, 0 }
 0x806   : > { %v3201_v38 = vmul.f32 %v8126_v6, %v11137_v14  ;;  %v3176_v16 = vpop.xlane.xlu2 %3175 }
 0x807   : > { %4846 = vmatpush.bf16.msrb.mxu1 %v4823_v29  ;;  %v3602_v18 = vpop.f32.mrf.mxu1  ;;  %8127 = vrcp.f32 %v3176_v16 }
 0x808   : > { %v3208_v28 = vpack.c.bf16 %v3201_v38, %v3200_v24  ;;  %v13862_v38 = vld [vmem:[#allocation131_spill] sm:$0xff] }
 0x80a   : > { %7599 = vmatmul.msk.bf16.vlgmr.msrb.gmra.mxu2 %vm2200_vm2, %v3208_v28 }
 0x80b   : > { %4041 = vmatpush.bf16.xpose.msrb.mxu2 %v4035_v8  ;;  %4847 = vmatpush.bf16.msrb.mxu1 %v4822_v17 }
 0x80d   : > { %v8128_v6 = vpop.eup %8127 }
 0x80e   : > { %v3179_v57 = vpop.xlane.xlu0 %3178  ;;  %v3202_v46 = vmul.f32 %v8128_v6, %v11147_v58  ;;  %v13865_v58 = vld [vmem:[#allocation124_spill] sm:$0xff] }
 0x80f   : > { %8129 = vrcp.f32 %v3179_v57  ;;  %4848 = vmatpush.bf16.msrb.mxu1 %v4821_v39  ;;  %v3604_v14 = vpop.f32.mrf.mxu1 }
 0x810   : > { %v3618_v44 = vpack.c.bf16 %v3604_v14, %v3602_v18  ;;  %v13863_v18 = vld [vmem:[#allocation130_spill] sm:$0xff] }
 0x811   : > { %v13864_v28 = vpack.c.b16 %v13862_v38, %v13863_v18  ;;  %v13870_v38 = vld [vmem:[#allocation63_spill] sm:$0xff]  ;;  %v13871_v18 = vld [vmem:[#allocation62_spill] sm:$0xff] }
 0x812   : > { %7644 = vmatmul.msk.bf16.gmra.mxu1 %vm2146_vm1, %v3618_v44 }
 0x813   : > { %4042 = vmatpush.bf16.xpose.msrb.mxu2 %v4032_v2  ;;  %v4029_v34 = vsel %vm2146_vm1, %v13864_v28, 0  ;;  %v13872_v28 = vpack.c.b16 %v13870_v38, %v13871_v18  ;;  %v13885_v18 = vld [vmem:[#allocation27_spill] sm:$0xff] }
 0x815   : > { %v8130_v35 = vpop.eup %8129 }
 0x816   : > { %v3203_v1 = vmul.f32 %v8130_v35, %v11158_v36  ;;  %v3182_v24 = vpop.xlane.xlu1 %3181  ;;  %v13866_v36 = vld [vmem:[#allocation123_spill] sm:$0xff] }
 0x817   : > { %v3607_v54 = vpop.f32.mrf.mxu1  ;;  %8131 = vrcp.f32 %v3182_v24  ;;  %v13867_v37 = vpack.c.b16 %v13865_v58, %v13866_v36  ;;  %v13875_v58 = vld [vmem:[#allocation241_spill] sm:$0xff] }
 0x818   : > { %v3209_v29 = vpack.c.bf16 %v3203_v1, %v3202_v46  ;;  %v2016_v36 = vpack.c.bf16 %v13875_v58, %v13875_v58 }
 0x819   : > { %v4026_v40 = vsel %vm2146_vm1, %v13867_v37, 0  ;;  %v13876_v37 = vld [vmem:[#allocation243_spill] sm:$0xff] }
 0x81a   : > { %7600 = vmatmul.msk.bf16.gmra.mxu2 %vm2200_vm2, %v3209_v29  ;;  %v13869_v29 = vld [vmem:[#allocation251_spill] sm:$0xff] }
 0x81b   : > { %4043 = vmatpush.bf16.xpose.msrb.mxu2 %v4029_v34  ;;  %v2021_v24 = vpack.c.bf16 %v13869_v29, %v13869_v29  ;;  %v13873_v34 = vld [vmem:[#allocation245_spill] sm:$0xff]  ;;  %v13883_v29 = vld [vmem:[#allocation70_spill] sm:$0xff] }
 0x81d   : > { %v8132_v56 = vpop.eup %8131 }
 0x81e   : > { %v3185_v23 = vpop.xlane.xlu2 %3184  ;;  %v3204_v39 = vmul.f32 %v8132_v56, %v11164_v33 }
 0x81f   : > { %8133 = vrcp.f32 %v3185_v23  ;;  %v3609_v17 = vpop.f32.mrf.mxu1  ;;  %v2018_v23 = vpack.c.bf16 %v13873_v34, %v13873_v34 }
 0x820   : > { %v3619_v16 = vpack.c.bf16 %v3609_v17, %v3607_v54 }
 0x821   : > { %v4481_v56 = vunpack.c.l.b16 %v2018_v23  ;;  %v13888_v23 = vld [vmem:[#allocation79_spill] sm:$0xff] }
 0x822   : > { %7645 = vmatmul.msk.bf16.gmra.mxu1 %vm2146_vm1, %v3619_v16  ;;  %v4484_v16 = vunpack.c.l.b16 %v2021_v24 }
 0x823   : > { %4044 = vmatpush.bf16.xpose.msrb.mxu2 %v4026_v40  ;;  %v2017_v40 = vpack.c.bf16 %v13876_v37, %v13876_v37  ;;  %v13895_v37 = vld [vmem:[#allocation86_spill] sm:$0xff] }
 0x825   : > { %v8134_v8 = vpop.eup %8133 }
 0x826   : > { %v3205_v57 = vmul.f32 %v8134_v8, %v11171_v48  ;;  %v3188_v41 = vpop.xlane.xlu0 %3187  ;;  %v13868_v48 = vld [vmem:[#allocation249_spill] sm:$0xff] }
 0x827   : > { %v3612_v14 = vpop.f32.mrf.mxu1  ;;  %v2020_v54 = vpack.c.bf16 %v13868_v48, %v13868_v48 }
 0x828   : > { %v3210_v44 = vpack.c.bf16 %v3205_v57, %v3204_v39  ;;  %v13877_v57 = vld [vmem:[#allocation21_spill] sm:$0xff] }
 0x829   : > { %v3191_v11 = vpop.xlane.xlu1 %3190  ;;  %v4483_v17 = vunpack.c.l.b16 %v2020_v54  ;;  %v13882_v54 = vld [vmem:[#allocation71_spill] sm:$0xff] }
 0x82a   : > { %7601 = vmatmul.msk.bf16.gmra.mxu2 %vm2200_vm2, %v3210_v44  ;;  %8135 = vrcp.f32 %v3191_v11  ;;  %v13880_v11 = vld [vmem:[#allocation235_spill] sm:$0xff]  ;;  %v13884_v24 = vpack.c.b16 %v13882_v54, %v13883_v29  ;;  %v13909_v29 = vld [vmem:[#allocation222_spill] sm:$0xff] }
 0x82b   : > { %8137 = vrcp.f32 %v3188_v41  ;;  %v4488_v39 = vpack.c.b16 %v4484_v16, %v4483_v17  ;;  %v2014_v41 = vpack.c.bf16 %v13880_v11, %v13880_v11  ;;  %v13891_v17 = vld [vmem:[#allocation35_spill] sm:$0xff]  ;;  %v13892_v16 = vld [vmem:[#allocation33_spill] sm:$0xff] }
 0x82c   : > { %v13893_v58 = vpack.c.b16 %v13891_v17, %v13892_v16  ;;  %v13903_v11 = vld [vmem:[#allocation165_spill] sm:$0xff]  ;;  %v13918_v16 = vld [vmem:[#allocation218_spill] sm:$0xff] }
 0x82f   : > { %v3614_v47 = vpop.f32.mrf.mxu1 }
 0x830   : > { %v3620_v2 = vpack.c.bf16 %v3614_v47, %v3612_v14  ;;  %v8136_v6 = vpop.eup %8135  ;;  %v13878_v14 = vld [vmem:[#allocation19_spill] sm:$0xff]  ;;  %v13881_v47 = vld [vmem:[#allocation172_spill] sm:$0xff] }
 0x831   : > { %v8138_v35 = vpop.eup %8137  ;;  %v3207_v46 = vmul.f32 %v8136_v6, %v11181_v53  ;;  %v13874_v53 = vld [vmem:[#allocation247_spill] sm:$0xff]  ;;  %v13879_v44 = vpack.c.b16 %v13877_v57, %v13878_v14  ;;  %v4479_v6 = vunpack.c.l.b16 %v2016_v36  ;;  %v13901_v14 = vld [vmem:[#allocation22_spill] sm:$0xff] }
 0x832   : > { %7646 = vmatmul.msk.bf16.gmra.mxu1 %vm2146_vm1, %v3620_v2  ;;  %v3206_v33 = vmul.f32 %v8138_v35, %v11177_v50  ;;  %v2019_v50 = vpack.c.bf16 %v13874_v53, %v13874_v53  ;;  %v2015_v2 = vpack.c.bf16 %v13881_v47, %v13881_v47  ;;  %v4480_v35 = vunpack.c.l.b16 %v2017_v40  ;;  %v13889_v53 = vld [vmem:[#allocation78_spill] sm:$0xff]  ;;  %v13894_v36 = vld [vmem:[#allocation87_spill] sm:$0xff] }
 0x833   : > { %v13896_v40 = vpack.c.b16 %v13894_v36, %v13895_v37  ;;  %v13900_v57 = vld [vmem:[#allocation23_spill] sm:$0xff] }
 0x834   : > { %v3211_v1 = vpack.c.bf16 %v3207_v46, %v3206_v33  ;;  %v4482_v8 = vunpack.c.l.b16 %v2019_v50  ;;  %v4477_v33 = vunpack.c.l.b16 %v2014_v41  ;;  %v4486_v48 = vpack.c.b16 %v4480_v35, %v4479_v6  ;;  %v13904_v41 = vld [vmem:[#allocation163_spill] sm:$0xff]  ;;  %v13906_v35 = vld [vmem:[#allocation141_spill] sm:$0xff] }
 0x835   : > { %v13890_v50 = vpack.c.b16 %v13888_v23, %v13889_v53  ;;  %v13905_v47 = vpack.c.b16 %v13903_v11, %v13904_v41  ;;  %v13915_v23 = vld [vmem:[#allocation184_spill] sm:$0xff]  ;;  %v13916_v53 = vld [vmem:[#allocation179_spill] sm:$0xff] }
 0x836   : > { %v4487_v46 = vpack.c.b16 %v4482_v8, %v4481_v56  ;;  %v13897_v56 = vld [vmem:[#allocation43_spill] sm:$0xff]  ;;  %v13898_v8 = vld [vmem:[#allocation41_spill] sm:$0xff]  ;;  %v13927_v11 = vld [vmem:[#allocation212_spill] sm:$0xff] }
 0x837   : > { %v13928_v41 = vld [vmem:[#allocation211_spill] sm:$0xff] }
 0x83a   : > { %7602 = vmatmul.msk.bf16.gmra.mxu2 %vm2200_vm2, %v3211_v1  ;;  %v4478_v1 = vunpack.c.l.b16 %v2015_v2  ;;  %v4938_v2 = vsel %vm2146_vm1, %v13905_v47, 0  ;;  %v13929_v47 = vpack.c.b16 %v13927_v11, %v13928_v41 }
 0x83c   : > { %v4485_v38 = vpack.c.b16 %v4478_v1, %v4477_v33 }
 0x842   : > { %7665 = vmatmul.msk.bf16.vlgmr.msra.gmra.mxu1 %vm2146_vm1, %v13872_v28  ;;  %v13886_v28 = vld [vmem:[#allocation25_spill] sm:$0xff] }
 0x843   : > { %v13887_v34 = vpack.c.b16 %v13885_v18, %v13886_v28  ;;  %v13912_v18 = vld [vmem:[#allocation29_spill] sm:$0xff]  ;;  %v13913_v28 = vld [vmem:[#allocation28_spill] sm:$0xff] }
 0x84a   : > { %7621 = vmatmul.msk.bf16.vlgmr.msra.gmra.mxu2 %vm2146_vm1, %v13879_v44  ;;  %v13902_v44 = vpack.c.b16 %v13900_v57, %v13901_v14  ;;  %v13925_v57 = vld [vmem:[#allocation158_spill] sm:$0xff] }
 0x84b   : > { %4509 = vmatpush.bf16.msra.mxu2 %v4488_v39  ;;  %v13899_v39 = vpack.c.b16 %v13897_v56, %v13898_v8  ;;  %v13922_v56 = vld [vmem:[#allocation215_spill] sm:$0xff] }
 0x84f   : > { %4510 = vmatpush.bf16.msra.mxu2 %v4487_v46  ;;  %v13907_v46 = vld [vmem:[#allocation199_spill] sm:$0xff] }
 0x850   : > { %v13908_v33 = vpack.c.b16 %v13906_v35, %v13907_v46  ;;  %v13930_v35 = vld [vmem:[#allocation37_spill] sm:$0xff]  ;;  %v13931_v46 = vld [vmem:[#allocation36_spill] sm:$0xff] }
 0x852   : > { %7666 = vmatmul.msk.bf16.gmra.mxu1 %vm2146_vm1, %v13884_v24  ;;  %v4935_v1 = vsel %vm2146_vm1, %v13908_v33, 0  ;;  %v13910_v24 = vld [vmem:[#allocation221_spill] sm:$0xff]  ;;  %v13932_v33 = vpack.c.b16 %v13930_v35, %v13931_v46 }
 0x853   : > { %4511 = vmatpush.bf16.msra.mxu2 %v4486_v48 }
 0x857   : > { %4512 = vmatpush.bf16.msra.mxu2 %v4485_v38  ;;  %v13911_v38 = vpack.c.b16 %v13909_v29, %v13910_v24  ;;  %v13933_v29 = vld [vmem:[#allocation45_spill] sm:$0xff]  ;;  %v13934_v24 = vld [vmem:[#allocation44_spill] sm:$0xff] }
 0x85a   : > { %7622 = vmatmul.msk.bf16.gmra.mxu2 %vm2146_vm1, %v13887_v34  ;;  %v13914_v34 = vpack.c.b16 %v13912_v18, %v13913_v28 }
 0x862   : > { %7667 = vmatmul.msk.bf16.gmra.mxu1 %vm2146_vm1, %v13890_v50  ;;  %v13917_v50 = vpack.c.b16 %v13915_v23, %v13916_v53 }
 0x864   : > { %v4932_v17 = vsel %vm2146_vm1, %v13917_v50, 0 }
 0x86a   : > { %7623 = vmatmul.msk.bf16.gmra.mxu2 %vm2146_vm1, %v13893_v58  ;;  %v13919_v58 = vld [vmem:[#allocation217_spill] sm:$0xff] }
 0x86b   : > { %v13920_v36 = vpack.c.b16 %v13918_v16, %v13919_v58 }
 0x872   : > { %7668 = vmatmul.msk.bf16.gmra.mxu1 %vm2146_vm1, %v13896_v40  ;;  %v13921_v40 = vld [vmem:[#allocation216_spill] sm:$0xff] }
 0x873   : > { %v13923_v8 = vpack.c.b16 %v13921_v40, %v13922_v56  ;;  %v13937_v40 = vld [vmem:[#allocation5_spill] sm:$0xff] }
 0x87a   : > { %7624 = vmatmul.msk.bf16.gmra.mxu2 %vm2146_vm1, %v13899_v39  ;;  %v13924_v39 = vld [vmem:[#allocation161_spill] sm:$0xff] }
 0x87b   : > { %v13926_v14 = vpack.c.b16 %v13924_v39, %v13925_v57 }
 0x87f   : > { %v11328_v18 = vpop.f32.mrf.mxu1 }
 0x887   : > { %v11330_v53 = vpop.f32.mrf.mxu1 }
 0x88a   : > { %7647 = vmatmul.msk.bf16.vlgmr.msrb.gmra.mxu2 %vm2146_vm1, %v13902_v44  ;;  %v4929_v44 = vsel %vm2146_vm1, %v13926_v14, 0  ;;  %v13939_v14 = vld [vmem:[#allocation4_spill] sm:$0xff] }
 0x88b   : > { %4944 = vmatpush.bf16.xpose.msrb.mxu2 %v4938_v2 }
 0x88d   : > { %v3257_v6 = vpop.f32.mrf.mxu2 }
 0x893   : > { %4945 = vmatpush.bf16.xpose.msrb.mxu2 %v4935_v1 }
 0x895   : > { %v3259_v48 = vpop.f32.mrf.mxu2 }
 0x896   : > { %v3277_v54 = vpack.c.bf16 %v3259_v48, %v3257_v6 }
 0x898   : > { %7609 = vmatmul.msk.bf16.vlgmr.msrb.gmra.mxu3 %vm2146_vm1, %v3277_v54 }
 0x899   : > { %4198 = vmatpush.bf16.msrb.mxu3 %v13911_v38  ;;  %v13935_v38 = vpack.c.b16 %v13933_v29, %v13934_v24  ;;  %v13944_v24 = vld [vmem:[#allocation11_spill] sm:$0xff] }
 0x89a   : > { %7648 = vmatmul.msk.bf16.gmra.mxu2 %vm2146_vm1, %v13914_v34 }
 0x89b   : > { %4946 = vmatpush.bf16.xpose.msrb.mxu2 %v4932_v17  ;;  %v13936_v17 = vld [vmem:[#allocation177_spill] sm:$0xff] }
 0x89d   : > { %4199 = vmatpush.bf16.msrb.mxu3 %v13920_v36  ;;  %v3262_v37 = vpop.f32.mrf.mxu2  ;;  %v11338_v36 = vpop.f32.mrf.mxu1 }
 0x8a1   : > { %4200 = vmatpush.bf16.msrb.mxu3 %v13923_v8 }
 0x8a3   : > { %4947 = vmatpush.bf16.xpose.msrb.mxu2 %v4929_v44 }
 0x8a5   : > { %4201 = vmatpush.bf16.msrb.mxu3 %v13929_v47  ;;  %v3264_v2 = vpop.f32.mrf.mxu2  ;;  %v11345_v39 = vpop.f32.mrf.mxu1 }
 0x8a6   : > { %v3278_v6 = vpack.c.bf16 %v3264_v2, %v3262_v37  ;;  %13938 = vst [vmem:[#allocation47_spill] sm:$0xff] %v11345_v39  ;;  %v13941_v2 = vld [vmem:[#allocation180_spill] sm:$0xff] }
 0x8a8   : > { %7610 = vmatmul.msk.bf16.gmra.mxu3 %vm2146_vm1, %v3278_v6 }
 0x8aa   : > { %7649 = vmatmul.msk.bf16.gmra.mxu2 %vm2146_vm1, %v13932_v33  ;;  %v13942_v33 = vld [vmem:[#allocation185_spill] sm:$0xff] }
 0x8ad   : > { %v3267_v1 = vpop.f32.mrf.mxu2  ;;  %v11352_v41 = vpop.f32.mrf.mxu1 }
 0x8ae   : > { %13940 = vst [vmem:[#allocation46_spill] sm:$0xff] %v11352_v41 }
 0x8b5   : > { %v3269_v48 = vpop.f32.mrf.mxu2 }
 0x8b6   : > { %v3279_v54 = vpack.c.bf16 %v3269_v48, %v3267_v1  ;;  %v11362_v48 = vpop.f32.mrf.mxu1 }
 0x8b7   : > { %13943 = vst [vmem:[#allocation55_spill] sm:$0xff] %v11362_v48 }
 0x8b8   : > { %7611 = vmatmul.msk.bf16.gmra.mxu3 %vm2146_vm1, %v3279_v54 }
 0x8ba   : > { %7650 = vmatmul.msk.bf16.gmra.mxu2 %vm2146_vm1, %v13935_v38 }
 0x8bd   : > { %v3272_v28 = vpop.f32.mrf.mxu2 }
 0x8c5   : > { %v3274_v34 = vpop.f32.mrf.mxu2 }
 0x8c6   : > { %v3280_v23 = vpack.c.bf16 %v3274_v34, %v3272_v28  ;;  %v11371_v34 = vpop.f32.mrf.mxu1 }
 0x8c7   : > { %13945 = vst [vmem:[#allocation54_spill] sm:$0xff] %v11371_v34 }
 0x8c8   : > { %7612 = vmatmul.msk.bf16.gmra.mxu3 %vm2146_vm1, %v3280_v23 }
 0x8cd   : > { %v3696_v50 = vpop.f32.mrf.mxu2 }
 0x8ce   : > { %v11334_v16 = vadd.f32 %v13936_v17, %v3696_v50  ;;  %v13946_v50 = vld [vmem:[#allocation10_spill] sm:$0xff] }
 0x8d0   : > { %v3716_v58 = vsel %vm2200_vm2, %v11334_v16, -inf }
 0x8d1   : > { %3717 = vmax.xlane.f32.xlu2 %v3716_v58 }
 0x8d5   : > { %v3698_v37 = vpop.f32.mrf.mxu2 }
 0x8d6   : > { %v11341_v56 = vadd.f32 %v13937_v40, %v3698_v37 }
 0x8d8   : > { %v3719_v8 = vsel %vm2200_vm2, %v11341_v56, -inf }
 0x8d9   : > { %3720 = vmax.xlane.f32.xlu0 %v3719_v8  ;;  %v11378_v8 = vpop.f32.mrf.mxu1 }
 0x8da   : > { %13947 = vst [vmem:[#allocation176_spill] sm:$0xff] %v11378_v8 }
 0x8dd   : > { %v3701_v57 = vpop.f32.mrf.mxu2 }
 0x8de   : > { %v11348_v44 = vadd.f32 %v13939_v14, %v3701_v57 }
 0x8e0   : > { %v3722_v11 = vsel %vm2200_vm2, %v11348_v44, -inf }
 0x8e1   : > { %3723 = vmax.xlane.f32.xlu1 %v3722_v11  ;;  %v13948_v11 = vld [vmem:[#allocation206_spill] sm:$0xff] }
 0x8e5   : > { %v3703_v47 = vpop.f32.mrf.mxu2 }
 0x8e6   : > { %v11355_v6 = vadd.f32 %v13941_v2, %v3703_v47 }
 0x8e8   : > { %v3725_v35 = vsel %vm2200_vm2, %v11355_v6, -inf }
 0x8e9   : > { %3726 = vmax.xlane.f32.xlu2 %v3725_v35 }
 0x8ed   : > { %v3706_v46 = vpop.f32.mrf.mxu2 }
 0x8ee   : > { %v11360_v1 = vadd.f32 %v13942_v33, %v3706_v46  ;;  %v4357_v46 = vpop.f32.mrf.mxu1 }
 0x8ef   : > { %v11403_v41 = vadd.f32 %v11019_v0, %v4357_v46 }
 0x8f0   : > { %v3728_v54 = vsel %vm2200_vm2, %v11360_v1, -inf }
 0x8f1   : > { %3729 = vmax.xlane.f32.xlu0 %v3728_v54  ;;  %v4377_v46 = vsel %vm2200_vm2, %v11403_v41, -inf }
 0x8f5   : > { %v3708_v29 = vpop.f32.mrf.mxu2 }
 0x8f6   : > { %v11367_v38 = vadd.f32 %v13944_v24, %v3708_v29  ;;  %v11392_v8 = vpop.f32.mrf.mxu1 }
 0x8f8   : > { %v3731_v28 = vsel %vm2200_vm2, %v11367_v38, -inf }
 0x8f9   : > { %3732 = vmax.xlane.f32.xlu1 %v3731_v28  ;;  %v2696_v28 = vadd.f32 %v10994_v9, %v10867_v27 }
 0x8fb   : > { %v3019_v34 = vadd.f32 %v10918_v45, %v2696_v28 }
 0x8fd   : > { %v3711_v23 = vpop.f32.mrf.mxu2 }
 0x8fe   : > { %v11374_v58 = vadd.f32 %v13946_v50, %v3711_v23  ;;  %v13949_v23 = vld [vmem:[#allocation205_spill] sm:$0xff] }
 0x900   : > { %v3734_v37 = vsel %vm2200_vm2, %v11374_v58, -inf }
 0x901   : > { %3735 = vmax.xlane.f32.xlu2 %v3734_v37 }
 0x905   : > { %v3713_v57 = vpop.f32.mrf.mxu2 }
 0x906   : > { %v11381_v47 = vadd.f32 %v13948_v11, %v3713_v57 }
 0x908   : > { %v3737_v35 = vsel %vm2200_vm2, %v11381_v47, -inf }
 0x909   : > { %3738 = vmax.xlane.f32.xlu0 %v3737_v35  ;;  %v11400_v35 = vld [vmem:[%s13074_s6] ss:$0 sm:$0xff] }
 0x90d   : > { %v11385_v54 = vpop.f32.mrf.mxu2 }
 0x915   : > { %v4048_v29 = vpop.f32.mrf.mxu2 }
 0x916   : > { %v11390_v37 = vadd.f32 %v13949_v23, %v4048_v29  ;;  %v2698_v29 = vadd.f32 %v10996_v61, %v10874_v22  ;;  %v13950_v23 = vld [vmem:[#allocation210_spill] sm:$0xff] }
 0x918   : > { %v4069_v57 = vsel %vm2200_vm2, %v11390_v37, -inf  ;;  %v3020_v22 = vadd.f32 %v10920_v60, %v2698_v29 }
 0x919   : > { %4070 = vmax.xlane.f32.xlu0 %v4069_v57 }
 0x91b   : > { %v3311_v48 = vpop.f32.mrf.mxu3 }
 0x91c   : > { %v3331_v27 = vadd.f32 %v3311_v48, %v3019_v34  ;;  %v4362_v48 = vpop.f32.mrf.mxu1 }
 0x91d   : > { %v11406_v9 = vpop.f32.mrf.mxu2 }
 0x91e   : > { %v3342_v57 = vadd.f32 %v11400_v35, %v3331_v27  ;;  %v2701_v27 = vadd.f32 %v10998_v12, %v10882_v62  ;;  %v11435_v62 = vadd.f32 %v11043_v43, %v4362_v48 }
 0x920   : > { %v3350_v45 = vpack.c.bf16 %v3342_v57, %v3342_v57  ;;  %v3021_v60 = vadd.f32 %v10926_v52, %v2701_v27 }
 0x921   : > { %4378 = vmax.xlane.f32.xlu0 %v4377_v46 }
 0x922   : > { %3359 = vst.msk [vmem:[%s11414_s19] sm:$0xf] %vm3358_vm3, %v3350_v45 }
 0x923   : > { %v3313_v61 = vpop.f32.mrf.mxu3 }
 0x924   : > { %v3332_v34 = vadd.f32 %v3313_v61, %v3020_v22  ;;  %v11432_v29 = vpop.f32.mrf.mxu1 }
 0x925   : > { %v4053_v28 = vpop.f32.mrf.mxu2 }
 0x926   : > { %v3343_v0 = vadd.f32 %v11400_v35, %v3332_v34  ;;  %v11425_v39 = vadd.f32 %v13950_v23, %v4053_v28  ;;  %v4383_v28 = vsel %vm2200_vm2, %v11435_v62, -inf }
 0x928   : > { %v3351_v57 = vpack.c.bf16 %v3343_v0, %v3343_v0  ;;  %v4075_v46 = vsel %vm2200_vm2, %v11425_v39, -inf  ;;  %v2703_v0 = vadd.f32 %v11000_v10, %v10886_v49  ;;  %v13951_v10 = vld [vmem:[#allocation234_spill] sm:$0xff] }
 0x929   : > { %4076 = vmax.xlane.f32.xlu0 %v4075_v46 }
 0x92a   : > { %3360 = vst.msk [vmem:[%s11414_s19 + $0x4] sm:$0xf] %vm3358_vm3, %v3351_v57  ;;  %v3022_v52 = vadd.f32 %v10934_v55, %v2703_v0 }
 0x92b   : > { %v3316_v45 = vpop.f32.mrf.mxu3 }
 0x92c   : > { %v3333_v12 = vadd.f32 %v3316_v45, %v3021_v60  ;;  %v4367_v57 = vpop.f32.mrf.mxu1  ;;  %v2706_v60 = vadd.f32 %v11002_v42, %v10894_v7 }
 0x92d   : > { %v11437_v22 = vpop.f32.mrf.mxu2 }
 0x92e   : > { %v3344_v61 = vadd.f32 %v11400_v35, %v3333_v12  ;;  %v3023_v55 = vadd.f32 %v10940_v31, %v2706_v60 }
 0x930   : > { %v3352_v34 = vpack.c.bf16 %v3344_v61, %v3344_v61 }
 0x931   : > { %4384 = vmax.xlane.f32.xlu0 %v4383_v28  ;;  %v2708_v28 = vadd.f32 %v11004_v25, %v10902_v15  ;;  %v2711_v25 = vadd.f32 %v11006_v13, %v10906_v32 }
 0x932   : > { %3361 = vst.msk [vmem:[%s11414_s19 + $0x8] sm:$0xf] %vm3358_vm3, %v3352_v34  ;;  %v11459_v34 = vadd.f32 %v11070_v63, %v4367_v57 }
 0x933   : > { %v3318_v48 = vpop.f32.mrf.mxu3  ;;  %v3024_v31 = vadd.f32 %v10942_v59, %v2708_v28 }
 0x934   : > { %v3334_v27 = vadd.f32 %v3318_v48, %v3022_v52  ;;  %v11466_v48 = vpop.f32.mrf.mxu1 }
 0x935   : > { %v4058_v46 = vpop.f32.mrf.mxu2 }
 0x936   : > { %v3345_v49 = vadd.f32 %v11400_v35, %v3334_v27  ;;  %v11451_v45 = vadd.f32 %v13951_v10, %v4058_v46  ;;  %v4389_v46 = vsel %vm2200_vm2, %v11459_v34, -inf }
 0x938   : > { %v3353_v12 = vpack.c.bf16 %v3345_v49, %v3345_v49  ;;  %v4081_v61 = vsel %vm2200_vm2, %v11451_v45, -inf }
 0x939   : > { %4082 = vmax.xlane.f32.xlu0 %v4081_v61 }
 0x93a   : > { %3362 = vst.msk [vmem:[%s11414_s19 + $0xc] sm:$0xf] %vm3358_vm3, %v3353_v12 }
 0x93b   : > { %v3321_v0 = vpop.f32.mrf.mxu3 }
 0x93c   : > { %v3335_v7 = vadd.f32 %v3321_v0, %v3023_v55  ;;  %v13952_v55 = vld [vmem:[#allocation240_spill] sm:$0xff]  ;;  %v4372_v59 = vpop.f32.mrf.mxu1 }
 0x93d   : > { %v11461_v42 = vpop.f32.mrf.mxu2  ;;  %v11486_v32 = vadd.f32 %v11096_v3, %v4372_v59 }
 0x93e   : > { %v3346_v52 = vadd.f32 %v11400_v35, %v3335_v7 }
 0x940   : > { %v3354_v27 = vpack.c.bf16 %v3346_v52, %v3346_v52 }
 0x941   : > { %4390 = vmax.xlane.f32.xlu0 %v4389_v46 }
 0x942   : > { %3363 = vst.msk [vmem:[%s11414_s19 + $0x10] sm:$0xf] %vm3358_vm3, %v3354_v27 }
 0x943   : > { %v3323_v57 = vpop.f32.mrf.mxu3 }
 0x944   : > { %v3336_v60 = vadd.f32 %v3323_v57, %v3024_v31  ;;  %v3718_v49 = vpop.xlane.xlu2 %3717  ;;  %v2713_v57 = vadd.f32 %v11010_v26, %v10914_v20 }
 0x945   : > { %v3740_v12 = vsub.f32 %v11334_v16, %v3718_v49  ;;  %v4063_v15 = vpop.f32.mrf.mxu2  ;;  %v3025_v16 = vadd.f32 %v10945_v4, %v2711_v25  ;;  %v4395_v4 = vsel %vm2200_vm2, %v11486_v32, -inf }
 0x946   : > { %v3347_v61 = vadd.f32 %v11400_v35, %v3336_v60  ;;  %v11478_v0 = vadd.f32 %v13952_v55, %v4063_v15  ;;  %v3026_v26 = vadd.f32 %v10947_v51, %v2713_v57  ;;  %v13953_v51 = vld [vmem:[#allocation208_spill] sm:$0xff] }
 0x947   : > { %v3748_v7 = vmul.f32 1.442695, %v3740_v12 }
 0x948   : > { %v3355_v52 = vpack.c.bf16 %v3347_v61, %v3347_v61  ;;  %v4087_v27 = vsel %vm2200_vm2, %v11478_v0, -inf }
 0x949   : > { %8139 = vpow2.f32 %v3748_v7  ;;  %4088 = vmax.xlane.f32.xlu0 %v4087_v27 }
 0x94a   : > { %3364 = vst.msk [vmem:[%s11414_s19 + $0x14] sm:$0xf] %vm3358_vm3, %v3355_v52 }
 0x94b   : > { %v3326_v28 = vpop.f32.mrf.mxu3 }
 0x94c   : > { %v3337_v13 = vadd.f32 %v3326_v28, %v3025_v16  ;;  %v3721_v46 = vpop.xlane.xlu0 %3720 }
 0x94d   : > { %v3741_v31 = vsub.f32 %v11341_v56, %v3721_v46 }
 0x94e   : > { %v3348_v60 = vadd.f32 %v11400_v35, %v3337_v13  ;;  %v11511_v13 = vadd.f32 %v13953_v51, %v11385_v54 }
 0x94f   : > { %v11492_v49 = vpop.eup %8139  ;;  %v3750_v12 = vmul.f32 1.442695, %v3741_v31 }
 0x950   : > { %v3356_v15 = vpack.c.bf16 %v3348_v60, %v3348_v60  ;;  %v3764_v25 = vsel %vm2200_vm2, %v11492_v49, 0.0  ;;  %v4066_v57 = vsel %vm2200_vm2, %v11511_v13, -inf }
 0x951   : > { %8141 = vpow2.f32 %v3750_v12  ;;  %4396 = vmax.xlane.f32.xlu0 %v4395_v4  ;;  %3765 = vadd.xlane.f32.xlu1 %v3764_v25  ;;  %v11522_v12 = vadd.f32 %v11028_v5, %v11392_v8 }
 0x952   : > { %3365 = vst.msk [vmem:[%s11414_s19 + $0x18] sm:$0xf] %vm3358_vm3, %v3356_v15 }
 0x953   : > { %v3328_v20 = vpop.f32.mrf.mxu3  ;;  %v4380_v25 = vsel %vm2200_vm2, %v11522_v12, -inf }
 0x954   : > { %v3338_v56 = vadd.f32 %v3328_v20, %v3026_v26  ;;  %v3724_v61 = vpop.xlane.xlu1 %3723  ;;  %v13954_v20 = vld [vmem:[#allocation153_spill] sm:$0xff] }
 0x955   : > { %v3742_v7 = vsub.f32 %v11348_v44, %v3724_v61 }
 0x956   : > { %v3349_v52 = vadd.f32 %v11400_v35, %v3338_v56  ;;  %v11533_v56 = vadd.f32 %v13954_v20, %v11406_v9 }
 0x957   : > { %v11503_v27 = vpop.eup %8141  ;;  %v3752_v59 = vmul.f32 1.442695, %v3742_v7 }
 0x958   : > { %v3357_v16 = vpack.c.bf16 %v3349_v52, %v3349_v52  ;;  %v3767_v28 = vsel %vm2200_vm2, %v11503_v27, 0.0 }
 0x959   : > { %8143 = vpow2.f32 %v3752_v59  ;;  %3768 = vadd.xlane.f32.xlu2 %v3767_v28  ;;  %v4072_v59 = vsel %vm2200_vm2, %v11533_v56, -inf }
 0x95a   : > { %3366 = vst.msk [vmem:[%s11414_s19 + $0x1c] sm:$0xf] %vm3358_vm3, %v3357_v16  ;;  %v11544_v16 = vadd.f32 %v11055_v30, %v11432_v29 }
 0x95c   : > { %v3727_v46 = vpop.xlane.xlu2 %3726 }
 0x95d   : > { %v3743_v44 = vsub.f32 %v11355_v6, %v3727_v46 }
 0x95f   : > { %v11514_v31 = vpop.eup %8143  ;;  %v3754_v35 = vmul.f32 1.442695, %v3743_v44  ;;  %v4386_v44 = vsel %vm2200_vm2, %v11544_v16, -inf }
 0x960   : > { %v3770_v60 = vsel %vm2200_vm2, %v11514_v31, 0.0 }
 0x961   : > { %8145 = vpow2.f32 %v3754_v35  ;;  %4067 = vmax.xlane.f32.xlu2 %v4066_v57  ;;  %3771 = vadd.xlane.f32.xlu1 %v3770_v60  ;;  %v13955_v57 = vld [vmem:[#allocation232_spill] sm:$0xff] }
 0x962   : > { %v11555_v60 = vadd.f32 %v13955_v57, %v11437_v22 }
 0x964   : > { %v3730_v54 = vpop.xlane.xlu0 %3729 }
 0x965   : > { %v3744_v15 = vsub.f32 %v11360_v1, %v3730_v54 }
 0x967   : > { %v11525_v6 = vpop.eup %8145  ;;  %v3756_v4 = vmul.f32 1.442695, %v3744_v15 }
 0x968   : > { %v3773_v26 = vsel %vm2200_vm2, %v11525_v6, 0.0 }
 0x969   : > { %8147 = vpow2.f32 %v3756_v4  ;;  %4381 = vmax.xlane.f32.xlu1 %v4380_v25  ;;  %3774 = vadd.xlane.f32.xlu2 %v3773_v26  ;;  %v4078_v4 = vsel %vm2200_vm2, %v11555_v60, -inf  ;;  %v11566_v26 = vadd.f32 %v11082_v21, %v11466_v48 }
 0x96c   : > { %v3733_v8 = vpop.xlane.xlu1 %3732 }
 0x96d   : > { %v3745_v61 = vsub.f32 %v11367_v38, %v3733_v8  ;;  %v4392_v8 = vsel %vm2200_vm2, %v11566_v26, -inf }
 0x96f   : > { %v11536_v1 = vpop.eup %8147  ;;  %v3758_v7 = vmul.f32 1.442695, %v3745_v61  ;;  %v4374_v61 = vpop.f32.mrf.mxu1 }
 0x970   : > { %v3776_v52 = vsel %vm2200_vm2, %v11536_v1, 0.0 }
 0x971   : > { %8149 = vpow2.f32 %v3758_v7  ;;  %3777 = vadd.xlane.f32.xlu1 %v3776_v52  ;;  %4073 = vmax.xlane.f32.xlu2 %v4072_v59  ;;  %v11575_v7 = vadd.f32 %v11105_v19, %v4374_v61  ;;  %v13956_v52 = vld [vmem:[#allocation237_spill] sm:$0xff] }
 0x972   : > { %v11579_v59 = vadd.f32 %v13956_v52, %v11461_v42 }
 0x974   : > { %v3736_v9 = vpop.xlane.xlu2 %3735 }
 0x975   : > { %v3746_v28 = vsub.f32 %v11374_v58, %v3736_v9  ;;  %v4084_v9 = vsel %vm2200_vm2, %v11579_v59, -inf }
 0x977   : > { %v11547_v38 = vpop.eup %8149  ;;  %v3760_v46 = vmul.f32 1.442695, %v3746_v28  ;;  %v4398_v28 = vsel %vm2200_vm2, %v11575_v7, -inf }
 0x978   : > { %v3779_v35 = vsel %vm2200_vm2, %v11547_v38, 0.0 }
 0x979   : > { %8151 = vpow2.f32 %v3760_v46  ;;  %4387 = vmax.xlane.f32.xlu1 %v4386_v44  ;;  %3780 = vadd.xlane.f32.xlu2 %v3779_v35 }
 0x97c   : > { %v3739_v29 = vpop.xlane.xlu0 %3738 }
 0x97d   : > { %v3747_v54 = vsub.f32 %v11381_v47, %v3739_v29 }
 0x97f   : > { %v11558_v58 = vpop.eup %8151  ;;  %v3762_v15 = vmul.f32 1.442695, %v3747_v54 }
 0x980   : > { %v3782_v25 = vsel %vm2200_vm2, %v11558_v58, 0.0 }
 0x981   : > { %8153 = vpow2.f32 %v3762_v15  ;;  %4079 = vmax.xlane.f32.xlu2 %v4078_v4  ;;  %3783 = vadd.xlane.f32.xlu1 %v3782_v25 }
 0x987   : > { %v11568_v22 = vpop.eup %8153 }
 0x988   : > { %v3785_v47 = vsel %vm2200_vm2, %v11568_v22, 0.0 }
 0x989   : > { %3786 = vadd.xlane.f32.xlu2 %v3785_v47  ;;  %4393 = vmax.xlane.f32.xlu1 %v4392_v8 }
 0x98c   : > { %v4071_v48 = vpop.xlane.xlu0 %4070 }
 0x98d   : > { %v4091_v35 = vsub.f32 %v11390_v37, %v4071_v48 }
 0x98f   : > { %v4100_v54 = vmul.f32 1.442695, %v4091_v35 }
 0x991   : > { %4085 = vmax.xlane.f32.xlu2 %v4084_v9  ;;  %4399 = vmax.xlane.f32.xlu1 %v4398_v28 }
 0x994   : > { %v4379_v46 = vpop.xlane.xlu0 %4378 }
 0x995   : > { %v4401_v44 = vsub.f32 %v11403_v41, %v4379_v46 }
 0x997   : > { %v4409_v29 = vmul.f32 1.442695, %v4401_v44 }
 0x999   : > { %8155 = vpow2.f32 %v4409_v29 }
 0x99a   : > { %8157 = vpow2.f32 %v4100_v54 }
 0x99c   : > { %v4077_v41 = vpop.xlane.xlu0 %4076 }
 0x99f   : > { %v11587_v15 = vpop.eup %8155 }
 0x9a0   : > { %v4425_v42 = vsel %vm2200_vm2, %v11587_v15, 0.0  ;;  %v11591_v4 = vpop.eup %8157 }
 0x9a1   : > { %4426 = vadd.xlane.f32.xlu1 %v4425_v42  ;;  %v4117_v25 = vsel %vm2200_vm2, %v11591_v4, 0.0 }
 0x9a4   : > { %v4385_v48 = vpop.xlane.xlu0 %4384 }
 0x9a9   : > { %4118 = vadd.xlane.f32.xlu1 %v4117_v25 }
 0x9c4   : > { %v3766_v47 = vpop.xlane.xlu1 %3765 }
 0x9c5   : > { %8159 = vrcp.f32 %v3766_v47  ;;  %v11599_v47 = vpop.xlane.xlu0 %4082 }
 0x9cb   : > { %v8160_v8 = vpop.eup %8159 }
 0x9cc   : > { %v3769_v37 = vpop.xlane.xlu2 %3768  ;;  %v3796_v9 = vmul.f32 %v8160_v8, %v11492_v49 }
 0x9cd   : > { %8161 = vrcp.f32 %v3769_v37 }
 0x9d3   : > { %v8162_v61 = vpop.eup %8161 }
 0x9d4   : > { %v3797_v28 = vmul.f32 %v8162_v61, %v11503_v27  ;;  %v3772_v46 = vpop.xlane.xlu1 %3771  ;;  %v4068_v44 = vpop.xlane.xlu2 %4067  ;;  %v4403_v27 = vsub.f32 %v11435_v62, %v4385_v48  ;;  %v4093_v62 = vsub.f32 %v11425_v39, %v4077_v41 }
 0x9d5   : > { %v4090_v35 = vsub.f32 %v11511_v13, %v4068_v44  ;;  %v4391_v48 = vpop.xlane.xlu0 %4390 }
 0x9d6   : > { %v3804_v29 = vpack.c.bf16 %v3797_v28, %v3796_v9  ;;  %v4413_v28 = vmul.f32 1.442695, %v4403_v27  ;;  %v4405_v41 = vsub.f32 %v11459_v34, %v4391_v48 }
 0x9d7   : > { %v4098_v54 = vmul.f32 1.442695, %v4090_v35 }
 0x9d8   : > { %7625 = vmatmul.msk.bf16.vlgmr.msra.gmra.mxu3 %vm2200_vm2, %v3804_v29 }
 0x9d9   : > { %8163 = vpow2.f32 %v4098_v54 }
 0x9da   : > { %8165 = vrcp.f32 %v3772_v46 }
 0x9dc   : > { %v4382_v42 = vpop.xlane.xlu1 %4381  ;;  %v3775_v25 = vpop.xlane.xlu2 %3774 }
 0x9dd   : > { %v4402_v37 = vsub.f32 %v11522_v12, %v4382_v42  ;;  %8167 = vrcp.f32 %v3775_v25 }
 0x9df   : > { %v11602_v49 = vpop.eup %8163  ;;  %v4411_v8 = vmul.f32 1.442695, %v4402_v37 }
 0x9e0   : > { %v4114_v13 = vsel %vm2200_vm2, %v11602_v49, 0.0  ;;  %v8166_v61 = vpop.eup %8165 }
 0x9e1   : > { %8169 = vpow2.f32 %v4411_v8  ;;  %4115 = vadd.xlane.f32.xlu0 %v4114_v13  ;;  %v3798_v46 = vmul.f32 %v8166_v61, %v11514_v31  ;;  %v4104_v31 = vmul.f32 1.442695, %v4093_v62 }
 0x9e2   : > { %8171 = vpow2.f32 %v4413_v28 }
 0x9e3   : > { %v8168_v9 = vpop.eup %8167 }
 0x9e4   : > { %v3799_v44 = vmul.f32 %v8168_v9, %v11525_v6  ;;  %v3778_v35 = vpop.xlane.xlu1 %3777  ;;  %v4074_v12 = vpop.xlane.xlu2 %4073 }
 0x9e5   : > { %v4092_v29 = vsub.f32 %v11533_v56, %v4074_v12 }
 0x9e6   : > { %v3805_v54 = vpack.c.bf16 %v3799_v44, %v3798_v46  ;;  %v11626_v46 = vpop.xlane.xlu0 %4088  ;;  %v4417_v44 = vmul.f32 1.442695, %v4405_v41 }
 0x9e7   : > { %v11610_v42 = vpop.eup %8169  ;;  %v4102_v25 = vmul.f32 1.442695, %v4092_v29 }
 0x9e8   : > { %7626 = vmatmul.msk.bf16.gmra.mxu3 %vm2200_vm2, %v3805_v54  ;;  %v4428_v37 = vsel %vm2200_vm2, %v11610_v42, 0.0  ;;  %v11616_v56 = vpop.eup %8171 }
 0x9e9   : > { %8173 = vpow2.f32 %v4102_v25  ;;  %4429 = vadd.xlane.f32.xlu2 %v4428_v37  ;;  %v4431_v61 = vsel %vm2200_vm2, %v11616_v56, 0.0  ;;  %v4095_v37 = vsub.f32 %v11451_v45, %v11599_v47 }
 0x9ea   : > { %8175 = vrcp.f32 %v3778_v35 }
 0x9ec   : > { %v4388_v6 = vpop.xlane.xlu1 %4387  ;;  %v3781_v27 = vpop.xlane.xlu2 %3780 }
 0x9ed   : > { %v4404_v8 = vsub.f32 %v11544_v16, %v4388_v6  ;;  %8177 = vrcp.f32 %v3781_v27 }
 0x9ee   : > { %8179 = vpow2.f32 %v4104_v31  ;;  %v4397_v6 = vpop.xlane.xlu0 %4396 }
 0x9ef   : > { %v11619_v39 = vpop.eup %8173  ;;  %v4415_v13 = vmul.f32 1.442695, %v4404_v8 }
 0x9f0   : > { %v4120_v9 = vsel %vm2200_vm2, %v11619_v39, 0.0  ;;  %v8176_v28 = vpop.eup %8175 }
 0x9f1   : > { %8181 = vpow2.f32 %v4415_v13  ;;  %4432 = vadd.xlane.f32.xlu2 %v4431_v61  ;;  %4121 = vadd.xlane.f32.xlu1 %v4120_v9  ;;  %v3800_v35 = vmul.f32 %v8176_v28, %v11536_v1  ;;  %v4407_v13 = vsub.f32 %v11486_v32, %v4397_v6 }
 0x9f2   : > { %8183 = vpow2.f32 %v4417_v44 }
 0x9f3   : > { %v8178_v16 = vpop.eup %8177 }
 0x9f4   : > { %v3801_v12 = vmul.f32 %v8178_v16, %v11547_v38  ;;  %v3784_v34 = vpop.xlane.xlu1 %3783  ;;  %v4080_v29 = vpop.xlane.xlu2 %4079 }
 0x9f5   : > { %v11630_v54 = vpop.eup %8179  ;;  %v4094_v62 = vsub.f32 %v11555_v60, %v4080_v29  ;;  %v4108_v60 = vmul.f32 1.442695, %v4095_v37 }
 0x9f6   : > { %v3806_v48 = vpack.c.bf16 %v3801_v12, %v3800_v35  ;;  %v4123_v1 = vsel %vm2200_vm2, %v11630_v54, 0.0  ;;  %v4421_v35 = vmul.f32 1.442695, %v4407_v13 }
 0x9f7   : > { %v11633_v25 = vpop.eup %8181  ;;  %v4106_v31 = vmul.f32 1.442695, %v4094_v62 }
 0x9f8   : > { %7627 = vmatmul.msk.bf16.gmra.mxu3 %vm2200_vm2, %v3806_v48  ;;  %v4434_v38 = vsel %vm2200_vm2, %v11633_v25, 0.0  ;;  %v11642_v41 = vpop.eup %8183 }
 0x9f9   : > { %8185 = vpow2.f32 %v4106_v31  ;;  %4124 = vadd.xlane.f32.xlu2 %v4123_v1  ;;  %4435 = vadd.xlane.f32.xlu0 %v4434_v38  ;;  %v4437_v9 = vsel %vm2200_vm2, %v11642_v41, 0.0  ;;  %v4097_v1 = vsub.f32 %v11478_v0, %v11626_v46 }
 0x9fa   : > { %8187 = vrcp.f32 %v3784_v34 }
 0x9fc   : > { %v4394_v27 = vpop.xlane.xlu1 %4393  ;;  %v3787_v8 = vpop.xlane.xlu2 %3786 }
 0x9fd   : > { %v4406_v45 = vsub.f32 %v11566_v26, %v4394_v27  ;;  %8189 = vrcp.f32 %v3787_v8 }
 0x9fe   : > { %8191 = vpow2.f32 %v4108_v60 }
 0x9ff   : > { %v11645_v47 = vpop.eup %8185  ;;  %v4419_v61 = vmul.f32 1.442695, %v4406_v45 }
 0xa00   : > { %v4126_v28 = vsel %vm2200_vm2, %v11645_v47, 0.0  ;;  %v8188_v16 = vpop.eup %8187 }
 0xa01   : > { %8193 = vpow2.f32 %v4419_v61  ;;  %4438 = vadd.xlane.f32.xlu0 %v4437_v9  ;;  %4127 = vadd.xlane.f32.xlu2 %v4126_v28  ;;  %v3802_v26 = vmul.f32 %v8188_v16, %v11558_v58  ;;  %v7882_v61 = vld [vmem:[%s13073_s5 + $0x18] sm:$0xff]  ;;  %v7880_v9 = vld [vmem:[%s13073_s5 + $0x8] sm:$0xff]  ;;  %v7881_v28 = vld [vmem:[%s13073_s5 + $0x10] sm:$0xff] }
 0xa02   : > { %8195 = vpow2.f32 %v4421_v35  ;;  %4565 = vmatpush.bf16.msra.mxu3 %v7882_v61  ;;  %3904 = vmatpush.bf16.msrb.mxu0 %v7880_v9 }
 0xa03   : > { %v8190_v44 = vpop.eup %8189 }
 0xa04   : > { %v3803_v12 = vmul.f32 %v8190_v44, %v11568_v22  ;;  %v4400_v34 = vpop.xlane.xlu1 %4399  ;;  %v4086_v29 = vpop.xlane.xlu2 %4085 }
 0xa05   : > { %v11654_v32 = vpop.eup %8191  ;;  %v4408_v62 = vsub.f32 %v11575_v7, %v4400_v34  ;;  %v4096_v48 = vsub.f32 %v11579_v59, %v4086_v29  ;;  %v4112_v7 = vmul.f32 1.442695, %v4097_v1  ;;  %v13958_v34 = vld [vmem:[#allocation279_spill] sm:$0xff] }
 0xa06   : > { %v3807_v37 = vpack.c.bf16 %v3803_v12, %v3802_v26  ;;  %v4129_v58 = vsel %vm2200_vm2, %v11654_v32, 0.0  ;;  %4254 = vmatpush.bf16.msra.mxu0 %v7881_v28  ;;  %v13957_v26 = vld [vmem:[#allocation278_spill] sm:$0xff]  ;;  %v1753_v29 = vpack.c.bf16 %v13958_v34, %v13958_v34  ;;  %v13962_v28 = vld [vmem:[#allocation277_spill] sm:$0xff] }
 0xa07   : > { %v11658_v31 = vpop.eup %8193  ;;  %v4423_v38 = vmul.f32 1.442695, %v4408_v62  ;;  %v4110_v60 = vmul.f32 1.442695, %v4096_v48  ;;  %v1752_v12 = vpack.c.bf16 %v13957_v26, %v13957_v26  ;;  %v13959_v48 = vld [vmem:[#allocation150_spill] sm:$0xff] }
 0xa08   : > { %7628 = vmatmul.msk.bf16.gmra.mxu3 %vm2200_vm2, %v3807_v37  ;;  %v4440_v22 = vsel %vm2200_vm2, %v11658_v31, 0.0  ;;  %v11667_v59 = vpop.eup %8195  ;;  %v1750_v37 = vpack.c.bf16 %v13959_v48, %v13959_v48 }
 0xa09   : > { %8197 = vpow2.f32 %v4423_v38  ;;  %4130 = vadd.xlane.f32.xlu0 %v4129_v58  ;;  %4441 = vadd.xlane.f32.xlu1 %v4440_v22  ;;  %v4443_v46 = vsel %vm2200_vm2, %v11667_v59, 0.0  ;;  %v13960_v38 = vld [vmem:[#allocation149_spill] sm:$0xff]  ;;  %v5075_v58 = vunpack.c.l.b16 %v1752_v12  ;;  %v5076_v22 = vunpack.c.l.b16 %v1753_v29  ;;  %v13963_v12 = vld [vmem:[#allocation139_spill] sm:$0xff]  ;;  %v13964_v29 = vld [vmem:[#allocation138_spill] sm:$0xff] }
 0xa0a   : > { %8199 = vpow2.f32 %v4110_v60  ;;  %v1751_v60 = vpack.c.bf16 %v13960_v38, %v13960_v38 }
 0xa0b   : > { %8201 = vpow2.f32 %v4112_v7  ;;  %v5080_v34 = vpack.c.b16 %v5076_v22, %v5075_v58 }
 0xa0c   : > { %v5074_v26 = vunpack.c.l.b16 %v1751_v60 }
 0xa0f   : > { %v11669_v6 = vpop.eup %8197 }
 0xa10   : > { %v11671_v0 = vpop.eup %8199  ;;  %v4446_v27 = vsel %vm2200_vm2, %v11669_v6, 0.0 }
 0xa11   : > { %4444 = vadd.xlane.f32.xlu1 %v4443_v46  ;;  %4447 = vadd.xlane.f32.xlu2 %v4446_v27  ;;  %v4132_v8 = vsel %vm2200_vm2, %v11671_v0, 0.0  ;;  %v11679_v45 = vpop.eup %8201 }
 0xa12   : > { %4133 = vadd.xlane.f32.xlu0 %v4132_v8  ;;  %v4135_v13 = vsel %vm2200_vm2, %v11679_v45, 0.0 }
 0xa14   : > { %v4427_v16 = vpop.xlane.xlu1 %4426 }
 0xa19   : > { %4136 = vadd.xlane.f32.xlu1 %v4135_v13  ;;  %v13961_v13 = vld [vmem:[#allocation276_spill] sm:$0xff] }
 0xa1a   : > { %v1748_v61 = vpack.c.bf16 %v13961_v13, %v13961_v13  ;;  %v13966_v13 = vld [vmem:[#allocation162_spill] sm:$0xff] }
 0xa1c   : > { %v4119_v44 = vpop.xlane.xlu1 %4118  ;;  %v5071_v48 = vunpack.c.l.b16 %v1748_v61 }
 0xa1d   : > { %8203 = vrcp.f32 %v4119_v44  ;;  %v1749_v44 = vpack.c.bf16 %v13962_v28, %v13962_v28 }
 0xa23   : > { %v8204_v62 = vpop.eup %8203 }
 0xa24   : > { %v4147_v46 = vmul.f32 %v8204_v62, %v11591_v4  ;;  %v1746_v4 = vpack.c.bf16 %v13963_v12, %v13963_v12  ;;  %v1747_v62 = vpack.c.bf16 %v13964_v29, %v13964_v29 }
 0xa26   : > { %v5070_v61 = vunpack.c.l.b16 %v1747_v62  ;;  %v13972_v62 = vld [vmem:[#allocation227_spill] sm:$0xff] }
 0xa54   : > { %v4116_v35 = vpop.xlane.xlu0 %4115 }
 0xa55   : > { %8205 = vrcp.f32 %v4116_v35  ;;  %v5073_v35 = vunpack.c.l.b16 %v1750_v37 }
 0xa56   : > { %8207 = vrcp.f32 %v4427_v16 }
 0xa5b   : > { %v8206_v1 = vpop.eup %8205  ;;  %v3853_v7 = vpop.f32.mrf.mxu3 }
 0xa5c   : > { %v4146_v27 = vmul.f32 %v8206_v1, %v11602_v49  ;;  %v4430_v8 = vpop.xlane.xlu2 %4429  ;;  %v8208_v16 = vpop.eup %8207  ;;  %v5072_v1 = vunpack.c.l.b16 %v1749_v44 }
 0xa5d   : > { %8209 = vrcp.f32 %v4430_v8  ;;  %v13965_v8 = vld [vmem:[#allocation164_spill] sm:$0xff] }
 0xa5e   : > { %v4154_v9 = vpack.c.bf16 %v4147_v46, %v4146_v27  ;;  %v5079_v46 = vpack.c.b16 %v5074_v26, %v5073_v35  ;;  %v4457_v27 = vmul.f32 %v8208_v16, %v11587_v15  ;;  %v5078_v44 = vpack.c.b16 %v5072_v1, %v5071_v48  ;;  %v13968_v15 = vld [vmem:[#allocation169_spill] sm:$0xff]  ;;  %v13969_v35 = vld [vmem:[#allocation168_spill] sm:$0xff] }
 0xa60   : > { %7651 = vmatmul.msk.bf16.vlgmr.msrb.gmra.mxu3 %vm2200_vm2, %v4154_v9  ;;  %v13967_v9 = vpack.c.b16 %v13965_v8, %v13966_v13 }
 0xa61   : > { %5101 = vmatpush.bf16.msrb.mxu3 %v5080_v34  ;;  %v5069_v34 = vunpack.c.l.b16 %v1746_v4  ;;  %v13971_v4 = vld [vmem:[#allocation228_spill] sm:$0xff] }
 0xa62   : > { %v4682_v28 = vsel %vm2146_vm1, %v13967_v9, 0  ;;  %v13973_v48 = vpack.c.b16 %v13971_v4, %v13972_v62 }
 0xa63   : > { %v8210_v49 = vpop.eup %8209  ;;  %v3855_v38 = vpop.f32.mrf.mxu3  ;;  %v5077_v12 = vpack.c.b16 %v5070_v61, %v5069_v34 }
 0xa64   : > { %v4458_v37 = vmul.f32 %v8210_v49, %v11610_v42  ;;  %v3873_v60 = vpack.c.bf16 %v3855_v38, %v3853_v7  ;;  %v4433_v58 = vpop.xlane.xlu2 %4432  ;;  %v13970_v42 = vpack.c.b16 %v13968_v15, %v13969_v35  ;;  %v4122_v26 = vpop.xlane.xlu1 %4121  ;;  %v4679_v1 = vsel %vm2146_vm1, %v13973_v48, 0  ;;  %v13974_v38 = vld [vmem:[#allocation160_spill] sm:$0xff] }
 0xa65   : > { %5102 = vmatpush.bf16.msrb.mxu3 %v5079_v46  ;;  %8211 = vrcp.f32 %v4433_v58  ;;  %v13975_v46 = vld [vmem:[#allocation159_spill] sm:$0xff]  ;;  %v13977_v35 = vld [vmem:[#allocation224_spill] sm:$0xff] }
 0xa66   : > { %v4465_v22 = vpack.c.bf16 %v4458_v37, %v4457_v27  ;;  %7635 = vmatmul.msk.bf16.vlgmr.msrb.gmra.mxu0 %vm2146_vm1, %v3873_v60  ;;  %v5288_v7 = vsel %vm2146_vm1, %v13970_v42, 0  ;;  %8213 = vrcp.f32 %v4122_v26  ;;  %v13976_v27 = vpack.c.b16 %v13974_v38, %v13975_v46  ;;  %v13978_v42 = vld [vmem:[#allocation223_spill] sm:$0xff]  ;;  %v13983_v48 = vld [vmem:[#allocation220_spill] sm:$0xff] }
 0xa67   : > { %4688 = vmatpush.bf16.xpose.msrb.mxu0 %v4682_v28 }
 0xa68   : > { %7669 = vmatmul.msk.bf16.vlgmr.msra.gmra.mxu2 %vm2200_vm2, %v4465_v22  ;;  %v5285_v37 = vsel %vm2146_vm1, %v13976_v27, 0  ;;  %v13986_v27 = vld [vmem:[#allocation148_spill] sm:$0xff] }
 0xa69   : > { %5103 = vmatpush.bf16.msrb.mxu3 %v5078_v44  ;;  %5294 = vmatpush.bf16.xpose.msra.mxu2 %v5288_v7  ;;  %v13979_v7 = vpack.c.b16 %v13977_v35, %v13978_v42 }
 0xa6b   : > { %v3858_v16 = vpop.f32.mrf.mxu3  ;;  %v8212_v60 = vpop.eup %8211  ;;  %v4676_v26 = vsel %vm2146_vm1, %v13979_v7, 0 }
 0xa6c   : > { %v4436_v49 = vpop.xlane.xlu0 %4435  ;;  %v4125_v29 = vpop.xlane.xlu2 %4124  ;;  %v4459_v9 = vmul.f32 %v8212_v60, %v11616_v56  ;;  %v13980_v56 = vld [vmem:[#allocation155_spill] sm:$0xff] }
 0xa6d   : > { %8215 = vrcp.f32 %v4436_v49  ;;  %5104 = vmatpush.bf16.msrb.mxu3 %v5077_v12  ;;  %v8214_v58 = vpop.eup %8213 }
 0xa6e   : > { %8217 = vrcp.f32 %v4125_v29  ;;  %v4148_v44 = vmul.f32 %v8214_v58, %v11619_v39 }
 0xa6f   : > { %4689 = vmatpush.bf16.xpose.msrb.mxu0 %v4679_v1  ;;  %v13984_v1 = vld [vmem:[#allocation219_spill] sm:$0xff] }
 0xa70   : > { %v13985_v38 = vpack.c.b16 %v13983_v48, %v13984_v1 }
 0xa71   : > { %5295 = vmatpush.bf16.xpose.msra.mxu2 %v5285_v37  ;;  %v13987_v37 = vld [vmem:[#allocation147_spill] sm:$0xff] }
 0xa72   : > { %v4673_v46 = vsel %vm2146_vm1, %v13985_v38, 0  ;;  %v13988_v60 = vpack.c.b16 %v13986_v27, %v13987_v37  ;;  %v13989_v38 = vld [vmem:[#allocation262_spill] sm:$0xff]  ;;  %v13992_v37 = vld [vmem:[#allocation260_spill] sm:$0xff] }
 0xa73   : > { %v8216_v22 = vpop.eup %8215  ;;  %v3860_v8 = vpop.f32.mrf.mxu3  ;;  %v13991_v27 = vld [vmem:[#allocation258_spill] sm:$0xff] }
 0xa74   : > { %v8218_v13 = vpop.eup %8217  ;;  %v4460_v28 = vmul.f32 %v8216_v22, %v11633_v25  ;;  %v3874_v34 = vpack.c.bf16 %v3860_v8, %v3858_v16  ;;  %v4439_v61 = vpop.xlane.xlu0 %4438  ;;  %v13981_v25 = vld [vmem:[#allocation154_spill] sm:$0xff]  ;;  %v5279_v58 = vsel %vm2146_vm1, %v13988_v60, 0 }
 0xa75   : > { %v4149_v15 = vmul.f32 %v8218_v13, %v11630_v54  ;;  %v4128_v29 = vpop.xlane.xlu2 %4127  ;;  %v13982_v16 = vpack.c.b16 %v13980_v56, %v13981_v25 }
 0xa76   : > { %7636 = vmatmul.msk.bf16.gmra.mxu0 %vm2146_vm1, %v3874_v34  ;;  %v4466_v12 = vpack.c.bf16 %v4460_v28, %v4459_v9  ;;  %8219 = vrcp.f32 %v4128_v29 }
 0xa77   : > { %4690 = vmatpush.bf16.xpose.msrb.mxu0 %v4676_v26  ;;  %v4155_v49 = vpack.c.bf16 %v4149_v15, %v4148_v44  ;;  %v5282_v39 = vsel %vm2146_vm1, %v13982_v16, 0  ;;  %8221 = vrcp.f32 %v4439_v61 }
 0xa78   : > { %7670 = vmatmul.msk.bf16.gmra.mxu2 %vm2200_vm2, %v4466_v12 }
 0xa79   : > { %7652 = vmatmul.msk.bf16.gmra.mxu3 %vm2200_vm2, %v4155_v49  ;;  %5296 = vmatpush.bf16.xpose.msra.mxu2 %v5282_v39 }
 0xa7b   : > { %v3863_v54 = vpop.f32.mrf.mxu3 }
 0xa7c   : > { %v4131_v4 = vpop.xlane.xlu0 %4130  ;;  %v4442_v62 = vpop.xlane.xlu1 %4441 }
 0xa7d   : > { %8223 = vrcp.f32 %v4131_v4  ;;  %v8220_v22 = vpop.eup %8219 }
 0xa7e   : > { %8225 = vrcp.f32 %v4442_v62  ;;  %v8222_v8 = vpop.eup %8221  ;;  %v4150_v34 = vmul.f32 %v8220_v22, %v11645_v47  ;;  %v13993_v22 = vld [vmem:[#allocation254_spill] sm:$0xff] }
 0xa7f   : > { %4691 = vmatpush.bf16.xpose.msrb.mxu0 %v4673_v46  ;;  %v4461_v35 = vmul.f32 %v8222_v8, %v11642_v41  ;;  %v2028_v46 = vpack.c.bf16 %v13989_v38, %v13989_v38  ;;  %v2024_v8 = vpack.c.bf16 %v13993_v22, %v13993_v22 }
 0xa81   : > { %5297 = vmatpush.bf16.xpose.msra.mxu2 %v5279_v58  ;;  %v5736_v60 = vunpack.c.l.b16 %v2028_v46 }
 0xa83   : > { %v8224_v13 = vpop.eup %8223  ;;  %v3865_v9 = vpop.f32.mrf.mxu3 }
 0xa84   : > { %v8226_v28 = vpop.eup %8225  ;;  %v4151_v61 = vmul.f32 %v8224_v13, %v11654_v32  ;;  %v3875_v44 = vpack.c.bf16 %v3865_v9, %v3863_v54  ;;  %v4445_v15 = vpop.xlane.xlu1 %4444  ;;  %v13994_v13 = vld [vmem:[#allocation256_spill] sm:$0xff] }
 0xa85   : > { %v4462_v42 = vmul.f32 %v8226_v28, %v11658_v31  ;;  %v4448_v26 = vpop.xlane.xlu2 %4447  ;;  %v4134_v49 = vpop.xlane.xlu0 %4133  ;;  %8227 = vrcp.f32 %v4445_v15  ;;  %v2025_v9 = vpack.c.bf16 %v13994_v13, %v13994_v13  ;;  %v13996_v15 = vld [vmem:[#allocation49_spill] sm:$0xff]  ;;  %v14015_v13 = vld [vmem:[#allocation242_spill] sm:$0xff] }
 0xa86   : > { %7637 = vmatmul.msk.bf16.gmra.mxu0 %vm2146_vm1, %v3875_v44  ;;  %v4156_v7 = vpack.c.bf16 %v4151_v61, %v4150_v34  ;;  %8229 = vrcp.f32 %v4448_v26  ;;  %v13995_v44 = vld [vmem:[#allocation51_spill] sm:$0xff]  ;;  %v13999_v26 = vld [vmem:[#allocation253_spill] sm:$0xff] }
 0xa87   : > { %v4467_v12 = vpack.c.bf16 %v4462_v42, %v4461_v35  ;;  %8231 = vrcp.f32 %v4134_v49  ;;  %v13997_v35 = vpack.c.b16 %v13995_v44, %v13996_v15  ;;  %v13998_v42 = vld [vmem:[#allocation252_spill] sm:$0xff]  ;;  %v5732_v49 = vunpack.c.l.b16 %v2024_v8  ;;  %v14018_v15 = vld [vmem:[#allocation7_spill] sm:$0xff] }
 0xa89   : > { %7653 = vmatmul.msk.bf16.gmra.mxu3 %vm2200_vm2, %v4156_v7  ;;  %7671 = vmatmul.msk.bf16.gmra.mxu2 %vm2200_vm2, %v4467_v12  ;;  %v2022_v7 = vpack.c.bf16 %v13998_v42, %v13998_v42  ;;  %v2023_v12 = vpack.c.bf16 %v13999_v26, %v13999_v26  ;;  %v14022_v26 = vld [vmem:[#allocation60_spill] sm:$0xff] }
 0xa8b   : > { %v3868_v47 = vpop.f32.mrf.mxu3  ;;  %v8228_v29 = vpop.eup %8227 }
 0xa8c   : > { %v4137_v32 = vpop.xlane.xlu1 %4136  ;;  %v8230_v41 = vpop.eup %8229  ;;  %v4463_v25 = vmul.f32 %v8228_v29, %v11667_v59  ;;  %v13990_v59 = vld [vmem:[#allocation266_spill] sm:$0xff]  ;;  %v5730_v29 = vunpack.c.l.b16 %v2022_v7  ;;  %v14021_v7 = vld [vmem:[#allocation61_spill] sm:$0xff] }
 0xa8d   : > { %8233 = vrcp.f32 %v4137_v32  ;;  %v8232_v56 = vpop.eup %8231  ;;  %v4464_v16 = vmul.f32 %v8230_v41, %v11669_v6  ;;  %v2029_v6 = vpack.c.bf16 %v13990_v59, %v13990_v59  ;;  %v5731_v41 = vunpack.c.l.b16 %v2023_v12  ;;  %v14009_v59 = vld [vmem:[#allocation53_spill] sm:$0xff] }
 0xa8e   : > { %v4152_v54 = vmul.f32 %v8232_v56, %v11671_v0  ;;  %v2026_v0 = vpack.c.bf16 %v13991_v27, %v13991_v27  ;;  %v14023_v12 = vpack.c.b16 %v14021_v7, %v14022_v26 }
 0xa8f   : > { %v4468_v1 = vpack.c.bf16 %v4464_v16, %v4463_v25  ;;  %v5737_v58 = vunpack.c.l.b16 %v2029_v6  ;;  %v14000_v25 = vld [vmem:[#allocation59_spill] sm:$0xff]  ;;  %v14001_v16 = vld [vmem:[#allocation57_spill] sm:$0xff]  ;;  %v14010_v6 = vld [vmem:[#allocation52_spill] sm:$0xff] }
 0xa90   : > { %v5734_v28 = vunpack.c.l.b16 %v2026_v0  ;;  %v14011_v27 = vpack.c.b16 %v14009_v59, %v14010_v6  ;;  %v14012_v0 = vld [vmem:[#allocation194_spill] sm:$0xff]  ;;  %v14037_v59 = vld [vmem:[#allocation225_spill] sm:$0xff] }
 0xa91   : > { %v5741_v61 = vpack.c.b16 %v5737_v58, %v5736_v60 }
 0xa93   : > { %v8234_v31 = vpop.eup %8233  ;;  %v3870_v39 = vpop.f32.mrf.mxu3 }
 0xa94   : > { %v4153_v4 = vmul.f32 %v8234_v31, %v11679_v45  ;;  %v3876_v62 = vpack.c.bf16 %v3870_v39, %v3868_v47  ;;  %v2027_v45 = vpack.c.bf16 %v13992_v37, %v13992_v37  ;;  %v5733_v47 = vunpack.c.l.b16 %v2025_v9  ;;  %v14013_v37 = vld [vmem:[#allocation192_spill] sm:$0xff]  ;;  %v14016_v9 = vld [vmem:[#allocation186_spill] sm:$0xff] }
 0xa95   : > { %v5738_v31 = vpack.c.b16 %v5731_v41, %v5730_v29  ;;  %v14002_v39 = vpack.c.b16 %v14000_v25, %v14001_v16  ;;  %v14027_v41 = vld [vmem:[#allocation133_spill] sm:$0xff] }
 0xa96   : > { %7638 = vmatmul.msk.bf16.gmra.mxu0 %vm2146_vm1, %v3876_v62  ;;  %v4157_v48 = vpack.c.bf16 %v4153_v4, %v4152_v54  ;;  %v5735_v34 = vunpack.c.l.b16 %v2027_v45  ;;  %v5739_v56 = vpack.c.b16 %v5733_v47, %v5732_v49  ;;  %v14003_v54 = vld [vmem:[#allocation67_spill] sm:$0xff]  ;;  %v14004_v4 = vld [vmem:[#allocation65_spill] sm:$0xff]  ;;  %v14014_v45 = vpack.c.b16 %v14012_v0, %v14013_v37  ;;  %v14024_v49 = vld [vmem:[#allocation238_spill] sm:$0xff] }
 0xa97   : > { %v14005_v62 = vpack.c.b16 %v14003_v54, %v14004_v4  ;;  %v14025_v47 = vld [vmem:[#allocation178_spill] sm:$0xff]  ;;  %v14031_v54 = vld [vmem:[#allocation229_spill] sm:$0xff] }
 0xa98   : > { %v5740_v32 = vpack.c.b16 %v5735_v34, %v5734_v28  ;;  %v6191_v60 = vsel %vm2146_vm1, %v14014_v45, 0  ;;  %v14017_v28 = vpack.c.b16 %v14015_v13, %v14016_v9 }
 0xa99   : > { %7654 = vmatmul.msk.bf16.gmra.mxu3 %vm2200_vm2, %v4157_v48  ;;  %7672 = vmatmul.msk.bf16.gmra.mxu2 %vm2200_vm2, %v4468_v1  ;;  %v14006_v48 = vld [vmem:[#allocation75_spill] sm:$0xff]  ;;  %v14007_v1 = vld [vmem:[#allocation73_spill] sm:$0xff] }
 0xa9a   : > { %v14008_v38 = vpack.c.b16 %v14006_v48, %v14007_v1  ;;  %v6188_v34 = vsel %vm2146_vm1, %v14017_v28, 0  ;;  %v14034_v48 = vld [vmem:[#allocation171_spill] sm:$0xff] }
 0xaa9   : > { %7699 = vmatmul.msk.bf16.vlgmr.msrb.gmra.mxu2 %vm2146_vm1, %v13997_v35  ;;  %v14019_v35 = vld [vmem:[#allocation9_spill] sm:$0xff] }
 0xaaa   : > { %5762 = vmatpush.bf16.msrb.mxu2 %v5741_v61  ;;  %v14020_v42 = vpack.c.b16 %v14018_v15, %v14019_v35  ;;  %v14043_v15 = vld [vmem:[#allocation76_spill] sm:$0xff] }
 0xaae   : > { %5763 = vmatpush.bf16.msrb.mxu2 %v5740_v32  ;;  %v14026_v32 = vpack.c.b16 %v14024_v49, %v14025_v47 }
 0xab0   : > { %v6185_v29 = vsel %vm2146_vm1, %v14026_v32, 0 }
 0xab2   : > { %5764 = vmatpush.bf16.msrb.mxu2 %v5739_v56  ;;  %v14028_v56 = vld [vmem:[#allocation129_spill] sm:$0xff] }
 0xab6   : > { %5765 = vmatpush.bf16.msrb.mxu2 %v5738_v31  ;;  %v14029_v31 = vpack.c.b16 %v14027_v41, %v14028_v56 }
 0xab9   : > { %7700 = vmatmul.msk.bf16.gmra.mxu2 %vm2146_vm1, %v14002_v39  ;;  %v14030_v39 = vld [vmem:[#allocation230_spill] sm:$0xff] }
 0xaba   : > { %v14032_v4 = vpack.c.b16 %v14030_v39, %v14031_v54  ;;  %v14045_v39 = vld [vmem:[#allocation50_spill] sm:$0xff]  ;;  %v14046_v54 = vld [vmem:[#allocation48_spill] sm:$0xff] }
 0xac9   : > { %7701 = vmatmul.msk.bf16.gmra.mxu2 %vm2146_vm1, %v14005_v62  ;;  %v14033_v62 = vld [vmem:[#allocation233_spill] sm:$0xff] }
 0xaca   : > { %v14035_v1 = vpack.c.b16 %v14033_v62, %v14034_v48 }
 0xad9   : > { %7702 = vmatmul.msk.bf16.gmra.mxu2 %vm2146_vm1, %v14008_v38  ;;  %v6182_v38 = vsel %vm2146_vm1, %v14035_v1, 0 }
 0xae3   : > { %v4203_v46 = vpop.f32.mrf.mxu3  ;;  %v3906_v26 = vpop.f32.mrf.mxu0 }
 0xae9   : > { %7725 = vmatmul.msk.bf16.vlgmr.msra.gmra.mxu2 %vm2146_vm1, %v14011_v27 }
 0xaea   : > { %6197 = vmatpush.bf16.xpose.msra.mxu2 %v6191_v60  ;;  %v14039_v60 = vld [vmem:[#allocation69_spill] sm:$0xff] }
 0xaeb   : > { %v4205_v58 = vpop.f32.mrf.mxu3  ;;  %v4514_v8 = vpop.f32.mrf.mxu2 }
 0xaec   : > { %v4223_v22 = vpack.c.bf16 %v4205_v58, %v4203_v46  ;;  %v14036_v46 = vld [vmem:[#allocation226_spill] sm:$0xff]  ;;  %v14040_v58 = vld [vmem:[#allocation68_spill] sm:$0xff]  ;;  %v3908_v56 = vpop.f32.mrf.mxu0 }
 0xaed   : > { %v14038_v6 = vpack.c.b16 %v14036_v46, %v14037_v59 }
 0xaee   : > { %7661 = vmatmul.msk.bf16.vlgmr.msra.gmra.mxu0 %vm2146_vm1, %v4223_v22  ;;  %v14041_v22 = vpack.c.b16 %v14039_v60, %v14040_v58 }
 0xaf2   : > { %6198 = vmatpush.bf16.xpose.msra.mxu2 %v6188_v34 }
 0xaf3   : > { %v4516_v61 = vpop.f32.mrf.mxu2 }
 0xaf4   : > { %v4534_v44 = vpack.c.bf16 %v4516_v61, %v4514_v8  ;;  %v3911_v48 = vpop.f32.mrf.mxu0 }
 0xaf6   : > { %7679 = vmatmul.msk.bf16.vlgmr.msra.gmra.mxu3 %vm2146_vm1, %v4534_v44  ;;  %v14042_v44 = vld [vmem:[#allocation77_spill] sm:$0xff] }
 0xaf7   : > { %5451 = vmatpush.bf16.msra.mxu3 %v14020_v42  ;;  %v14044_v35 = vpack.c.b16 %v14042_v44, %v14043_v15  ;;  %v14052_v44 = vld [vmem:[#allocation64_spill] sm:$0xff] }
 0xaf9   : > { %7726 = vmatmul.msk.bf16.gmra.mxu2 %vm2146_vm1, %v14023_v12 }
 0xafa   : > { %6199 = vmatpush.bf16.xpose.msra.mxu2 %v6185_v29 }
 0xafb   : > { %5452 = vmatpush.bf16.msra.mxu3 %v14029_v31  ;;  %v4519_v16 = vpop.f32.mrf.mxu2 }
 0xafc   : > { %v4208_v25 = vpop.f32.mrf.mxu3  ;;  %v3913_v59 = vpop.f32.mrf.mxu0 }
 0xaff   : > { %5453 = vmatpush.bf16.msra.mxu3 %v14032_v4  ;;  %v14047_v4 = vpack.c.b16 %v14045_v39, %v14046_v54 }
 0xb02   : > { %6200 = vmatpush.bf16.xpose.msra.mxu2 %v6182_v38 }
 0xb03   : > { %5454 = vmatpush.bf16.msra.mxu3 %v14038_v6  ;;  %v4521_v0 = vpop.f32.mrf.mxu2 }
 0xb04   : > { %v4210_v27 = vpop.f32.mrf.mxu3  ;;  %v4535_v45 = vpack.c.bf16 %v4521_v0, %v4519_v16  ;;  %v14048_v0 = vld [vmem:[#allocation58_spill] sm:$0xff]  ;;  %v3916_v58 = vpop.f32.mrf.mxu0 }
 0xb05   : > { %v4224_v37 = vpack.c.bf16 %v4210_v27, %v4208_v25 }
 0xb06   : > { %7680 = vmatmul.msk.bf16.gmra.mxu3 %vm2146_vm1, %v4535_v45 }
 0xb07   : > { %7662 = vmatmul.msk.bf16.gmra.mxu0 %vm2146_vm1, %v4224_v37  ;;  %v14049_v37 = vld [vmem:[#allocation56_spill] sm:$0xff] }
 0xb08   : > { %v14050_v45 = vpack.c.b16 %v14048_v0, %v14049_v37 }
 0xb09   : > { %7727 = vmatmul.msk.bf16.gmra.mxu2 %vm2146_vm1, %v14041_v22 }
 0xb0c   : > { %v4213_v8 = vpop.f32.mrf.mxu3  ;;  %v4524_v13 = vpop.f32.mrf.mxu2 }
 0xb14   : > { %v4215_v9 = vpop.f32.mrf.mxu3  ;;  %v4526_v28 = vpop.f32.mrf.mxu2 }
 0xb15   : > { %v4225_v34 = vpack.c.bf16 %v4215_v9, %v4213_v8  ;;  %v4536_v61 = vpack.c.bf16 %v4526_v28, %v4524_v13 }
 0xb17   : > { %7663 = vmatmul.msk.bf16.gmra.mxu0 %vm2146_vm1, %v4225_v34  ;;  %7681 = vmatmul.msk.bf16.gmra.mxu3 %vm2146_vm1, %v4536_v61  ;;  %v3918_v34 = vpop.f32.mrf.mxu0  ;;  %v14051_v61 = vld [vmem:[#allocation66_spill] sm:$0xff] }
 0xb18   : > { %v14053_v15 = vpack.c.b16 %v14051_v61, %v14052_v44 }
 0xb19   : > { %7728 = vmatmul.msk.bf16.gmra.mxu2 %vm2146_vm1, %v14044_v35 }
 0xb1c   : > { %v4218_v42 = vpop.f32.mrf.mxu3  ;;  %v4529_v7 = vpop.f32.mrf.mxu2 }
 0xb24   : > { %v4220_v12 = vpop.f32.mrf.mxu3  ;;  %v4531_v49 = vpop.f32.mrf.mxu2 }
 0xb25   : > { %v4226_v47 = vpack.c.bf16 %v4220_v12, %v4218_v42  ;;  %v4537_v32 = vpack.c.bf16 %v4531_v49, %v4529_v7  ;;  %v11899_v49 = vpop.f32.mrf.mxu0 }
 0xb27   : > { %7664 = vmatmul.msk.bf16.gmra.mxu0 %vm2146_vm1, %v4226_v47  ;;  %7682 = vmatmul.msk.bf16.gmra.mxu3 %vm2146_vm1, %v4537_v32 }
 0xb2c   : > { %v4949_v29 = vpop.f32.mrf.mxu2 }
 0xb2d   : > { %v11853_v41 = vadd.f32 %v13936_v17, %v4949_v29  ;;  %v14054_v29 = vld [vmem:[#allocation74_spill] sm:$0xff]  ;;  %v11910_v54 = vpop.f32.mrf.mxu0 }
 0xb2f   : > { %v4969_v31 = vsel %vm2200_vm2, %v11853_v41, -inf }
 0xb30   : > { %4970 = vmax.xlane.f32.xlu2 %v4969_v31  ;;  %v14055_v31 = vld [vmem:[#allocation72_spill] sm:$0xff] }
 0xb34   : > { %v4951_v25 = vpop.f32.mrf.mxu2 }
 0xb35   : > { %v11858_v16 = vadd.f32 %v13937_v40, %v4951_v25  ;;  %v14056_v25 = vpack.c.b16 %v14054_v29, %v14055_v31 }
 0xb37   : > { %7691 = vmatmul.msk.bf16.vlgmr.msrb.gmra.mxu0 %vm2146_vm1, %v14047_v4  ;;  %v4972_v62 = vsel %vm2200_vm2, %v11858_v16, -inf }
 0xb38   : > { %4973 = vmax.xlane.f32.xlu0 %v4972_v62 }
 0xb3c   : > { %v4954_v1 = vpop.f32.mrf.mxu2 }
 0xb3d   : > { %v11867_v38 = vadd.f32 %v13939_v14, %v4954_v1 }
 0xb3f   : > { %v4975_v46 = vsel %vm2200_vm2, %v11867_v38, -inf }
 0xb40   : > { %4976 = vmax.xlane.f32.xlu1 %v4975_v46 }
 0xb44   : > { %v4956_v6 = vpop.f32.mrf.mxu2 }
 0xb45   : > { %v11872_v27 = vadd.f32 %v13941_v2, %v4956_v6  ;;  %v3954_v6 = vadd.f32 %v11328_v18, %v3906_v26 }
 0xb47   : > { %7692 = vmatmul.msk.bf16.gmra.mxu0 %vm2146_vm1, %v14050_v45  ;;  %v4978_v60 = vsel %vm2200_vm2, %v11872_v27, -inf }
 0xb48   : > { %4979 = vmax.xlane.f32.xlu2 %v4978_v60 }
 0xb4c   : > { %v4959_v22 = vpop.f32.mrf.mxu2 }
 0xb4d   : > { %v11881_v8 = vadd.f32 %v13942_v33, %v4959_v22  ;;  %v11921_v22 = vld [vmem:[%s13074_s6] ss:$0 sm:$0xff] }
 0xb4f   : > { %v4981_v13 = vsel %vm2200_vm2, %v11881_v8, -inf }
 0xb50   : > { %4982 = vmax.xlane.f32.xlu0 %v4981_v13 }
 0xb54   : > { %v4961_v9 = vpop.f32.mrf.mxu2 }
 0xb55   : > { %v11886_v28 = vadd.f32 %v13944_v24, %v4961_v9  ;;  %v3956_v9 = vadd.f32 %v11330_v53, %v3908_v56 }
 0xb57   : > { %7693 = vmatmul.msk.bf16.gmra.mxu0 %vm2146_vm1, %v14053_v15  ;;  %v4984_v35 = vsel %vm2200_vm2, %v11886_v28, -inf }
 0xb58   : > { %4985 = vmax.xlane.f32.xlu1 %v4984_v35 }
 0xb5c   : > { %v4964_v42 = vpop.f32.mrf.mxu2 }
 0xb5d   : > { %v11895_v7 = vadd.f32 %v13946_v50, %v4964_v42  ;;  %v3959_v42 = vadd.f32 %v11338_v36, %v3911_v48 }
 0xb5f   : > { %v4987_v12 = vsel %vm2200_vm2, %v11895_v7, -inf }
 0xb60   : > { %4988 = vmax.xlane.f32.xlu2 %v4987_v12 }
 0xb64   : > { %v4966_v47 = vpop.f32.mrf.mxu2 }
 0xb65   : > { %v11902_v32 = vadd.f32 %v13948_v11, %v4966_v47 }
 0xb67   : > { %7694 = vmatmul.msk.bf16.gmra.mxu0 %vm2146_vm1, %v14056_v25  ;;  %v4990_v39 = vsel %vm2200_vm2, %v11902_v32, -inf  ;;  %v14057_v25 = vld [vmem:[#allocation47_spill] sm:$0xff] }
 0xb68   : > { %4991 = vmax.xlane.f32.xlu0 %v4990_v39  ;;  %v3961_v39 = vadd.f32 %v14057_v25, %v3913_v59 }
 0xb6b   : > { %v4256_v46 = vpop.f32.mrf.mxu0 }
 0xb6c   : > { %v5299_v4 = vpop.f32.mrf.mxu2  ;;  %v4276_v0 = vadd.f32 %v4256_v46, %v3954_v6 }
 0xb6d   : > { %v11913_v62 = vadd.f32 %v13953_v51, %v5299_v4 }
 0xb6f   : > { %v5319_v1 = vsel %vm2200_vm2, %v11913_v62, -inf }
 0xb70   : > { %5320 = vmax.xlane.f32.xlu0 %v5319_v1 }
 0xb73   : > { %v4258_v60 = vpop.f32.mrf.mxu0 }
 0xb74   : > { %v4277_v44 = vadd.f32 %v4258_v60, %v3956_v9 }
 0xb79   : > { %v4567_v37 = vpop.f32.mrf.mxu3 }
 0xb7a   : > { %v4587_v45 = vadd.f32 %v4567_v37, %v4276_v0  ;;  %v14058_v0 = vld [vmem:[#allocation46_spill] sm:$0xff] }
 0xb7b   : > { %v3964_v37 = vadd.f32 %v14058_v0, %v3916_v58  ;;  %v5301_v58 = vpop.f32.mrf.mxu2 }
 0xb7c   : > { %v4595_v13 = vadd.f32 %v11921_v22, %v4587_v45 }
 0xb7e   : > { %v4603_v61 = vpack.c.bf16 %v4595_v13, %v4595_v13 }
 0xb80   : > { %7683 = vst.msk [vmem:[%s11414_s19 + $0x20] sm:$0xf] %vm3358_vm3, %v4603_v61 }
 0xb81   : > { %v4569_v18 = vpop.f32.mrf.mxu3 }
 0xb82   : > { %v4588_v26 = vadd.f32 %v4569_v18, %v4277_v44  ;;  %v14059_v44 = vld [vmem:[#allocation55_spill] sm:$0xff] }
 0xb83   : > { %v3966_v18 = vadd.f32 %v14059_v44, %v3918_v34 }
 0xb84   : > { %v4261_v15 = vpop.f32.mrf.mxu0  ;;  %v4596_v35 = vadd.f32 %v11921_v22, %v4588_v26 }
 0xb85   : > { %v4278_v47 = vadd.f32 %v4261_v15, %v3959_v42 }
 0xb86   : > { %v4604_v12 = vpack.c.bf16 %v4596_v35, %v4596_v35 }
 0xb88   : > { %7684 = vst.msk [vmem:[%s11414_s19 + $0x24] sm:$0xf] %vm3358_vm3, %v4604_v12 }
 0xb89   : > { %v4572_v29 = vpop.f32.mrf.mxu3 }
 0xb8a   : > { %v4589_v31 = vadd.f32 %v4572_v29, %v4278_v47 }
 0xb8c   : > { %v4263_v53 = vpop.f32.mrf.mxu0  ;;  %v4597_v56 = vadd.f32 %v11921_v22, %v4589_v31 }
 0xb8d   : > { %v4279_v1 = vadd.f32 %v4263_v53, %v3961_v39 }
 0xb8e   : > { %v4605_v4 = vpack.c.bf16 %v4597_v56, %v4597_v56  ;;  %v14060_v56 = vld [vmem:[#allocation54_spill] sm:$0xff] }
 0xb8f   : > { %v3969_v25 = vadd.f32 %v14060_v56, %v11899_v49  ;;  %v14061_v49 = vld [vmem:[#allocation176_spill] sm:$0xff] }
 0xb90   : > { %7685 = vst.msk [vmem:[%s11414_s19 + $0x28] sm:$0xf] %vm3358_vm3, %v4605_v4 }
 0xb91   : > { %v4574_v46 = vpop.f32.mrf.mxu3 }
 0xb92   : > { %v4590_v6 = vadd.f32 %v4574_v46, %v4279_v1 }
 0xb94   : > { %v4266_v36 = vpop.f32.mrf.mxu0  ;;  %v4598_v48 = vadd.f32 %v11921_v22, %v4590_v6 }
 0xb95   : > { %v4280_v60 = vadd.f32 %v4266_v36, %v3964_v37 }
 0xb96   : > { %v4606_v45 = vpack.c.bf16 %v4598_v48, %v4598_v48  ;;  %v5304_v48 = vpop.f32.mrf.mxu2 }
 0xb98   : > { %7686 = vst.msk [vmem:[%s11414_s19 + $0x2c] sm:$0xf] %vm3358_vm3, %v4606_v45  ;;  %v3971_v45 = vadd.f32 %v14061_v49, %v11910_v54 }
 0xb9a   : > { %v4577_v13 = vpop.f32.mrf.mxu3 }
 0xb9b   : > { %v4591_v9 = vadd.f32 %v4577_v13, %v4280_v60 }
 0xb9c   : > { %v4268_v61 = vpop.f32.mrf.mxu0 }
 0xb9d   : > { %v4599_v59 = vadd.f32 %v11921_v22, %v4591_v9  ;;  %v4281_v15 = vadd.f32 %v4268_v61, %v3966_v18  ;;  %v14062_v61 = vld [vmem:[#allocation205_spill] sm:$0xff] }
 0xb9f   : > { %v4607_v26 = vpack.c.bf16 %v4599_v59, %v4599_v59  ;;  %v11960_v59 = vadd.f32 %v14062_v61, %v5301_v58 }
 0xba1   : > { %7687 = vst.msk [vmem:[%s11414_s19 + $0x30] sm:$0xf] %vm3358_vm3, %v4607_v26 }
 0xba2   : > { %v4579_v35 = vpop.f32.mrf.mxu3 }
 0xba3   : > { %v4592_v42 = vadd.f32 %v4579_v35, %v4281_v15  ;;  %v4971_v12 = vpop.xlane.xlu2 %4970 }
 0xba4   : > { %v4993_v47 = vsub.f32 %v11853_v41, %v4971_v12  ;;  %v4271_v29 = vpop.f32.mrf.mxu0 }
 0xba5   : > { %v4600_v31 = vadd.f32 %v11921_v22, %v4592_v42  ;;  %v4282_v34 = vadd.f32 %v4271_v29, %v3969_v25  ;;  %v5306_v29 = vpop.f32.mrf.mxu2 }
 0xba6   : > { %v5001_v53 = vmul.f32 1.442695, %v4993_v47  ;;  %v5322_v47 = vsel %vm2200_vm2, %v11960_v59, -inf }
 0xba7   : > { %v4608_v39 = vpack.c.bf16 %v4600_v31, %v4600_v31 }
 0xba8   : > { %8235 = vpow2.f32 %v5001_v53 }
 0xba9   : > { %7688 = vst.msk [vmem:[%s11414_s19 + $0x34] sm:$0xf] %vm3358_vm3, %v4608_v39 }
 0xbaa   : > { %v4582_v4 = vpop.f32.mrf.mxu3 }
 0xbab   : > { %v4593_v1 = vadd.f32 %v4582_v4, %v4282_v34  ;;  %v4974_v46 = vpop.xlane.xlu0 %4973  ;;  %v11983_v34 = vadd.f32 %v13950_v23, %v5306_v29 }
 0xbac   : > { %v4994_v6 = vsub.f32 %v11858_v16, %v4974_v46  ;;  %v4273_v37 = vpop.f32.mrf.mxu0 }
 0xbad   : > { %v4601_v41 = vadd.f32 %v11921_v22, %v4593_v1  ;;  %v4283_v9 = vadd.f32 %v4273_v37, %v3971_v45  ;;  %v5309_v39 = vpop.f32.mrf.mxu2 }
 0xbae   : > { %v11951_v36 = vpop.eup %8235  ;;  %v5003_v0 = vmul.f32 1.442695, %v4994_v6  ;;  %v5328_v6 = vsel %vm2200_vm2, %v11983_v34, -inf }
 0xbaf   : > { %v4609_v60 = vpack.c.bf16 %v4601_v41, %v4601_v41  ;;  %v5017_v13 = vsel %vm2200_vm2, %v11951_v36, 0.0 }
 0xbb0   : > { %8237 = vpow2.f32 %v5003_v0  ;;  %5018 = vadd.xlane.f32.xlu1 %v5017_v13 }
 0xbb1   : > { %7689 = vst.msk [vmem:[%s11414_s19 + $0x38] sm:$0xf] %vm3358_vm3, %v4609_v60 }
 0xbb2   : > { %v4584_v16 = vpop.f32.mrf.mxu3 }
 0xbb3   : > { %v4594_v44 = vadd.f32 %v4584_v16, %v4283_v9  ;;  %v4977_v18 = vpop.xlane.xlu1 %4976 }
 0xbb4   : > { %v4995_v26 = vsub.f32 %v11867_v38, %v4977_v18  ;;  %v11973_v38 = vadd.f32 %v13954_v20, %v5304_v48  ;;  %v11993_v48 = vadd.f32 %v13955_v57, %v5309_v39 }
 0xbb5   : > { %v4602_v54 = vadd.f32 %v11921_v22, %v4594_v44  ;;  %v5311_v37 = vpop.f32.mrf.mxu2 }
 0xbb6   : > { %v11964_v15 = vpop.eup %8237  ;;  %v5005_v35 = vmul.f32 1.442695, %v4995_v26  ;;  %v5325_v25 = vsel %vm2200_vm2, %v11973_v38, -inf  ;;  %v5331_v60 = vsel %vm2200_vm2, %v11993_v48, -inf  ;;  %v12003_v9 = vadd.f32 %v13951_v10, %v5311_v37 }
 0xbb7   : > { %v4610_v42 = vpack.c.bf16 %v4602_v54, %v4602_v54  ;;  %v5020_v12 = vsel %vm2200_vm2, %v11964_v15, 0.0 }
 0xbb8   : > { %8239 = vpow2.f32 %v5005_v35  ;;  %5021 = vadd.xlane.f32.xlu2 %v5020_v12  ;;  %5323 = vmax.xlane.f32.xlu1 %v5322_v47  ;;  %v5334_v35 = vsel %vm2200_vm2, %v12003_v9, -inf }
 0xbb9   : > { %7690 = vst.msk [vmem:[%s11414_s19 + $0x3c] sm:$0xf] %vm3358_vm3, %v4610_v42 }
 0xbbb   : > { %v4980_v22 = vpop.xlane.xlu2 %4979 }
 0xbbc   : > { %v4996_v58 = vsub.f32 %v11872_v27, %v4980_v22 }
 0xbbe   : > { %v11976_v31 = vpop.eup %8239  ;;  %v5007_v53 = vmul.f32 1.442695, %v4996_v58 }
 0xbbf   : > { %v5023_v56 = vsel %vm2200_vm2, %v11976_v31, 0.0 }
 0xbc0   : > { %8241 = vpow2.f32 %v5007_v53  ;;  %5024 = vadd.xlane.f32.xlu2 %v5023_v56  ;;  %5326 = vmax.xlane.f32.xlu1 %v5325_v25 }
 0xbc3   : > { %v4983_v4 = vpop.xlane.xlu0 %4982 }
 0xbc4   : > { %v4997_v1 = vsub.f32 %v11881_v8, %v4983_v4 }
 0xbc6   : > { %v11986_v27 = vpop.eup %8241  ;;  %v5009_v46 = vmul.f32 1.442695, %v4997_v1 }
 0xbc7   : > { %v5026_v41 = vsel %vm2200_vm2, %v11986_v27, 0.0 }
 0xbc8   : > { %8243 = vpow2.f32 %v5009_v46  ;;  %5329 = vmax.xlane.f32.xlu2 %v5328_v6  ;;  %5027 = vadd.xlane.f32.xlu0 %v5026_v41 }
 0xbcb   : > { %v4986_v0 = vpop.xlane.xlu1 %4985 }
 0xbcc   : > { %v4998_v49 = vsub.f32 %v11886_v28, %v4986_v0  ;;  %v5314_v28 = vpop.f32.mrf.mxu2  ;;  %v4693_v0 = vpop.f32.mrf.mxu0 }
 0xbcd   : > { %v12013_v42 = vadd.f32 %v13956_v52, %v5314_v28  ;;  %v14076_v52 = vld [vmem:[#allocation18_spill] sm:$0xff] }
 0xbce   : > { %v11996_v8 = vpop.eup %8243  ;;  %v5011_v45 = vmul.f32 1.442695, %v4998_v49  ;;  %v1757_v57 = vpack.c.bf16 %v14076_v52, %v14076_v52 }
 0xbcf   : > { %v5029_v13 = vsel %vm2200_vm2, %v11996_v8, 0.0  ;;  %v5337_v22 = vsel %vm2200_vm2, %v12013_v42, -inf }
 0xbd0   : > { %8245 = vpow2.f32 %v5011_v45  ;;  %5332 = vmax.xlane.f32.xlu2 %v5331_v60  ;;  %5030 = vadd.xlane.f32.xlu0 %v5029_v13 }
 0xbd3   : > { %v4989_v16 = vpop.xlane.xlu2 %4988 }
 0xbd4   : > { %v4999_v44 = vsub.f32 %v11895_v7, %v4989_v16  ;;  %v5316_v53 = vpop.f32.mrf.mxu2  ;;  %v4695_v37 = vpop.f32.mrf.mxu0 }
 0xbd5   : > { %v12023_v56 = vadd.f32 %v13952_v55, %v5316_v53 }
 0xbd6   : > { %v12006_v18 = vpop.eup %8245  ;;  %v5013_v26 = vmul.f32 1.442695, %v4999_v44 }
 0xbd7   : > { %v5032_v54 = vsel %vm2200_vm2, %v12006_v18, 0.0  ;;  %v5340_v46 = vsel %vm2200_vm2, %v12023_v56, -inf }
 0xbd8   : > { %8247 = vpow2.f32 %v5013_v26  ;;  %5033 = vadd.xlane.f32.xlu1 %v5032_v54  ;;  %5335 = vmax.xlane.f32.xlu0 %v5334_v35 }
 0xbdb   : > { %v4992_v12 = vpop.xlane.xlu0 %4991 }
 0xbdc   : > { %v5000_v47 = vsub.f32 %v11902_v32, %v4992_v12  ;;  %v4698_v13 = vpop.f32.mrf.mxu0 }
 0xbde   : > { %v12016_v7 = vpop.eup %8247  ;;  %v5015_v29 = vmul.f32 1.442695, %v5000_v47 }
 0xbdf   : > { %v5035_v58 = vsel %vm2200_vm2, %v12016_v7, 0.0 }
 0xbe0   : > { %8249 = vpow2.f32 %v5015_v29  ;;  %5338 = vmax.xlane.f32.xlu0 %v5337_v22  ;;  %5036 = vadd.xlane.f32.xlu1 %v5035_v58 }
 0xbe3   : > { %v5321_v25 = vpop.xlane.xlu0 %5320 }
 0xbe4   : > { %v5343_v39 = vsub.f32 %v11913_v62, %v5321_v25  ;;  %v4700_v53 = vpop.f32.mrf.mxu0 }
 0xbe6   : > { %v12026_v32 = vpop.eup %8249  ;;  %v5351_v4 = vmul.f32 1.442695, %v5343_v39 }
 0xbe7   : > { %v5038_v1 = vsel %vm2200_vm2, %v12026_v32, 0.0 }
 0xbe8   : > { %8251 = vpow2.f32 %v5351_v4  ;;  %5039 = vadd.xlane.f32.xlu2 %v5038_v1  ;;  %5341 = vmax.xlane.f32.xlu1 %v5340_v46 }
 0xbee   : > { %v12032_v6 = vpop.eup %8251 }
 0xbef   : > { %v5367_v41 = vsel %vm2200_vm2, %v12032_v6, 0.0 }
 0xbf0   : > { %5368 = vadd.xlane.f32.xlu2 %v5367_v41 }
 0xc23   : > { %v5019_v62 = vpop.xlane.xlu1 %5018 }
 0xc24   : > { %8253 = vrcp.f32 %v5019_v62 }
 0xc2a   : > { %v8254_v44 = vpop.eup %8253 }
 0xc2b   : > { %v5324_v49 = vpop.xlane.xlu1 %5323  ;;  %v5022_v45 = vpop.xlane.xlu2 %5021  ;;  %v5049_v26 = vmul.f32 %v8254_v44, %v11951_v36  ;;  %v14063_v36 = vld [vmem:[#allocation255_spill] sm:$0xff] }
 0xc2c   : > { %v5344_v60 = vsub.f32 %v11960_v59, %v5324_v49  ;;  %8255 = vrcp.f32 %v5022_v45  ;;  %v12046_v25 = vadd.f32 %v14063_v36, %v4693_v0  ;;  %v4703_v49 = vpop.f32.mrf.mxu0  ;;  %v14064_v45 = vld [vmem:[#allocation257_spill] sm:$0xff] }
 0xc2e   : > { %v5353_v16 = vmul.f32 1.442695, %v5344_v60  ;;  %v4713_v41 = vsel %vm2200_vm2, %v12046_v25, -inf  ;;  %v12056_v60 = vadd.f32 %v14064_v45, %v4695_v37 }
 0xc30   : > { %8257 = vpow2.f32 %v5353_v16  ;;  %v4716_v37 = vsel %vm2200_vm2, %v12056_v60, -inf }
 0xc32   : > { %v8256_v28 = vpop.eup %8255 }
 0xc33   : > { %v5050_v54 = vmul.f32 %v8256_v28, %v11964_v15  ;;  %v5327_v35 = vpop.xlane.xlu1 %5326  ;;  %v5025_v12 = vpop.xlane.xlu2 %5024 }
 0xc34   : > { %v5345_v47 = vsub.f32 %v11973_v38, %v5327_v35 }
 0xc35   : > { %v5057_v29 = vpack.c.bf16 %v5050_v54, %v5049_v26 }
 0xc36   : > { %v12040_v22 = vpop.eup %8257  ;;  %v5355_v58 = vmul.f32 1.442695, %v5345_v47 }
 0xc37   : > { %7703 = vmatmul.msk.bf16.vlgmr.msrb.gmra.mxu3 %vm2200_vm2, %v5057_v29  ;;  %v5370_v59 = vsel %vm2200_vm2, %v12040_v22, 0.0 }
 0xc38   : > { %8259 = vpow2.f32 %v5355_v58  ;;  %5371 = vadd.xlane.f32.xlu0 %v5370_v59  ;;  %v4705_v58 = vpop.f32.mrf.mxu0 }
 0xc39   : > { %8261 = vrcp.f32 %v5025_v12 }
 0xc3b   : > { %v5028_v15 = vpop.xlane.xlu0 %5027  ;;  %v5330_v39 = vpop.xlane.xlu2 %5329 }
 0xc3c   : > { %8263 = vrcp.f32 %v5028_v15  ;;  %v5346_v38 = vsub.f32 %v11983_v34, %v5330_v39 }
 0xc3e   : > { %v12049_v4 = vpop.eup %8259  ;;  %v5357_v1 = vmul.f32 1.442695, %v5346_v38 }
 0xc3f   : > { %v5373_v46 = vsel %vm2200_vm2, %v12049_v4, 0.0  ;;  %v8262_v62 = vpop.eup %8261 }
 0xc40   : > { %8265 = vpow2.f32 %v5357_v1  ;;  %5374 = vadd.xlane.f32.xlu1 %v5373_v46  ;;  %4714 = vmax.xlane.f32.xlu0 %v4713_v41  ;;  %v5051_v34 = vmul.f32 %v8262_v62, %v11976_v31  ;;  %v14065_v31 = vld [vmem:[#allocation259_spill] sm:$0xff]  ;;  %v14066_v41 = vld [vmem:[#allocation261_spill] sm:$0xff] }
 0xc41   : > { %v12079_v62 = vadd.f32 %v14066_v41, %v4700_v53 }
 0xc42   : > { %v8264_v0 = vpop.eup %8263 }
 0xc43   : > { %v5052_v16 = vmul.f32 %v8264_v0, %v11986_v27  ;;  %v5031_v44 = vpop.xlane.xlu0 %5030  ;;  %v5333_v28 = vpop.xlane.xlu2 %5332  ;;  %v12069_v27 = vadd.f32 %v14065_v31, %v4698_v13 }
 0xc44   : > { %v5347_v26 = vsub.f32 %v11993_v48, %v5333_v28 }
 0xc45   : > { %v5058_v54 = vpack.c.bf16 %v5052_v16, %v5051_v34  ;;  %v4719_v1 = vsel %vm2200_vm2, %v12069_v27, -inf }
 0xc46   : > { %v12061_v35 = vpop.eup %8265  ;;  %v5359_v12 = vmul.f32 1.442695, %v5347_v26 }
 0xc47   : > { %7704 = vmatmul.msk.bf16.gmra.mxu3 %vm2200_vm2, %v5058_v54  ;;  %v5376_v47 = vsel %vm2200_vm2, %v12061_v35, 0.0  ;;  %v4708_v54 = vpop.f32.mrf.mxu0 }
 0xc48   : > { %8267 = vpow2.f32 %v5359_v12  ;;  %5377 = vadd.xlane.f32.xlu2 %v5376_v47  ;;  %4717 = vmax.xlane.f32.xlu1 %v4716_v37  ;;  %v4722_v47 = vsel %vm2200_vm2, %v12079_v62, -inf }
 0xc49   : > { %8269 = vrcp.f32 %v5031_v44 }
 0xc4b   : > { %v5034_v48 = vpop.xlane.xlu1 %5033  ;;  %v5336_v29 = vpop.xlane.xlu0 %5335 }
 0xc4c   : > { %8271 = vrcp.f32 %v5034_v48  ;;  %v5348_v59 = vsub.f32 %v12003_v9, %v5336_v29 }
 0xc4e   : > { %v12072_v15 = vpop.eup %8267  ;;  %v5361_v39 = vmul.f32 1.442695, %v5348_v59 }
 0xc4f   : > { %v5379_v38 = vsel %vm2200_vm2, %v12072_v15, 0.0  ;;  %v8270_v46 = vpop.eup %8269 }
 0xc50   : > { %8273 = vpow2.f32 %v5361_v39  ;;  %5380 = vadd.xlane.f32.xlu2 %v5379_v38  ;;  %4720 = vmax.xlane.f32.xlu1 %v4719_v1  ;;  %v5053_v0 = vmul.f32 %v8270_v46, %v11996_v8  ;;  %v14067_v8 = vld [vmem:[#allocation263_spill] sm:$0xff]  ;;  %v4710_v46 = vpop.f32.mrf.mxu0 }
 0xc52   : > { %v8272_v13 = vpop.eup %8271 }
 0xc53   : > { %v5054_v9 = vmul.f32 %v8272_v13, %v12006_v18  ;;  %v5339_v34 = vpop.xlane.xlu0 %5338  ;;  %v5037_v16 = vpop.xlane.xlu1 %5036  ;;  %v12092_v18 = vadd.f32 %v14067_v8, %v4703_v49  ;;  %v14068_v13 = vld [vmem:[#allocation264_spill] sm:$0xff] }
 0xc54   : > { %v5349_v44 = vsub.f32 %v12013_v42, %v5339_v34  ;;  %v14069_v34 = vld [vmem:[#allocation265_spill] sm:$0xff] }
 0xc55   : > { %v5059_v28 = vpack.c.bf16 %v5054_v9, %v5053_v0  ;;  %v4725_v39 = vsel %vm2200_vm2, %v12092_v18, -inf  ;;  %v12102_v0 = vadd.f32 %v14068_v13, %v4710_v46 }
 0xc56   : > { %v12084_v26 = vpop.eup %8273  ;;  %v5363_v12 = vmul.f32 1.442695, %v5349_v44 }
 0xc57   : > { %7705 = vmatmul.msk.bf16.gmra.mxu3 %vm2200_vm2, %v5059_v28  ;;  %v5382_v53 = vsel %vm2200_vm2, %v12084_v26, 0.0 }
 0xc58   : > { %8275 = vpow2.f32 %v5363_v12  ;;  %4723 = vmax.xlane.f32.xlu2 %v4722_v47  ;;  %5383 = vadd.xlane.f32.xlu0 %v5382_v53  ;;  %v4734_v12 = vsel %vm2200_vm2, %v12102_v0, -inf }
 0xc59   : > { %8277 = vrcp.f32 %v5037_v16  ;;  %v12107_v16 = vadd.f32 %v14069_v34, %v4705_v58 }
 0xc5b   : > { %v5342_v42 = vpop.xlane.xlu1 %5341  ;;  %v5040_v37 = vpop.xlane.xlu2 %5039 }
 0xc5c   : > { %v5350_v48 = vsub.f32 %v12023_v56, %v5342_v42  ;;  %8279 = vrcp.f32 %v5040_v37  ;;  %v7886_v42 = vld [vmem:[%s13073_s5 + $0x18] sm:$0xff]  ;;  %v7884_v37 = vld [vmem:[%s13073_s5 + $0x8] sm:$0xff] }
 0xc5d   : > { %5818 = vmatpush.bf16.msrb.mxu3 %v7886_v42  ;;  %5157 = vmatpush.bf16.msra.mxu0 %v7884_v37 }
 0xc5e   : > { %v12095_v29 = vpop.eup %8275  ;;  %v5365_v59 = vmul.f32 1.442695, %v5350_v48  ;;  %v7885_v48 = vld [vmem:[%s13073_s5 + $0x10] sm:$0xff] }
 0xc5f   : > { %v5385_v38 = vsel %vm2200_vm2, %v12095_v29, 0.0  ;;  %v8278_v1 = vpop.eup %8277 }
 0xc60   : > { %8281 = vpow2.f32 %v5365_v59  ;;  %4726 = vmax.xlane.f32.xlu2 %v4725_v39  ;;  %5386 = vadd.xlane.f32.xlu0 %v5385_v38  ;;  %v5055_v56 = vmul.f32 %v8278_v1, %v12016_v7  ;;  %v4728_v7 = vsel %vm2200_vm2, %v12107_v16, -inf  ;;  %v14071_v39 = vld [vmem:[#allocation34_spill] sm:$0xff]  ;;  %v14072_v1 = vld [vmem:[#allocation32_spill] sm:$0xff] }
 0xc61   : > { %5507 = vmatpush.bf16.msrb.mxu0 %v7885_v48  ;;  %v1760_v38 = vpack.c.bf16 %v14071_v39, %v14071_v39  ;;  %v1761_v46 = vpack.c.bf16 %v14072_v1, %v14072_v1  ;;  %v14075_v39 = vld [vmem:[#allocation20_spill] sm:$0xff] }
 0xc62   : > { %v8280_v49 = vpop.eup %8279  ;;  %v1756_v1 = vpack.c.bf16 %v14075_v39, %v14075_v39 }
 0xc63   : > { %v5056_v9 = vmul.f32 %v8280_v49, %v12026_v32  ;;  %v14070_v32 = vld [vmem:[#allocation267_spill] sm:$0xff] }
 0xc64   : > { %v12119_v58 = vadd.f32 %v14070_v32, %v4708_v54  ;;  %v5369_v54 = vpop.xlane.xlu2 %5368 }
 0xc65   : > { %v5060_v44 = vpack.c.bf16 %v5056_v9, %v5055_v56  ;;  %8283 = vrcp.f32 %v5369_v54  ;;  %v14073_v9 = vld [vmem:[#allocation26_spill] sm:$0xff] }
 0xc66   : > { %v12109_v28 = vpop.eup %8281  ;;  %v4731_v53 = vsel %vm2200_vm2, %v12119_v58, -inf }
 0xc67   : > { %7706 = vmatmul.msk.bf16.gmra.mxu3 %vm2200_vm2, %v5060_v44  ;;  %v5388_v47 = vsel %vm2200_vm2, %v12109_v28, 0.0  ;;  %v1758_v44 = vpack.c.bf16 %v14073_v9, %v14073_v9 }
 0xc68   : > { %4735 = vmax.xlane.f32.xlu2 %v4734_v12  ;;  %5389 = vadd.xlane.f32.xlu1 %v5388_v47  ;;  %v14074_v12 = vld [vmem:[#allocation24_spill] sm:$0xff] }
 0xc69   : > { %4729 = vmax.xlane.f32.xlu0 %v4728_v7  ;;  %v1759_v47 = vpack.c.bf16 %v14074_v12, %v14074_v12  ;;  %v6328_v7 = vunpack.c.l.b16 %v1760_v38  ;;  %v6326_v20 = vunpack.c.l.b16 %v1758_v44 }
 0xc6b   : > { %v8284_v49 = vpop.eup %8283  ;;  %v6327_v51 = vunpack.c.l.b16 %v1759_v47 }
 0xc6c   : > { %v5399_v42 = vmul.f32 %v8284_v49, %v12032_v6  ;;  %v14077_v6 = vld [vmem:[#allocation280_spill] sm:$0xff]  ;;  %v6324_v49 = vunpack.c.l.b16 %v1756_v1 }
 0xc6d   : > { %v6332_v52 = vpack.c.b16 %v6327_v51, %v6326_v20 }
 0xc70   : > { %4732 = vmax.xlane.f32.xlu1 %v4731_v53  ;;  %v6329_v53 = vunpack.c.l.b16 %v1761_v46  ;;  %v14078_v46 = vld [vmem:[#allocation281_spill] sm:$0xff] }
 0xc72   : > { %v6333_v12 = vpack.c.b16 %v6329_v53, %v6328_v7 }
 0xcab   : > { %v5372_v59 = vpop.xlane.xlu0 %5371 }
 0xcac   : > { %8285 = vrcp.f32 %v5372_v59 }
 0xcb2   : > { %v8286_v56 = vpop.eup %8285 }
 0xcb3   : > { %v5400_v37 = vmul.f32 %v8286_v56, %v12040_v22  ;;  %v5375_v48 = vpop.xlane.xlu1 %5374  ;;  %v4715_v54 = vpop.xlane.xlu0 %4714  ;;  %v1754_v22 = vpack.c.bf16 %v14077_v6, %v14077_v6  ;;  %v6325_v56 = vunpack.c.l.b16 %v1757_v57 }
 0xcb4   : > { %v4737_v59 = vsub.f32 %v12046_v25, %v4715_v54  ;;  %v1755_v25 = vpack.c.bf16 %v14078_v46, %v14078_v46  ;;  %v14079_v46 = vld [vmem:[#allocation193_spill] sm:$0xff] }
 0xcb5   : > { %v5407_v9 = vpack.c.bf16 %v5400_v37, %v5399_v42  ;;  %v6322_v53 = vunpack.c.l.b16 %v1754_v22  ;;  %v6331_v39 = vpack.c.b16 %v6325_v56, %v6324_v49 }
 0xcb6   : > { %v4745_v38 = vmul.f32 1.442695, %v4737_v59  ;;  %v6323_v37 = vunpack.c.l.b16 %v1755_v25  ;;  %v14080_v25 = vld [vmem:[#allocation191_spill] sm:$0xff] }
 0xcb7   : > { %7729 = vmatmul.msk.bf16.vlgmr.msra.gmra.mxu3 %vm2200_vm2, %v5407_v9  ;;  %v14081_v49 = vpack.c.b16 %v14079_v46, %v14080_v25  ;;  %v14085_v46 = vld [vmem:[#allocation121_spill] sm:$0xff]  ;;  %v14086_v25 = vld [vmem:[#allocation118_spill] sm:$0xff] }
 0xcb8   : > { %8287 = vpow2.f32 %v4745_v38  ;;  %6354 = vmatpush.bf16.msra.mxu3 %v6333_v12  ;;  %v6330_v57 = vpack.c.b16 %v6323_v37, %v6322_v53  ;;  %v14082_v53 = vld [vmem:[#allocation12_spill] sm:$0xff]  ;;  %v14083_v37 = vld [vmem:[#allocation14_spill] sm:$0xff] }
 0xcb9   : > { %8289 = vrcp.f32 %v5375_v48  ;;  %v5935_v56 = vsel %vm2146_vm1, %v14081_v49, 0  ;;  %v14087_v49 = vpack.c.b16 %v14085_v46, %v14086_v25 }
 0xcba   : > { %v5106_v54 = vpop.f32.mrf.mxu3 }
 0xcbb   : > { %v5378_v42 = vpop.xlane.xlu2 %5377  ;;  %v4718_v44 = vpop.xlane.xlu1 %4717 }
 0xcbc   : > { %8291 = vrcp.f32 %v5378_v42  ;;  %6355 = vmatpush.bf16.msra.mxu3 %v6332_v52  ;;  %v4738_v47 = vsub.f32 %v12056_v60, %v4718_v44 }
 0xcbe   : > { %v12153_v7 = vpop.eup %8287  ;;  %v4747_v59 = vmul.f32 1.442695, %v4738_v47 }
 0xcbf   : > { %v4761_v9 = vsel %vm2200_vm2, %v12153_v7, 0.0  ;;  %v8290_v1 = vpop.eup %8289 }
 0xcc0   : > { %8293 = vpow2.f32 %v4747_v59  ;;  %6356 = vmatpush.bf16.msra.mxu3 %v6331_v39  ;;  %4762 = vadd.xlane.f32.xlu0 %v4761_v9  ;;  %v5401_v48 = vmul.f32 %v8290_v1, %v12049_v4  ;;  %v14084_v59 = vpack.c.b16 %v14082_v53, %v14083_v37  ;;  %v14088_v53 = vld [vmem:[#allocation6_spill] sm:$0xff]  ;;  %v14089_v37 = vld [vmem:[#allocation8_spill] sm:$0xff] }
 0xcc2   : > { %v8292_v51 = vpop.eup %8291  ;;  %v5108_v20 = vpop.f32.mrf.mxu3  ;;  %v5932_v39 = vsel %vm2146_vm1, %v14084_v59, 0  ;;  %v14090_v59 = vpack.c.b16 %v14088_v53, %v14089_v37 }
 0xcc3   : > { %v5402_v60 = vmul.f32 %v8292_v51, %v12061_v35  ;;  %v5126_v12 = vpack.c.bf16 %v5108_v20, %v5106_v54  ;;  %v5381_v38 = vpop.xlane.xlu2 %5380  ;;  %v4721_v6 = vpop.xlane.xlu1 %4720 }
 0xcc4   : > { %6357 = vmatpush.bf16.msra.mxu3 %v6330_v57  ;;  %v4739_v22 = vsub.f32 %v12069_v27, %v4721_v6 }
 0xcc5   : > { %7713 = vmatmul.msk.bf16.vlgmr.msra.gmra.mxu0 %vm2146_vm1, %v5126_v12  ;;  %v5408_v52 = vpack.c.bf16 %v5402_v60, %v5401_v48 }
 0xcc6   : > { %v12165_v42 = vpop.eup %8293  ;;  %v4749_v44 = vmul.f32 1.442695, %v4739_v22  ;;  %5941 = vmatpush.bf16.xpose.msra.mxu0 %v5935_v56  ;;  %v5929_v56 = vsel %vm2146_vm1, %v14087_v49, 0 }
 0xcc7   : > { %7730 = vmatmul.msk.bf16.gmra.mxu3 %vm2200_vm2, %v5408_v52  ;;  %v4764_v4 = vsel %vm2200_vm2, %v12165_v42, 0.0 }
 0xcc8   : > { %8295 = vpow2.f32 %v4749_v44  ;;  %4765 = vadd.xlane.f32.xlu1 %v4764_v4 }
 0xcc9   : > { %8297 = vrcp.f32 %v5381_v38 }
 0xcca   : > { %v5111_v35 = vpop.f32.mrf.mxu3 }
 0xccb   : > { %v4724_v27 = vpop.xlane.xlu2 %4723  ;;  %v5384_v54 = vpop.xlane.xlu0 %5383 }
 0xccc   : > { %v4740_v47 = vsub.f32 %v12079_v62, %v4724_v27  ;;  %8299 = vrcp.f32 %v5384_v54 }
 0xcce   : > { %v12175_v9 = vpop.eup %8295  ;;  %v4751_v1 = vmul.f32 1.442695, %v4740_v47  ;;  %5942 = vmatpush.bf16.xpose.msra.mxu0 %v5932_v39  ;;  %v5926_v39 = vsel %vm2146_vm1, %v14090_v59, 0 }
 0xccf   : > { %v4767_v51 = vsel %vm2200_vm2, %v12175_v9, 0.0  ;;  %v8298_v20 = vpop.eup %8297 }
 0xcd0   : > { %8301 = vpow2.f32 %v4751_v1  ;;  %4768 = vadd.xlane.f32.xlu2 %v4767_v51  ;;  %v5403_v62 = vmul.f32 %v8298_v20, %v12072_v15 }
 0xcd2   : > { %v8300_v57 = vpop.eup %8299  ;;  %v5113_v48 = vpop.f32.mrf.mxu3 }
 0xcd3   : > { %v5404_v60 = vmul.f32 %v8300_v57, %v12084_v26  ;;  %v5127_v12 = vpack.c.bf16 %v5113_v48, %v5111_v35  ;;  %v4727_v38 = vpop.xlane.xlu2 %4726  ;;  %v5387_v6 = vpop.xlane.xlu0 %5386 }
 0xcd4   : > { %v4741_v22 = vsub.f32 %v12092_v18, %v4727_v38 }
 0xcd5   : > { %7714 = vmatmul.msk.bf16.gmra.mxu0 %vm2146_vm1, %v5127_v12  ;;  %v5409_v52 = vpack.c.bf16 %v5404_v60, %v5403_v62 }
 0xcd6   : > { %v12187_v44 = vpop.eup %8301  ;;  %v4753_v4 = vmul.f32 1.442695, %v4741_v22  ;;  %5943 = vmatpush.bf16.xpose.msra.mxu0 %v5929_v56 }
 0xcd7   : > { %7731 = vmatmul.msk.bf16.gmra.mxu3 %vm2200_vm2, %v5409_v52  ;;  %v4770_v15 = vsel %vm2200_vm2, %v12187_v44, 0.0 }
 0xcd8   : > { %8303 = vpow2.f32 %v4753_v4  ;;  %4771 = vadd.xlane.f32.xlu0 %v4770_v15 }
 0xcd9   : > { %8305 = vrcp.f32 %v5387_v6 }
 0xcda   : > { %v5116_v26 = vpop.f32.mrf.mxu3 }
 0xcdb   : > { %v4736_v18 = vpop.xlane.xlu2 %4735  ;;  %v5390_v35 = vpop.xlane.xlu1 %5389 }
 0xcdc   : > { %v4744_v27 = vsub.f32 %v12102_v0, %v4736_v18  ;;  %8307 = vrcp.f32 %v5390_v35  ;;  %v4730_v54 = vpop.xlane.xlu0 %4729 }
 0xcdd   : > { %v4742_v47 = vsub.f32 %v12107_v16, %v4730_v54 }
 0xcde   : > { %v12198_v1 = vpop.eup %8303  ;;  %v4759_v51 = vmul.f32 1.442695, %v4744_v27  ;;  %5944 = vmatpush.bf16.xpose.msra.mxu0 %v5926_v39 }
 0xcdf   : > { %v4755_v20 = vmul.f32 1.442695, %v4742_v47  ;;  %v4773_v57 = vsel %vm2200_vm2, %v12198_v1, 0.0  ;;  %v8306_v48 = vpop.eup %8305 }
 0xce0   : > { %8309 = vpow2.f32 %v4759_v51  ;;  %4774 = vadd.xlane.f32.xlu1 %v4773_v57  ;;  %v5405_v16 = vmul.f32 %v8306_v48, %v12095_v29  ;;  %v14091_v57 = vld [vmem:[#allocation203_spill] sm:$0xff]  ;;  %v14092_v48 = vld [vmem:[#allocation202_spill] sm:$0xff] }
 0xce1   : > { %8311 = vpow2.f32 %v4755_v20 }
 0xce2   : > { %v8308_v0 = vpop.eup %8307  ;;  %v5118_v62 = vpop.f32.mrf.mxu3 }
 0xce3   : > { %v5406_v60 = vmul.f32 %v8308_v0, %v12109_v28  ;;  %v5128_v12 = vpack.c.bf16 %v5118_v62, %v5116_v26  ;;  %v4733_v38 = vpop.xlane.xlu1 %4732  ;;  %v7883_v26 = vld [vmem:[%s13073_s5] sm:$0xff]  ;;  %v14093_v0 = vpack.c.b16 %v14091_v57, %v14092_v48 }
 0xce4   : > { %v4743_v6 = vsub.f32 %v12119_v58, %v4733_v38  ;;  %5204 = vmatpush.bf16.msra.mxu1 %v7883_v26 }
 0xce5   : > { %7715 = vmatmul.msk.bf16.gmra.mxu0 %vm2146_vm1, %v5128_v12  ;;  %v5410_v22 = vpack.c.bf16 %v5406_v60, %v5405_v16  ;;  %v5599_v62 = vsel %vm2146_vm1, %v14093_v0, 0  ;;  %v14095_v12 = vld [vmem:[#allocation204_spill] sm:$0xff] }
 0xce6   : > { %v12206_v46 = vpop.eup %8309  ;;  %v4757_v25 = vmul.f32 1.442695, %v4743_v6 }
 0xce7   : > { %v8312_v49 = vpop.eup %8311  ;;  %7732 = vmatmul.msk.bf16.gmra.mxu3 %vm2200_vm2, %v5410_v22  ;;  %v4782_v56 = vsel %vm2200_vm2, %v12206_v46, 0.0 }
 0xce8   : > { %8313 = vpow2.f32 %v4757_v25  ;;  %4783 = vadd.xlane.f32.xlu1 %v4782_v56  ;;  %v4776_v29 = vsel %vm2200_vm2, %v8312_v49, 0.0 }
 0xce9   : > { %4777 = vadd.xlane.f32.xlu2 %v4776_v29 }
 0xcea   : > { %v5121_v28 = vpop.f32.mrf.mxu3 }
 0xcee   : > { %v12212_v52 = vpop.eup %8313 }
 0xcef   : > { %v4779_v58 = vsel %vm2200_vm2, %v12212_v52, 0.0 }
 0xcf0   : > { %4780 = vadd.xlane.f32.xlu0 %v4779_v58 }
 0xcf2   : > { %v5123_v4 = vpop.f32.mrf.mxu3 }
 0xcf3   : > { %v5129_v15 = vpack.c.bf16 %v5123_v4, %v5121_v28  ;;  %v14097_v4 = vld [vmem:[#allocation16_spill] sm:$0xff] }
 0xcf5   : > { %7716 = vmatmul.msk.bf16.gmra.mxu0 %vm2146_vm1, %v5129_v15  ;;  %v14098_v15 = vld [vmem:[#allocation17_spill] sm:$0xff] }
 0xcf6   : > { %v14099_v26 = vpack.c.b16 %v14097_v4, %v14098_v15  ;;  %v14107_v4 = vld [vmem:[#allocation88_spill] sm:$0xff] }
 0xd33   : > { %v4763_v18 = vpop.xlane.xlu0 %4762 }
 0xd34   : > { %8315 = vrcp.f32 %v4763_v18  ;;  %v5593_v18 = vsel %vm2146_vm1, %v14099_v26, 0  ;;  %v14109_v26 = vld [vmem:[#allocation98_spill] sm:$0xff] }
 0xd3a   : > { %v5456_v35 = vpop.f32.mrf.mxu3  ;;  %v8316_v54 = vpop.eup %8315 }
 0xd3b   : > { %v4766_v27 = vpop.xlane.xlu1 %4765  ;;  %v4793_v37 = vmul.f32 %v8316_v54, %v12153_v7  ;;  %v14094_v7 = vld [vmem:[#allocation196_spill] sm:$0xff] }
 0xd3c   : > { %8317 = vrcp.f32 %v4766_v27 }
 0xd42   : > { %v8318_v47 = vpop.eup %8317  ;;  %v5458_v53 = vpop.f32.mrf.mxu3 }
 0xd43   : > { %v4794_v59 = vmul.f32 %v8318_v47, %v12165_v42  ;;  %v5476_v39 = vpack.c.bf16 %v5458_v53, %v5456_v35  ;;  %v4769_v20 = vpop.xlane.xlu2 %4768  ;;  %v14096_v42 = vpack.c.b16 %v14094_v7, %v14095_v12  ;;  %v14101_v47 = vld [vmem:[#allocation152_spill] sm:$0xff] }
 0xd44   : > { %8319 = vrcp.f32 %v4769_v20 }
 0xd45   : > { %v4801_v51 = vpack.c.bf16 %v4794_v59, %v4793_v37  ;;  %7739 = vmatmul.msk.bf16.vlgmr.msrb.gmra.mxu0 %vm2146_vm1, %v5476_v39  ;;  %v5596_v38 = vsel %vm2146_vm1, %v14096_v42, 0 }
 0xd47   : > { %7695 = vmatmul.msk.bf16.vlgmr.msrb.gmra.mxu1 %vm2200_vm2, %v4801_v51 }
 0xd48   : > { %5605 = vmatpush.bf16.xpose.msrb.mxu1 %v5599_v62 }
 0xd4a   : > { %v5461_v16 = vpop.f32.mrf.mxu3  ;;  %v8320_v6 = vpop.eup %8319 }
 0xd4b   : > { %v4772_v60 = vpop.xlane.xlu0 %4771  ;;  %v4795_v56 = vmul.f32 %v8320_v6, %v12175_v9  ;;  %v14100_v9 = vld [vmem:[#allocation156_spill] sm:$0xff]  ;;  %v12248_v6 = vpop.f32.mrf.mxu0 }
 0xd4c   : > { %8321 = vrcp.f32 %v4772_v60 }
 0xd50   : > { %5606 = vmatpush.bf16.xpose.msrb.mxu1 %v5596_v38 }
 0xd52   : > { %v8322_v22 = vpop.eup %8321  ;;  %v5463_v25 = vpop.f32.mrf.mxu3 }
 0xd53   : > { %v4796_v29 = vmul.f32 %v8322_v22, %v12187_v44  ;;  %v5477_v28 = vpack.c.bf16 %v5463_v25, %v5461_v16  ;;  %v4775_v35 = vpop.xlane.xlu1 %4774  ;;  %v14102_v44 = vpack.c.b16 %v14100_v9, %v14101_v47  ;;  %v12253_v22 = vpop.f32.mrf.mxu0  ;;  %v14103_v25 = vld [vmem:[#allocation82_spill] sm:$0xff]  ;;  %v14113_v47 = vld [vmem:[#allocation104_spill] sm:$0xff] }
 0xd54   : > { %8323 = vrcp.f32 %v4775_v35  ;;  %v14112_v9 = vld [vmem:[#allocation106_spill] sm:$0xff] }
 0xd55   : > { %7740 = vmatmul.msk.bf16.gmra.mxu0 %vm2146_vm1, %v5477_v28  ;;  %v4802_v58 = vpack.c.bf16 %v4796_v29, %v4795_v56  ;;  %v5590_v53 = vsel %vm2146_vm1, %v14102_v44, 0  ;;  %v14104_v56 = vld [vmem:[#allocation80_spill] sm:$0xff]  ;;  %v14114_v44 = vpack.c.b16 %v14112_v9, %v14113_v47 }
 0xd56   : > { %v14105_v29 = vpack.c.b16 %v14103_v25, %v14104_v56  ;;  %v14121_v25 = vld [vmem:[#allocation181_spill] sm:$0xff] }
 0xd57   : > { %7696 = vmatmul.msk.bf16.gmra.mxu1 %vm2200_vm2, %v4802_v58  ;;  %v14106_v58 = vld [vmem:[#allocation90_spill] sm:$0xff]  ;;  %v1619_v56 = vpack.c.bf16 %v14121_v25, %v14121_v25 }
 0xd58   : > { %5607 = vmatpush.bf16.xpose.msrb.mxu1 %v5593_v18  ;;  %v14108_v15 = vpack.c.b16 %v14106_v58, %v14107_v4  ;;  %v14110_v18 = vld [vmem:[#allocation96_spill] sm:$0xff] }
 0xd59   : > { %v14111_v35 = vpack.c.b16 %v14109_v26, %v14110_v18  ;;  %v14123_v18 = vld [vmem:[#allocation236_spill] sm:$0xff]  ;;  %v6069_v47 = vunpack.c.l.b16 %v1619_v56 }
 0xd5a   : > { %v5466_v27 = vpop.f32.mrf.mxu3  ;;  %v8324_v37 = vpop.eup %8323 }
 0xd5b   : > { %v4797_v20 = vmul.f32 %v8324_v37, %v12198_v1  ;;  %v4784_v62 = vpop.xlane.xlu1 %4783  ;;  %v12259_v28 = vpop.f32.mrf.mxu0 }
 0xd5c   : > { %v4778_v54 = vpop.xlane.xlu2 %4777 }
 0xd5d   : > { %8325 = vrcp.f32 %v4778_v54 }
 0xd60   : > { %5608 = vmatpush.bf16.xpose.msrb.mxu1 %v5590_v53 }
 0xd62   : > { %v5468_v59 = vpop.f32.mrf.mxu3 }
 0xd63   : > { %v8326_v39 = vpop.eup %8325  ;;  %v5478_v51 = vpack.c.bf16 %v5468_v59, %v5466_v27  ;;  %v4781_v48 = vpop.xlane.xlu0 %4780 }
 0xd64   : > { %v4798_v57 = vmul.f32 %v8326_v39, %v8312_v49  ;;  %8327 = vrcp.f32 %v4781_v48  ;;  %v14116_v39 = vld [vmem:[#allocation248_spill] sm:$0xff] }
 0xd65   : > { %7741 = vmatmul.msk.bf16.gmra.mxu0 %vm2146_vm1, %v5478_v51  ;;  %8329 = vrcp.f32 %v4784_v62  ;;  %v1622_v51 = vpack.c.bf16 %v14116_v39, %v14116_v39  ;;  %v14118_v48 = vld [vmem:[#allocation244_spill] sm:$0xff]  ;;  %v14119_v62 = vld [vmem:[#allocation246_spill] sm:$0xff] }
 0xd66   : > { %v4803_v0 = vpack.c.bf16 %v4798_v57, %v4797_v20  ;;  %v14117_v20 = vld [vmem:[#allocation250_spill] sm:$0xff] }
 0xd67   : > { %v1623_v57 = vpack.c.bf16 %v14117_v20, %v14117_v20 }
 0xd68   : > { %7697 = vmatmul.msk.bf16.gmra.mxu1 %vm2200_vm2, %v4803_v0  ;;  %v1620_v0 = vpack.c.bf16 %v14118_v48, %v14118_v48 }
 0xd6a   : > { %v5471_v16 = vpop.f32.mrf.mxu3  ;;  %v8328_v60 = vpop.eup %8327 }
 0xd6b   : > { %v8330_v7 = vpop.eup %8329  ;;  %v4799_v12 = vmul.f32 %v8328_v60, %v12212_v52  ;;  %v12261_v52 = vpop.f32.mrf.mxu0  ;;  %v6072_v60 = vunpack.c.l.b16 %v1622_v51 }
 0xd6c   : > { %v4800_v1 = vmul.f32 %v8330_v7, %v12206_v46  ;;  %v6073_v7 = vunpack.c.l.b16 %v1623_v57 }
 0xd6e   : > { %v4804_v49 = vpack.c.bf16 %v4800_v1, %v4799_v12  ;;  %v6077_v4 = vpack.c.b16 %v6073_v7, %v6072_v60 }
 0xd72   : > { %v5473_v42 = vpop.f32.mrf.mxu3 }
 0xd73   : > { %v5479_v38 = vpack.c.bf16 %v5473_v42, %v5471_v16  ;;  %v12267_v46 = vpop.f32.mrf.mxu0  ;;  %v1621_v16 = vpack.c.bf16 %v14119_v62, %v14119_v62 }
 0xd75   : > { %7742 = vmatmul.msk.bf16.gmra.mxu0 %vm2146_vm1, %v5479_v38  ;;  %v14120_v38 = vld [vmem:[#allocation239_spill] sm:$0xff]  ;;  %v6071_v58 = vunpack.c.l.b16 %v1621_v16 }
 0xd76   : > { %v1618_v1 = vpack.c.bf16 %v14120_v38, %v14120_v38 }
 0xd78   : > { %7698 = vmatmul.msk.bf16.gmra.mxu1 %vm2200_vm2, %v4804_v49  ;;  %v6068_v9 = vunpack.c.l.b16 %v1618_v1 }
 0xd7a   : > { %v6075_v57 = vpack.c.b16 %v6069_v47, %v6068_v9  ;;  %v14126_v47 = vld [vmem:[#allocation95_spill] sm:$0xff] }
 0xd7b   : > { %v12273_v27 = vpop.f32.mrf.mxu0 }
 0xd83   : > { %v12275_v54 = vpop.f32.mrf.mxu0 }
 0xd85   : > { %7769 = vmatmul.msk.bf16.vlgmr.msra.gmra.mxu0 %vm2146_vm1, %v14105_v29  ;;  %v6070_v29 = vunpack.c.l.b16 %v1620_v0 }
 0xd8b   : > { %v12281_v53 = vpop.f32.mrf.mxu0 }
 0xd8c   : > { %14115 = vst [vmem:[#allocation175_spill] sm:$0xff] %v12281_v53 }
 0xd95   : > { %7770 = vmatmul.msk.bf16.gmra.mxu0 %vm2146_vm1, %v14108_v15  ;;  %v14122_v15 = vld [vmem:[#allocation167_spill] sm:$0xff] }
 0xd96   : > { %v1616_v26 = vpack.c.bf16 %v14122_v15, %v14122_v15 }
 0xd98   : > { %v6066_v51 = vunpack.c.l.b16 %v1616_v26 }
 0xda5   : > { %7771 = vmatmul.msk.bf16.gmra.mxu0 %vm2146_vm1, %v14111_v35  ;;  %v1617_v35 = vpack.c.bf16 %v14123_v18, %v14123_v18 }
 0xda7   : > { %v6067_v20 = vunpack.c.l.b16 %v1617_v35 }
 0xda9   : > { %v6074_v0 = vpack.c.b16 %v6067_v20, %v6066_v51 }
 0xdb5   : > { %7772 = vmatmul.msk.bf16.gmra.mxu0 %vm2146_vm1, %v14114_v44 }
 0xdc2   : > { %v12283_v37 = vpop.f32.mrf.mxu0 }
 0xdc4   : > { %v4850_v59 = vpop.f32.mrf.mxu1 }
 0xdca   : > { %v12293_v12 = vpop.f32.mrf.mxu0 }
 0xdcc   : > { %v4852_v42 = vpop.f32.mrf.mxu1 }
 0xdcd   : > { %v4870_v49 = vpack.c.bf16 %v4852_v42, %v4850_v59  ;;  %v6076_v59 = vpack.c.b16 %v6071_v58, %v6070_v29 }
 0xdcf   : > { %7721 = vmatmul.msk.bf16.vlgmr.msra.gmra.mxu1 %vm2146_vm1, %v4870_v49 }
 0xdd0   : > { %6098 = vmatpush.bf16.msra.mxu1 %v6077_v4 }
 0xdd2   : > { %v12304_v44 = vpop.f32.mrf.mxu0 }
 0xdd4   : > { %6099 = vmatpush.bf16.msra.mxu1 %v6076_v59  ;;  %v4855_v39 = vpop.f32.mrf.mxu1  ;;  %v14127_v59 = vld [vmem:[#allocation94_spill] sm:$0xff] }
 0xdd8   : > { %6100 = vmatpush.bf16.msra.mxu1 %v6075_v57 }
 0xdda   : > { %v12306_v48 = vpop.f32.mrf.mxu0 }
 0xddc   : > { %6101 = vmatpush.bf16.msra.mxu1 %v6074_v0  ;;  %v4857_v62 = vpop.f32.mrf.mxu1 }
 0xddd   : > { %v4871_v16 = vpack.c.bf16 %v4857_v62, %v4855_v39  ;;  %v14128_v39 = vpack.c.b16 %v14126_v47, %v14127_v59 }
 0xddf   : > { %7722 = vmatmul.msk.bf16.gmra.mxu1 %vm2146_vm1, %v4871_v16  ;;  %v14130_v16 = vld [vmem:[#allocation102_spill] sm:$0xff] }
 0xde2   : > { %v12309_v60 = vpop.f32.mrf.mxu0 }
 0xde5   : > { %v4860_v7 = vpop.f32.mrf.mxu1 }
 0xdea   : > { %v12311_v42 = vpop.f32.mrf.mxu0 }
 0xded   : > { %v4862_v38 = vpop.f32.mrf.mxu1 }
 0xdee   : > { %v4872_v1 = vpack.c.bf16 %v4862_v38, %v4860_v7 }
 0xdf0   : > { %7723 = vmatmul.msk.bf16.gmra.mxu1 %vm2146_vm1, %v4872_v1 }
 0xdf2   : > { %v12314_v49 = vpop.f32.mrf.mxu0 }
 0xdf3   : > { %14124 = vst [vmem:[#allocation144_spill] sm:$0xff] %v12314_v49  ;;  %v14140_v49 = vld [vmem:[#allocation214_spill] sm:$0xff] }
 0xdf5   : > { %v4865_v25 = vpop.f32.mrf.mxu1 }
 0xdfa   : > { %v12316_v56 = vpop.f32.mrf.mxu0 }
 0xdfb   : > { %14125 = vst [vmem:[#allocation140_spill] sm:$0xff] %v12316_v56 }
 0xdfd   : > { %v4867_v29 = vpop.f32.mrf.mxu1 }
 0xdfe   : > { %v4873_v58 = vpack.c.bf16 %v4867_v29, %v4865_v25 }
 0xe00   : > { %7724 = vmatmul.msk.bf16.gmra.mxu1 %vm2146_vm1, %v4873_v58  ;;  %v14132_v58 = vld [vmem:[#allocation111_spill] sm:$0xff] }
 0xe02   : > { %v5946_v4 = vpop.f32.mrf.mxu0 }
 0xe03   : > { %v5947_v15 = vadd.f32 %v14063_v36, %v5946_v4  ;;  %v14133_v4 = vld [vmem:[#allocation110_spill] sm:$0xff] }
 0xe05   : > { %v5966_v26 = vsel %vm2200_vm2, %v5947_v15, -inf }
 0xe06   : > { %5967 = vmax.xlane.f32.xlu2 %v5966_v26  ;;  %v14134_v26 = vpack.c.b16 %v14132_v58, %v14133_v4 }
 0xe0a   : > { %v5948_v18 = vpop.f32.mrf.mxu0 }
 0xe0b   : > { %v5949_v35 = vadd.f32 %v14064_v45, %v5948_v18  ;;  %v14129_v45 = vld [vmem:[#allocation103_spill] sm:$0xff] }
 0xe0c   : > { %v14131_v7 = vpack.c.b16 %v14129_v45, %v14130_v16 }
 0xe0d   : > { %v5969_v9 = vsel %vm2200_vm2, %v5949_v35, -inf }
 0xe0e   : > { %5970 = vmax.xlane.f32.xlu0 %v5969_v9 }
 0xe10   : > { %7743 = vmatmul.msk.bf16.vlgmr.msrb.gmra.mxu1 %vm2146_vm1, %v14128_v39  ;;  %v14135_v39 = vld [vmem:[#allocation113_spill] sm:$0xff] }
 0xe12   : > { %v5951_v51 = vpop.f32.mrf.mxu0 }
 0xe13   : > { %v5952_v20 = vadd.f32 %v14065_v31, %v5951_v51  ;;  %v14136_v51 = vld [vmem:[#allocation112_spill] sm:$0xff] }
 0xe15   : > { %v5972_v57 = vsel %vm2200_vm2, %v5952_v20, -inf }
 0xe16   : > { %5973 = vmax.xlane.f32.xlu1 %v5972_v57  ;;  %v14137_v57 = vpack.c.b16 %v14135_v39, %v14136_v51 }
 0xe1a   : > { %v5953_v36 = vpop.f32.mrf.mxu0 }
 0xe1b   : > { %v5954_v0 = vadd.f32 %v14066_v41, %v5953_v36 }
 0xe1d   : > { %v5975_v62 = vsel %vm2200_vm2, %v5954_v0, -inf }
 0xe1e   : > { %5976 = vmax.xlane.f32.xlu2 %v5975_v62 }
 0xe20   : > { %7744 = vmatmul.msk.bf16.gmra.mxu1 %vm2146_vm1, %v14131_v7 }
 0xe22   : > { %v5956_v38 = vpop.f32.mrf.mxu0 }
 0xe23   : > { %v5957_v1 = vadd.f32 %v14067_v8, %v5956_v38 }
 0xe25   : > { %v5978_v25 = vsel %vm2200_vm2, %v5957_v1, -inf }
 0xe26   : > { %5979 = vmax.xlane.f32.xlu0 %v5978_v25 }
 0xe2a   : > { %v5958_v31 = vpop.f32.mrf.mxu0 }
 0xe2b   : > { %v12338_v29 = vadd.f32 %v14069_v34, %v5958_v31 }
 0xe2d   : > { %v5981_v41 = vsel %vm2200_vm2, %v12338_v29, -inf }
 0xe2e   : > { %5982 = vmax.xlane.f32.xlu1 %v5981_v41 }
 0xe30   : > { %7745 = vmatmul.msk.bf16.gmra.mxu1 %vm2146_vm1, %v14134_v26 }
 0xe32   : > { %v5961_v18 = vpop.f32.mrf.mxu0 }
 0xe33   : > { %v12347_v9 = vadd.f32 %v14070_v32, %v5961_v18 }
 0xe35   : > { %v5984_v8 = vsel %vm2200_vm2, %v12347_v9, -inf }
 0xe36   : > { %5985 = vmax.xlane.f32.xlu2 %v5984_v8 }
 0xe3a   : > { %v5963_v47 = vpop.f32.mrf.mxu0 }
 0xe3b   : > { %v12352_v34 = vadd.f32 %v14068_v13, %v5963_v47 }
 0xe3d   : > { %v5987_v59 = vsel %vm2200_vm2, %v12352_v34, -inf }
 0xe3e   : > { %5988 = vmax.xlane.f32.xlu0 %v5987_v59 }
 0xe40   : > { %7746 = vmatmul.msk.bf16.gmra.mxu1 %vm2146_vm1, %v14137_v57 }
 0xe4c   : > { %v12360_v36 = vpop.f32.mrf.mxu1 }
 0xe54   : > { %v12362_v32 = vpop.f32.mrf.mxu1 }
 0xe5c   : > { %v12364_v62 = vpop.f32.mrf.mxu1 }
 0xe64   : > { %v12366_v45 = vpop.f32.mrf.mxu1 }
 0xe6d   : > { %v12368_v16 = vpop.f32.mrf.mxu1 }
 0xe75   : > { %v12370_v13 = vpop.f32.mrf.mxu1 }
 0xe79   : > { %v5968_v7 = vpop.xlane.xlu2 %5967 }
 0xe7a   : > { %v5990_v38 = vsub.f32 %v5947_v15, %v5968_v7 }
 0xe7c   : > { %v5998_v25 = vmul.f32 1.442695, %v5990_v38 }
 0xe7d   : > { %v12372_v31 = vpop.f32.mrf.mxu1 }
 0xe7e   : > { %8331 = vpow2.f32 %v5998_v25 }
 0xe81   : > { %v5971_v41 = vpop.xlane.xlu0 %5970 }
 0xe82   : > { %v5991_v58 = vsub.f32 %v5949_v35, %v5971_v41  ;;  %v14139_v35 = vld [vmem:[#allocation42_spill] sm:$0xff] }
 0xe84   : > { %v12374_v4 = vpop.eup %8331  ;;  %v6000_v26 = vmul.f32 1.442695, %v5991_v58 }
 0xe85   : > { %v12376_v18 = vpop.f32.mrf.mxu1  ;;  %v6014_v8 = vsel %vm2200_vm2, %v12374_v4, 0.0 }
 0xe86   : > { %14138 = vst [vmem:[#allocation137_spill] sm:$0xff] %v12376_v18  ;;  %8333 = vpow2.f32 %v6000_v26  ;;  %6015 = vadd.xlane.f32.xlu1 %v6014_v8 }
 0xe89   : > { %v5974_v47 = vpop.xlane.xlu1 %5973 }
 0xe8a   : > { %v5992_v59 = vsub.f32 %v5952_v20, %v5974_v47 }
 0xe8c   : > { %v12380_v39 = vpop.eup %8333  ;;  %v6002_v15 = vmul.f32 1.442695, %v5992_v59 }
 0xe8d   : > { %v5610_v51 = vpop.f32.mrf.mxu1  ;;  %v6017_v57 = vsel %vm2200_vm2, %v12380_v39, 0.0 }
 0xe8e   : > { %8335 = vpow2.f32 %v6002_v15  ;;  %6018 = vadd.xlane.f32.xlu2 %v6017_v57  ;;  %v12385_v7 = vadd.f32 %v14139_v35, %v5610_v51 }
 0xe90   : > { %v5630_v8 = vsel %vm2200_vm2, %v12385_v7, -inf }
 0xe91   : > { %v5977_v38 = vpop.xlane.xlu2 %5976 }
 0xe92   : > { %v5993_v25 = vsub.f32 %v5954_v0, %v5977_v38 }
 0xe94   : > { %v12387_v41 = vpop.eup %8335  ;;  %v6004_v58 = vmul.f32 1.442695, %v5993_v25 }
 0xe95   : > { %v5612_v26 = vpop.f32.mrf.mxu1  ;;  %v6020_v20 = vsel %vm2200_vm2, %v12387_v41, 0.0 }
 0xe96   : > { %8337 = vpow2.f32 %v6004_v58  ;;  %6021 = vadd.xlane.f32.xlu0 %v6020_v20  ;;  %5631 = vmax.xlane.f32.xlu2 %v5630_v8  ;;  %v12394_v47 = vadd.f32 %v11028_v5, %v5612_v26 }
 0xe98   : > { %v5633_v25 = vsel %vm2200_vm2, %v12394_v47, -inf }
 0xe99   : > { %v5980_v59 = vpop.xlane.xlu0 %5979 }
 0xe9a   : > { %v5994_v15 = vsub.f32 %v5957_v1, %v5980_v59 }
 0xe9c   : > { %v12396_v51 = vpop.eup %8337  ;;  %v6006_v0 = vmul.f32 1.442695, %v5994_v15 }
 0xe9d   : > { %v5615_v57 = vpop.f32.mrf.mxu1  ;;  %v6023_v38 = vsel %vm2200_vm2, %v12396_v51, 0.0 }
 0xe9e   : > { %8339 = vpow2.f32 %v6006_v0  ;;  %6024 = vadd.xlane.f32.xlu1 %v6023_v38  ;;  %5634 = vmax.xlane.f32.xlu0 %v5633_v25  ;;  %v12403_v58 = vadd.f32 %v11043_v43, %v5615_v57 }
 0xea0   : > { %v5636_v5 = vsel %vm2200_vm2, %v12403_v58, -inf }
 0xea1   : > { %v5983_v26 = vpop.xlane.xlu1 %5982 }
 0xea2   : > { %v5995_v20 = vsub.f32 %v12338_v29, %v5983_v26 }
 0xea4   : > { %v12406_v1 = vpop.eup %8339  ;;  %v6008_v8 = vmul.f32 1.442695, %v5995_v20 }
 0xea5   : > { %v5617_v59 = vpop.f32.mrf.mxu1  ;;  %v6026_v15 = vsel %vm2200_vm2, %v12406_v1, 0.0 }
 0xea6   : > { %8341 = vpow2.f32 %v6008_v8  ;;  %6027 = vadd.xlane.f32.xlu1 %v6026_v15  ;;  %5637 = vmax.xlane.f32.xlu0 %v5636_v5  ;;  %v12413_v0 = vadd.f32 %v11055_v30, %v5617_v59 }
 0xea8   : > { %v5639_v20 = vsel %vm2200_vm2, %v12413_v0, -inf }
 0xea9   : > { %v5986_v57 = vpop.xlane.xlu2 %5985 }
 0xeaa   : > { %v5996_v38 = vsub.f32 %v12347_v9, %v5986_v57 }
 0xeac   : > { %v12416_v29 = vpop.eup %8341  ;;  %v6010_v25 = vmul.f32 1.442695, %v5996_v38 }
 0xead   : > { %v5620_v26 = vpop.f32.mrf.mxu1  ;;  %v6029_v56 = vsel %vm2200_vm2, %v12416_v29, 0.0 }
 0xeae   : > { %8343 = vpow2.f32 %v6010_v25  ;;  %5640 = vmax.xlane.f32.xlu1 %v5639_v20  ;;  %6030 = vadd.xlane.f32.xlu2 %v6029_v56  ;;  %v12423_v5 = vadd.f32 %v11070_v63, %v5620_v26 }
 0xeb0   : > { %v5642_v38 = vsel %vm2200_vm2, %v12423_v5, -inf }
 0xeb1   : > { %v5989_v8 = vpop.xlane.xlu0 %5988 }
 0xeb2   : > { %v5997_v59 = vsub.f32 %v12352_v34, %v5989_v8 }
 0xeb4   : > { %v12426_v9 = vpop.eup %8343  ;;  %v6012_v15 = vmul.f32 1.442695, %v5997_v59 }
 0xeb5   : > { %v5622_v57 = vpop.f32.mrf.mxu1  ;;  %v6032_v30 = vsel %vm2200_vm2, %v12426_v9, 0.0 }
 0xeb6   : > { %8345 = vpow2.f32 %v6012_v15  ;;  %5643 = vmax.xlane.f32.xlu1 %v5642_v38  ;;  %6033 = vadd.xlane.f32.xlu2 %v6032_v30  ;;  %v12433_v56 = vadd.f32 %v11082_v21, %v5622_v57  ;;  %v7887_v38 = vld [vmem:[%s13073_s5] sm:$0xff] }
 0xeb7   : > { %6457 = vmatpush.bf16.msrb.mxu1 %v7887_v38  ;;  %v14141_v38 = vld [vmem:[#allocation213_spill] sm:$0xff] }
 0xeb8   : > { %v5645_v20 = vsel %vm2200_vm2, %v12433_v56, -inf  ;;  %v14142_v55 = vpack.c.b16 %v14140_v49, %v14141_v38 }
 0xebc   : > { %v12435_v25 = vpop.eup %8345 }
 0xebd   : > { %v5625_v26 = vpop.f32.mrf.mxu1  ;;  %v6035_v34 = vsel %vm2200_vm2, %v12435_v25, 0.0 }
 0xebe   : > { %6036 = vadd.xlane.f32.xlu0 %v6035_v34  ;;  %5646 = vmax.xlane.f32.xlu2 %v5645_v20  ;;  %v12442_v8 = vadd.f32 %v11096_v3, %v5625_v26 }
 0xec0   : > { %v5648_v30 = vsel %vm2200_vm2, %v12442_v8, -inf }
 0xec5   : > { %v5627_v59 = vpop.f32.mrf.mxu1 }
 0xec6   : > { %v12447_v15 = vadd.f32 %v11105_v19, %v5627_v59  ;;  %5649 = vmax.xlane.f32.xlu0 %v5648_v30 }
 0xec8   : > { %v5651_v57 = vsel %vm2200_vm2, %v12447_v15, -inf }
 0xec9   : > { %5652 = vmax.xlane.f32.xlu1 %v5651_v57 }
 0xef9   : > { %v6016_v34 = vpop.xlane.xlu1 %6015 }
 0xefa   : > { %8347 = vrcp.f32 %v6016_v34  ;;  %v6852_v34 = vsel %vm2146_vm1, %v14142_v55, 0 }
 0xf00   : > { %v8348_v20 = vpop.eup %8347 }
 0xf01   : > { %v6019_v26 = vpop.xlane.xlu2 %6018  ;;  %v6046_v18 = vmul.f32 %v8348_v20, %v12374_v4 }
 0xf02   : > { %8349 = vrcp.f32 %v6019_v26 }
 0xf08   : > { %v8350_v21 = vpop.eup %8349 }
 0xf09   : > { %v6047_v59 = vmul.f32 %v8350_v21, %v12380_v39  ;;  %v6022_v30 = vpop.xlane.xlu0 %6021  ;;  %v5632_v19 = vpop.xlane.xlu2 %5631 }
 0xf0a   : > { %v5654_v53 = vsub.f32 %v12385_v7, %v5632_v19 }
 0xf0b   : > { %v6054_v57 = vpack.c.bf16 %v6047_v59, %v6046_v18  ;;  %v14143_v18 = vld [vmem:[#allocation209_spill] sm:$0xff] }
 0xf0c   : > { %v5662_v3 = vmul.f32 1.442695, %v5654_v53  ;;  %v14144_v53 = vld [vmem:[#allocation157_spill] sm:$0xff] }
 0xf0d   : > { %7773 = vmatmul.msk.bf16.vlgmr.msra.gmra.mxu1 %vm2200_vm2, %v6054_v57  ;;  %v14145_v7 = vpack.c.b16 %v14143_v18, %v14144_v53  ;;  %v14147_v18 = vld [vmem:[#allocation146_spill] sm:$0xff] }
 0xf0e   : > { %8351 = vpow2.f32 %v5662_v3  ;;  %6858 = vmatpush.bf16.xpose.msra.mxu1 %v6852_v34 }
 0xf0f   : > { %8353 = vrcp.f32 %v6022_v30  ;;  %v6849_v20 = vsel %vm2146_vm1, %v14145_v7, 0 }
 0xf11   : > { %v6025_v26 = vpop.xlane.xlu1 %6024  ;;  %v5635_v4 = vpop.xlane.xlu0 %5634 }
 0xf12   : > { %8355 = vrcp.f32 %v6025_v26  ;;  %v5655_v21 = vsub.f32 %v12394_v47, %v5635_v4 }
 0xf14   : > { %v12463_v39 = vpop.eup %8351  ;;  %v5664_v19 = vmul.f32 1.442695, %v5655_v21  ;;  %v14146_v21 = vld [vmem:[#allocation151_spill] sm:$0xff] }
 0xf15   : > { %v5678_v49 = vsel %vm2200_vm2, %v12463_v39, 0.0  ;;  %v8354_v55 = vpop.eup %8353 }
 0xf16   : > { %8357 = vpow2.f32 %v5664_v19  ;;  %6859 = vmatpush.bf16.xpose.msra.mxu1 %v6849_v20  ;;  %5679 = vadd.xlane.f32.xlu2 %v5678_v49  ;;  %v6048_v59 = vmul.f32 %v8354_v55, %v12387_v41  ;;  %v14148_v19 = vpack.c.b16 %v14146_v21, %v14147_v18  ;;  %v14149_v55 = vld [vmem:[#allocation190_spill] sm:$0xff] }
 0xf18   : > { %v8356_v3 = vpop.eup %8355  ;;  %v6846_v53 = vsel %vm2146_vm1, %v14148_v19, 0 }
 0xf19   : > { %v6049_v47 = vmul.f32 %v8356_v3, %v12396_v51  ;;  %v6028_v30 = vpop.xlane.xlu1 %6027  ;;  %v5638_v57 = vpop.xlane.xlu0 %5637  ;;  %v14150_v3 = vld [vmem:[#allocation187_spill] sm:$0xff] }
 0xf1a   : > { %v5656_v38 = vsub.f32 %v12403_v58, %v5638_v57 }
 0xf1b   : > { %v6055_v34 = vpack.c.bf16 %v6049_v47, %v6048_v59  ;;  %v14151_v59 = vpack.c.b16 %v14149_v55, %v14150_v3 }
 0xf1c   : > { %v12474_v26 = vpop.eup %8357  ;;  %v5666_v4 = vmul.f32 1.442695, %v5656_v38 }
 0xf1d   : > { %7774 = vmatmul.msk.bf16.gmra.mxu1 %vm2200_vm2, %v6055_v34  ;;  %v5681_v41 = vsel %vm2200_vm2, %v12474_v26, 0.0  ;;  %v6843_v47 = vsel %vm2146_vm1, %v14151_v59, 0 }
 0xf1e   : > { %8359 = vpow2.f32 %v5666_v4  ;;  %6860 = vmatpush.bf16.xpose.msra.mxu1 %v6846_v53  ;;  %5682 = vadd.xlane.f32.xlu0 %v5681_v41 }
 0xf1f   : > { %8361 = vrcp.f32 %v6028_v30 }
 0xf21   : > { %v5641_v51 = vpop.xlane.xlu1 %5640  ;;  %v6031_v58 = vpop.xlane.xlu2 %6030 }
 0xf22   : > { %v5657_v7 = vsub.f32 %v12413_v0, %v5641_v51  ;;  %8363 = vrcp.f32 %v6031_v58 }
 0xf24   : > { %v12484_v20 = vpop.eup %8359  ;;  %v5668_v49 = vmul.f32 1.442695, %v5657_v7 }
 0xf25   : > { %v5684_v57 = vsel %vm2200_vm2, %v12484_v20, 0.0  ;;  %v8362_v38 = vpop.eup %8361 }
 0xf26   : > { %8365 = vpow2.f32 %v5668_v49  ;;  %6861 = vmatpush.bf16.xpose.msra.mxu1 %v6843_v47  ;;  %5685 = vadd.xlane.f32.xlu1 %v5684_v57  ;;  %v6050_v34 = vmul.f32 %v8362_v38, %v12406_v1 }
 0xf28   : > { %v8364_v30 = vpop.eup %8363 }
 0xf29   : > { %v6051_v0 = vmul.f32 %v8364_v30, %v12416_v29  ;;  %v5644_v4 = vpop.xlane.xlu1 %5643  ;;  %v6034_v21 = vpop.xlane.xlu2 %6033 }
 0xf2a   : > { %v5658_v18 = vsub.f32 %v12423_v5, %v5644_v4 }
 0xf2b   : > { %v6056_v19 = vpack.c.bf16 %v6051_v0, %v6050_v34 }
 0xf2c   : > { %v12495_v53 = vpop.eup %8365  ;;  %v5670_v41 = vmul.f32 1.442695, %v5658_v18 }
 0xf2d   : > { %7775 = vmatmul.msk.bf16.gmra.mxu1 %vm2200_vm2, %v6056_v19  ;;  %v5687_v51 = vsel %vm2200_vm2, %v12495_v53, 0.0 }
 0xf2e   : > { %8367 = vpow2.f32 %v5670_v41  ;;  %5688 = vadd.xlane.f32.xlu2 %v5687_v51 }
 0xf2f   : > { %8369 = vrcp.f32 %v6034_v21 }
 0xf31   : > { %v6037_v58 = vpop.xlane.xlu0 %6036  ;;  %v5647_v1 = vpop.xlane.xlu2 %5646 }
 0xf32   : > { %8371 = vrcp.f32 %v6037_v58  ;;  %v5659_v29 = vsub.f32 %v12433_v56, %v5647_v1 }
 0xf34   : > { %v12501_v7 = vpop.eup %8367  ;;  %v5672_v5 = vmul.f32 1.442695, %v5659_v29 }
 0xf35   : > { %v5690_v49 = vsel %vm2200_vm2, %v12501_v7, 0.0  ;;  %v8370_v55 = vpop.eup %8369 }
 0xf36   : > { %8373 = vpow2.f32 %v5672_v5  ;;  %5691 = vadd.xlane.f32.xlu0 %v5690_v49  ;;  %v6052_v59 = vmul.f32 %v8370_v55, %v12426_v9 }
 0xf38   : > { %v8372_v3 = vpop.eup %8371 }
 0xf39   : > { %v6053_v47 = vmul.f32 %v8372_v3, %v12435_v25  ;;  %v5650_v57 = vpop.xlane.xlu0 %5649 }
 0xf3a   : > { %v5660_v38 = vsub.f32 %v12442_v8, %v5650_v57  ;;  %v14152_v57 = vld [vmem:[#allocation198_spill] sm:$0xff] }
 0xf3b   : > { %v6057_v30 = vpack.c.bf16 %v6053_v47, %v6052_v59 }
 0xf3c   : > { %v12508_v34 = vpop.eup %8373  ;;  %v5674_v56 = vmul.f32 1.442695, %v5660_v38  ;;  %v5653_v0 = vpop.xlane.xlu1 %5652  ;;  %v14153_v38 = vld [vmem:[#allocation197_spill] sm:$0xff] }
 0xf3d   : > { %v5661_v4 = vsub.f32 %v12447_v15, %v5653_v0  ;;  %7776 = vmatmul.msk.bf16.gmra.mxu1 %vm2200_vm2, %v6057_v30  ;;  %v5693_v21 = vsel %vm2200_vm2, %v12508_v34, 0.0  ;;  %v14154_v30 = vpack.c.b16 %v14152_v57, %v14153_v38 }
 0xf3e   : > { %8375 = vpow2.f32 %v5674_v56  ;;  %5694 = vadd.xlane.f32.xlu1 %v5693_v21 }
 0xf3f   : > { %v5676_v9 = vmul.f32 1.442695, %v5661_v4  ;;  %v6541_v56 = vsel %vm2146_vm1, %v14154_v30, 0 }
 0xf41   : > { %8377 = vpow2.f32 %v5676_v9 }
 0xf44   : > { %v12514_v25 = vpop.eup %8375 }
 0xf45   : > { %v5696_v8 = vsel %vm2200_vm2, %v12514_v25, 0.0 }
 0xf46   : > { %5697 = vadd.xlane.f32.xlu2 %v5696_v8 }
 0xf47   : > { %v12518_v18 = vpop.eup %8377 }
 0xf48   : > { %v5699_v15 = vsel %vm2200_vm2, %v12518_v18, 0.0 }
 0xf49   : > { %5700 = vadd.xlane.f32.xlu0 %v5699_v15 }
 0xf89   : > { %v5680_v41 = vpop.xlane.xlu2 %5679 }
 0xf8a   : > { %v6103_v19 = vpop.f32.mrf.mxu1  ;;  %8379 = vrcp.f32 %v5680_v41 }
 0xf90   : > { %v8380_v29 = vpop.eup %8379 }
 0xf91   : > { %v5683_v51 = vpop.xlane.xlu0 %5682  ;;  %v5710_v49 = vmul.f32 %v8380_v29, %v12463_v39  ;;  %v14155_v39 = vld [vmem:[#allocation189_spill] sm:$0xff] }
 0xf92   : > { %8381 = vrcp.f32 %v5683_v51  ;;  %v6105_v58 = vpop.f32.mrf.mxu1 }
 0xf93   : > { %v6123_v1 = vpack.c.bf16 %v6105_v58, %v6103_v19 }
 0xf95   : > { %7799 = vmatmul.msk.bf16.vlgmr.msrb.gmra.mxu1 %vm2146_vm1, %v6123_v1 }
 0xf98   : > { %v8382_v5 = vpop.eup %8381 }
 0xf99   : > { %v5711_v55 = vmul.f32 %v8382_v5, %v12474_v26  ;;  %v5686_v47 = vpop.xlane.xlu1 %5685  ;;  %v14156_v26 = vld [vmem:[#allocation188_spill] sm:$0xff]  ;;  %v14158_v5 = vld [vmem:[#allocation183_spill] sm:$0xff] }
 0xf9a   : > { %v6108_v3 = vpop.f32.mrf.mxu1  ;;  %8383 = vrcp.f32 %v5686_v47  ;;  %v14157_v9 = vpack.c.b16 %v14155_v39, %v14156_v26 }
 0xf9b   : > { %v5718_v59 = vpack.c.bf16 %v5711_v55, %v5710_v49  ;;  %v14159_v49 = vld [vmem:[#allocation182_spill] sm:$0xff] }
 0xf9c   : > { %v6538_v8 = vsel %vm2146_vm1, %v14157_v9, 0  ;;  %v14160_v55 = vpack.c.b16 %v14158_v5, %v14159_v49  ;;  %v14165_v5 = vld [vmem:[#allocation275_spill] sm:$0xff] }
 0xf9d   : > { %7747 = vmatmul.msk.bf16.vlgmr.msrb.gmra.mxu2 %vm2200_vm2, %v5718_v59  ;;  %v2037_v49 = vpack.c.bf16 %v14165_v5, %v14165_v5 }
 0xf9e   : > { %6547 = vmatpush.bf16.xpose.msrb.mxu2 %v6541_v56 }
 0xfa0   : > { %v8384_v15 = vpop.eup %8383 }
 0xfa1   : > { %v5689_v0 = vpop.xlane.xlu2 %5688  ;;  %v5712_v41 = vmul.f32 %v8384_v15, %v12484_v20  ;;  %v14161_v20 = vld [vmem:[#allocation174_spill] sm:$0xff] }
 0xfa2   : > { %8385 = vrcp.f32 %v5689_v0  ;;  %v6110_v4 = vpop.f32.mrf.mxu1 }
 0xfa3   : > { %v6124_v21 = vpack.c.bf16 %v6110_v4, %v6108_v3  ;;  %v6535_v3 = vsel %vm2146_vm1, %v14160_v55, 0  ;;  %v14166_v55 = vld [vmem:[#allocation115_spill] sm:$0xff] }
 0xfa5   : > { %7800 = vmatmul.msk.bf16.gmra.mxu1 %vm2146_vm1, %v6124_v21 }
 0xfa6   : > { %6548 = vmatpush.bf16.xpose.msrb.mxu2 %v6538_v8 }
 0xfa8   : > { %v8386_v19 = vpop.eup %8385 }
 0xfa9   : > { %v5713_v51 = vmul.f32 %v8386_v19, %v12495_v53  ;;  %v5692_v29 = vpop.xlane.xlu0 %5691  ;;  %v14162_v53 = vld [vmem:[#allocation173_spill] sm:$0xff] }
 0xfaa   : > { %v6113_v58 = vpop.f32.mrf.mxu1  ;;  %8387 = vrcp.f32 %v5692_v29  ;;  %v14163_v38 = vpack.c.b16 %v14161_v20, %v14162_v53  ;;  %v6990_v53 = vunpack.c.l.b16 %v2037_v49  ;;  %v14178_v49 = vld [vmem:[#allocation117_spill] sm:$0xff] }
 0xfab   : > { %v5719_v1 = vpack.c.bf16 %v5713_v51, %v5712_v41 }
 0xfac   : > { %v6532_v30 = vsel %vm2146_vm1, %v14163_v38, 0  ;;  %v14171_v38 = vld [vmem:[#allocation270_spill] sm:$0xff] }
 0xfad   : > { %7748 = vmatmul.msk.bf16.gmra.mxu2 %vm2200_vm2, %v5719_v1 }
 0xfae   : > { %6549 = vmatpush.bf16.xpose.msrb.mxu2 %v6535_v3  ;;  %v14167_v3 = vld [vmem:[#allocation114_spill] sm:$0xff] }
 0xfb0   : > { %v8388_v56 = vpop.eup %8387 }
 0xfb1   : > { %v5695_v59 = vpop.xlane.xlu1 %5694  ;;  %v5714_v4 = vmul.f32 %v8388_v56, %v12501_v7  ;;  %v14172_v56 = vld [vmem:[#allocation271_spill] sm:$0xff] }
 0xfb2   : > { %8389 = vrcp.f32 %v5695_v59  ;;  %v6115_v47 = vpop.f32.mrf.mxu1  ;;  %v14168_v59 = vpack.c.b16 %v14166_v55, %v14167_v3  ;;  %v14179_v55 = vld [vmem:[#allocation116_spill] sm:$0xff] }
 0xfb3   : > { %v6125_v57 = vpack.c.bf16 %v6115_v47, %v6113_v58  ;;  %v14169_v47 = vld [vmem:[#allocation272_spill] sm:$0xff]  ;;  %v14180_v3 = vpack.c.b16 %v14178_v49, %v14179_v55  ;;  %v14202_v49 = vld [vmem:[#allocation15_spill] sm:$0xff] }
 0xfb4   : > { %v1896_v55 = vpack.c.bf16 %v14202_v49, %v14202_v49  ;;  %v14211_v49 = vld [vmem:[#allocation100_spill] sm:$0xff] }
 0xfb5   : > { %7801 = vmatmul.msk.bf16.gmra.mxu1 %vm2146_vm1, %v6125_v57  ;;  %v2034_v57 = vpack.c.bf16 %v14169_v47, %v14169_v47  ;;  %v14181_v47 = vld [vmem:[#allocation91_spill] sm:$0xff] }
 0xfb6   : > { %6550 = vmatpush.bf16.xpose.msrb.mxu2 %v6532_v30  ;;  %v2032_v30 = vpack.c.bf16 %v14171_v38, %v14171_v38  ;;  %v14187_v38 = vld [vmem:[#allocation99_spill] sm:$0xff] }
 0xfb8   : > { %v8390_v0 = vpop.eup %8389 }
 0xfb9   : > { %v5715_v21 = vmul.f32 %v8390_v0, %v12508_v34  ;;  %v5698_v8 = vpop.xlane.xlu2 %5697  ;;  %v14164_v34 = vld [vmem:[#allocation274_spill] sm:$0xff]  ;;  %v2033_v0 = vpack.c.bf16 %v14172_v56, %v14172_v56 }
 0xfba   : > { %v6118_v39 = vpop.f32.mrf.mxu1  ;;  %v2036_v29 = vpack.c.bf16 %v14164_v34, %v14164_v34 }
 0xfbb   : > { %v5720_v26 = vpack.c.bf16 %v5715_v21, %v5714_v4  ;;  %v6987_v4 = vunpack.c.l.b16 %v2034_v57  ;;  %v14182_v57 = vld [vmem:[#allocation89_spill] sm:$0xff] }
 0xfbc   : > { %v5701_v9 = vpop.xlane.xlu0 %5700  ;;  %v6989_v20 = vunpack.c.l.b16 %v2036_v29 }
 0xfbd   : > { %7749 = vmatmul.msk.bf16.gmra.mxu2 %vm2200_vm2, %v5720_v26  ;;  %8391 = vrcp.f32 %v5701_v9  ;;  %v14173_v26 = vld [vmem:[#allocation83_spill] sm:$0xff]  ;;  %v14174_v9 = vld [vmem:[#allocation81_spill] sm:$0xff] }
 0xfbe   : > { %8393 = vrcp.f32 %v5698_v8  ;;  %v14175_v8 = vpack.c.b16 %v14173_v26, %v14174_v9  ;;  %v14194_v26 = vld [vmem:[#allocation105_spill] sm:$0xff] }
 0xfc2   : > { %v6120_v15 = vpop.f32.mrf.mxu1 }
 0xfc3   : > { %v6126_v19 = vpack.c.bf16 %v6120_v15, %v6118_v39  ;;  %v8392_v41 = vpop.eup %8391  ;;  %v6994_v39 = vpack.c.b16 %v6990_v53, %v6989_v20  ;;  %v14176_v15 = vld [vmem:[#allocation268_spill] sm:$0xff]  ;;  %v14185_v20 = vld [vmem:[#allocation119_spill] sm:$0xff] }
 0xfc4   : > { %v8394_v51 = vpop.eup %8393  ;;  %v5717_v58 = vmul.f32 %v8392_v41, %v12518_v18  ;;  %v14170_v18 = vld [vmem:[#allocation273_spill] sm:$0xff] }
 0xfc5   : > { %7802 = vmatmul.msk.bf16.gmra.mxu1 %vm2146_vm1, %v6126_v19  ;;  %v5716_v7 = vmul.f32 %v8394_v51, %v12514_v25  ;;  %v2035_v25 = vpack.c.bf16 %v14170_v18, %v14170_v18  ;;  %v2030_v19 = vpack.c.bf16 %v14176_v15, %v14176_v15  ;;  %v14177_v41 = vld [vmem:[#allocation269_spill] sm:$0xff]  ;;  %v14183_v18 = vpack.c.b16 %v14181_v47, %v14182_v57  ;;  %v14197_v15 = vld [vmem:[#allocation84_spill] sm:$0xff] }
 0xfc6   : > { %v2031_v51 = vpack.c.bf16 %v14177_v41, %v14177_v41  ;;  %v14203_v57 = vld [vmem:[#allocation132_spill] sm:$0xff] }
 0xfc7   : > { %v5721_v1 = vpack.c.bf16 %v5717_v58, %v5716_v7  ;;  %v6988_v21 = vunpack.c.l.b16 %v2035_v25  ;;  %v6985_v58 = vunpack.c.l.b16 %v2032_v30  ;;  %v6986_v7 = vunpack.c.l.b16 %v2033_v0  ;;  %v14184_v25 = vld [vmem:[#allocation120_spill] sm:$0xff]  ;;  %v14188_v30 = vld [vmem:[#allocation97_spill] sm:$0xff]  ;;  %v14190_v0 = vld [vmem:[#allocation126_spill] sm:$0xff] }
 0xfc8   : > { %v6983_v34 = vunpack.c.l.b16 %v2030_v19  ;;  %v6984_v29 = vunpack.c.l.b16 %v2031_v51  ;;  %v14186_v53 = vpack.c.b16 %v14184_v25, %v14185_v20  ;;  %v14189_v56 = vpack.c.b16 %v14187_v38, %v14188_v30  ;;  %v14199_v51 = vld [vmem:[#allocation2_spill] sm:$0xff] }
 0xfc9   : > { %v6992_v5 = vpack.c.b16 %v6986_v7, %v6985_v58  ;;  %v1899_v58 = vpack.c.bf16 %v14199_v51, %v14199_v51  ;;  %v14200_v7 = vld [vmem:[#allocation3_spill] sm:$0xff]  ;;  %v6676_v30 = vunpack.c.l.b16 %v1896_v55 }
 0xfcd   : > { %7750 = vmatmul.msk.bf16.gmra.mxu2 %vm2200_vm2, %v5721_v1  ;;  %v6993_v1 = vpack.c.b16 %v6988_v21, %v6987_v4  ;;  %v14191_v4 = vld [vmem:[#allocation125_spill] sm:$0xff] }
 0xfce   : > { %v14192_v21 = vpack.c.b16 %v14190_v0, %v14191_v4  ;;  %v14206_v0 = vld [vmem:[#allocation92_spill] sm:$0xff] }
 0xfd5   : > { %7821 = vmatmul.msk.bf16.vlgmr.msra.gmra.mxu1 %vm2146_vm1, %v14168_v59  ;;  %v6991_v59 = vpack.c.b16 %v6984_v29, %v6983_v34  ;;  %v14201_v34 = vld [vmem:[#allocation13_spill] sm:$0xff] }
 0xfd6   : > { %v1897_v29 = vpack.c.bf16 %v14201_v34, %v14201_v34 }
 0xfd8   : > { %v6677_v25 = vunpack.c.l.b16 %v1897_v29 }
 0xfdd   : > { %7777 = vmatmul.msk.bf16.vlgmr.msra.gmra.mxu2 %vm2146_vm1, %v14175_v8  ;;  %v14196_v8 = vld [vmem:[#allocation85_spill] sm:$0xff] }
 0xfde   : > { %7015 = vmatpush.bf16.msra.mxu2 %v6994_v39  ;;  %v14193_v39 = vld [vmem:[#allocation107_spill] sm:$0xff]  ;;  %v14198_v19 = vpack.c.b16 %v14196_v8, %v14197_v15  ;;  %v14209_v8 = vld [vmem:[#allocation122_spill] sm:$0xff] }
 0xfdf   : > { %v14195_v9 = vpack.c.b16 %v14193_v39, %v14194_v26  ;;  %v1892_v15 = vpack.c.bf16 %v14209_v8, %v14209_v8 }
 0xfe2   : > { %7016 = vmatpush.bf16.msra.mxu2 %v6993_v1  ;;  %v1898_v1 = vpack.c.bf16 %v14200_v7, %v14200_v7  ;;  %v6672_v7 = vunpack.c.l.b16 %v1892_v15 }
 0xfe5   : > { %7822 = vmatmul.msk.bf16.gmra.mxu1 %vm2146_vm1, %v14180_v3  ;;  %v6678_v3 = vunpack.c.l.b16 %v1898_v1 }
 0xfe6   : > { %7017 = vmatpush.bf16.msra.mxu2 %v6992_v5  ;;  %v6679_v5 = vunpack.c.l.b16 %v1899_v58 }
 0xfe8   : > { %v6683_v20 = vpack.c.b16 %v6679_v5, %v6678_v3  ;;  %v14210_v5 = vld [vmem:[#allocation101_spill] sm:$0xff] }
 0xfe9   : > { %v14212_v55 = vpack.c.b16 %v14210_v5, %v14211_v49 }
 0xfea   : > { %7018 = vmatpush.bf16.msra.mxu2 %v6991_v59 }
 0xfed   : > { %7778 = vmatmul.msk.bf16.gmra.mxu2 %vm2146_vm1, %v14183_v18  ;;  %v1895_v18 = vpack.c.bf16 %v14203_v57, %v14203_v57  ;;  %v14213_v57 = vld [vmem:[#allocation109_spill] sm:$0xff] }
 0xfef   : > { %v6675_v26 = vunpack.c.l.b16 %v1895_v18  ;;  %v14214_v18 = vld [vmem:[#allocation108_spill] sm:$0xff] }
 0xff5   : > { %7823 = vmatmul.msk.bf16.gmra.mxu1 %vm2146_vm1, %v14186_v53  ;;  %v14204_v53 = vld [vmem:[#allocation128_spill] sm:$0xff] }
 0xff6   : > { %v1894_v38 = vpack.c.bf16 %v14204_v53, %v14204_v53 }
 0xffd   : > { %7779 = vmatmul.msk.bf16.gmra.mxu2 %vm2146_vm1, %v14189_v56  ;;  %v14205_v56 = vld [vmem:[#allocation93_spill] sm:$0xff] }
 0xffe   : > { %v14207_v4 = vpack.c.b16 %v14205_v56, %v14206_v0 }
0x1005   : > { %7824 = vmatmul.msk.bf16.gmra.mxu1 %vm2146_vm1, %v14192_v21  ;;  %v14208_v21 = vld [vmem:[#allocation127_spill] sm:$0xff] }
0x1006   : > { %v1893_v39 = vpack.c.bf16 %v14208_v21, %v14208_v21 }
0x1008   : > { %v6673_v51 = vunpack.c.l.b16 %v1893_v39 }
0x100a   : > { %v6680_v1 = vpack.c.b16 %v6673_v51, %v6672_v7 }
0x100d   : > { %7780 = vmatmul.msk.bf16.gmra.mxu2 %vm2146_vm1, %v14195_v9  ;;  %v6682_v9 = vpack.c.b16 %v6677_v25, %v6676_v30  ;;  %v14215_v25 = vpack.c.b16 %v14213_v57, %v14214_v18 }
0x101d   : > { %7803 = vmatmul.msk.bf16.vlgmr.msrb.gmra.mxu2 %vm2146_vm1, %v14198_v19  ;;  %v6674_v19 = vunpack.c.l.b16 %v1894_v38 }
0x101f   : > { %v6681_v58 = vpack.c.b16 %v6675_v26, %v6674_v19 }
0x1020   : > { %v5767_v41 = vpop.f32.mrf.mxu2 }
0x1028   : > { %v5769_v59 = vpop.f32.mrf.mxu2 }
0x1029   : > { %v5787_v47 = vpack.c.bf16 %v5769_v59, %v5767_v41 }
0x102b   : > { %7757 = vmatmul.msk.bf16.vlgmr.msrb.gmra.mxu3 %vm2146_vm1, %v5787_v47 }
0x102c   : > { %6704 = vmatpush.bf16.msrb.mxu3 %v6683_v20  ;;  %v12637_v20 = vpop.f32.mrf.mxu1 }
0x102d   : > { %7804 = vmatmul.msk.bf16.gmra.mxu2 %vm2146_vm1, %v14207_v4 }
0x1030   : > { %6705 = vmatpush.bf16.msrb.mxu3 %v6682_v9  ;;  %v5772_v41 = vpop.f32.mrf.mxu2 }
0x1034   : > { %6706 = vmatpush.bf16.msrb.mxu3 %v6681_v58  ;;  %v12639_v56 = vpop.f32.mrf.mxu1 }
0x1038   : > { %6707 = vmatpush.bf16.msrb.mxu3 %v6680_v1  ;;  %v5774_v34 = vpop.f32.mrf.mxu2 }
0x1039   : > { %v5788_v29 = vpack.c.bf16 %v5774_v34, %v5772_v41 }
0x103b   : > { %7758 = vmatmul.msk.bf16.gmra.mxu3 %vm2146_vm1, %v5788_v29 }
0x103c   : > { %v12647_v39 = vpop.f32.mrf.mxu1 }
0x103d   : > { %7805 = vmatmul.msk.bf16.gmra.mxu2 %vm2146_vm1, %v14212_v55 }
0x1040   : > { %v5777_v3 = vpop.f32.mrf.mxu2 }
0x1044   : > { %v12654_v15 = vpop.f32.mrf.mxu1 }
0x1048   : > { %v5779_v59 = vpop.f32.mrf.mxu2 }
0x1049   : > { %v5789_v47 = vpack.c.bf16 %v5779_v59, %v5777_v3 }
0x104b   : > { %7759 = vmatmul.msk.bf16.gmra.mxu3 %vm2146_vm1, %v5789_v47 }
0x104c   : > { %v12661_v51 = vpop.f32.mrf.mxu1 }
0x104d   : > { %7806 = vmatmul.msk.bf16.gmra.mxu2 %vm2146_vm1, %v14215_v25 }
0x1050   : > { %v5782_v53 = vpop.f32.mrf.mxu2 }
0x1058   : > { %v5784_v38 = vpop.f32.mrf.mxu2 }
0x1059   : > { %v5790_v30 = vpack.c.bf16 %v5784_v38, %v5782_v53 }
0x105b   : > { %7760 = vmatmul.msk.bf16.gmra.mxu3 %vm2146_vm1, %v5790_v30 }
0x1060   : > { %v6202_v0 = vpop.f32.mrf.mxu2 }
0x1061   : > { %v12643_v4 = vadd.f32 %v13936_v17, %v6202_v0 }
0x1063   : > { %v6222_v21 = vsel %vm2200_vm2, %v12643_v4, -inf }
0x1064   : > { %6223 = vmax.xlane.f32.xlu1 %v6222_v21 }
0x1068   : > { %v6204_v26 = vpop.f32.mrf.mxu2 }
0x1069   : > { %v12650_v9 = vadd.f32 %v13937_v40, %v6204_v26 }
0x106b   : > { %v6225_v8 = vsel %vm2200_vm2, %v12650_v9, -inf }
0x106c   : > { %6226 = vmax.xlane.f32.xlu2 %v6225_v8 }
0x1070   : > { %v6207_v19 = vpop.f32.mrf.mxu2 }
0x1071   : > { %v12657_v17 = vadd.f32 %v13939_v14, %v6207_v19  ;;  %v12671_v14 = vpop.f32.mrf.mxu1 }
0x1073   : > { %v6228_v41 = vsel %vm2200_vm2, %v12657_v17, -inf }
0x1074   : > { %6229 = vmax.xlane.f32.xlu0 %v6228_v41 }
0x1078   : > { %v6209_v58 = vpop.f32.mrf.mxu2 }
0x1079   : > { %v12664_v40 = vadd.f32 %v13941_v2, %v6209_v58  ;;  %v12680_v55 = vpop.f32.mrf.mxu1 }
0x107b   : > { %v6231_v7 = vsel %vm2200_vm2, %v12664_v40, -inf }
0x107c   : > { %6232 = vmax.xlane.f32.xlu1 %v6231_v7 }
0x1080   : > { %v6212_v1 = vpop.f32.mrf.mxu2 }
0x1081   : > { %v12669_v34 = vadd.f32 %v13942_v33, %v6212_v1  ;;  %v12687_v47 = vpop.f32.mrf.mxu1 }
0x1083   : > { %v6234_v29 = vsel %vm2200_vm2, %v12669_v34, -inf }
0x1084   : > { %6235 = vmax.xlane.f32.xlu2 %v6234_v29  ;;  %v5212_v29 = vadd.f32 %v12364_v62, %v12259_v28 }
0x1088   : > { %v6214_v5 = vpop.f32.mrf.mxu2 }
0x1089   : > { %v12676_v49 = vadd.f32 %v13944_v24, %v6214_v5  ;;  %v6863_v25 = vpop.f32.mrf.mxu1 }
0x108a   : > { %v12707_v8 = vadd.f32 %v14139_v35, %v6863_v25 }
0x108b   : > { %v6237_v2 = vsel %vm2200_vm2, %v12676_v49, -inf }
0x108c   : > { %6238 = vmax.xlane.f32.xlu0 %v6237_v2 }
0x1090   : > { %v6217_v3 = vpop.f32.mrf.mxu2 }
0x1091   : > { %v12683_v33 = vadd.f32 %v13946_v50, %v6217_v3  ;;  %v5207_v50 = vadd.f32 %v12360_v36, %v12248_v6  ;;  %v12701_v0 = vpop.f32.mrf.mxu1  ;;  %v12716_v6 = vld [vmem:[%s13074_s6] ss:$0 sm:$0xff] }
0x1093   : > { %v6240_v59 = vsel %vm2200_vm2, %v12683_v33, -inf  ;;  %v5529_v21 = vadd.f32 %v12283_v37, %v5207_v50  ;;  %v6883_v37 = vsel %vm2200_vm2, %v12707_v8, -inf }
0x1094   : > { %6241 = vmax.xlane.f32.xlu1 %v6240_v59 }
0x1098   : > { %v6219_v57 = vpop.f32.mrf.mxu2 }
0x1099   : > { %v12690_v24 = vadd.f32 %v13948_v11, %v6219_v57  ;;  %v6868_v35 = vpop.f32.mrf.mxu1 }
0x109a   : > { %v12738_v28 = vadd.f32 %v11043_v43, %v6868_v35 }
0x109b   : > { %v6243_v18 = vsel %vm2200_vm2, %v12690_v24, -inf }
0x109c   : > { %6244 = vmax.xlane.f32.xlu2 %v6243_v18 }
0x10a0   : > { %v12694_v53 = vpop.f32.mrf.mxu2 }
0x10a1   : > { %v12735_v57 = vpop.f32.mrf.mxu1 }
0x10a8   : > { %v6554_v38 = vpop.f32.mrf.mxu2 }
0x10a9   : > { %v12699_v30 = vadd.f32 %v14062_v61, %v6554_v38  ;;  %v5209_v61 = vadd.f32 %v12362_v32, %v12253_v22 }
0x10ab   : > { %v6575_v11 = vsel %vm2200_vm2, %v12699_v30, -inf  ;;  %v5530_v7 = vadd.f32 %v12293_v12, %v5209_v61  ;;  %v5531_v12 = vadd.f32 %v12304_v44, %v5212_v29  ;;  %v5217_v61 = vadd.f32 %v12368_v16, %v12267_v46 }
0x10ac   : > { %6576 = vmax.xlane.f32.xlu2 %v6575_v11  ;;  %v6889_v11 = vsel %vm2200_vm2, %v12738_v28, -inf }
0x10ae   : > { %v5820_v26 = vpop.f32.mrf.mxu3 }
0x10af   : > { %v5840_v19 = vadd.f32 %v5820_v26, %v5529_v21  ;;  %v6873_v26 = vpop.f32.mrf.mxu1 }
0x10b0   : > { %v12709_v41 = vpop.f32.mrf.mxu2  ;;  %v12762_v35 = vadd.f32 %v11070_v63, %v6873_v26  ;;  %v14219_v26 = vld [vmem:[#allocation175_spill] sm:$0xff] }
0x10b1   : > { %v5848_v36 = vadd.f32 %v12716_v6, %v5840_v19 }
0x10b3   : > { %v5856_v58 = vpack.c.bf16 %v5848_v36, %v5848_v36 }
0x10b4   : > { %6884 = vmax.xlane.f32.xlu2 %v6883_v37 }
0x10b5   : > { %7761 = vst.msk [vmem:[%s11414_s19 + $0x40] sm:$0xf] %vm3358_vm3, %v5856_v58 }
0x10b6   : > { %v5822_v1 = vpop.f32.mrf.mxu3 }
0x10b7   : > { %v5841_v22 = vadd.f32 %v5822_v1, %v5530_v7  ;;  %v12769_v1 = vpop.f32.mrf.mxu1 }
0x10b8   : > { %v6559_v32 = vpop.f32.mrf.mxu2 }
0x10b9   : > { %v5849_v5 = vadd.f32 %v12716_v6, %v5841_v22  ;;  %v12728_v2 = vadd.f32 %v13950_v23, %v6559_v32  ;;  %v5214_v23 = vadd.f32 %v12366_v45, %v12261_v52  ;;  %v6895_v32 = vsel %vm2200_vm2, %v12762_v35, -inf }
0x10bb   : > { %v5857_v3 = vpack.c.bf16 %v5849_v5, %v5849_v5  ;;  %v6581_v59 = vsel %vm2200_vm2, %v12728_v2, -inf  ;;  %v5532_v44 = vadd.f32 %v12306_v48, %v5214_v23  ;;  %v5533_v48 = vadd.f32 %v12309_v60, %v5217_v61 }
0x10bc   : > { %6582 = vmax.xlane.f32.xlu2 %v6581_v59 }
0x10bd   : > { %7762 = vst.msk [vmem:[%s11414_s19 + $0x44] sm:$0xf] %vm3358_vm3, %v5857_v3 }
0x10be   : > { %v5825_v18 = vpop.f32.mrf.mxu3 }
0x10bf   : > { %v5842_v62 = vadd.f32 %v5825_v18, %v5531_v12  ;;  %v14216_v12 = vld [vmem:[#allocation240_spill] sm:$0xff] }
0x10c0   : > { %v12740_v25 = vpop.f32.mrf.mxu2 }
0x10c1   : > { %v5850_v38 = vadd.f32 %v12716_v6, %v5842_v62 }
0x10c3   : > { %v5858_v50 = vpack.c.bf16 %v5850_v38, %v5850_v38 }
0x10c4   : > { %6890 = vmax.xlane.f32.xlu2 %v6889_v11 }
0x10c5   : > { %7763 = vst.msk [vmem:[%s11414_s19 + $0x48] sm:$0xf] %vm3358_vm3, %v5858_v50 }
0x10c6   : > { %v5827_v43 = vpop.f32.mrf.mxu3 }
0x10c7   : > { %v5843_v21 = vadd.f32 %v5827_v43, %v5532_v44 }
0x10c8   : > { %v6564_v19 = vpop.f32.mrf.mxu2 }
0x10c9   : > { %v5851_v52 = vadd.f32 %v12716_v6, %v5843_v21  ;;  %v12754_v45 = vadd.f32 %v13951_v10, %v6564_v19  ;;  %v5219_v10 = vadd.f32 %v12370_v13, %v12273_v27  ;;  %v5222_v13 = vadd.f32 %v12372_v31, %v12275_v54  ;;  %v14218_v54 = vld [vmem:[#allocation39_spill] sm:$0xff]  ;;  %v14220_v19 = vld [vmem:[#allocation137_spill] sm:$0xff] }
0x10ca   : > { %v5224_v61 = vadd.f32 %v14220_v19, %v14219_v26 }
0x10cb   : > { %v5859_v36 = vpack.c.bf16 %v5851_v52, %v5851_v52  ;;  %v6587_v58 = vsel %vm2200_vm2, %v12754_v45, -inf  ;;  %v5534_v63 = vadd.f32 %v12311_v42, %v5219_v10  ;;  %v6878_v42 = vpop.f32.mrf.mxu1 }
0x10cc   : > { %6588 = vmax.xlane.f32.xlu2 %v6587_v58  ;;  %v12789_v31 = vadd.f32 %v14218_v54, %v6878_v42 }
0x10cd   : > { %7764 = vst.msk [vmem:[%s11414_s19 + $0x4c] sm:$0xf] %vm3358_vm3, %v5859_v36 }
0x10ce   : > { %v5830_v37 = vpop.f32.mrf.mxu3 }
0x10cf   : > { %v5844_v46 = vadd.f32 %v5830_v37, %v5533_v48  ;;  %v6901_v37 = vsel %vm2200_vm2, %v12789_v31, -inf }
0x10d0   : > { %v12764_v16 = vpop.f32.mrf.mxu2 }
0x10d1   : > { %v5852_v7 = vadd.f32 %v12716_v6, %v5844_v46 }
0x10d3   : > { %v5860_v22 = vpack.c.bf16 %v5852_v7, %v5852_v7 }
0x10d4   : > { %6896 = vmax.xlane.f32.xlu2 %v6895_v32 }
0x10d5   : > { %7765 = vst.msk [vmem:[%s11414_s19 + $0x50] sm:$0xf] %vm3358_vm3, %v5860_v22 }
0x10d6   : > { %v5832_v60 = vpop.f32.mrf.mxu3 }
0x10d7   : > { %v5845_v29 = vadd.f32 %v5832_v60, %v5534_v63  ;;  %v6224_v5 = vpop.xlane.xlu1 %6223 }
0x10d8   : > { %v6246_v3 = vsub.f32 %v12643_v4, %v6224_v5  ;;  %v6569_v27 = vpop.f32.mrf.mxu2  ;;  %v14217_v4 = vld [vmem:[#allocation144_spill] sm:$0xff] }
0x10d9   : > { %v5853_v59 = vadd.f32 %v12716_v6, %v5845_v29  ;;  %v12781_v18 = vadd.f32 %v14216_v12, %v6569_v27  ;;  %v5535_v50 = vadd.f32 %v14217_v4, %v5222_v13  ;;  %v14222_v13 = vld [vmem:[#allocation208_spill] sm:$0xff] }
0x10da   : > { %v6254_v62 = vmul.f32 1.442695, %v6246_v3  ;;  %v14223_v4 = vld [vmem:[#allocation40_spill] sm:$0xff] }
0x10db   : > { %v5861_v23 = vpack.c.bf16 %v5853_v59, %v5853_v59  ;;  %v6593_v38 = vsel %vm2200_vm2, %v12781_v18, -inf  ;;  %v12814_v59 = vadd.f32 %v14222_v13, %v12694_v53 }
0x10dc   : > { %8395 = vpow2.f32 %v6254_v62  ;;  %6594 = vmax.xlane.f32.xlu2 %v6593_v38 }
0x10dd   : > { %7766 = vst.msk [vmem:[%s11414_s19 + $0x54] sm:$0xf] %vm3358_vm3, %v5861_v23  ;;  %v6572_v38 = vsel %vm2200_vm2, %v12814_v59, -inf }
0x10de   : > { %v5835_v11 = vpop.f32.mrf.mxu3 }
0x10df   : > { %v5846_v44 = vadd.f32 %v5835_v11, %v5535_v50  ;;  %v6227_v43 = vpop.xlane.xlu2 %6226  ;;  %v12825_v50 = vadd.f32 %v14223_v4, %v12701_v0 }
0x10e0   : > { %v6247_v21 = vsub.f32 %v12650_v9, %v6227_v43  ;;  %v14221_v9 = vld [vmem:[#allocation140_spill] sm:$0xff] }
0x10e1   : > { %v5854_v52 = vadd.f32 %v12716_v6, %v5846_v44  ;;  %v5536_v10 = vadd.f32 %v14221_v9, %v5224_v61  ;;  %v6886_v44 = vsel %vm2200_vm2, %v12825_v50, -inf }
0x10e2   : > { %v12795_v36 = vpop.eup %8395  ;;  %v6256_v58 = vmul.f32 1.442695, %v6247_v21  ;;  %v14224_v21 = vld [vmem:[#allocation153_spill] sm:$0xff] }
0x10e3   : > { %v5862_v48 = vpack.c.bf16 %v5854_v52, %v5854_v52  ;;  %v6270_v46 = vsel %vm2200_vm2, %v12795_v36, 0.0  ;;  %v12836_v26 = vadd.f32 %v14224_v21, %v12709_v41 }
0x10e4   : > { %8397 = vpow2.f32 %v6256_v58  ;;  %6902 = vmax.xlane.f32.xlu2 %v6901_v37  ;;  %6271 = vadd.xlane.f32.xlu0 %v6270_v46 }
0x10e5   : > { %7767 = vst.msk [vmem:[%s11414_s19 + $0x58] sm:$0xf] %vm3358_vm3, %v5862_v48  ;;  %v6578_v58 = vsel %vm2200_vm2, %v12836_v26, -inf  ;;  %v14225_v48 = vld [vmem:[#allocation31_spill] sm:$0xff] }
0x10e6   : > { %v5837_v7 = vpop.f32.mrf.mxu3  ;;  %v12847_v37 = vadd.f32 %v14225_v48, %v12735_v57 }
0x10e7   : > { %v5847_v22 = vadd.f32 %v5837_v7, %v5536_v10  ;;  %v6230_v32 = vpop.xlane.xlu0 %6229 }
0x10e8   : > { %v6248_v63 = vsub.f32 %v12657_v17, %v6230_v32  ;;  %v6892_v10 = vsel %vm2200_vm2, %v12847_v37, -inf }
0x10e9   : > { %v5855_v60 = vadd.f32 %v12716_v6, %v5847_v22  ;;  %v14226_v22 = vld [vmem:[#allocation232_spill] sm:$0xff] }
0x10ea   : > { %v12806_v29 = vpop.eup %8397  ;;  %v6258_v5 = vmul.f32 1.442695, %v6248_v63  ;;  %v12858_v32 = vadd.f32 %v14226_v22, %v12740_v25 }
0x10eb   : > { %v5863_v3 = vpack.c.bf16 %v5855_v60, %v5855_v60  ;;  %v6273_v27 = vsel %vm2200_vm2, %v12806_v29, 0.0 }
0x10ec   : > { %8399 = vpow2.f32 %v6258_v5  ;;  %6274 = vadd.xlane.f32.xlu1 %v6273_v27  ;;  %v6584_v5 = vsel %vm2200_vm2, %v12858_v32, -inf  ;;  %v14227_v27 = vld [vmem:[#allocation30_spill] sm:$0xff] }
0x10ed   : > { %7768 = vst.msk [vmem:[%s11414_s19 + $0x5c] sm:$0xf] %vm3358_vm3, %v5863_v3  ;;  %v12869_v13 = vadd.f32 %v14227_v27, %v12769_v1 }
0x10ef   : > { %v6233_v12 = vpop.xlane.xlu1 %6232 }
0x10f0   : > { %v6249_v17 = vsub.f32 %v12664_v40, %v6233_v12  ;;  %v6898_v12 = vsel %vm2200_vm2, %v12869_v13, -inf }
0x10f2   : > { %v12817_v62 = vpop.eup %8399  ;;  %v6260_v23 = vmul.f32 1.442695, %v6249_v17  ;;  %v6880_v17 = vpop.f32.mrf.mxu1 }
0x10f3   : > { %v6276_v42 = vsel %vm2200_vm2, %v12817_v62, 0.0 }
0x10f4   : > { %8401 = vpow2.f32 %v6260_v23  ;;  %6573 = vmax.xlane.f32.xlu1 %v6572_v38  ;;  %6277 = vadd.xlane.f32.xlu0 %v6276_v42  ;;  %v14228_v23 = vld [vmem:[#allocation38_spill] sm:$0xff]  ;;  %v14229_v42 = vld [vmem:[#allocation237_spill] sm:$0xff] }
0x10f5   : > { %v12878_v38 = vadd.f32 %v14228_v23, %v6880_v17  ;;  %v12882_v4 = vadd.f32 %v14229_v42, %v12764_v16 }
0x10f7   : > { %v6236_v53 = vpop.xlane.xlu2 %6235 }
0x10f8   : > { %v6250_v11 = vsub.f32 %v12669_v34, %v6236_v53  ;;  %v6590_v53 = vsel %vm2200_vm2, %v12882_v4, -inf }
0x10fa   : > { %v12828_v40 = vpop.eup %8401  ;;  %v6262_v54 = vmul.f32 1.442695, %v6250_v11  ;;  %v6904_v11 = vsel %vm2200_vm2, %v12878_v38, -inf }
0x10fb   : > { %v6279_v43 = vsel %vm2200_vm2, %v12828_v40, 0.0 }
0x10fc   : > { %8403 = vpow2.f32 %v6262_v54  ;;  %6887 = vmax.xlane.f32.xlu0 %v6886_v44  ;;  %6280 = vadd.xlane.f32.xlu1 %v6279_v43 }
0x10ff   : > { %v6239_v0 = vpop.xlane.xlu0 %6238 }
0x1100   : > { %v6251_v19 = vsub.f32 %v12676_v49, %v6239_v0 }
0x1102   : > { %v12839_v34 = vpop.eup %8403  ;;  %v6264_v61 = vmul.f32 1.442695, %v6251_v19 }
0x1103   : > { %v6282_v52 = vsel %vm2200_vm2, %v12839_v34, 0.0 }
0x1104   : > { %8405 = vpow2.f32 %v6264_v61  ;;  %6283 = vadd.xlane.f32.xlu0 %v6282_v52  ;;  %6579 = vmax.xlane.f32.xlu1 %v6578_v58 }
0x1107   : > { %v6242_v41 = vpop.xlane.xlu1 %6241 }
0x1108   : > { %v6252_v46 = vsub.f32 %v12683_v33, %v6242_v41 }
0x110a   : > { %v12850_v49 = vpop.eup %8405  ;;  %v6266_v9 = vmul.f32 1.442695, %v6252_v46 }
0x110b   : > { %v6285_v7 = vsel %vm2200_vm2, %v12850_v49, 0.0 }
0x110c   : > { %8407 = vpow2.f32 %v6266_v9  ;;  %6893 = vmax.xlane.f32.xlu0 %v6892_v10  ;;  %6286 = vadd.xlane.f32.xlu1 %v6285_v7 }
0x110f   : > { %v6245_v57 = vpop.xlane.xlu2 %6244 }
0x1110   : > { %v6253_v63 = vsub.f32 %v12690_v24, %v6245_v57 }
0x1112   : > { %v12861_v33 = vpop.eup %8407  ;;  %v6268_v60 = vmul.f32 1.442695, %v6253_v63 }
0x1113   : > { %v6288_v3 = vsel %vm2200_vm2, %v12861_v33, 0.0 }
0x1114   : > { %8409 = vpow2.f32 %v6268_v60  ;;  %6585 = vmax.xlane.f32.xlu1 %v6584_v5  ;;  %6289 = vadd.xlane.f32.xlu0 %v6288_v3 }
0x111a   : > { %v12871_v25 = vpop.eup %8409 }
0x111b   : > { %v6291_v24 = vsel %vm2200_vm2, %v12871_v25, 0.0 }
0x111c   : > { %6292 = vadd.xlane.f32.xlu1 %v6291_v24  ;;  %6899 = vmax.xlane.f32.xlu0 %v6898_v12 }
0x111f   : > { %v6577_v1 = vpop.xlane.xlu2 %6576 }
0x1120   : > { %v6597_v43 = vsub.f32 %v12699_v30, %v6577_v1 }
0x1122   : > { %v6606_v0 = vmul.f32 1.442695, %v6597_v43 }
0x1124   : > { %6591 = vmax.xlane.f32.xlu1 %v6590_v53  ;;  %6905 = vmax.xlane.f32.xlu0 %v6904_v11 }
0x1127   : > { %v6885_v54 = vpop.xlane.xlu2 %6884 }
0x1128   : > { %v6907_v44 = vsub.f32 %v12707_v8, %v6885_v54 }
0x112a   : > { %v6915_v21 = vmul.f32 1.442695, %v6907_v44 }
0x112c   : > { %8411 = vpow2.f32 %v6915_v21 }
0x112d   : > { %8413 = vpow2.f32 %v6606_v0 }
0x112f   : > { %v6583_v8 = vpop.xlane.xlu2 %6582 }
0x1132   : > { %v12890_v19 = vpop.eup %8411 }
0x1133   : > { %v6931_v16 = vsel %vm2200_vm2, %v12890_v19, 0.0  ;;  %v12894_v61 = vpop.eup %8413 }
0x1134   : > { %6932 = vadd.xlane.f32.xlu0 %v6931_v16  ;;  %v6623_v52 = vsel %vm2200_vm2, %v12894_v61, 0.0 }
0x1137   : > { %v6891_v46 = vpop.xlane.xlu2 %6890 }
0x113c   : > { %6624 = vadd.xlane.f32.xlu0 %v6623_v52 }
0x113f   : > { %v12902_v27 = vpop.xlane.xlu2 %6588 }
0x1147   : > { %v6897_v21 = vpop.xlane.xlu2 %6896 }
0x1157   : > { %v6272_v58 = vpop.xlane.xlu0 %6271 }
0x1158   : > { %8415 = vrcp.f32 %v6272_v58 }
0x115e   : > { %v8416_v48 = vpop.eup %8415 }
0x115f   : > { %v6275_v30 = vpop.xlane.xlu1 %6274  ;;  %v6302_v9 = vmul.f32 %v8416_v48, %v12795_v36 }
0x1160   : > { %8417 = vrcp.f32 %v6275_v30 }
0x1166   : > { %v8418_v41 = vpop.eup %8417 }
0x1167   : > { %v6303_v10 = vmul.f32 %v8418_v41, %v12806_v29  ;;  %v6278_v7 = vpop.xlane.xlu0 %6277  ;;  %v6574_v22 = vpop.xlane.xlu1 %6573  ;;  %v6909_v29 = vsub.f32 %v12738_v28, %v6891_v46  ;;  %v6599_v28 = vsub.f32 %v12728_v2, %v6583_v8  ;;  %v6911_v8 = vsub.f32 %v12762_v35, %v6897_v21 }
0x1168   : > { %v6596_v57 = vsub.f32 %v12814_v59, %v6574_v22 }
0x1169   : > { %v6310_v63 = vpack.c.bf16 %v6303_v10, %v6302_v9  ;;  %v6919_v42 = vmul.f32 1.442695, %v6909_v29  ;;  %v12929_v9 = vpop.xlane.xlu2 %6594  ;;  %v6923_v10 = vmul.f32 1.442695, %v6911_v8 }
0x116a   : > { %v6604_v60 = vmul.f32 1.442695, %v6596_v57 }
0x116b   : > { %7781 = vmatmul.msk.bf16.vlgmr.msra.gmra.mxu3 %vm2200_vm2, %v6310_v63 }
0x116c   : > { %8419 = vpow2.f32 %v6604_v60 }
0x116d   : > { %8421 = vrcp.f32 %v6278_v7 }
0x116f   : > { %v6888_v5 = vpop.xlane.xlu0 %6887  ;;  %v6281_v3 = vpop.xlane.xlu1 %6280 }
0x1170   : > { %v6908_v24 = vsub.f32 %v12825_v50, %v6888_v5  ;;  %8423 = vrcp.f32 %v6281_v3 }
0x1172   : > { %v12905_v36 = vpop.eup %8419  ;;  %v6917_v12 = vmul.f32 1.442695, %v6908_v24  ;;  %v6601_v24 = vsub.f32 %v12754_v45, %v12902_v27 }
0x1173   : > { %v6620_v59 = vsel %vm2200_vm2, %v12905_v36, 0.0  ;;  %v8422_v17 = vpop.eup %8421 }
0x1174   : > { %8425 = vpow2.f32 %v6917_v12  ;;  %6621 = vadd.xlane.f32.xlu2 %v6620_v59  ;;  %v6304_v1 = vmul.f32 %v8422_v17, %v12817_v62  ;;  %v6610_v62 = vmul.f32 1.442695, %v6599_v28  ;;  %v6903_v12 = vpop.xlane.xlu2 %6902 }
0x1175   : > { %8427 = vpow2.f32 %v6919_v42  ;;  %v6913_v42 = vsub.f32 %v12789_v31, %v6903_v12 }
0x1176   : > { %v8424_v23 = vpop.eup %8423 }
0x1177   : > { %v6305_v53 = vmul.f32 %v8424_v23, %v12828_v40  ;;  %v6284_v11 = vpop.xlane.xlu0 %6283  ;;  %v6580_v50 = vpop.xlane.xlu1 %6579 }
0x1178   : > { %v6598_v54 = vsub.f32 %v12836_v26, %v6580_v50 }
0x1179   : > { %v6311_v44 = vpack.c.bf16 %v6305_v53, %v6304_v1 }
0x117a   : > { %v12913_v43 = vpop.eup %8425  ;;  %v6608_v0 = vmul.f32 1.442695, %v6598_v54 }
0x117b   : > { %7782 = vmatmul.msk.bf16.gmra.mxu3 %vm2200_vm2, %v6311_v44  ;;  %v6934_v16 = vsel %vm2200_vm2, %v12913_v43, 0.0  ;;  %v12919_v26 = vpop.eup %8427  ;;  %v6927_v44 = vmul.f32 1.442695, %v6913_v42 }
0x117c   : > { %8429 = vpow2.f32 %v6608_v0  ;;  %6935 = vadd.xlane.f32.xlu1 %v6934_v16  ;;  %v6937_v48 = vsel %vm2200_vm2, %v12919_v26, 0.0 }
0x117d   : > { %8431 = vrcp.f32 %v6284_v11 }
0x117f   : > { %v6894_v40 = vpop.xlane.xlu0 %6893  ;;  %v6287_v52 = vpop.xlane.xlu1 %6286 }
0x1180   : > { %v6910_v58 = vsub.f32 %v12847_v37, %v6894_v40  ;;  %8433 = vrcp.f32 %v6287_v52 }
0x1181   : > { %8435 = vpow2.f32 %v6610_v62 }
0x1182   : > { %v12922_v2 = vpop.eup %8429  ;;  %v6921_v30 = vmul.f32 1.442695, %v6910_v58  ;;  %v6603_v58 = vsub.f32 %v12781_v18, %v12929_v9 }
0x1183   : > { %v6626_v41 = vsel %vm2200_vm2, %v12922_v2, 0.0  ;;  %v8432_v46 = vpop.eup %8431 }
0x1184   : > { %8437 = vpow2.f32 %v6921_v30  ;;  %6938 = vadd.xlane.f32.xlu1 %v6937_v48  ;;  %6627 = vadd.xlane.f32.xlu0 %v6626_v41  ;;  %v6306_v7 = vmul.f32 %v8432_v46, %v12839_v34 }
0x1185   : > { %8439 = vpow2.f32 %v6923_v10 }
0x1186   : > { %v8434_v37 = vpop.eup %8433 }
0x1187   : > { %v6307_v22 = vmul.f32 %v8434_v37, %v12850_v49  ;;  %v6290_v35 = vpop.xlane.xlu0 %6289  ;;  %v6586_v57 = vpop.xlane.xlu1 %6585 }
0x1188   : > { %v12933_v63 = vpop.eup %8435  ;;  %v6600_v60 = vsub.f32 %v12858_v32, %v6586_v57  ;;  %v6614_v32 = vmul.f32 1.442695, %v6601_v24 }
0x1189   : > { %v6312_v5 = vpack.c.bf16 %v6307_v22, %v6306_v7  ;;  %v6629_v34 = vsel %vm2200_vm2, %v12933_v63, 0.0  ;;  %v7888_v7 = vld [vmem:[%s13073_s5 + $0x8] sm:$0xff] }
0x118a   : > { %v12936_v3 = vpop.eup %8437  ;;  %v6612_v29 = vmul.f32 1.442695, %v6600_v60  ;;  %6410 = vmatpush.bf16.msrb.mxu0 %v7888_v7 }
0x118b   : > { %7783 = vmatmul.msk.bf16.gmra.mxu3 %vm2200_vm2, %v6312_v5  ;;  %v6940_v49 = vsel %vm2200_vm2, %v12936_v3, 0.0  ;;  %v12945_v23 = vpop.eup %8439 }
0x118c   : > { %8441 = vpow2.f32 %v6612_v29  ;;  %6630 = vadd.xlane.f32.xlu1 %v6629_v34  ;;  %6941 = vadd.xlane.f32.xlu2 %v6940_v49  ;;  %v6943_v53 = vsel %vm2200_vm2, %v12945_v23, 0.0 }
0x118d   : > { %8443 = vrcp.f32 %v6290_v35 }
0x118f   : > { %v6900_v59 = vpop.xlane.xlu0 %6899  ;;  %v6293_v17 = vpop.xlane.xlu1 %6292 }
0x1190   : > { %v6912_v45 = vsub.f32 %v12869_v13, %v6900_v59  ;;  %8445 = vrcp.f32 %v6293_v17 }
0x1191   : > { %8447 = vpow2.f32 %v6614_v32 }
0x1192   : > { %v12948_v27 = vpop.eup %8441  ;;  %v6925_v1 = vmul.f32 1.442695, %v6912_v45 }
0x1193   : > { %v6632_v11 = vsel %vm2200_vm2, %v12948_v27, 0.0  ;;  %v8444_v50 = vpop.eup %8443 }
0x1194   : > { %8449 = vpow2.f32 %v6925_v1  ;;  %6944 = vadd.xlane.f32.xlu2 %v6943_v53  ;;  %6633 = vadd.xlane.f32.xlu1 %v6632_v11  ;;  %v6308_v13 = vmul.f32 %v8444_v50, %v12861_v33 }
0x1195   : > { %8451 = vpow2.f32 %v6927_v44 }
0x1196   : > { %v8446_v54 = vpop.eup %8445 }
0x1197   : > { %v6309_v28 = vmul.f32 %v8446_v54, %v12871_v25  ;;  %v6906_v21 = vpop.xlane.xlu0 %6905  ;;  %v6592_v0 = vpop.xlane.xlu1 %6591 }
0x1198   : > { %v12957_v31 = vpop.eup %8447  ;;  %v6914_v16 = vsub.f32 %v12878_v38, %v6906_v21  ;;  %v6602_v62 = vsub.f32 %v12882_v4, %v6592_v0  ;;  %v6618_v38 = vmul.f32 1.442695, %v6603_v58 }
0x1199   : > { %v6313_v40 = vpack.c.bf16 %v6309_v28, %v6308_v13  ;;  %v6635_v33 = vsel %vm2200_vm2, %v12957_v31, 0.0 }
0x119a   : > { %v12961_v52 = vpop.eup %8449  ;;  %v6929_v8 = vmul.f32 1.442695, %v6914_v16  ;;  %v6616_v30 = vmul.f32 1.442695, %v6602_v62 }
0x119b   : > { %7784 = vmatmul.msk.bf16.gmra.mxu3 %vm2200_vm2, %v6313_v40  ;;  %v6946_v25 = vsel %vm2200_vm2, %v12961_v52, 0.0  ;;  %v12970_v4 = vpop.eup %8451 }
0x119c   : > { %8453 = vpow2.f32 %v6929_v8  ;;  %6636 = vadd.xlane.f32.xlu2 %v6635_v33  ;;  %6947 = vadd.xlane.f32.xlu0 %v6946_v25  ;;  %v6949_v41 = vsel %vm2200_vm2, %v12970_v4, 0.0 }
0x119d   : > { %8455 = vpow2.f32 %v6616_v30 }
0x119e   : > { %8457 = vpow2.f32 %v6618_v38 }
0x11a2   : > { %v12972_v48 = vpop.eup %8453 }
0x11a3   : > { %v12974_v18 = vpop.eup %8455  ;;  %v6952_v46 = vsel %vm2200_vm2, %v12972_v48, 0.0 }
0x11a4   : > { %6950 = vadd.xlane.f32.xlu0 %v6949_v41  ;;  %6953 = vadd.xlane.f32.xlu1 %v6952_v46  ;;  %v6638_v9 = vsel %vm2200_vm2, %v12974_v18, 0.0  ;;  %v12982_v37 = vpop.eup %8457 }
0x11a5   : > { %6639 = vadd.xlane.f32.xlu2 %v6638_v9  ;;  %v6641_v10 = vsel %vm2200_vm2, %v12982_v37, 0.0 }
0x11a7   : > { %v6933_v22 = vpop.xlane.xlu0 %6932 }
0x11ac   : > { %6642 = vadd.xlane.f32.xlu0 %v6641_v10 }
0x11af   : > { %v6625_v35 = vpop.xlane.xlu0 %6624 }
0x11b0   : > { %8459 = vrcp.f32 %v6625_v35 }
0x11b6   : > { %v8460_v60 = vpop.eup %8459 }
0x11b7   : > { %v6653_v29 = vmul.f32 %v8460_v60, %v12894_v61 }
0x11e7   : > { %v6622_v57 = vpop.xlane.xlu2 %6621 }
0x11e8   : > { %8461 = vrcp.f32 %v6622_v57 }
0x11e9   : > { %8463 = vrcp.f32 %v6933_v22 }
0x11ee   : > { %v8462_v5 = vpop.eup %8461  ;;  %v6359_v24 = vpop.f32.mrf.mxu3 }
0x11ef   : > { %v6652_v34 = vmul.f32 %v8462_v5, %v12905_v36  ;;  %v6936_v49 = vpop.xlane.xlu1 %6935  ;;  %v8464_v12 = vpop.eup %8463 }
0x11f0   : > { %8465 = vrcp.f32 %v6936_v49  ;;  %v6963_v45 = vmul.f32 %v8464_v12, %v12890_v19 }
0x11f1   : > { %v6660_v32 = vpack.c.bf16 %v6653_v29, %v6652_v34 }
0x11f3   : > { %7807 = vmatmul.msk.bf16.vlgmr.msrb.gmra.mxu3 %vm2200_vm2, %v6660_v32 }
0x11f6   : > { %v8466_v59 = vpop.eup %8465  ;;  %v6361_v17 = vpop.f32.mrf.mxu3 }
0x11f7   : > { %v6964_v42 = vmul.f32 %v8466_v59, %v12913_v43  ;;  %v6379_v1 = vpack.c.bf16 %v6361_v17, %v6359_v24  ;;  %v6939_v53 = vpop.xlane.xlu1 %6938  ;;  %v6628_v61 = vpop.xlane.xlu0 %6627 }
0x11f8   : > { %8467 = vrcp.f32 %v6939_v53 }
0x11f9   : > { %v6971_v11 = vpack.c.bf16 %v6964_v42, %v6963_v45  ;;  %7791 = vmatmul.msk.bf16.vlgmr.msrb.gmra.mxu0 %vm2146_vm1, %v6379_v1  ;;  %8469 = vrcp.f32 %v6628_v61 }
0x11fb   : > { %7825 = vmatmul.msk.bf16.vlgmr.msra.gmra.mxu2 %vm2200_vm2, %v6971_v11 }
0x11fe   : > { %v6364_v36 = vpop.f32.mrf.mxu3  ;;  %v8468_v44 = vpop.eup %8467 }
0x11ff   : > { %v6942_v50 = vpop.xlane.xlu2 %6941  ;;  %v6631_v54 = vpop.xlane.xlu1 %6630  ;;  %v6965_v21 = vmul.f32 %v8468_v44, %v12919_v26  ;;  %v7890_v26 = vld [vmem:[%s13073_s5 + $0x18] sm:$0xff] }
0x1200   : > { %8471 = vrcp.f32 %v6942_v50  ;;  %v8470_v13 = vpop.eup %8469  ;;  %7071 = vmatpush.bf16.msra.mxu3 %v7890_v26 }
0x1201   : > { %8473 = vrcp.f32 %v6631_v54  ;;  %v6654_v40 = vmul.f32 %v8470_v13, %v12922_v2 }
0x1206   : > { %v8472_v19 = vpop.eup %8471  ;;  %v6366_v28 = vpop.f32.mrf.mxu3 }
0x1207   : > { %v8474_v43 = vpop.eup %8473  ;;  %v6966_v0 = vmul.f32 %v8472_v19, %v12936_v3  ;;  %v6380_v16 = vpack.c.bf16 %v6366_v28, %v6364_v36  ;;  %v6945_v62 = vpop.xlane.xlu2 %6944  ;;  %v7889_v3 = vld [vmem:[%s13073_s5 + $0x10] sm:$0xff] }
0x1208   : > { %v6655_v58 = vmul.f32 %v8474_v43, %v12933_v63  ;;  %v6634_v33 = vpop.xlane.xlu1 %6633  ;;  %6760 = vmatpush.bf16.msra.mxu0 %v7889_v3 }
0x1209   : > { %7792 = vmatmul.msk.bf16.gmra.mxu0 %vm2146_vm1, %v6380_v16  ;;  %v6972_v8 = vpack.c.bf16 %v6966_v0, %v6965_v21  ;;  %8475 = vrcp.f32 %v6634_v33 }
0x120a   : > { %v6661_v30 = vpack.c.bf16 %v6655_v58, %v6654_v40  ;;  %8477 = vrcp.f32 %v6945_v62 }
0x120b   : > { %7826 = vmatmul.msk.bf16.gmra.mxu2 %vm2200_vm2, %v6972_v8 }
0x120c   : > { %7808 = vmatmul.msk.bf16.gmra.mxu3 %vm2200_vm2, %v6661_v30 }
0x120e   : > { %v6369_v2 = vpop.f32.mrf.mxu3 }
0x120f   : > { %v6637_v63 = vpop.xlane.xlu2 %6636  ;;  %v6948_v25 = vpop.xlane.xlu0 %6947 }
0x1210   : > { %8479 = vrcp.f32 %v6637_v63  ;;  %v8476_v38 = vpop.eup %8475 }
0x1211   : > { %8481 = vrcp.f32 %v6948_v25  ;;  %v8478_v41 = vpop.eup %8477  ;;  %v6656_v7 = vmul.f32 %v8476_v38, %v12948_v27 }
0x1212   : > { %v6967_v60 = vmul.f32 %v8478_v41, %v12945_v23 }
0x1216   : > { %v8480_v46 = vpop.eup %8479  ;;  %v6371_v9 = vpop.f32.mrf.mxu3 }
0x1217   : > { %v8482_v10 = vpop.eup %8481  ;;  %v6657_v22 = vmul.f32 %v8480_v46, %v12957_v31  ;;  %v6381_v35 = vpack.c.bf16 %v6371_v9, %v6369_v2  ;;  %v6951_v57 = vpop.xlane.xlu0 %6950 }
0x1218   : > { %v6968_v5 = vmul.f32 %v8482_v10, %v12961_v52  ;;  %v6954_v29 = vpop.xlane.xlu1 %6953  ;;  %v6640_v49 = vpop.xlane.xlu2 %6639  ;;  %8483 = vrcp.f32 %v6951_v57 }
0x1219   : > { %7793 = vmatmul.msk.bf16.gmra.mxu0 %vm2146_vm1, %v6381_v35  ;;  %v6662_v24 = vpack.c.bf16 %v6657_v22, %v6656_v7  ;;  %8485 = vrcp.f32 %v6954_v29 }
0x121a   : > { %v6973_v34 = vpack.c.bf16 %v6968_v5, %v6967_v60  ;;  %8487 = vrcp.f32 %v6640_v49 }
0x121c   : > { %7809 = vmatmul.msk.bf16.gmra.mxu3 %vm2200_vm2, %v6662_v24  ;;  %7827 = vmatmul.msk.bf16.gmra.mxu2 %vm2200_vm2, %v6973_v34 }
0x121e   : > { %v6374_v27 = vpop.f32.mrf.mxu3  ;;  %v8484_v32 = vpop.eup %8483 }
0x121f   : > { %v6643_v31 = vpop.xlane.xlu0 %6642  ;;  %v8486_v23 = vpop.eup %8485  ;;  %v6969_v59 = vmul.f32 %v8484_v32, %v12970_v4 }
0x1220   : > { %8489 = vrcp.f32 %v6643_v31  ;;  %v8488_v12 = vpop.eup %8487  ;;  %v6970_v17 = vmul.f32 %v8486_v23, %v12972_v48 }
0x1221   : > { %v6658_v42 = vmul.f32 %v8488_v12, %v12974_v18 }
0x1222   : > { %v6974_v61 = vpack.c.bf16 %v6970_v17, %v6969_v59 }
0x1226   : > { %v8490_v52 = vpop.eup %8489  ;;  %v6376_v45 = vpop.f32.mrf.mxu3 }
0x1227   : > { %v6659_v1 = vmul.f32 %v8490_v52, %v12982_v37  ;;  %v6382_v53 = vpack.c.bf16 %v6376_v45, %v6374_v27 }
0x1229   : > { %7794 = vmatmul.msk.bf16.gmra.mxu0 %vm2146_vm1, %v6382_v53  ;;  %v6663_v11 = vpack.c.bf16 %v6659_v1, %v6658_v42 }
0x122c   : > { %7810 = vmatmul.msk.bf16.gmra.mxu3 %vm2200_vm2, %v6663_v11  ;;  %7828 = vmatmul.msk.bf16.gmra.mxu2 %vm2200_vm2, %v6974_v61 }
0x1276   : > { %v6709_v36 = vpop.f32.mrf.mxu3  ;;  %v6412_v33 = vpop.f32.mrf.mxu0 }
0x1277   : > { %v6460_v35 = vadd.f32 %v12637_v20, %v6412_v33 }
0x127e   : > { %v6711_v50 = vpop.f32.mrf.mxu3  ;;  %v7020_v4 = vpop.f32.mrf.mxu2 }
0x127f   : > { %v6729_v54 = vpack.c.bf16 %v6711_v50, %v6709_v36  ;;  %v6414_v25 = vpop.f32.mrf.mxu0 }
0x1280   : > { %v6462_v34 = vadd.f32 %v12639_v56, %v6414_v25 }
0x1281   : > { %7817 = vmatmul.msk.bf16.vlgmr.msra.gmra.mxu0 %vm2146_vm1, %v6729_v54 }
0x1286   : > { %v7022_v48 = vpop.f32.mrf.mxu2 }
0x1287   : > { %v7040_v44 = vpack.c.bf16 %v7022_v48, %v7020_v4  ;;  %v6417_v38 = vpop.f32.mrf.mxu0 }
0x1288   : > { %v6465_v20 = vadd.f32 %v12647_v39, %v6417_v38 }
0x1289   : > { %7835 = vmatmul.msk.bf16.vlgmr.msra.gmra.mxu3 %vm2146_vm1, %v7040_v44 }
0x128e   : > { %v7025_v37 = vpop.f32.mrf.mxu2 }
0x128f   : > { %v6714_v18 = vpop.f32.mrf.mxu3  ;;  %v6419_v41 = vpop.f32.mrf.mxu0 }
0x1290   : > { %v6467_v1 = vadd.f32 %v12654_v15, %v6419_v41 }
0x1296   : > { %v7027_v19 = vpop.f32.mrf.mxu2 }
0x1297   : > { %v6716_v13 = vpop.f32.mrf.mxu3  ;;  %v7041_v43 = vpack.c.bf16 %v7027_v19, %v7025_v37  ;;  %v6422_v46 = vpop.f32.mrf.mxu0 }
0x1298   : > { %v6730_v28 = vpack.c.bf16 %v6716_v13, %v6714_v18  ;;  %v6470_v54 = vadd.f32 %v12661_v51, %v6422_v46 }
0x1299   : > { %7836 = vmatmul.msk.bf16.gmra.mxu3 %vm2146_vm1, %v7041_v43 }
0x129a   : > { %7818 = vmatmul.msk.bf16.gmra.mxu0 %vm2146_vm1, %v6730_v28 }
0x129f   : > { %v6719_v21 = vpop.f32.mrf.mxu3  ;;  %v7030_v0 = vpop.f32.mrf.mxu2 }
0x12a0   : > { %v6424_v9 = vpop.f32.mrf.mxu0 }
0x12a1   : > { %v6472_v13 = vadd.f32 %v12671_v14, %v6424_v9 }
0x12a7   : > { %v6721_v16 = vpop.f32.mrf.mxu3  ;;  %v7032_v62 = vpop.f32.mrf.mxu2 }
0x12a8   : > { %v6731_v40 = vpack.c.bf16 %v6721_v16, %v6719_v21  ;;  %v7042_v58 = vpack.c.bf16 %v7032_v62, %v7030_v0  ;;  %v6427_v10 = vpop.f32.mrf.mxu0 }
0x12a9   : > { %v6475_v16 = vadd.f32 %v12680_v55, %v6427_v10  ;;  %v8493_v55 = vld [vmem:[%s13074_s6] ss:$0 sm:$0xff] }
0x12aa   : > { %7819 = vmatmul.msk.bf16.gmra.mxu0 %vm2146_vm1, %v6731_v40  ;;  %7837 = vmatmul.msk.bf16.gmra.mxu3 %vm2146_vm1, %v7042_v58 }
0x12af   : > { %v6724_v8 = vpop.f32.mrf.mxu3  ;;  %v7035_v30 = vpop.f32.mrf.mxu2 }
0x12b0   : > { %v6429_v7 = vpop.f32.mrf.mxu0 }
0x12b1   : > { %v6477_v33 = vadd.f32 %v12687_v47, %v6429_v7 }
0x12b7   : > { %v6726_v26 = vpop.f32.mrf.mxu3  ;;  %v7037_v3 = vpop.f32.mrf.mxu2 }
0x12b8   : > { %v6732_v2 = vpack.c.bf16 %v6726_v26, %v6724_v8  ;;  %v7043_v63 = vpack.c.bf16 %v7037_v3, %v7035_v30 }
0x12ba   : > { %7820 = vmatmul.msk.bf16.gmra.mxu0 %vm2146_vm1, %v6732_v2  ;;  %7838 = vmatmul.msk.bf16.gmra.mxu3 %vm2146_vm1, %v7043_v63 }
0x12fe   : > { %v6762_v22 = vpop.f32.mrf.mxu0 }
0x12ff   : > { %v6782_v57 = vadd.f32 %v6762_v22, %v6460_v35 }
0x1306   : > { %v6764_v24 = vpop.f32.mrf.mxu0 }
0x1307   : > { %v6783_v27 = vadd.f32 %v6764_v24, %v6462_v34 }
0x130c   : > { %v7073_v60 = vpop.f32.mrf.mxu3 }
0x130d   : > { %v7093_v5 = vadd.f32 %v7073_v60, %v6782_v57 }
0x130f   : > { %v7101_v29 = vadd.f32 %v12716_v6, %v7093_v5 }
0x1311   : > { %v7109_v49 = vpack.c.bf16 %v7101_v29, %v7101_v29 }
0x1313   : > { %7839 = vst.msk [vmem:[%s11414_s19 + $0x60] sm:$0xf] %vm3358_vm3, %v7109_v49 }
0x1314   : > { %v7075_v31 = vpop.f32.mrf.mxu3 }
0x1315   : > { %v7094_v32 = vadd.f32 %v7075_v31, %v6783_v27 }
0x1317   : > { %v6767_v23 = vpop.f32.mrf.mxu0  ;;  %v7102_v12 = vadd.f32 %v12716_v6, %v7094_v32 }
0x1318   : > { %v6784_v59 = vadd.f32 %v6767_v23, %v6465_v20 }
0x1319   : > { %v7110_v52 = vpack.c.bf16 %v7102_v12, %v7102_v12 }
0x131b   : > { %7840 = vst.msk [vmem:[%s11414_s19 + $0x64] sm:$0xf] %vm3358_vm3, %v7110_v52 }
0x131c   : > { %v7078_v17 = vpop.f32.mrf.mxu3 }
0x131d   : > { %v7095_v45 = vadd.f32 %v7078_v17, %v6784_v59 }
0x131f   : > { %v6769_v56 = vpop.f32.mrf.mxu0  ;;  %v7103_v42 = vadd.f32 %v12716_v6, %v7095_v45 }
0x1320   : > { %v6785_v11 = vadd.f32 %v6769_v56, %v6467_v1 }
0x1321   : > { %v7111_v53 = vpack.c.bf16 %v7103_v42, %v7103_v42 }
0x1323   : > { %7841 = vst.msk [vmem:[%s11414_s19 + $0x68] sm:$0xf] %vm3358_vm3, %v7111_v53 }
0x1324   : > { %v7080_v61 = vpop.f32.mrf.mxu3 }
0x1325   : > { %v7096_v36 = vadd.f32 %v7080_v61, %v6785_v11 }
0x1327   : > { %v6772_v39 = vpop.f32.mrf.mxu0  ;;  %v7104_v50 = vadd.f32 %v12716_v6, %v7096_v36 }
0x1328   : > { %v6786_v48 = vadd.f32 %v6772_v39, %v6470_v54 }
0x1329   : > { %v7112_v4 = vpack.c.bf16 %v7104_v50, %v7104_v50 }
0x132b   : > { %7842 = vst.msk [vmem:[%s11414_s19 + $0x6c] sm:$0xf] %vm3358_vm3, %v7112_v4 }
0x132d   : > { %v7083_v44 = vpop.f32.mrf.mxu3 }
0x132e   : > { %v7097_v18 = vadd.f32 %v7083_v44, %v6786_v48 }
0x132f   : > { %v6774_v15 = vpop.f32.mrf.mxu0 }
0x1330   : > { %v7105_v37 = vadd.f32 %v12716_v6, %v7097_v18  ;;  %v6787_v28 = vadd.f32 %v6774_v15, %v6472_v13 }
0x1332   : > { %v7113_v19 = vpack.c.bf16 %v7105_v37, %v7105_v37 }
0x1334   : > { %7843 = vst.msk [vmem:[%s11414_s19 + $0x70] sm:$0xf] %vm3358_vm3, %v7113_v19 }
0x1335   : > { %v7085_v43 = vpop.f32.mrf.mxu3 }
0x1336   : > { %v7098_v21 = vadd.f32 %v7085_v43, %v6787_v28 }
0x1337   : > { %v6777_v51 = vpop.f32.mrf.mxu0 }
0x1338   : > { %v7106_v0 = vadd.f32 %v12716_v6, %v7098_v21  ;;  %v6788_v40 = vadd.f32 %v6777_v51, %v6475_v16 }
0x133a   : > { %v7114_v62 = vpack.c.bf16 %v7106_v0, %v7106_v0 }
0x133c   : > { %7844 = vst.msk [vmem:[%s11414_s19 + $0x74] sm:$0xf] %vm3358_vm3, %v7114_v62 }
0x133d   : > { %v7088_v58 = vpop.f32.mrf.mxu3 }
0x133e   : > { %v7099_v8 = vadd.f32 %v7088_v58, %v6788_v40 }
0x133f   : > { %v6779_v30 = vpop.f32.mrf.mxu0 }
0x1340   : > { %v7107_v14 = vadd.f32 %v12716_v6, %v7099_v8  ;;  %v6789_v3 = vadd.f32 %v6779_v30, %v6477_v33 }
0x1342   : > { %v7115_v26 = vpack.c.bf16 %v7107_v14, %v7107_v14 }
0x1344   : > { %7845 = vst.msk [vmem:[%s11414_s19 + $0x78] sm:$0xf] %vm3358_vm3, %v7115_v26 }
0x1345   : > { %v7090_v2 = vpop.f32.mrf.mxu3 }
0x1346   : > { %v7100_v63 = vadd.f32 %v7090_v2, %v6789_v3 }
0x1348   : > { %v7108_v25 = vadd.f32 %v8493_v55, %v7100_v63 }
0x134a   : > { %v7116_v38 = vpack.c.bf16 %v7108_v25, %v7108_v25 }
0x134c   : > { %7846 = vst.msk [vmem:[%s11414_s19 + $0x7c] sm:$0xf] %vm3358_vm3, %v7116_v38 }
0x134d PF: > { %s17_s24 = sadd.s32 1, %s8500_s24  }
0x134e   : > { %p14_p4 = scmp.ge.s32.totalorder %s17_s24, 4  }
0x1350   :  { %16 = sbr.rel (!%p14_p4) target bundleno = 1 (0x1), region = 96 }

</bundles_post_ra>
